<compile_context>
chip_gen: v7x
topology: tpu7x:2x2x1
jax: 0.10.0
libtpu: 0.0.40
codegen_flags: <defaults>
</compile_context>

<pallas_src>
import jax
import jax.numpy as jnp
from jax.experimental import pallas as pl
from jax.experimental.pallas import tpu as pltpu

IN_FEATURES = 7 * 7 * 64      # 3136
HIDDEN = 1028                 # as written in the PyTorch module (1024 + 4)
OUT_FEATURES = 10

HIDDEN_PAD = 1152             # 1028 padded up to 9 * 128 (zero pad -> exact)
MAX_TB = 512                  # batch tile cap (VMEM: ~26 MiB total at tb=512)


def section3_kernel(x_ref, w1_ref, b1_ref, w2_ref, b2_ref, o_ref):
    # ---- Linear1: (tb, K) bf16 @ (K, HIDDEN_PAD) bf16 on the MXU, f32 accumulate ----
    h = jnp.dot(x_ref[...], w1_ref[...], preferred_element_type=jnp.float32)

    # ---- bias + ReLU (f32 on the VPU) ----
    h = jnp.maximum(h + b1_ref[...], 0.0)

    # ---- Dropout(p=0.25): identity in eval mode ----

    # ---- Linear2 (bf16 MXU inputs, f32 accumulate) ----
    logits = jnp.dot(h.astype(jnp.bfloat16), w2_ref[...],
                     preferred_element_type=jnp.float32) + b2_ref[...]

    # ---- Softmax over dim=1 (numerically stable, f32; reciprocal on the EUP) ----
    m = jnp.max(logits, axis=1, keepdims=True)
    e = jnp.exp(logits - m)
    denom = jnp.sum(e, axis=1, keepdims=True)
    o_ref[...] = (e * pl.reciprocal(denom, approx=True)).astype(o_ref.dtype)


def _round_up(n, m):
    return ((n + m - 1) // m) * m


def _choose_tb(B):
    """Batch tile: tiny batches stay one tile; otherwise split into >=2 tiles
    (keeps both v7x TensorCores busy) capped at MAX_TB for VMEM."""
    if B <= 8:
        return B
    return min(MAX_TB, _round_up(-(-B // 2), 8))


def prepare_params(w1_bf16, b1, w2_bf16, b2):
    """One-time weight/bias padding to lane-aligned HIDDEN_PAD (zeros -> exact)."""
    w1_p = jnp.pad(w1_bf16, ((0, 0), (0, HIDDEN_PAD - HIDDEN)))
    b1_p = jnp.pad(b1, (0, HIDDEN_PAD - HIDDEN)).reshape(1, HIDDEN_PAD)
    w2_p = jnp.pad(w2_bf16, ((0, HIDDEN_PAD - HIDDEN), (0, 0)))
    b2_p = b2.reshape(1, OUT_FEATURES)
    return w1_p, b1_p, w2_p, b2_p


def section3_forward(x, params):
    """x: (B, IN_FEATURES), preferably bf16 (cast once if not);
       params: output of prepare_params (padded, W* in bf16)."""
    w1_p, b1_p, w2_p, b2_p = params
    B = x.shape[0]

    if x.dtype != jnp.bfloat16:
        x = x.astype(jnp.bfloat16)

    tb = _choose_tb(B)
    bp = _round_up(B, tb)
    if bp != B:
        # Only pad batch when B isn't a tile multiple (zero rows -> finite softmax, discarded).
        x = jnp.pad(x, ((0, bp - B), (0, 0)))

    out = pl.pallas_call(
        section3_kernel,
        out_shape=jax.ShapeDtypeStruct((bp, OUT_FEATURES), jnp.float32),
        grid_spec=pltpu.PrefetchScalarGridSpec(
            num_scalar_prefetch=0,
            grid=(bp // tb,),
            in_specs=[
                # x tile: full (unpadded) K as a full-dim block -> no wrapper pad pass
                pl.BlockSpec((tb, IN_FEATURES), lambda i: (i, 0)),
                # W1 resident in VMEM: constant block index -> DMA'd once, reused per tile
                pl.BlockSpec((IN_FEATURES, HIDDEN_PAD), lambda i: (0, 0)),
                pl.BlockSpec((1, HIDDEN_PAD), lambda i: (0, 0)),             # b1 (resident)
                pl.BlockSpec((HIDDEN_PAD, OUT_FEATURES), lambda i: (0, 0)),  # W2 (resident)
                pl.BlockSpec((1, OUT_FEATURES), lambda i: (0, 0)),           # b2 (resident)
            ],
            out_specs=pl.BlockSpec((tb, OUT_FEATURES), lambda i: (i, 0)),
        ),
        compiler_params=pltpu.CompilerParams(
            dimension_semantics=("parallel",),
            vmem_limit_bytes=48 * 1024 * 1024,   # explicit; below v7x's 64 MiB physical
        ),
    )(x, w1_p, b1_p, w2_p, b2_p)

    return out[:B] if bp != B else out


def reference_forward(x_bf16, w1_bf16, b1, w2_bf16, b2):
    x = x_bf16.astype(jnp.float32)
    w1 = w1_bf16.astype(jnp.float32)
    w2 = w2_bf16.astype(jnp.float32)
    h = jnp.maximum(x @ w1 + b1, 0.0)
    logits = h @ w2 + b2
    return jax.nn.softmax(logits, axis=1)


if __name__ == "__main__":
    key = jax.random.PRNGKey(0)
    kx, kw1, kb1, kw2, kb2 = jax.random.split(key, 5)

    # Deterministic synthetic parameters (uniform, roughly matching nn.Linear scale).
    s1 = 1.0 / (IN_FEATURES ** 0.5)
    s2 = 1.0 / (HIDDEN ** 0.5)
    w1 = jax.random.uniform(kw1, (IN_FEATURES, HIDDEN), jnp.float32, -s1, s1).astype(jnp.bfloat16)
    b1 = jax.random.uniform(kb1, (HIDDEN,), jnp.float32, -s1, s1)
    w2 = jax.random.uniform(kw2, (HIDDEN, OUT_FEATURES), jnp.float32, -s2, s2).astype(jnp.bfloat16)
    b2 = jax.random.uniform(kb2, (OUT_FEATURES,), jnp.float32, -s2, s2)
    params = prepare_params(w1, b1, w2, b2)

    # --- primary small-shape check: batch = 2 (single tile path) ---
    B = 2
    x = jax.random.normal(kx, (B, IN_FEATURES), dtype=jnp.float32).astype(jnp.bfloat16)
    out = jax.block_until_ready(section3_forward(x, params))
    ref = reference_forward(x, w1, b1, w2, b2)
    assert out.shape == (B, OUT_FEATURES)
    assert jnp.allclose(out, ref, atol=5e-3, rtol=5e-2), "mismatch vs reference (B=2)"
    assert jnp.allclose(jnp.sum(out, axis=1), 1.0, atol=5e-3), "softmax rows must sum to ~1"

    # --- secondary check: batch = 24 exercises the multi-tile + batch-pad path ---
    B2 = 24
    x2 = jax.random.normal(kx, (B2, IN_FEATURES), dtype=jnp.float32).astype(jnp.bfloat16)
    out2 = jax.block_until_ready(section3_forward(x2, params))
    ref2 = reference_forward(x2, w1, b1, w2, b2)
    assert out2.shape == (B2, OUT_FEATURES)
    assert jnp.allclose(out2, ref2, atol=5e-3, rtol=5e-2), "mismatch vs reference (B=24)"
    assert jnp.allclose(jnp.sum(out2, axis=1), 1.0, atol=5e-3), "softmax rows must sum to ~1"

    print("KERNEL_OK")
</pallas_src>

<mosaic_0001>
module attributes {stable_mosaic.version = 11 : i64} {
  func.func @section3_kernel(%arg0: i32, %arg1: memref<2x3136xbf16, #tpu.memory_space<vmem>>, %arg2: memref<3136x1152xbf16, #tpu.memory_space<vmem>>, %arg3: memref<1x1152xf32, #tpu.memory_space<vmem>>, %arg4: memref<1152x10xbf16, #tpu.memory_space<vmem>>, %arg5: memref<1x10xf32, #tpu.memory_space<vmem>>, %arg6: memref<2x10xf32, #tpu.memory_space<vmem>>) attributes {dimension_semantics = [#tpu.dimension_semantics<parallel>], iteration_bounds = array<i64: 1>, scalar_prefetch = 0 : i64, scratch_operands = 0 : i64, tpu.core_type = #tpu.core_type<tc>, window_params = [{transform_indices = @transform_0, window_bounds = array<i64: 2, 3136>}, {pipeline_mode = #tpu.pipeline_mode<synchronous>, transform_indices = @transform_1, window_bounds = array<i64: 3136, 1152>}, {pipeline_mode = #tpu.pipeline_mode<synchronous>, transform_indices = @transform_2, window_bounds = array<i64: 1, 1152>}, {pipeline_mode = #tpu.pipeline_mode<synchronous>, transform_indices = @transform_3, window_bounds = array<i64: 1152, 10>}, {pipeline_mode = #tpu.pipeline_mode<synchronous>, transform_indices = @transform_4, window_bounds = array<i64: 1, 10>}, {transform_indices = @transform_5, window_bounds = array<i64: 2, 10>}]} {
    %c0 = arith.constant 0 : index
    %c0_0 = arith.constant 0 : index
    %0 = vector.load %arg1[%c0, %c0_0] : memref<2x3136xbf16, #tpu.memory_space<vmem>>, vector<2x3136xbf16>
    %c0_1 = arith.constant 0 : index
    %c0_2 = arith.constant 0 : index
    %1 = vector.load %arg2[%c0_1, %c0_2] : memref<3136x1152xbf16, #tpu.memory_space<vmem>>, vector<3136x1152xbf16>
    %cst = arith.constant dense<0.000000e+00> : vector<2x1152xf32>
    %2 = tpu.matmul %0, %1, %cst {dimension_numbers = #tpu.dot_dimension_numbers<[1], [0], [0], [1], [0, 0, 1, 1], [], []>} : vector<2x3136xbf16>, vector<3136x1152xbf16>, vector<2x1152xf32> -> vector<2x1152xf32>
    %c0_3 = arith.constant 0 : index
    %c0_4 = arith.constant 0 : index
    %3 = vector.load %arg3[%c0_3, %c0_4] : memref<1x1152xf32, #tpu.memory_space<vmem>>, vector<1x1152xf32>
    %4 = vector.broadcast %3 : vector<1x1152xf32> to vector<2x1152xf32>
    %5 = arith.addf %2, %4 : vector<2x1152xf32>
    %cst_5 = arith.constant 0.000000e+00 : f32
    %6 = vector.broadcast %cst_5 : f32 to vector<2x1152xf32>
    %7 = arith.maximumf %5, %6 : vector<2x1152xf32>
    %8 = arith.truncf %7 : vector<2x1152xf32> to vector<2x1152xbf16>
    %c0_6 = arith.constant 0 : index
    %c0_7 = arith.constant 0 : index
    %9 = vector.load %arg4[%c0_6, %c0_7] : memref<1152x10xbf16, #tpu.memory_space<vmem>>, vector<1152x10xbf16>
    %cst_8 = arith.constant dense<0.000000e+00> : vector<2x10xf32>
    %10 = tpu.matmul %8, %9, %cst_8 {dimension_numbers = #tpu.dot_dimension_numbers<[1], [0], [0], [1], [0, 0, 1, 1], [], []>} : vector<2x1152xbf16>, vector<1152x10xbf16>, vector<2x10xf32> -> vector<2x10xf32>
    %c0_9 = arith.constant 0 : index
    %c0_10 = arith.constant 0 : index
    %11 = vector.load %arg5[%c0_9, %c0_10] : memref<1x10xf32, #tpu.memory_space<vmem>>, vector<1x10xf32>
    %12 = vector.broadcast %11 : vector<1x10xf32> to vector<2x10xf32>
    %13 = arith.addf %10, %12 : vector<2x10xf32>
    %cst_11 = arith.constant dense<0xFF800000> : vector<2xf32>
    %14 = vector.multi_reduction <maximumf>, %13, %cst_11 [1] : vector<2x10xf32> to vector<2xf32>
    %15 = vector.shape_cast %14 : vector<2xf32> to vector<2x1xf32>
    %16 = vector.broadcast %15 : vector<2x1xf32> to vector<2x10xf32>
    %17 = arith.subf %13, %16 : vector<2x10xf32>
    %18 = math.exp %17 : vector<2x10xf32>
    %cst_12 = arith.constant dense<0.000000e+00> : vector<2xf32>
    %19 = vector.multi_reduction <add>, %18, %cst_12 [1] : vector<2x10xf32> to vector<2xf32>
    %20 = vector.shape_cast %19 : vector<2xf32> to vector<2x1xf32>
    %21 = tpu.reciprocal %20 {approx = true} : vector<2x1xf32> -> vector<2x1xf32>
    %22 = vector.broadcast %21 : vector<2x1xf32> to vector<2x10xf32>
    %23 = arith.mulf %18, %22 : vector<2x10xf32>
    %c0_13 = arith.constant 0 : index
    %c0_14 = arith.constant 0 : index
    %24 = vector.load %arg6[%c0_13, %c0_14] : memref<2x10xf32, #tpu.memory_space<vmem>>, vector<2x10xf32>
    tpu.vector_store %arg6[%c0_13, %c0_14], %23 {strides = array<i32>} : memref<2x10xf32, #tpu.memory_space<vmem>>, vector<2x10xf32>,
    return
  }
  func.func @transform_0(%arg0: i32) -> (i32, i32) {
    %c0_i32 = arith.constant 0 : i32
    %c0_i32_0 = arith.constant 0 : i32
    return %arg0, %c0_i32 : i32, i32
  }
  func.func @transform_1(%arg0: i32) -> (i32, i32) {
    %c0_i32 = arith.constant 0 : i32
    %c0_i32_0 = arith.constant 0 : i32
    %c0_i32_1 = arith.constant 0 : i32
    return %c0_i32, %c0_i32_0 : i32, i32
  }
  func.func @transform_2(%arg0: i32) -> (i32, i32) {
    %c0_i32 = arith.constant 0 : i32
    %c0_i32_0 = arith.constant 0 : i32
    %c0_i32_1 = arith.constant 0 : i32
    return %c0_i32, %c0_i32_0 : i32, i32
  }
  func.func @transform_3(%arg0: i32) -> (i32, i32) {
    %c0_i32 = arith.constant 0 : i32
    %c0_i32_0 = arith.constant 0 : i32
    %c0_i32_1 = arith.constant 0 : i32
    return %c0_i32, %c0_i32_0 : i32, i32
  }
  func.func @transform_4(%arg0: i32) -> (i32, i32) {
    %c0_i32 = arith.constant 0 : i32
    %c0_i32_0 = arith.constant 0 : i32
    %c0_i32_1 = arith.constant 0 : i32
    return %c0_i32, %c0_i32_0 : i32, i32
  }
  func.func @transform_5(%arg0: i32) -> (i32, i32) {
    %c0_i32 = arith.constant 0 : i32
    %c0_i32_0 = arith.constant 0 : i32
    return %arg0, %c0_i32 : i32, i32
  }
}

</mosaic_0001>

<bundles_post_ra>
// kernel: tpu_custom_call.1
= control target key start
LH: loop header
LB: loop body
LE: loop exit
PB: predicated region body
PF: predicated region fallthrough
CT: control target
= control target key end

     0   :  { %10 = vsyncpa [#allocation3], 0  ;;  %s20610_s0 = inlined_call_operand.hbm [shape: bf16[2,3136], index: 0, kind: input, shape index: {}]   ;;  %s20611_s1 = inlined_call_operand.hbm [shape: bf16[3136,1152], index: 1, kind: input, shape index: {}]   ;;  %s20612_s2 = inlined_call_operand.hbm [shape: f32[1,1152], index: 2, kind: input, shape index: {}]   ;;  %s20613_s3 = inlined_call_operand.vmem [shape: bf16[1152,10], index: 3, kind: input, shape index: {}]   ;;  %s20614_s4 = inlined_call_operand.hbm [shape: f32[1,10], index: 4, kind: input, shape index: {}]   ;;  %s20615_s5 = inlined_call_operand.hbm [shape: f32[2,10], index: 5, kind: output, shape index: {}]  }
   0x1   :  { %11 = vsyncpa [#allocation6], 0 }
   0x2   :  { %12 = vsyncpa [#allocation9], 0 }
   0x3   :  { %13 = vsyncpa [#allocation4], 0  ;;  %s19978_s18 = smov [#allocation5]   ;;  %s19860_s22 = scalar_lea.hbm %s20611_s1, 225792 }
   0x4   :  { %s29_s19 = sshll.u32 %s19978_s18, 4  ;;  %p19861_p0 = scmp.ne.s32.totalorder %s20611_s1, %s19860_s22  ;;  %s30_s19 = int_to_ptr.vmem [resolvable:$true] %s29_s19 }
   0x5   :  { %p19864_p1 = scmp.lt.u32.totalorder %s19860_s22, %s20611_s1 }
   0x7   :  { %p19866_p2 = pnand %p19864_p1, %p19861_p0 }
   0x9   :  { %19869 = shalt.err (!%p19866_p2)
}
   0xa   :  { %s19870_s27 = scalar_lea.vmem %s30_s19, 225792  ;;  %p19875_p4 = scmp.lt.s32.totalorder %s30_s19, %s30_s19 }
   0xb   :  { %p19871_p3 = scmp.ne.s32.totalorder %s30_s19, %s19870_s27  ;;  %p19876_p5 = scmp.lt.s32.totalorder %s19870_s27, %s19870_s27 }
   0xd   :  { %p19877_p6 = por %p19876_p5, %p19875_p4 }
   0xf   :  { %p19878_p7 = pnand %p19877_p6, %p19871_p3 }
  0x11   :  { %19881 = shalt.err (!%p19878_p7)
}
  0x12   :  { %s19979_s28 = smov 576   ;;  %s19980_s29 = smov 36  }
  0x13   :  { %35 = dma.hbm_to_vmem [thread:$0]  %s20611_s1, 225792, %s30_s19, [#allocation6], %s19979_s28, %s19979_s28, %s19980_s29  }
  0x14   :  { %s19981_s7 = smov [#allocation2]   ;;  %s19982_s9 = smov [#allocation7]  }
  0x15   :  { %s20_s8 = sshll.u32 %s19981_s7, 4  ;;  %s42_s10 = sshll.u32 %s19982_s9, 4  ;;  %s21_s8 = int_to_ptr.vmem [resolvable:$true] %s20_s8  ;;  %s43_s10 = int_to_ptr.vmem [resolvable:$true] %s42_s10 }
  0x16   :  { %s19882_s13 = scalar_lea.hbm %s20610_s0, 400 }
  0x17   :  { %p19883_p8 = scmp.ne.s32.totalorder %s20610_s0, %s19882_s13  ;;  %p19886_p9 = scmp.lt.u32.totalorder %s19882_s13, %s20610_s0 }
  0x19   :  { %p19888_p10 = pnand %p19886_p9, %p19883_p8 }
  0x1b   :  { %19891 = shalt.err (!%p19888_p10)
}
  0x1c   :  { %s19892_s1 = scalar_lea.vmem %s21_s8, 400  ;;  %s19896_s18 = scalar_lea.vmem %s21_s8, 416 }
  0x1d   :  { %p19893_p11 = scmp.ne.s32.totalorder %s21_s8, %s19892_s1  ;;  %p19897_p12 = scmp.lt.s32.totalorder %s21_s8, %s21_s8 }
  0x1e   :  { %p19898_p13 = scmp.lt.s32.totalorder %s19896_s18, %s19892_s1 }
  0x20   :  { %p19899_p0 = por %p19898_p13, %p19897_p12 }
  0x22   :  { %p19900_p1 = pnand %p19899_p0, %p19893_p11 }
  0x24   :  { %19903 = shalt.err (!%p19900_p1)
}
  0x25   :  { %23 = dma.hbm_to_vmem [thread:$0]  %s20610_s0, 400, %s21_s8, [#allocation3]  }
  0x26   :  { %s19904_s23 = scalar_lea.hbm %s20612_s2, 144 }
  0x27   :  { %p19905_p2 = scmp.ne.s32.totalorder %s20612_s2, %s19904_s23  ;;  %p19908_p3 = scmp.lt.u32.totalorder %s19904_s23, %s20612_s2 }
  0x29   :  { %p19910_p4 = pnand %p19908_p3, %p19905_p2 }
  0x2b   :  { %19913 = shalt.err (!%p19910_p4)
}
  0x2c   :  { %s19914_s28 = scalar_lea.vmem %s43_s10, 144  ;;  %s19918_s29 = scalar_lea.vmem %s43_s10, 160 }
  0x2d   :  { %p19915_p5 = scmp.ne.s32.totalorder %s43_s10, %s19914_s28  ;;  %p19919_p6 = scmp.lt.s32.totalorder %s43_s10, %s43_s10 }
  0x2e   :  { %p19920_p7 = scmp.lt.s32.totalorder %s19918_s29, %s19914_s28 }
  0x30   :  { %p19921_p8 = por %p19920_p7, %p19919_p6 }
  0x32   :  { %p19922_p9 = pnand %p19921_p8, %p19915_p5 }
  0x34   :  { %19925 = shalt.err (!%p19922_p9)
}
  0x35   :  { %45 = dma.hbm_to_vmem [thread:$0]  %s20612_s2, 144, %s43_s10, [#allocation6]  }
  0x36   :  { %s19983_s6 = smov [#allocation8]   ;;  %s19926_s11 = scalar_lea.hbm %s20614_s4, 16 }
  0x37   :  { %s54_s7 = sshll.u32 %s19983_s6, 4  ;;  %p19927_p10 = scmp.ne.s32.totalorder %s20614_s4, %s19926_s11  ;;  %s55_s7 = int_to_ptr.vmem [resolvable:$true] %s54_s7 }
  0x38   :  { %p19930_p11 = scmp.lt.u32.totalorder %s19926_s11, %s20614_s4 }
  0x3a   :  { %p19932_p12 = pnand %p19930_p11, %p19927_p10 }
  0x3c   :  { %19935 = shalt.err (!%p19932_p12)
}
  0x3d   :  { %s19936_s16 = scalar_lea.vmem %s55_s7, 16  ;;  %s19940_s2 = scalar_lea.vmem %s55_s7, 32 }
  0x3e   :  { %p19937_p13 = scmp.ne.s32.totalorder %s55_s7, %s19936_s16  ;;  %p19941_p0 = scmp.lt.s32.totalorder %s55_s7, %s55_s7 }
  0x3f   :  { %p19942_p1 = scmp.lt.s32.totalorder %s19940_s2, %s19936_s16 }
  0x41   :  { %p19943_p2 = por %p19942_p1, %p19941_p0 }
  0x43   :  { %p19944_p3 = pnand %p19943_p2, %p19937_p13 }
  0x45   :  { %19947 = shalt.err (!%p19944_p3)
}
  0x46   :  { %57 = dma.hbm_to_vmem [thread:$0]  %s20614_s4, 16, %s55_s7, [#allocation9]  }
  0x47   :  { %19970 = dma.done.wait [#allocation3], 400  }
  0x48   :  { %19971 = vsyncadd [#allocation3], 4294966896 }
  0x49   :  { %19972 = dma.done.wait [#allocation6], 225936  }
  0x4a   :  { %19973 = vsyncadd [#allocation6], 4294741360 }
  0x4b   :  { %19974 = dma.done.wait [#allocation9], 16  }
  0x4c   :  { %19975 = vsyncadd [#allocation9], 4294967280  ;;  %v17229_v0 = vld [vmem:[#allocation5 + $0x4] ss:$36 sps:$4 sm:$0xff]   ;;  %v17231_v1 = vld [vmem:[#allocation5 + $0xc] ss:$36 sps:$4 sm:$0xff]   ;;  %v2039_v36 = vlaneseq }
  0x4d   :  { %11293 = vmatprep.subr.bf16.mxu0 %v17229_v0  ;;  %v17233_v2 = vld [vmem:[#allocation5] ss:$36 sps:$4 sm:$0xff]   ;;  %v17234_v3 = vld [vmem:[#allocation5 + $0x8] ss:$36 sps:$4 sm:$0xff]   ;;  %11826 = vmatprep.subr.bf16.mxu1 %v17231_v1  ;;  %v17237_v5 = vld [vmem:[#allocation5 + $0x54] ss:$36 sps:$4 sm:$0xff]  }
  0x4e   :  { %v17235_v4 = vld [vmem:[#allocation5 + $0x4c] ss:$36 sps:$4 sm:$0xff]   ;;  %11294 = vmatpush1.bf16.msra.mxu0 %v17233_v2  ;;  %11827 = vmatpush1.bf16.msra.mxu1 %v17234_v3  ;;  %v17241_v8 = vld [vmem:[#allocation5 + $0x94] ss:$36 sps:$4 sm:$0xff]   ;;  %v17243_v9 = vld [vmem:[#allocation5 + $0x9c] ss:$36 sps:$4 sm:$0xff]  }
  0x4f   :  { %v17239_v6 = vld [vmem:[#allocation5 + $0x48] ss:$36 sps:$4 sm:$0xff]   ;;  %11295 = vmatprep.subr.bf16.mxu0 %v17235_v4  ;;  %v17240_v7 = vld [vmem:[#allocation5 + $0x50] ss:$36 sps:$4 sm:$0xff]   ;;  %11828 = vmatprep.subr.bf16.mxu1 %v17237_v5  ;;  %v17246_v11 = vld [vmem:[#allocation5 + $0x98] ss:$36 sps:$4 sm:$0xff]  }
  0x50   :  { %v17245_v10 = vld [vmem:[#allocation5 + $0x90] ss:$36 sps:$4 sm:$0xff]   ;;  %v17247_v12 = vld [vmem:[#allocation5 + $0xdc] ss:$36 sps:$4 sm:$0xff]   ;;  %v17249_v13 = vld [vmem:[#allocation5 + $0xe4] ss:$36 sps:$4 sm:$0xff]  }
  0x51   :  { %v17251_v14 = vld [vmem:[#allocation5 + $0xd8] ss:$36 sps:$4 sm:$0xff]   ;;  %v17252_v15 = vld [vmem:[#allocation5 + $0xe0] ss:$36 sps:$4 sm:$0xff]   ;;  %v17255_v17 = vld [vmem:[#allocation5 + $0x12c] ss:$36 sps:$4 sm:$0xff]  }
  0x52   :  { %11296 = vmatpush1.bf16.msra.mxu0 %v17239_v6  ;;  %11829 = vmatpush1.bf16.msra.mxu1 %v17240_v7  ;;  %v17253_v16 = vld [vmem:[#allocation5 + $0x124] ss:$36 sps:$4 sm:$0xff]   ;;  %v17259_v20 = vld [vmem:[#allocation5 + $0x16c] ss:$36 sps:$4 sm:$0xff]   ;;  %v17261_v21 = vld [vmem:[#allocation5 + $0x174] ss:$36 sps:$4 sm:$0xff]  }
  0x53   :  { %11297 = vmatprep.subr.bf16.mxu0 %v17241_v8  ;;  %11830 = vmatprep.subr.bf16.mxu1 %v17243_v9  ;;  %v17257_v18 = vld [vmem:[#allocation5 + $0x120] ss:$36 sps:$4 sm:$0xff]   ;;  %v17258_v19 = vld [vmem:[#allocation5 + $0x128] ss:$36 sps:$4 sm:$0xff]   ;;  %v17264_v23 = vld [vmem:[#allocation5 + $0x170] ss:$36 sps:$4 sm:$0xff]  }
  0x54   :  { %v17263_v22 = vld [vmem:[#allocation5 + $0x168] ss:$36 sps:$4 sm:$0xff]   ;;  %v17265_v24 = vld [vmem:[#allocation5 + $0x1b4] ss:$36 sps:$4 sm:$0xff]   ;;  %v17267_v25 = vld [vmem:[#allocation5 + $0x1bc] ss:$36 sps:$4 sm:$0xff]  }
  0x55   :  { %v17269_v26 = vld [vmem:[#allocation5 + $0x1b0] ss:$36 sps:$4 sm:$0xff]   ;;  %v17270_v27 = vld [vmem:[#allocation5 + $0x1b8] ss:$36 sps:$4 sm:$0xff]   ;;  %v17273_v29 = vld [vmem:[#allocation5 + $0x204] ss:$36 sps:$4 sm:$0xff]  }
  0x56   :  { %11298 = vmatpush1.bf16.msra.mxu0 %v17245_v10  ;;  %11831 = vmatpush1.bf16.msra.mxu1 %v17246_v11  ;;  %v17271_v28 = vld [vmem:[#allocation5 + $0x1fc] ss:$36 sps:$4 sm:$0xff]   ;;  %v17277_v32 = vld [vmem:[#allocation5 + $0x244] ss:$36 sps:$4 sm:$0xff]   ;;  %v17279_v33 = vld [vmem:[#allocation5 + $0x24c] ss:$36 sps:$4 sm:$0xff]  }
  0x57   :  { %11299 = vmatprep.subr.bf16.mxu0 %v17247_v12  ;;  %11832 = vmatprep.subr.bf16.mxu1 %v17249_v13  ;;  %v17275_v30 = vld [vmem:[#allocation5 + $0x1f8] ss:$36 sps:$4 sm:$0xff]   ;;  %v17276_v31 = vld [vmem:[#allocation5 + $0x200] ss:$36 sps:$4 sm:$0xff]   ;;  %v17282_v35 = vld [vmem:[#allocation5 + $0x248] ss:$36 sps:$4 sm:$0xff]  }
  0x58   :  { %v17281_v34 = vld [vmem:[#allocation5 + $0x240] ss:$36 sps:$4 sm:$0xff]   ;;  %v19984_v37 = vmov 1966171168   ;;  %v17283_v39 = vld [vmem:[#allocation5 + $0x28c] ss:$36 sps:$4 sm:$0xff]  }
  0x59   :  { %v2090_v38 = vunpack.c.l.s4 %v19984_v37  ;;  %v17285_v40 = vld [vmem:[#allocation5 + $0x294] ss:$36 sps:$4 sm:$0xff]   ;;  %v17287_v41 = vld [vmem:[#allocation5 + $0x288] ss:$36 sps:$4 sm:$0xff]   ;;  %v20067_v42 = vshrl.u32 %v2039_v36, 7  ;;  %vm11289_vm0 = vcmask 523264  }
  0x5a   :  { %11300 = vmatpush1.bf16.msra.mxu0 %v17251_v14  ;;  %11833 = vmatpush1.bf16.msra.mxu1 %v17252_v15  ;;  %v17288_v44 = vld [vmem:[#allocation5 + $0x290] ss:$36 sps:$4 sm:$0xff]   ;;  %v17291_v46 = vld [vmem:[#allocation5 + $0x2dc] ss:$36 sps:$4 sm:$0xff]   ;;  %v17297_v51 = vld [vmem:[#allocation5 + $0x324] ss:$36 sps:$4 sm:$0xff]  }
  0x5b   :  { %11301 = vmatprep.subr.bf16.mxu0 %v17253_v16  ;;  %11834 = vmatprep.subr.bf16.mxu1 %v17255_v17  ;;  %v2091_v43 = vunpack.c.0.s8 %v2090_v38  ;;  %v17289_v45 = vld [vmem:[#allocation5 + $0x2d4] ss:$36 sps:$4 sm:$0xff]   ;;  %v17295_v50 = vld [vmem:[#allocation5 + $0x31c] ss:$36 sps:$4 sm:$0xff]   ;;  %v20072_v52 = vld [vmem:[#allocation2] sm:$0xff]  ;;  %vm19987_vm1 = vmmov 0  }
  0x5c   :  { %v17293_v47 = vld [vmem:[#allocation5 + $0x2d0] ss:$36 sps:$4 sm:$0xff]   ;;  %v17294_v48 = vld [vmem:[#allocation5 + $0x2d8] ss:$36 sps:$4 sm:$0xff]   ;;  %v17300_v55 = vld [vmem:[#allocation5 + $0x320] ss:$36 sps:$4 sm:$0xff]  }
  0x5d   :  { %v20070_v49 = vsub.s32 %v2091_v43, %v20067_v42  ;;  %v17299_v53 = vld [vmem:[#allocation5 + $0x318] ss:$36 sps:$4 sm:$0xff]   ;;  %v17301_v56 = vld [vmem:[#allocation5 + $0x364] ss:$36 sps:$4 sm:$0xff]   ;;  %v17303_v57 = vld [vmem:[#allocation5 + $0x36c] ss:$36 sps:$4 sm:$0xff]  }
  0x5e   :  { %11302 = vmatpush1.bf16.msra.mxu0 %v17257_v18  ;;  %11835 = vmatpush1.bf16.msra.mxu1 %v17258_v19  ;;  %v17305_v59 = vld [vmem:[#allocation5 + $0x360] ss:$36 sps:$4 sm:$0xff]   ;;  %v17306_v61 = vld [vmem:[#allocation5 + $0x368] ss:$36 sps:$4 sm:$0xff]   ;;  %v17309_v63 = vld [vmem:[#allocation5 + $0x3b4] ss:$36 sps:$4 sm:$0xff]  }
  0x5f   :  { %11303 = vmatprep.subr.bf16.mxu0 %v17259_v20  ;;  %11836 = vmatprep.subr.bf16.mxu1 %v17261_v21  ;;  %v2095_v54 = vrot.slane %v20072_v52, %v20070_v49  ;;  %v17307_v62 = vld [vmem:[#allocation5 + $0x3ac] ss:$36 sps:$4 sm:$0xff]   ;;  %v17313_v2 = vld [vmem:[#allocation5 + $0x3f4] ss:$36 sps:$4 sm:$0xff]   ;;  %v17315_v3 = vld [vmem:[#allocation5 + $0x3fc] ss:$36 sps:$4 sm:$0xff]  }
  0x60   :  { %v17311_v0 = vld [vmem:[#allocation5 + $0x3a8] ss:$36 sps:$4 sm:$0xff]   ;;  %v17312_v1 = vld [vmem:[#allocation5 + $0x3b0] ss:$36 sps:$4 sm:$0xff]   ;;  %v17318_v5 = vld [vmem:[#allocation5 + $0x3f8] ss:$36 sps:$4 sm:$0xff]  }
  0x61   :  { %v2103_v58 = vcombine.high %v2095_v54, %v2095_v54  ;;  %v17317_v4 = vld [vmem:[#allocation5 + $0x3f0] ss:$36 sps:$4 sm:$0xff]   ;;  %v17319_v6 = vld [vmem:[#allocation5 + $0x43c] ss:$36 sps:$4 sm:$0xff]   ;;  %v17321_v7 = vld [vmem:[#allocation5 + $0x444] ss:$36 sps:$4 sm:$0xff]   ;;  %v20082_v13 = vrot.slane %v2095_v54, %v20070_v49 }
  0x62   :  { %11304 = vmatpush1.bf16.msra.mxu0 %v17263_v22  ;;  %11837 = vmatpush1.bf16.msra.mxu1 %v17264_v23  ;;  %v17323_v8 = vld [vmem:[#allocation5 + $0x438] ss:$36 sps:$4 sm:$0xff]   ;;  %v17324_v9 = vld [vmem:[#allocation5 + $0x440] ss:$36 sps:$4 sm:$0xff]   ;;  %v17330_v11 = vld [vmem:[#allocation5 + $0x48c] ss:$36 sps:$4 sm:$0xff]  }
  0x63   :  { %11305 = vmatprep.subr.bf16.mxu0 %v17265_v24  ;;  %11838 = vmatprep.subr.bf16.mxu1 %v17267_v25  ;;  %v20077_v60 = vrot.slane %v2103_v58, %v20070_v49  ;;  %v17327_v10 = vld [vmem:[#allocation5 + $0x484] ss:$36 sps:$4 sm:$0xff]   ;;  %v17333_v15 = vld [vmem:[#allocation5 + $0x4cc] ss:$36 sps:$4 sm:$0xff]   ;;  %v17336_v16 = vld [vmem:[#allocation5 + $0x4d4] ss:$36 sps:$4 sm:$0xff]  }
  0x64   :  { %v17325_v12 = vld [vmem:[#allocation5 + $0x480] ss:$36 sps:$4 sm:$0xff]   ;;  %v17328_v14 = vld [vmem:[#allocation5 + $0x488] ss:$36 sps:$4 sm:$0xff]   ;;  %v17334_v19 = vld [vmem:[#allocation5 + $0x4d0] ss:$36 sps:$4 sm:$0xff]  }
  0x65   :  { %11325 = vmatprep.mubr.bf16.mxu0 %v20077_v60  ;;  %11858 = vmatprep.mubr.bf16.mxu1 %v20077_v60  ;;  %v20086_v17 = vcombine.high %v20077_v60, %v20077_v60  ;;  %v17331_v18 = vld [vmem:[#allocation5 + $0x4c8] ss:$36 sps:$4 sm:$0xff]   ;;  %v17339_v20 = vld [vmem:[#allocation5 + $0x514] ss:$36 sps:$4 sm:$0xff]   ;;  %v17342_v21 = vld [vmem:[#allocation5 + $0x51c] ss:$36 sps:$4 sm:$0xff]  }
  0x66   :  { %11306 = vmatpush1.bf16.msra.mxu0 %v17269_v26  ;;  %11839 = vmatpush1.bf16.msra.mxu1 %v17270_v27  ;;  %v17337_v22 = vld [vmem:[#allocation5 + $0x510] ss:$36 sps:$4 sm:$0xff]   ;;  %v17340_v23 = vld [vmem:[#allocation5 + $0x518] ss:$36 sps:$4 sm:$0xff]   ;;  %v17348_v25 = vld [vmem:[#allocation5 + $0x564] ss:$36 sps:$4 sm:$0xff]  }
  0x67   :  { %11307 = vmatprep.subr.bf16.mxu0 %v17271_v28  ;;  %11840 = vmatprep.subr.bf16.mxu1 %v17273_v29  ;;  %v17345_v24 = vld [vmem:[#allocation5 + $0x55c] ss:$36 sps:$4 sm:$0xff]   ;;  %v17351_v28 = vld [vmem:[#allocation5 + $0x5a4] ss:$36 sps:$4 sm:$0xff]   ;;  %v17354_v29 = vld [vmem:[#allocation5 + $0x5ac] ss:$36 sps:$4 sm:$0xff]  }
  0x68   :  { %v17343_v26 = vld [vmem:[#allocation5 + $0x558] ss:$36 sps:$4 sm:$0xff]   ;;  %v17346_v27 = vld [vmem:[#allocation5 + $0x560] ss:$36 sps:$4 sm:$0xff]   ;;  %v17361_v38 = vld [vmem:[#allocation5 + $0x630] ss:$36 sps:$4 sm:$0xff]  }
  0x69   :  { %v17363_v36 = vld [vmem:[#allocation5 + $0x634] ss:$36 sps:$4 sm:$0xff]   ;;  %v17366_v37 = vld [vmem:[#allocation5 + $0x63c] ss:$36 sps:$4 sm:$0xff]   ;;  %vm14746_vm2 = vcmask 74752  }
  0x6a   :  { %11308 = vmatpush1.bf16.msra.mxu0 %v17275_v30  ;;  %11841 = vmatpush1.bf16.msra.mxu1 %v17276_v31  ;;  %v17349_v30 = vld [vmem:[#allocation5 + $0x5a0] ss:$36 sps:$4 sm:$0xff]   ;;  %v17352_v31 = vld [vmem:[#allocation5 + $0x5a8] ss:$36 sps:$4 sm:$0xff]   ;;  %v17367_v43 = vld [vmem:[#allocation5 + $0x678] ss:$36 sps:$4 sm:$0xff]  }
  0x6b   :  { %11309 = vmatprep.subr.bf16.mxu0 %v17277_v32  ;;  %11842 = vmatprep.subr.bf16.mxu1 %v17279_v33  ;;  %v17357_v32 = vld [vmem:[#allocation5 + $0x5ec] ss:$36 sps:$4 sm:$0xff]   ;;  %v17360_v33 = vld [vmem:[#allocation5 + $0x5f4] ss:$36 sps:$4 sm:$0xff]  }
  0x6c   :  { %v17382_v54 = vld [vmem:[#allocation5 + $0x710] ss:$36 sps:$4 sm:$0xff]   ;;  %v17388_v58 = vld [vmem:[#allocation5 + $0x758] ss:$36 sps:$4 sm:$0xff]  }
  0x6e   :  { %11310 = vmatpush1.bf16.msra.mxu0 %v17281_v34  ;;  %11843 = vmatpush1.bf16.msra.mxu1 %v17282_v35  ;;  %v17355_v34 = vld [vmem:[#allocation5 + $0x5e8] ss:$36 sps:$4 sm:$0xff]   ;;  %v17358_v35 = vld [vmem:[#allocation5 + $0x5f0] ss:$36 sps:$4 sm:$0xff]  }
  0x6f   :  { %11311 = vmatprep.subr.bf16.mxu0 %v17283_v39  ;;  %11844 = vmatprep.subr.bf16.mxu1 %v17285_v40  ;;  %v17364_v39 = vld [vmem:[#allocation5 + $0x638] ss:$36 sps:$4 sm:$0xff]  }
  0x70   :  { %v17369_v40 = vld [vmem:[#allocation5 + $0x67c] ss:$36 sps:$4 sm:$0xff]  }
  0x72   :  { %11312 = vmatpush1.bf16.msra.mxu0 %v17287_v41  ;;  %11845 = vmatpush1.bf16.msra.mxu1 %v17288_v44  ;;  %v17372_v41 = vld [vmem:[#allocation5 + $0x684] ss:$36 sps:$4 sm:$0xff]  }
  0x73   :  { %11313 = vmatprep.subr.bf16.mxu0 %v17289_v45  ;;  %11846 = vmatprep.subr.bf16.mxu1 %v17291_v46  ;;  %v17370_v44 = vld [vmem:[#allocation5 + $0x680] ss:$36 sps:$4 sm:$0xff]   ;;  %v17378_v46 = vld [vmem:[#allocation5 + $0x6cc] ss:$36 sps:$4 sm:$0xff]  }
  0x74   :  { %v17375_v45 = vld [vmem:[#allocation5 + $0x6c4] ss:$36 sps:$4 sm:$0xff]  }
  0x76   :  { %11314 = vmatpush1.bf16.msra.mxu0 %v17293_v47  ;;  %11847 = vmatpush1.bf16.msra.mxu1 %v17294_v48  ;;  %v17373_v47 = vld [vmem:[#allocation5 + $0x6c0] ss:$36 sps:$4 sm:$0xff]   ;;  %v17376_v48 = vld [vmem:[#allocation5 + $0x6c8] ss:$36 sps:$4 sm:$0xff]  }
  0x77   :  { %11315 = vmatprep.subr.bf16.mxu0 %v17295_v50  ;;  %11848 = vmatprep.subr.bf16.mxu1 %v17297_v51  ;;  %v17381_v50 = vld [vmem:[#allocation5 + $0x70c] ss:$36 sps:$4 sm:$0xff]   ;;  %v17384_v51 = vld [vmem:[#allocation5 + $0x714] ss:$36 sps:$4 sm:$0xff]  }
  0x7a   :  { %11316 = vmatpush1.bf16.msra.mxu0 %v17299_v53  ;;  %11849 = vmatpush1.bf16.msra.mxu1 %v17300_v55  ;;  %v17379_v53 = vld [vmem:[#allocation5 + $0x708] ss:$36 sps:$4 sm:$0xff]   ;;  %v17387_v55 = vld [vmem:[#allocation5 + $0x754] ss:$36 sps:$4 sm:$0xff]  }
  0x7b   :  { %11317 = vmatprep.subr.bf16.mxu0 %v17301_v56  ;;  %11850 = vmatprep.subr.bf16.mxu1 %v17303_v57  ;;  %v17390_v56 = vld [vmem:[#allocation5 + $0x75c] ss:$36 sps:$4 sm:$0xff]   ;;  %v17385_v57 = vld [vmem:[#allocation5 + $0x750] ss:$36 sps:$4 sm:$0xff]  }
  0x7e   :  { %11318 = vmatpush1.bf16.msra.mxu0 %v17305_v59  ;;  %11851 = vmatpush1.bf16.msra.mxu1 %v17306_v61  ;;  %v17393_v59 = vld [vmem:[#allocation5 + $0x79c] ss:$36 sps:$4 sm:$0xff]   ;;  %v17396_v61 = vld [vmem:[#allocation5 + $0x7a4] ss:$36 sps:$4 sm:$0xff]  }
  0x7f   :  { %11319 = vmatprep.subr.bf16.mxu0 %v17307_v62  ;;  %11852 = vmatprep.subr.bf16.mxu1 %v17309_v63  ;;  %v17391_v62 = vld [vmem:[#allocation5 + $0x798] ss:$36 sps:$4 sm:$0xff]   ;;  %v17394_v63 = vld [vmem:[#allocation5 + $0x7a0] ss:$36 sps:$4 sm:$0xff]  }
  0x82   :  { %11320 = vmatpush1.bf16.msra.mxu0 %v17311_v0  ;;  %11853 = vmatpush1.bf16.msra.mxu1 %v17312_v1  ;;  %v17399_v0 = vld [vmem:[#allocation5 + $0x7e4] ss:$36 sps:$4 sm:$0xff]   ;;  %v17402_v1 = vld [vmem:[#allocation5 + $0x7ec] ss:$36 sps:$4 sm:$0xff]  }
  0x83   :  { %11321 = vmatprep.subr.bf16.mxu0 %v17313_v2  ;;  %11854 = vmatprep.subr.bf16.mxu1 %v17315_v3  ;;  %v17397_v2 = vld [vmem:[#allocation5 + $0x7e0] ss:$36 sps:$4 sm:$0xff]   ;;  %v17400_v3 = vld [vmem:[#allocation5 + $0x7e8] ss:$36 sps:$4 sm:$0xff]  }
  0x86   :  { %11322 = vmatpush1.bf16.msra.mxu0 %v17317_v4  ;;  %11855 = vmatpush1.bf16.msra.mxu1 %v17318_v5  ;;  %v17405_v4 = vld [vmem:[#allocation5 + $0x82c] ss:$36 sps:$4 sm:$0xff]   ;;  %v17408_v5 = vld [vmem:[#allocation5 + $0x834] ss:$36 sps:$4 sm:$0xff]  }
  0x87   :  { %11323 = vmatprep.subr.bf16.mxu0 %v17319_v6  ;;  %11856 = vmatprep.subr.bf16.mxu1 %v17321_v7  ;;  %v17403_v6 = vld [vmem:[#allocation5 + $0x828] ss:$36 sps:$4 sm:$0xff]   ;;  %v17406_v7 = vld [vmem:[#allocation5 + $0x830] ss:$36 sps:$4 sm:$0xff]  }
  0x8a   :  { %11324 = vmatpush1.bf16.msra.mxu0 %v17323_v8  ;;  %11857 = vmatpush1.bf16.msra.mxu1 %v17324_v9  ;;  %v17411_v8 = vld [vmem:[#allocation5 + $0x874] ss:$36 sps:$4 sm:$0xff]   ;;  %v17414_v9 = vld [vmem:[#allocation5 + $0x87c] ss:$36 sps:$4 sm:$0xff]  }
  0x8b   :  { %11334 = vmatprep.subr.bf16.mxu0 %v17327_v10  ;;  %11867 = vmatprep.subr.bf16.mxu1 %v17330_v11  ;;  %v2088_v10 = vcombine.high %v20072_v52, %v20072_v52  ;;  %v17409_v11 = vld [vmem:[#allocation5 + $0x870] ss:$36 sps:$4 sm:$0xff]  }
  0x8d   :  { %11326 = vmatmul.mubr.bf16.vlgmr.msra.gmra.mrb[0].mxu0 %v20082_v13  ;;  %11859 = vmatmul.mubr.bf16.vlgmr.msra.gmra.mrb[0].mxu1 %v20082_v13 }
  0x8e   :  { %11335 = vmatpush1.bf16.msra.mxu0 %v17325_v12  ;;  %11868 = vmatpush1.bf16.msra.mxu1 %v17328_v14  ;;  %v17412_v12 = vld [vmem:[#allocation5 + $0x878] ss:$36 sps:$4 sm:$0xff]  }
  0x8f   :  { %11336 = vmatprep.subr.bf16.mxu0 %v17333_v15  ;;  %11869 = vmatprep.subr.bf16.mxu1 %v17336_v16  ;;  %v17417_v14 = vld [vmem:[#allocation5 + $0x8bc] ss:$36 sps:$4 sm:$0xff]   ;;  %v17420_v15 = vld [vmem:[#allocation5 + $0x8c4] ss:$36 sps:$4 sm:$0xff]   ;;  %v20095_v16 = vrot.slane %v2088_v10, %v20070_v49 }
  0x90   :  { %11366 = vmatprep.mubr.bf16.mxu0 %v20086_v17  ;;  %11899 = vmatprep.mubr.bf16.mxu1 %v20086_v17  ;;  %v17495_v10 = vld [vmem:[#allocation5 + $0xc64] ss:$36 sps:$4 sm:$0xff]  }
  0x91   :  { %v2104_v52 = vcombine.high %v20095_v16, %v20095_v16 }
  0x92   :  { %11337 = vmatpush1.bf16.msra.mxu0 %v17331_v18  ;;  %11870 = vmatpush1.bf16.msra.mxu1 %v17334_v19  ;;  %v17415_v18 = vld [vmem:[#allocation5 + $0x8b8] ss:$36 sps:$4 sm:$0xff]   ;;  %v17418_v19 = vld [vmem:[#allocation5 + $0x8c0] ss:$36 sps:$4 sm:$0xff]  }
  0x93   :  { %11338 = vmatprep.subr.bf16.mxu0 %v17339_v20  ;;  %11871 = vmatprep.subr.bf16.mxu1 %v17342_v21  ;;  %v17423_v20 = vld [vmem:[#allocation5 + $0x904] ss:$36 sps:$4 sm:$0xff]   ;;  %v17426_v21 = vld [vmem:[#allocation5 + $0x90c] ss:$36 sps:$4 sm:$0xff]  }
  0x96   :  { %11339 = vmatpush1.bf16.msra.mxu0 %v17337_v22  ;;  %11872 = vmatpush1.bf16.msra.mxu1 %v17340_v23  ;;  %v17421_v22 = vld [vmem:[#allocation5 + $0x900] ss:$36 sps:$4 sm:$0xff]   ;;  %v20101_v23 = vcombine.high %v20082_v13, %v20082_v13 }
  0x97   :  { %11340 = vmatprep.subr.bf16.mxu0 %v17345_v24  ;;  %11873 = vmatprep.subr.bf16.mxu1 %v17348_v25  ;;  %v17424_v24 = vld [vmem:[#allocation5 + $0x908] ss:$36 sps:$4 sm:$0xff]  }
  0x98   :  { %v17429_v25 = vld [vmem:[#allocation5 + $0x94c] ss:$36 sps:$4 sm:$0xff]  }
  0x9a   :  { %11341 = vmatpush1.bf16.msra.mxu0 %v17343_v26  ;;  %11874 = vmatpush1.bf16.msra.mxu1 %v17346_v27  ;;  %v17432_v26 = vld [vmem:[#allocation5 + $0x954] ss:$36 sps:$4 sm:$0xff]   ;;  %v20104_v27 = vrot.slane %v2104_v52, %v20070_v49  ;;  %v17510_v52 = vld [vmem:[#allocation5 + $0xcfc] ss:$36 sps:$4 sm:$0xff]  }
  0x9b   :  { %11342 = vmatprep.subr.bf16.mxu0 %v17351_v28  ;;  %11875 = vmatprep.subr.bf16.mxu1 %v17354_v29  ;;  %v17427_v28 = vld [vmem:[#allocation5 + $0x948] ss:$36 sps:$4 sm:$0xff]   ;;  %v17430_v29 = vld [vmem:[#allocation5 + $0x950] ss:$36 sps:$4 sm:$0xff]  }
  0x9e   :  { %11343 = vmatpush1.bf16.msra.mxu0 %v17349_v30  ;;  %11876 = vmatpush1.bf16.msra.mxu1 %v17352_v31  ;;  %v17435_v30 = vld [vmem:[#allocation5 + $0x994] ss:$36 sps:$4 sm:$0xff]   ;;  %v17438_v31 = vld [vmem:[#allocation5 + $0x99c] ss:$36 sps:$4 sm:$0xff]  }
  0x9f   :  { %11344 = vmatprep.subr.bf16.mxu0 %v17357_v32  ;;  %11877 = vmatprep.subr.bf16.mxu1 %v17360_v33  ;;  %v17433_v32 = vld [vmem:[#allocation5 + $0x990] ss:$36 sps:$4 sm:$0xff]   ;;  %v17436_v33 = vld [vmem:[#allocation5 + $0x998] ss:$36 sps:$4 sm:$0xff]  }
  0xa2   :  { %11345 = vmatpush1.bf16.msra.mxu0 %v17355_v34  ;;  %11878 = vmatpush1.bf16.msra.mxu1 %v17358_v35  ;;  %v17441_v34 = vld [vmem:[#allocation5 + $0x9dc] ss:$36 sps:$4 sm:$0xff]   ;;  %v17444_v35 = vld [vmem:[#allocation5 + $0x9e4] ss:$36 sps:$4 sm:$0xff]  }
  0xa3   :  { %11346 = vmatprep.subr.bf16.mxu0 %v17363_v36  ;;  %11879 = vmatprep.subr.bf16.mxu1 %v17366_v37  ;;  %v17439_v36 = vld [vmem:[#allocation5 + $0x9d8] ss:$36 sps:$4 sm:$0xff]   ;;  %v17442_v37 = vld [vmem:[#allocation5 + $0x9e0] ss:$36 sps:$4 sm:$0xff]  }
  0xa6   :  { %11347 = vmatpush1.bf16.msra.mxu0 %v17361_v38  ;;  %11880 = vmatpush1.bf16.msra.mxu1 %v17364_v39  ;;  %v17447_v38 = vld [vmem:[#allocation5 + $0xa24] ss:$36 sps:$4 sm:$0xff]   ;;  %v17450_v39 = vld [vmem:[#allocation5 + $0xa2c] ss:$36 sps:$4 sm:$0xff]  }
  0xa7   :  { %11348 = vmatprep.subr.bf16.mxu0 %v17369_v40  ;;  %11881 = vmatprep.subr.bf16.mxu1 %v17372_v41  ;;  %v17445_v40 = vld [vmem:[#allocation5 + $0xa20] ss:$36 sps:$4 sm:$0xff]   ;;  %v17448_v41 = vld [vmem:[#allocation5 + $0xa28] ss:$36 sps:$4 sm:$0xff]  }
  0xaa   :  { %11349 = vmatpush1.bf16.msra.mxu0 %v17367_v43  ;;  %11882 = vmatpush1.bf16.msra.mxu1 %v17370_v44  ;;  %v17453_v43 = vld [vmem:[#allocation5 + $0xa6c] ss:$36 sps:$4 sm:$0xff]   ;;  %v17456_v44 = vld [vmem:[#allocation5 + $0xa74] ss:$36 sps:$4 sm:$0xff]  }
  0xab   :  { %11350 = vmatprep.subr.bf16.mxu0 %v17375_v45  ;;  %11883 = vmatprep.subr.bf16.mxu1 %v17378_v46  ;;  %v17451_v45 = vld [vmem:[#allocation5 + $0xa68] ss:$36 sps:$4 sm:$0xff]   ;;  %v17454_v46 = vld [vmem:[#allocation5 + $0xa70] ss:$36 sps:$4 sm:$0xff]  }
  0xae   :  { %11351 = vmatpush1.bf16.msra.mxu0 %v17373_v47  ;;  %11884 = vmatpush1.bf16.msra.mxu1 %v17376_v48  ;;  %v17459_v47 = vld [vmem:[#allocation5 + $0xab4] ss:$36 sps:$4 sm:$0xff]   ;;  %v17462_v48 = vld [vmem:[#allocation5 + $0xabc] ss:$36 sps:$4 sm:$0xff]  }
  0xaf   :  { %11352 = vmatprep.subr.bf16.mxu0 %v17381_v50  ;;  %11885 = vmatprep.subr.bf16.mxu1 %v17384_v51  ;;  %v17457_v50 = vld [vmem:[#allocation5 + $0xab0] ss:$36 sps:$4 sm:$0xff]   ;;  %v17460_v51 = vld [vmem:[#allocation5 + $0xab8] ss:$36 sps:$4 sm:$0xff]  }
  0xb2   :  { %11353 = vmatpush1.bf16.msra.mxu0 %v17379_v53  ;;  %11886 = vmatpush1.bf16.msra.mxu1 %v17382_v54  ;;  %v17465_v53 = vld [vmem:[#allocation5 + $0xafc] ss:$36 sps:$4 sm:$0xff]   ;;  %v17468_v54 = vld [vmem:[#allocation5 + $0xb04] ss:$36 sps:$4 sm:$0xff]  }
  0xb3   :  { %11354 = vmatprep.subr.bf16.mxu0 %v17387_v55  ;;  %11887 = vmatprep.subr.bf16.mxu1 %v17390_v56  ;;  %v17463_v55 = vld [vmem:[#allocation5 + $0xaf8] ss:$36 sps:$4 sm:$0xff]   ;;  %v17466_v56 = vld [vmem:[#allocation5 + $0xb00] ss:$36 sps:$4 sm:$0xff]  }
  0xb6   :  { %11355 = vmatpush1.bf16.msra.mxu0 %v17385_v57  ;;  %11888 = vmatpush1.bf16.msra.mxu1 %v17388_v58  ;;  %v17471_v57 = vld [vmem:[#allocation5 + $0xb44] ss:$36 sps:$4 sm:$0xff]   ;;  %v17474_v58 = vld [vmem:[#allocation5 + $0xb4c] ss:$36 sps:$4 sm:$0xff]  }
  0xb7   :  { %11356 = vmatprep.subr.bf16.mxu0 %v17393_v59  ;;  %11889 = vmatprep.subr.bf16.mxu1 %v17396_v61  ;;  %v17469_v59 = vld [vmem:[#allocation5 + $0xb40] ss:$36 sps:$4 sm:$0xff]   ;;  %v17472_v61 = vld [vmem:[#allocation5 + $0xb48] ss:$36 sps:$4 sm:$0xff]  }
  0xba   :  { %11357 = vmatpush1.bf16.msra.mxu0 %v17391_v62  ;;  %11890 = vmatpush1.bf16.msra.mxu1 %v17394_v63  ;;  %v17477_v62 = vld [vmem:[#allocation5 + $0xb8c] ss:$36 sps:$4 sm:$0xff]   ;;  %v17480_v63 = vld [vmem:[#allocation5 + $0xb94] ss:$36 sps:$4 sm:$0xff]  }
  0xbb   :  { %11358 = vmatprep.subr.bf16.mxu0 %v17399_v0  ;;  %11891 = vmatprep.subr.bf16.mxu1 %v17402_v1  ;;  %v17475_v0 = vld [vmem:[#allocation5 + $0xb88] ss:$36 sps:$4 sm:$0xff]   ;;  %v17478_v1 = vld [vmem:[#allocation5 + $0xb90] ss:$36 sps:$4 sm:$0xff]  }
  0xbe   :  { %11359 = vmatpush1.bf16.msra.mxu0 %v17397_v2  ;;  %11892 = vmatpush1.bf16.msra.mxu1 %v17400_v3  ;;  %v17483_v2 = vld [vmem:[#allocation5 + $0xbd4] ss:$36 sps:$4 sm:$0xff]   ;;  %v17486_v3 = vld [vmem:[#allocation5 + $0xbdc] ss:$36 sps:$4 sm:$0xff]  }
  0xbf   :  { %11360 = vmatprep.subr.bf16.mxu0 %v17405_v4  ;;  %11893 = vmatprep.subr.bf16.mxu1 %v17408_v5  ;;  %v17481_v4 = vld [vmem:[#allocation5 + $0xbd0] ss:$36 sps:$4 sm:$0xff]   ;;  %v17484_v5 = vld [vmem:[#allocation5 + $0xbd8] ss:$36 sps:$4 sm:$0xff]  }
  0xc2   :  { %11361 = vmatpush1.bf16.msra.mxu0 %v17403_v6  ;;  %11894 = vmatpush1.bf16.msra.mxu1 %v17406_v7  ;;  %v17489_v6 = vld [vmem:[#allocation5 + $0xc1c] ss:$36 sps:$4 sm:$0xff]   ;;  %v17492_v7 = vld [vmem:[#allocation5 + $0xc24] ss:$36 sps:$4 sm:$0xff]  }
  0xc3   :  { %11362 = vmatprep.subr.bf16.mxu0 %v17411_v8  ;;  %11895 = vmatprep.subr.bf16.mxu1 %v17414_v9  ;;  %v17487_v8 = vld [vmem:[#allocation5 + $0xc18] ss:$36 sps:$4 sm:$0xff]   ;;  %v17490_v9 = vld [vmem:[#allocation5 + $0xc20] ss:$36 sps:$4 sm:$0xff]  }
  0xc6   :  { %11363 = vmatpush1.bf16.msra.mxu0 %v17409_v11  ;;  %11896 = vmatpush1.bf16.msra.mxu1 %v17412_v12  ;;  %v17498_v11 = vld [vmem:[#allocation5 + $0xc6c] ss:$36 sps:$4 sm:$0xff]   ;;  %v17493_v12 = vld [vmem:[#allocation5 + $0xc60] ss:$36 sps:$4 sm:$0xff]  }
  0xc7   :  { %11364 = vmatprep.subr.bf16.mxu0 %v17417_v14  ;;  %11897 = vmatprep.subr.bf16.mxu1 %v17420_v15  ;;  %v17496_v14 = vld [vmem:[#allocation5 + $0xc68] ss:$36 sps:$4 sm:$0xff]  }
  0xc8   :  { %v17501_v15 = vld [vmem:[#allocation5 + $0xcac] ss:$36 sps:$4 sm:$0xff]  }
  0xca   :  { %11365 = vmatpush1.bf16.msra.mxu0 %v17415_v18  ;;  %11898 = vmatpush1.bf16.msra.mxu1 %v17418_v19  ;;  %v17504_v18 = vld [vmem:[#allocation5 + $0xcb4] ss:$36 sps:$4 sm:$0xff]   ;;  %v17499_v19 = vld [vmem:[#allocation5 + $0xca8] ss:$36 sps:$4 sm:$0xff]  }
  0xcb   :  { %11375 = vmatprep.subr.bf16.mxu0 %v17423_v20  ;;  %11908 = vmatprep.subr.bf16.mxu1 %v17426_v21  ;;  %v17502_v20 = vld [vmem:[#allocation5 + $0xcb0] ss:$36 sps:$4 sm:$0xff]  }
  0xcc   :  { %v17507_v21 = vld [vmem:[#allocation5 + $0xcf4] ss:$36 sps:$4 sm:$0xff]  }
  0xcd   :  { %11367 = vmatmul.mubr.bf16.vlgmr.msra.gmra.mrb[0].mxu0 %v20101_v23  ;;  %11900 = vmatmul.mubr.bf16.vlgmr.msra.gmra.mrb[0].mxu1 %v20101_v23 }
  0xce   :  { %11376 = vmatpush1.bf16.msra.mxu0 %v17421_v22  ;;  %11909 = vmatpush1.bf16.msra.mxu1 %v17424_v24  ;;  %v17505_v22 = vld [vmem:[#allocation5 + $0xcf0] ss:$36 sps:$4 sm:$0xff]   ;;  %v17508_v24 = vld [vmem:[#allocation5 + $0xcf8] ss:$36 sps:$4 sm:$0xff]  }
  0xcf   :  { %11377 = vmatprep.subr.bf16.mxu0 %v17429_v25  ;;  %11910 = vmatprep.subr.bf16.mxu1 %v17432_v26  ;;  %v17513_v25 = vld [vmem:[#allocation5 + $0xd3c] ss:$36 sps:$4 sm:$0xff]   ;;  %v17516_v26 = vld [vmem:[#allocation5 + $0xd44] ss:$36 sps:$4 sm:$0xff]  }
  0xd0   :  { %11407 = vmatprep.mubr.bf16.mxu0 %v20104_v27  ;;  %11940 = vmatprep.mubr.bf16.mxu1 %v20104_v27 }
  0xd2   :  { %11378 = vmatpush1.bf16.msra.mxu0 %v17427_v28  ;;  %11911 = vmatpush1.bf16.msra.mxu1 %v17430_v29  ;;  %v17511_v28 = vld [vmem:[#allocation5 + $0xd38] ss:$36 sps:$4 sm:$0xff]   ;;  %v17514_v29 = vld [vmem:[#allocation5 + $0xd40] ss:$36 sps:$4 sm:$0xff]  }
  0xd3   :  { %11379 = vmatprep.subr.bf16.mxu0 %v17435_v30  ;;  %11912 = vmatprep.subr.bf16.mxu1 %v17438_v31  ;;  %v17520_v30 = vld [vmem:[#allocation5 + $0xd84] ss:$36 sps:$4 sm:$0xff]   ;;  %v17523_v31 = vld [vmem:[#allocation5 + $0xd8c] ss:$36 sps:$4 sm:$0xff]  }
  0xd6   :  { %11380 = vmatpush1.bf16.msra.mxu0 %v17433_v32  ;;  %11913 = vmatpush1.bf16.msra.mxu1 %v17436_v33  ;;  %v17518_v32 = vld [vmem:[#allocation5 + $0xd80] ss:$36 sps:$4 sm:$0xff]   ;;  %v20112_v33 = vrot.slane %v20095_v16, %v20070_v49  ;;  %v17527_v16 = vld [vmem:[#allocation5 + $0xdd0] ss:$36 sps:$4 sm:$0xff]  }
  0xd7   :  { %11381 = vmatprep.subr.bf16.mxu0 %v17441_v34  ;;  %11914 = vmatprep.subr.bf16.mxu1 %v17444_v35  ;;  %v17521_v34 = vld [vmem:[#allocation5 + $0xd88] ss:$36 sps:$4 sm:$0xff]  }
  0xd8   :  { %v17526_v35 = vld [vmem:[#allocation5 + $0xdcc] ss:$36 sps:$4 sm:$0xff]  }
  0xda   :  { %11382 = vmatpush1.bf16.msra.mxu0 %v17439_v36  ;;  %11915 = vmatpush1.bf16.msra.mxu1 %v17442_v37  ;;  %v17529_v36 = vld [vmem:[#allocation5 + $0xdd4] ss:$36 sps:$4 sm:$0xff]   ;;  %v20116_v37 = vcombine.high %v20104_v27, %v20104_v27 }
  0xdb   :  { %11383 = vmatprep.subr.bf16.mxu0 %v17447_v38  ;;  %11916 = vmatprep.subr.bf16.mxu1 %v17450_v39  ;;  %v17524_v38 = vld [vmem:[#allocation5 + $0xdc8] ss:$36 sps:$4 sm:$0xff]   ;;  %v17532_v39 = vld [vmem:[#allocation5 + $0xe14] ss:$36 sps:$4 sm:$0xff]  }
  0xde   :  { %11384 = vmatpush1.bf16.msra.mxu0 %v17445_v40  ;;  %11917 = vmatpush1.bf16.msra.mxu1 %v17448_v41  ;;  %v17535_v40 = vld [vmem:[#allocation5 + $0xe1c] ss:$36 sps:$4 sm:$0xff]   ;;  %v17530_v41 = vld [vmem:[#allocation5 + $0xe10] ss:$36 sps:$4 sm:$0xff]  }
  0xdf   :  { %11385 = vmatprep.subr.bf16.mxu0 %v17453_v43  ;;  %11918 = vmatprep.subr.bf16.mxu1 %v17456_v44  ;;  %v17533_v43 = vld [vmem:[#allocation5 + $0xe18] ss:$36 sps:$4 sm:$0xff]  }
  0xe0   :  { %v17538_v44 = vld [vmem:[#allocation5 + $0xe5c] ss:$36 sps:$4 sm:$0xff]  }
  0xe2   :  { %11386 = vmatpush1.bf16.msra.mxu0 %v17451_v45  ;;  %11919 = vmatpush1.bf16.msra.mxu1 %v17454_v46  ;;  %v17541_v45 = vld [vmem:[#allocation5 + $0xe64] ss:$36 sps:$4 sm:$0xff]   ;;  %v17536_v46 = vld [vmem:[#allocation5 + $0xe58] ss:$36 sps:$4 sm:$0xff]  }
  0xe3   :  { %11387 = vmatprep.subr.bf16.mxu0 %v17459_v47  ;;  %11920 = vmatprep.subr.bf16.mxu1 %v17462_v48  ;;  %v17539_v47 = vld [vmem:[#allocation5 + $0xe60] ss:$36 sps:$4 sm:$0xff]  }
  0xe4   :  { %v17544_v48 = vld [vmem:[#allocation5 + $0xea4] ss:$36 sps:$4 sm:$0xff]  }
  0xe6   :  { %11388 = vmatpush1.bf16.msra.mxu0 %v17457_v50  ;;  %11921 = vmatpush1.bf16.msra.mxu1 %v17460_v51  ;;  %v17547_v50 = vld [vmem:[#allocation5 + $0xeac] ss:$36 sps:$4 sm:$0xff]   ;;  %v17542_v51 = vld [vmem:[#allocation5 + $0xea0] ss:$36 sps:$4 sm:$0xff]  }
  0xe7   :  { %11389 = vmatprep.subr.bf16.mxu0 %v17465_v53  ;;  %11922 = vmatprep.subr.bf16.mxu1 %v17468_v54  ;;  %v17545_v53 = vld [vmem:[#allocation5 + $0xea8] ss:$36 sps:$4 sm:$0xff]  }
  0xe8   :  { %v17550_v54 = vld [vmem:[#allocation5 + $0xeec] ss:$36 sps:$4 sm:$0xff]  }
  0xea   :  { %11390 = vmatpush1.bf16.msra.mxu0 %v17463_v55  ;;  %11923 = vmatpush1.bf16.msra.mxu1 %v17466_v56  ;;  %v17553_v55 = vld [vmem:[#allocation5 + $0xef4] ss:$36 sps:$4 sm:$0xff]   ;;  %v17548_v56 = vld [vmem:[#allocation5 + $0xee8] ss:$36 sps:$4 sm:$0xff]  }
  0xeb   :  { %11391 = vmatprep.subr.bf16.mxu0 %v17471_v57  ;;  %11924 = vmatprep.subr.bf16.mxu1 %v17474_v58  ;;  %v17551_v57 = vld [vmem:[#allocation5 + $0xef0] ss:$36 sps:$4 sm:$0xff]  }
  0xec   :  { %v17556_v58 = vld [vmem:[#allocation5 + $0xf34] ss:$36 sps:$4 sm:$0xff]  }
  0xee   :  { %11392 = vmatpush1.bf16.msra.mxu0 %v17469_v59  ;;  %11925 = vmatpush1.bf16.msra.mxu1 %v17472_v61  ;;  %v17559_v59 = vld [vmem:[#allocation5 + $0xf3c] ss:$36 sps:$4 sm:$0xff]   ;;  %v17554_v61 = vld [vmem:[#allocation5 + $0xf30] ss:$36 sps:$4 sm:$0xff]  }
  0xef   :  { %11393 = vmatprep.subr.bf16.mxu0 %v17477_v62  ;;  %11926 = vmatprep.subr.bf16.mxu1 %v17480_v63  ;;  %v17557_v62 = vld [vmem:[#allocation5 + $0xf38] ss:$36 sps:$4 sm:$0xff]  }
  0xf0   :  { %v17562_v63 = vld [vmem:[#allocation5 + $0xf7c] ss:$36 sps:$4 sm:$0xff]  }
  0xf2   :  { %11394 = vmatpush1.bf16.msra.mxu0 %v17475_v0  ;;  %11927 = vmatpush1.bf16.msra.mxu1 %v17478_v1  ;;  %v17565_v0 = vld [vmem:[#allocation5 + $0xf84] ss:$36 sps:$4 sm:$0xff]   ;;  %v17560_v1 = vld [vmem:[#allocation5 + $0xf78] ss:$36 sps:$4 sm:$0xff]  }
  0xf3   :  { %11395 = vmatprep.subr.bf16.mxu0 %v17483_v2  ;;  %11928 = vmatprep.subr.bf16.mxu1 %v17486_v3  ;;  %v17563_v2 = vld [vmem:[#allocation5 + $0xf80] ss:$36 sps:$4 sm:$0xff]  }
  0xf4   :  { %v17568_v3 = vld [vmem:[#allocation5 + $0xfc4] ss:$36 sps:$4 sm:$0xff]  }
  0xf6   :  { %11396 = vmatpush1.bf16.msra.mxu0 %v17481_v4  ;;  %11929 = vmatpush1.bf16.msra.mxu1 %v17484_v5  ;;  %v17571_v4 = vld [vmem:[#allocation5 + $0xfcc] ss:$36 sps:$4 sm:$0xff]   ;;  %v17566_v5 = vld [vmem:[#allocation5 + $0xfc0] ss:$36 sps:$4 sm:$0xff]  }
  0xf7   :  { %11397 = vmatprep.subr.bf16.mxu0 %v17489_v6  ;;  %11930 = vmatprep.subr.bf16.mxu1 %v17492_v7  ;;  %v17569_v6 = vld [vmem:[#allocation5 + $0xfc8] ss:$36 sps:$4 sm:$0xff]  }
  0xf8   :  { %v17574_v7 = vld [vmem:[#allocation5 + $0x100c] ss:$36 sps:$4 sm:$0xff]  }
  0xfa   :  { %11398 = vmatpush1.bf16.msra.mxu0 %v17487_v8  ;;  %11931 = vmatpush1.bf16.msra.mxu1 %v17490_v9  ;;  %v17577_v8 = vld [vmem:[#allocation5 + $0x1014] ss:$36 sps:$4 sm:$0xff]   ;;  %v17572_v9 = vld [vmem:[#allocation5 + $0x1008] ss:$36 sps:$4 sm:$0xff]  }
  0xfb   :  { %11399 = vmatprep.subr.bf16.mxu0 %v17495_v10  ;;  %11932 = vmatprep.subr.bf16.mxu1 %v17498_v11  ;;  %v17575_v10 = vld [vmem:[#allocation5 + $0x1010] ss:$36 sps:$4 sm:$0xff]  }
  0xfc   :  { %v17580_v11 = vld [vmem:[#allocation5 + $0x1054] ss:$36 sps:$4 sm:$0xff]  }
  0xfe   :  { %11400 = vmatpush1.bf16.msra.mxu0 %v17493_v12  ;;  %11933 = vmatpush1.bf16.msra.mxu1 %v17496_v14  ;;  %v17583_v12 = vld [vmem:[#allocation5 + $0x105c] ss:$36 sps:$4 sm:$0xff]   ;;  %v17578_v14 = vld [vmem:[#allocation5 + $0x1050] ss:$36 sps:$4 sm:$0xff]  }
  0xff   :  { %11401 = vmatprep.subr.bf16.mxu0 %v17501_v15  ;;  %11934 = vmatprep.subr.bf16.mxu1 %v17504_v18  ;;  %v17581_v15 = vld [vmem:[#allocation5 + $0x1058] ss:$36 sps:$4 sm:$0xff]  }
 0x100   :  { %v17586_v18 = vld [vmem:[#allocation5 + $0x109c] ss:$36 sps:$4 sm:$0xff]  }
 0x102   :  { %11402 = vmatpush1.bf16.msra.mxu0 %v17499_v19  ;;  %11935 = vmatpush1.bf16.msra.mxu1 %v17502_v20  ;;  %v17589_v19 = vld [vmem:[#allocation5 + $0x10a4] ss:$36 sps:$4 sm:$0xff]   ;;  %v17584_v20 = vld [vmem:[#allocation5 + $0x1098] ss:$36 sps:$4 sm:$0xff]  }
 0x103   :  { %11403 = vmatprep.subr.bf16.mxu0 %v17507_v21  ;;  %11936 = vmatprep.subr.bf16.mxu1 %v17510_v52  ;;  %v17587_v21 = vld [vmem:[#allocation5 + $0x10a0] ss:$36 sps:$4 sm:$0xff]  }
 0x104   :  { %v17592_v52 = vld [vmem:[#allocation5 + $0x10e4] ss:$36 sps:$4 sm:$0xff]  }
 0x106   :  { %11404 = vmatpush1.bf16.msra.mxu0 %v17505_v22  ;;  %11937 = vmatpush1.bf16.msra.mxu1 %v17508_v24  ;;  %v17595_v22 = vld [vmem:[#allocation5 + $0x10ec] ss:$36 sps:$4 sm:$0xff]   ;;  %v17590_v24 = vld [vmem:[#allocation5 + $0x10e0] ss:$36 sps:$4 sm:$0xff]  }
 0x107   :  { %11405 = vmatprep.subr.bf16.mxu0 %v17513_v25  ;;  %11938 = vmatprep.subr.bf16.mxu1 %v17516_v26  ;;  %v17593_v25 = vld [vmem:[#allocation5 + $0x10e8] ss:$36 sps:$4 sm:$0xff]  }
 0x108   :  { %v17598_v26 = vld [vmem:[#allocation5 + $0x112c] ss:$36 sps:$4 sm:$0xff]  }
 0x10a   :  { %11406 = vmatpush1.bf16.msra.mxu0 %v17511_v28  ;;  %11939 = vmatpush1.bf16.msra.mxu1 %v17514_v29  ;;  %v17601_v28 = vld [vmem:[#allocation5 + $0x1134] ss:$36 sps:$4 sm:$0xff]   ;;  %v17596_v29 = vld [vmem:[#allocation5 + $0x1128] ss:$36 sps:$4 sm:$0xff]  }
 0x10b   :  { %11416 = vmatprep.subr.bf16.mxu0 %v17520_v30  ;;  %11949 = vmatprep.subr.bf16.mxu1 %v17523_v31  ;;  %v17599_v30 = vld [vmem:[#allocation5 + $0x1130] ss:$36 sps:$4 sm:$0xff]  }
 0x10c   :  { %v17604_v31 = vld [vmem:[#allocation5 + $0x1174] ss:$36 sps:$4 sm:$0xff]  }
 0x10d   :  { %11408 = vmatmul.mubr.bf16.vlgmr.msra.gmra.mrb[0].mxu0 %v20112_v33  ;;  %11941 = vmatmul.mubr.bf16.vlgmr.msra.gmra.mrb[0].mxu1 %v20112_v33 }
 0x10e   :  { %11417 = vmatpush1.bf16.msra.mxu0 %v17518_v32  ;;  %11950 = vmatpush1.bf16.msra.mxu1 %v17521_v34  ;;  %v17607_v32 = vld [vmem:[#allocation5 + $0x117c] ss:$36 sps:$4 sm:$0xff]   ;;  %v20122_v34 = vld.sshfl [vmem:[#allocation2 + $0x8] sm:$0xff pattern:$0x75316420] }
 0x10f   :  { %11418 = vmatprep.subr.bf16.mxu0 %v17526_v35  ;;  %11951 = vmatprep.subr.bf16.mxu1 %v17529_v36  ;;  %v17602_v35 = vld [vmem:[#allocation5 + $0x1170] ss:$36 sps:$4 sm:$0xff]   ;;  %v17605_v36 = vld [vmem:[#allocation5 + $0x1178] ss:$36 sps:$4 sm:$0xff]  }
 0x110   :  { %11448 = vmatprep.mubr.bf16.mxu0 %v20116_v37  ;;  %11981 = vmatprep.mubr.bf16.mxu1 %v20116_v37 }
 0x112   :  { %11419 = vmatpush1.bf16.msra.mxu0 %v17524_v38  ;;  %11952 = vmatpush1.bf16.msra.mxu1 %v17527_v16  ;;  %v17610_v38 = vld [vmem:[#allocation5 + $0x11bc] ss:$36 sps:$4 sm:$0xff]   ;;  %v17613_v16 = vld [vmem:[#allocation5 + $0x11c4] ss:$36 sps:$4 sm:$0xff]  }
 0x113   :  { %11420 = vmatprep.subr.bf16.mxu0 %v17532_v39  ;;  %11953 = vmatprep.subr.bf16.mxu1 %v17535_v40  ;;  %v17608_v39 = vld [vmem:[#allocation5 + $0x11b8] ss:$36 sps:$4 sm:$0xff]   ;;  %v17611_v40 = vld [vmem:[#allocation5 + $0x11c0] ss:$36 sps:$4 sm:$0xff]  }
 0x116   :  { %11421 = vmatpush1.bf16.msra.mxu0 %v17530_v41  ;;  %11954 = vmatpush1.bf16.msra.mxu1 %v17533_v43  ;;  %v17616_v41 = vld [vmem:[#allocation5 + $0x1204] ss:$36 sps:$4 sm:$0xff]   ;;  %v17619_v43 = vld [vmem:[#allocation5 + $0x120c] ss:$36 sps:$4 sm:$0xff]  }
 0x117   :  { %11422 = vmatprep.subr.bf16.mxu0 %v17538_v44  ;;  %11955 = vmatprep.subr.bf16.mxu1 %v17541_v45  ;;  %v2152_v44 = vcombine.high %v20122_v34, %v20122_v34  ;;  %v20128_v45 = vcombine.high %v20112_v33, %v20112_v33 }
 0x11a   :  { %11423 = vmatpush1.bf16.msra.mxu0 %v17536_v46  ;;  %11956 = vmatpush1.bf16.msra.mxu1 %v17539_v47  ;;  %v17614_v46 = vld [vmem:[#allocation5 + $0x1200] ss:$36 sps:$4 sm:$0xff]   ;;  %v17617_v47 = vld [vmem:[#allocation5 + $0x1208] ss:$36 sps:$4 sm:$0xff]  }
 0x11b   :  { %11424 = vmatprep.subr.bf16.mxu0 %v17544_v48  ;;  %11957 = vmatprep.subr.bf16.mxu1 %v17547_v50  ;;  %v17622_v48 = vld [vmem:[#allocation5 + $0x124c] ss:$36 sps:$4 sm:$0xff]   ;;  %v17625_v50 = vld [vmem:[#allocation5 + $0x1254] ss:$36 sps:$4 sm:$0xff]  }
 0x11e   :  { %11425 = vmatpush1.bf16.msra.mxu0 %v17542_v51  ;;  %11958 = vmatpush1.bf16.msra.mxu1 %v17545_v53  ;;  %v20131_v51 = vrot.slane %v2152_v44, %v20070_v49  ;;  %v17620_v53 = vld [vmem:[#allocation5 + $0x1248] ss:$36 sps:$4 sm:$0xff]   ;;  %v17697_v44 = vld [vmem:[#allocation5 + $0x15b4] ss:$36 sps:$4 sm:$0xff]  }
 0x11f   :  { %11426 = vmatprep.subr.bf16.mxu0 %v17550_v54  ;;  %11959 = vmatprep.subr.bf16.mxu1 %v17553_v55  ;;  %v17623_v54 = vld [vmem:[#allocation5 + $0x1250] ss:$36 sps:$4 sm:$0xff]  }
 0x120   :  { %v17628_v55 = vld [vmem:[#allocation5 + $0x1294] ss:$36 sps:$4 sm:$0xff]  }
 0x122   :  { %11427 = vmatpush1.bf16.msra.mxu0 %v17548_v56  ;;  %11960 = vmatpush1.bf16.msra.mxu1 %v17551_v57  ;;  %v17631_v56 = vld [vmem:[#allocation5 + $0x129c] ss:$36 sps:$4 sm:$0xff]   ;;  %v17626_v57 = vld [vmem:[#allocation5 + $0x1290] ss:$36 sps:$4 sm:$0xff]  }
 0x123   :  { %11428 = vmatprep.subr.bf16.mxu0 %v17556_v58  ;;  %11961 = vmatprep.subr.bf16.mxu1 %v17559_v59  ;;  %v17629_v58 = vld [vmem:[#allocation5 + $0x1298] ss:$36 sps:$4 sm:$0xff]  }
 0x124   :  { %v17634_v59 = vld [vmem:[#allocation5 + $0x12dc] ss:$36 sps:$4 sm:$0xff]  }
 0x126   :  { %11429 = vmatpush1.bf16.msra.mxu0 %v17554_v61  ;;  %11962 = vmatpush1.bf16.msra.mxu1 %v17557_v62  ;;  %v17637_v61 = vld [vmem:[#allocation5 + $0x12e4] ss:$36 sps:$4 sm:$0xff]   ;;  %v17632_v62 = vld [vmem:[#allocation5 + $0x12d8] ss:$36 sps:$4 sm:$0xff]  }
 0x127   :  { %11430 = vmatprep.subr.bf16.mxu0 %v17562_v63  ;;  %11963 = vmatprep.subr.bf16.mxu1 %v17565_v0  ;;  %v17635_v63 = vld [vmem:[#allocation5 + $0x12e0] ss:$36 sps:$4 sm:$0xff]  }
 0x128   :  { %v17640_v0 = vld [vmem:[#allocation5 + $0x1324] ss:$36 sps:$4 sm:$0xff]  }
 0x12a   :  { %11431 = vmatpush1.bf16.msra.mxu0 %v17560_v1  ;;  %11964 = vmatpush1.bf16.msra.mxu1 %v17563_v2  ;;  %v17643_v1 = vld [vmem:[#allocation5 + $0x132c] ss:$36 sps:$4 sm:$0xff]   ;;  %v17638_v2 = vld [vmem:[#allocation5 + $0x1320] ss:$36 sps:$4 sm:$0xff]  }
 0x12b   :  { %11432 = vmatprep.subr.bf16.mxu0 %v17568_v3  ;;  %11965 = vmatprep.subr.bf16.mxu1 %v17571_v4  ;;  %v17641_v3 = vld [vmem:[#allocation5 + $0x1328] ss:$36 sps:$4 sm:$0xff]  }
 0x12c   :  { %v17646_v4 = vld [vmem:[#allocation5 + $0x136c] ss:$36 sps:$4 sm:$0xff]  }
 0x12e   :  { %11433 = vmatpush1.bf16.msra.mxu0 %v17566_v5  ;;  %11966 = vmatpush1.bf16.msra.mxu1 %v17569_v6  ;;  %v17649_v5 = vld [vmem:[#allocation5 + $0x1374] ss:$36 sps:$4 sm:$0xff]   ;;  %v17644_v6 = vld [vmem:[#allocation5 + $0x1368] ss:$36 sps:$4 sm:$0xff]  }
 0x12f   :  { %11434 = vmatprep.subr.bf16.mxu0 %v17574_v7  ;;  %11967 = vmatprep.subr.bf16.mxu1 %v17577_v8  ;;  %v17647_v7 = vld [vmem:[#allocation5 + $0x1370] ss:$36 sps:$4 sm:$0xff]  }
 0x130   :  { %v17652_v8 = vld [vmem:[#allocation5 + $0x13b4] ss:$36 sps:$4 sm:$0xff]  }
 0x132   :  { %11435 = vmatpush1.bf16.msra.mxu0 %v17572_v9  ;;  %11968 = vmatpush1.bf16.msra.mxu1 %v17575_v10  ;;  %v17655_v9 = vld [vmem:[#allocation5 + $0x13bc] ss:$36 sps:$4 sm:$0xff]   ;;  %v17650_v10 = vld [vmem:[#allocation5 + $0x13b0] ss:$36 sps:$4 sm:$0xff]  }
 0x133   :  { %11436 = vmatprep.subr.bf16.mxu0 %v17580_v11  ;;  %11969 = vmatprep.subr.bf16.mxu1 %v17583_v12  ;;  %v17653_v11 = vld [vmem:[#allocation5 + $0x13b8] ss:$36 sps:$4 sm:$0xff]  }
 0x134   :  { %v17658_v12 = vld [vmem:[#allocation5 + $0x13fc] ss:$36 sps:$4 sm:$0xff]  }
 0x136   :  { %11437 = vmatpush1.bf16.msra.mxu0 %v17578_v14  ;;  %11970 = vmatpush1.bf16.msra.mxu1 %v17581_v15  ;;  %v17661_v14 = vld [vmem:[#allocation5 + $0x1404] ss:$36 sps:$4 sm:$0xff]   ;;  %v17656_v15 = vld [vmem:[#allocation5 + $0x13f8] ss:$36 sps:$4 sm:$0xff]  }
 0x137   :  { %11438 = vmatprep.subr.bf16.mxu0 %v17586_v18  ;;  %11971 = vmatprep.subr.bf16.mxu1 %v17589_v19  ;;  %v17659_v18 = vld [vmem:[#allocation5 + $0x1400] ss:$36 sps:$4 sm:$0xff]  }
 0x138   :  { %v17664_v19 = vld [vmem:[#allocation5 + $0x1444] ss:$36 sps:$4 sm:$0xff]  }
 0x13a   :  { %11439 = vmatpush1.bf16.msra.mxu0 %v17584_v20  ;;  %11972 = vmatpush1.bf16.msra.mxu1 %v17587_v21  ;;  %v17667_v20 = vld [vmem:[#allocation5 + $0x144c] ss:$36 sps:$4 sm:$0xff]   ;;  %v17662_v21 = vld [vmem:[#allocation5 + $0x1440] ss:$36 sps:$4 sm:$0xff]  }
 0x13b   :  { %11440 = vmatprep.subr.bf16.mxu0 %v17592_v52  ;;  %11973 = vmatprep.subr.bf16.mxu1 %v17595_v22  ;;  %v17665_v52 = vld [vmem:[#allocation5 + $0x1448] ss:$36 sps:$4 sm:$0xff]  }
 0x13c   :  { %v17670_v22 = vld [vmem:[#allocation5 + $0x148c] ss:$36 sps:$4 sm:$0xff]  }
 0x13e   :  { %11441 = vmatpush1.bf16.msra.mxu0 %v17590_v24  ;;  %11974 = vmatpush1.bf16.msra.mxu1 %v17593_v25  ;;  %v17673_v24 = vld [vmem:[#allocation5 + $0x1494] ss:$36 sps:$4 sm:$0xff]   ;;  %v17668_v25 = vld [vmem:[#allocation5 + $0x1488] ss:$36 sps:$4 sm:$0xff]  }
 0x13f   :  { %11442 = vmatprep.subr.bf16.mxu0 %v17598_v26  ;;  %11975 = vmatprep.subr.bf16.mxu1 %v17601_v28  ;;  %v17671_v26 = vld [vmem:[#allocation5 + $0x1490] ss:$36 sps:$4 sm:$0xff]  }
 0x140   :  { %v17676_v28 = vld [vmem:[#allocation5 + $0x14d4] ss:$36 sps:$4 sm:$0xff]  }
 0x142   :  { %11443 = vmatpush1.bf16.msra.mxu0 %v17596_v29  ;;  %11976 = vmatpush1.bf16.msra.mxu1 %v17599_v30  ;;  %v17679_v29 = vld [vmem:[#allocation5 + $0x14dc] ss:$36 sps:$4 sm:$0xff]   ;;  %v17674_v30 = vld [vmem:[#allocation5 + $0x14d0] ss:$36 sps:$4 sm:$0xff]  }
 0x143   :  { %11444 = vmatprep.subr.bf16.mxu0 %v17604_v31  ;;  %11977 = vmatprep.subr.bf16.mxu1 %v17607_v32  ;;  %v17677_v31 = vld [vmem:[#allocation5 + $0x14d8] ss:$36 sps:$4 sm:$0xff]  }
 0x144   :  { %v17682_v32 = vld [vmem:[#allocation5 + $0x151c] ss:$36 sps:$4 sm:$0xff]  }
 0x146   :  { %11445 = vmatpush1.bf16.msra.mxu0 %v17602_v35  ;;  %11978 = vmatpush1.bf16.msra.mxu1 %v17605_v36  ;;  %v17685_v35 = vld [vmem:[#allocation5 + $0x1524] ss:$36 sps:$4 sm:$0xff]   ;;  %v17680_v36 = vld [vmem:[#allocation5 + $0x1518] ss:$36 sps:$4 sm:$0xff]  }
 0x147   :  { %11446 = vmatprep.subr.bf16.mxu0 %v17610_v38  ;;  %11979 = vmatprep.subr.bf16.mxu1 %v17613_v16  ;;  %v17683_v38 = vld [vmem:[#allocation5 + $0x1520] ss:$36 sps:$4 sm:$0xff]  }
 0x148   :  { %v17688_v16 = vld [vmem:[#allocation5 + $0x1564] ss:$36 sps:$4 sm:$0xff]  }
 0x14a   :  { %11447 = vmatpush1.bf16.msra.mxu0 %v17608_v39  ;;  %11980 = vmatpush1.bf16.msra.mxu1 %v17611_v40  ;;  %v17691_v39 = vld [vmem:[#allocation5 + $0x156c] ss:$36 sps:$4 sm:$0xff]   ;;  %v17686_v40 = vld [vmem:[#allocation5 + $0x1560] ss:$36 sps:$4 sm:$0xff]  }
 0x14b   :  { %11457 = vmatprep.subr.bf16.mxu0 %v17616_v41  ;;  %11990 = vmatprep.subr.bf16.mxu1 %v17619_v43  ;;  %v17689_v41 = vld [vmem:[#allocation5 + $0x1568] ss:$36 sps:$4 sm:$0xff]  }
 0x14c   :  { %v17694_v43 = vld [vmem:[#allocation5 + $0x15ac] ss:$36 sps:$4 sm:$0xff]  }
 0x14d   :  { %11449 = vmatmul.mubr.bf16.vlgmr.msra.gmra.mrb[0].mxu0 %v20128_v45  ;;  %11982 = vmatmul.mubr.bf16.vlgmr.msra.gmra.mrb[0].mxu1 %v20128_v45 }
 0x14e   :  { %11458 = vmatpush1.bf16.msra.mxu0 %v17614_v46  ;;  %11991 = vmatpush1.bf16.msra.mxu1 %v17617_v47  ;;  %v17692_v46 = vld [vmem:[#allocation5 + $0x15a8] ss:$36 sps:$4 sm:$0xff]   ;;  %v17695_v47 = vld [vmem:[#allocation5 + $0x15b0] ss:$36 sps:$4 sm:$0xff]  }
 0x14f   :  { %11459 = vmatprep.subr.bf16.mxu0 %v17622_v48  ;;  %11992 = vmatprep.subr.bf16.mxu1 %v17625_v50  ;;  %v17700_v48 = vld [vmem:[#allocation5 + $0x15f4] ss:$36 sps:$4 sm:$0xff]   ;;  %v17703_v50 = vld [vmem:[#allocation5 + $0x15fc] ss:$36 sps:$4 sm:$0xff]  }
 0x150   :  { %11489 = vmatprep.mubr.bf16.mxu0 %v20131_v51  ;;  %12022 = vmatprep.mubr.bf16.mxu1 %v20131_v51 }
 0x152   :  { %11460 = vmatpush1.bf16.msra.mxu0 %v17620_v53  ;;  %11993 = vmatpush1.bf16.msra.mxu1 %v17623_v54  ;;  %v17698_v53 = vld [vmem:[#allocation5 + $0x15f0] ss:$36 sps:$4 sm:$0xff]   ;;  %v17701_v54 = vld [vmem:[#allocation5 + $0x15f8] ss:$36 sps:$4 sm:$0xff]  }
 0x153   :  { %11461 = vmatprep.subr.bf16.mxu0 %v17628_v55  ;;  %11994 = vmatprep.subr.bf16.mxu1 %v17631_v56  ;;  %v17706_v55 = vld [vmem:[#allocation5 + $0x163c] ss:$36 sps:$4 sm:$0xff]   ;;  %v17709_v56 = vld [vmem:[#allocation5 + $0x1644] ss:$36 sps:$4 sm:$0xff]  }
 0x156   :  { %11462 = vmatpush1.bf16.msra.mxu0 %v17626_v57  ;;  %11995 = vmatpush1.bf16.msra.mxu1 %v17629_v58  ;;  %v17704_v57 = vld [vmem:[#allocation5 + $0x1638] ss:$36 sps:$4 sm:$0xff]   ;;  %v17707_v58 = vld [vmem:[#allocation5 + $0x1640] ss:$36 sps:$4 sm:$0xff]  }
 0x157   :  { %11463 = vmatprep.subr.bf16.mxu0 %v17634_v59  ;;  %11996 = vmatprep.subr.bf16.mxu1 %v17637_v61  ;;  %v17712_v59 = vld [vmem:[#allocation5 + $0x1684] ss:$36 sps:$4 sm:$0xff]   ;;  %v17715_v61 = vld [vmem:[#allocation5 + $0x168c] ss:$36 sps:$4 sm:$0xff]  }
 0x15a   :  { %11464 = vmatpush1.bf16.msra.mxu0 %v17632_v62  ;;  %11997 = vmatpush1.bf16.msra.mxu1 %v17635_v63  ;;  %v20139_v62 = vrot.slane %v20122_v34, %v20070_v49  ;;  %v17710_v63 = vld [vmem:[#allocation5 + $0x1680] ss:$36 sps:$4 sm:$0xff]   ;;  %v17716_v34 = vld [vmem:[#allocation5 + $0x16c8] ss:$36 sps:$4 sm:$0xff]  }
 0x15b   :  { %11465 = vmatprep.subr.bf16.mxu0 %v17640_v0  ;;  %11998 = vmatprep.subr.bf16.mxu1 %v17643_v1  ;;  %v17713_v0 = vld [vmem:[#allocation5 + $0x1688] ss:$36 sps:$4 sm:$0xff]  }
 0x15c   :  { %v17718_v1 = vld [vmem:[#allocation5 + $0x16cc] ss:$36 sps:$4 sm:$0xff]  }
 0x15e   :  { %11466 = vmatpush1.bf16.msra.mxu0 %v17638_v2  ;;  %11999 = vmatpush1.bf16.msra.mxu1 %v17641_v3  ;;  %v17721_v2 = vld [vmem:[#allocation5 + $0x16d4] ss:$36 sps:$4 sm:$0xff]   ;;  %v20143_v3 = vcombine.high %v20131_v51, %v20131_v51 }
 0x15f   :  { %11467 = vmatprep.subr.bf16.mxu0 %v17646_v4  ;;  %12000 = vmatprep.subr.bf16.mxu1 %v17649_v5  ;;  %v17719_v4 = vld [vmem:[#allocation5 + $0x16d0] ss:$36 sps:$4 sm:$0xff]  }
 0x160   :  { %v17724_v5 = vld [vmem:[#allocation5 + $0x1714] ss:$36 sps:$4 sm:$0xff]  }
 0x162   :  { %11468 = vmatpush1.bf16.msra.mxu0 %v17644_v6  ;;  %12001 = vmatpush1.bf16.msra.mxu1 %v17647_v7  ;;  %v17727_v6 = vld [vmem:[#allocation5 + $0x171c] ss:$36 sps:$4 sm:$0xff]   ;;  %v17722_v7 = vld [vmem:[#allocation5 + $0x1710] ss:$36 sps:$4 sm:$0xff]  }
 0x163   :  { %11469 = vmatprep.subr.bf16.mxu0 %v17652_v8  ;;  %12002 = vmatprep.subr.bf16.mxu1 %v17655_v9  ;;  %v17725_v8 = vld [vmem:[#allocation5 + $0x1718] ss:$36 sps:$4 sm:$0xff]  }
 0x164   :  { %v17730_v9 = vld [vmem:[#allocation5 + $0x175c] ss:$36 sps:$4 sm:$0xff]  }
 0x166   :  { %11470 = vmatpush1.bf16.msra.mxu0 %v17650_v10  ;;  %12003 = vmatpush1.bf16.msra.mxu1 %v17653_v11  ;;  %v17733_v10 = vld [vmem:[#allocation5 + $0x1764] ss:$36 sps:$4 sm:$0xff]   ;;  %v17728_v11 = vld [vmem:[#allocation5 + $0x1758] ss:$36 sps:$4 sm:$0xff]  }
 0x167   :  { %11471 = vmatprep.subr.bf16.mxu0 %v17658_v12  ;;  %12004 = vmatprep.subr.bf16.mxu1 %v17661_v14  ;;  %v17731_v12 = vld [vmem:[#allocation5 + $0x1760] ss:$36 sps:$4 sm:$0xff]  }
 0x168   :  { %v17736_v14 = vld [vmem:[#allocation5 + $0x17a4] ss:$36 sps:$4 sm:$0xff]  }
 0x16a   :  { %11472 = vmatpush1.bf16.msra.mxu0 %v17656_v15  ;;  %12005 = vmatpush1.bf16.msra.mxu1 %v17659_v18  ;;  %v17739_v15 = vld [vmem:[#allocation5 + $0x17ac] ss:$36 sps:$4 sm:$0xff]   ;;  %v17734_v18 = vld [vmem:[#allocation5 + $0x17a0] ss:$36 sps:$4 sm:$0xff]  }
 0x16b   :  { %11473 = vmatprep.subr.bf16.mxu0 %v17664_v19  ;;  %12006 = vmatprep.subr.bf16.mxu1 %v17667_v20  ;;  %v17737_v19 = vld [vmem:[#allocation5 + $0x17a8] ss:$36 sps:$4 sm:$0xff]  }
 0x16c   :  { %v17742_v20 = vld [vmem:[#allocation5 + $0x17ec] ss:$36 sps:$4 sm:$0xff]  }
 0x16e   :  { %11474 = vmatpush1.bf16.msra.mxu0 %v17662_v21  ;;  %12007 = vmatpush1.bf16.msra.mxu1 %v17665_v52  ;;  %v17745_v21 = vld [vmem:[#allocation5 + $0x17f4] ss:$36 sps:$4 sm:$0xff]   ;;  %v17740_v52 = vld [vmem:[#allocation5 + $0x17e8] ss:$36 sps:$4 sm:$0xff]  }
 0x16f   :  { %11475 = vmatprep.subr.bf16.mxu0 %v17670_v22  ;;  %12008 = vmatprep.subr.bf16.mxu1 %v17673_v24  ;;  %v17743_v22 = vld [vmem:[#allocation5 + $0x17f0] ss:$36 sps:$4 sm:$0xff]  }
 0x170   :  { %v17748_v24 = vld [vmem:[#allocation5 + $0x1834] ss:$36 sps:$4 sm:$0xff]  }
 0x172   :  { %11476 = vmatpush1.bf16.msra.mxu0 %v17668_v25  ;;  %12009 = vmatpush1.bf16.msra.mxu1 %v17671_v26  ;;  %v17751_v25 = vld [vmem:[#allocation5 + $0x183c] ss:$36 sps:$4 sm:$0xff]   ;;  %v17746_v26 = vld [vmem:[#allocation5 + $0x1830] ss:$36 sps:$4 sm:$0xff]  }
 0x173   :  { %11477 = vmatprep.subr.bf16.mxu0 %v17676_v28  ;;  %12010 = vmatprep.subr.bf16.mxu1 %v17679_v29  ;;  %v17749_v28 = vld [vmem:[#allocation5 + $0x1838] ss:$36 sps:$4 sm:$0xff]  }
 0x174   :  { %v17754_v29 = vld [vmem:[#allocation5 + $0x187c] ss:$36 sps:$4 sm:$0xff]  }
 0x176   :  { %11478 = vmatpush1.bf16.msra.mxu0 %v17674_v30  ;;  %12011 = vmatpush1.bf16.msra.mxu1 %v17677_v31  ;;  %v17757_v30 = vld [vmem:[#allocation5 + $0x1884] ss:$36 sps:$4 sm:$0xff]   ;;  %v17752_v31 = vld [vmem:[#allocation5 + $0x1878] ss:$36 sps:$4 sm:$0xff]  }
 0x177   :  { %11479 = vmatprep.subr.bf16.mxu0 %v17682_v32  ;;  %12012 = vmatprep.subr.bf16.mxu1 %v17685_v35  ;;  %v17755_v32 = vld [vmem:[#allocation5 + $0x1880] ss:$36 sps:$4 sm:$0xff]  }
 0x178   :  { %v17760_v35 = vld [vmem:[#allocation5 + $0x18c4] ss:$36 sps:$4 sm:$0xff]  }
 0x17a   :  { %11480 = vmatpush1.bf16.msra.mxu0 %v17680_v36  ;;  %12013 = vmatpush1.bf16.msra.mxu1 %v17683_v38  ;;  %v17763_v36 = vld [vmem:[#allocation5 + $0x18cc] ss:$36 sps:$4 sm:$0xff]   ;;  %v17758_v38 = vld [vmem:[#allocation5 + $0x18c0] ss:$36 sps:$4 sm:$0xff]  }
 0x17b   :  { %11481 = vmatprep.subr.bf16.mxu0 %v17688_v16  ;;  %12014 = vmatprep.subr.bf16.mxu1 %v17691_v39  ;;  %v17761_v16 = vld [vmem:[#allocation5 + $0x18c8] ss:$36 sps:$4 sm:$0xff]  }
 0x17c   :  { %v17766_v39 = vld [vmem:[#allocation5 + $0x190c] ss:$36 sps:$4 sm:$0xff]  }
 0x17e   :  { %11482 = vmatpush1.bf16.msra.mxu0 %v17686_v40  ;;  %12015 = vmatpush1.bf16.msra.mxu1 %v17689_v41  ;;  %v17769_v40 = vld [vmem:[#allocation5 + $0x1914] ss:$36 sps:$4 sm:$0xff]   ;;  %v17764_v41 = vld [vmem:[#allocation5 + $0x1908] ss:$36 sps:$4 sm:$0xff]  }
 0x17f   :  { %11483 = vmatprep.subr.bf16.mxu0 %v17694_v43  ;;  %12016 = vmatprep.subr.bf16.mxu1 %v17697_v44  ;;  %v17767_v43 = vld [vmem:[#allocation5 + $0x1910] ss:$36 sps:$4 sm:$0xff]  }
 0x180   :  { %v17772_v44 = vld [vmem:[#allocation5 + $0x1954] ss:$36 sps:$4 sm:$0xff]  }
 0x182   :  { %11484 = vmatpush1.bf16.msra.mxu0 %v17692_v46  ;;  %12017 = vmatpush1.bf16.msra.mxu1 %v17695_v47  ;;  %v17775_v46 = vld [vmem:[#allocation5 + $0x195c] ss:$36 sps:$4 sm:$0xff]   ;;  %v17770_v47 = vld [vmem:[#allocation5 + $0x1950] ss:$36 sps:$4 sm:$0xff]  }
 0x183   :  { %11485 = vmatprep.subr.bf16.mxu0 %v17700_v48  ;;  %12018 = vmatprep.subr.bf16.mxu1 %v17703_v50  ;;  %v17773_v48 = vld [vmem:[#allocation5 + $0x1958] ss:$36 sps:$4 sm:$0xff]  }
 0x184   :  { %v17778_v50 = vld [vmem:[#allocation5 + $0x199c] ss:$36 sps:$4 sm:$0xff]  }
 0x186   :  { %11486 = vmatpush1.bf16.msra.mxu0 %v17698_v53  ;;  %12019 = vmatpush1.bf16.msra.mxu1 %v17701_v54  ;;  %v17781_v53 = vld [vmem:[#allocation5 + $0x19a4] ss:$36 sps:$4 sm:$0xff]   ;;  %v17776_v54 = vld [vmem:[#allocation5 + $0x1998] ss:$36 sps:$4 sm:$0xff]  }
 0x187   :  { %11487 = vmatprep.subr.bf16.mxu0 %v17706_v55  ;;  %12020 = vmatprep.subr.bf16.mxu1 %v17709_v56  ;;  %v17779_v55 = vld [vmem:[#allocation5 + $0x19a0] ss:$36 sps:$4 sm:$0xff]  }
 0x188   :  { %v17784_v56 = vld [vmem:[#allocation5 + $0x19e4] ss:$36 sps:$4 sm:$0xff]  }
 0x18a   :  { %11488 = vmatpush1.bf16.msra.mxu0 %v17704_v57  ;;  %12021 = vmatpush1.bf16.msra.mxu1 %v17707_v58  ;;  %v17787_v57 = vld [vmem:[#allocation5 + $0x19ec] ss:$36 sps:$4 sm:$0xff]   ;;  %v17782_v58 = vld [vmem:[#allocation5 + $0x19e0] ss:$36 sps:$4 sm:$0xff]  }
 0x18b   :  { %11498 = vmatprep.subr.bf16.mxu0 %v17712_v59  ;;  %12031 = vmatprep.subr.bf16.mxu1 %v17715_v61  ;;  %v17785_v59 = vld [vmem:[#allocation5 + $0x19e8] ss:$36 sps:$4 sm:$0xff]  }
 0x18c   :  { %v17790_v61 = vld [vmem:[#allocation5 + $0x1a2c] ss:$36 sps:$4 sm:$0xff]  }
 0x18d   :  { %11490 = vmatmul.mubr.bf16.vlgmr.msra.gmra.mrb[0].mxu0 %v20139_v62  ;;  %12023 = vmatmul.mubr.bf16.vlgmr.msra.gmra.mrb[0].mxu1 %v20139_v62 }
 0x18e   :  { %11499 = vmatpush1.bf16.msra.mxu0 %v17710_v63  ;;  %12032 = vmatpush1.bf16.msra.mxu1 %v17713_v0  ;;  %v17793_v63 = vld [vmem:[#allocation5 + $0x1a34] ss:$36 sps:$4 sm:$0xff]   ;;  %v17788_v0 = vld [vmem:[#allocation5 + $0x1a28] ss:$36 sps:$4 sm:$0xff]  }
 0x18f   :  { %11500 = vmatprep.subr.bf16.mxu0 %v17718_v1  ;;  %12033 = vmatprep.subr.bf16.mxu1 %v17721_v2  ;;  %v17791_v1 = vld [vmem:[#allocation5 + $0x1a30] ss:$36 sps:$4 sm:$0xff]  }
 0x190   :  { %11530 = vmatprep.mubr.bf16.mxu0 %v20143_v3  ;;  %12063 = vmatprep.mubr.bf16.mxu1 %v20143_v3  ;;  %v17796_v2 = vld [vmem:[#allocation5 + $0x1a74] ss:$36 sps:$4 sm:$0xff]  }
 0x192   :  { %11501 = vmatpush1.bf16.msra.mxu0 %v17716_v34  ;;  %12034 = vmatpush1.bf16.msra.mxu1 %v17719_v4  ;;  %v17799_v34 = vld [vmem:[#allocation5 + $0x1a7c] ss:$36 sps:$4 sm:$0xff]   ;;  %v19856_v4 = vld [vmem:[#allocation2 + $0x8] sm:$0xff] }
 0x193   :  { %11502 = vmatprep.subr.bf16.mxu0 %v17724_v5  ;;  %12035 = vmatprep.subr.bf16.mxu1 %v17727_v6  ;;  %v2137_v5 = vcombine.high %v19856_v4, %v19856_v4  ;;  %v17794_v6 = vld [vmem:[#allocation5 + $0x1a70] ss:$36 sps:$4 sm:$0xff]  }
 0x194   :  { %v17863_v4 = vld [vmem:[#allocation5 + $0x1d90] ss:$36 sps:$4 sm:$0xff]  }
 0x196   :  { %11503 = vmatpush1.bf16.msra.mxu0 %v17722_v7  ;;  %12036 = vmatpush1.bf16.msra.mxu1 %v17725_v8  ;;  %v17797_v7 = vld [vmem:[#allocation5 + $0x1a78] ss:$36 sps:$4 sm:$0xff]  }
 0x197   :  { %11504 = vmatprep.subr.bf16.mxu0 %v17730_v9  ;;  %12037 = vmatprep.subr.bf16.mxu1 %v17733_v10  ;;  %v17802_v8 = vld [vmem:[#allocation5 + $0x1abc] ss:$36 sps:$4 sm:$0xff]   ;;  %v17805_v9 = vld [vmem:[#allocation5 + $0x1ac4] ss:$36 sps:$4 sm:$0xff]   ;;  %v20150_v10 = vrot.slane %v2137_v5, %v20070_v49  ;;  %v17868_v5 = vld [vmem:[#allocation5 + $0x1dd4] ss:$36 sps:$4 sm:$0xff]  }
 0x19a   :  { %11505 = vmatpush1.bf16.msra.mxu0 %v17728_v11  ;;  %12038 = vmatpush1.bf16.msra.mxu1 %v17731_v12  ;;  %v17800_v11 = vld [vmem:[#allocation5 + $0x1ab8] ss:$36 sps:$4 sm:$0xff]   ;;  %v17803_v12 = vld [vmem:[#allocation5 + $0x1ac0] ss:$36 sps:$4 sm:$0xff]  }
 0x19b   :  { %11506 = vmatprep.subr.bf16.mxu0 %v17736_v14  ;;  %12039 = vmatprep.subr.bf16.mxu1 %v17739_v15  ;;  %v17808_v14 = vld [vmem:[#allocation5 + $0x1b04] ss:$36 sps:$4 sm:$0xff]   ;;  %v17811_v15 = vld [vmem:[#allocation5 + $0x1b0c] ss:$36 sps:$4 sm:$0xff]  }
 0x19e   :  { %11507 = vmatpush1.bf16.msra.mxu0 %v17734_v18  ;;  %12040 = vmatpush1.bf16.msra.mxu1 %v17737_v19  ;;  %v2153_v18 = vcombine.high %v20150_v10, %v20150_v10  ;;  %v20156_v19 = vcombine.high %v20139_v62, %v20139_v62 }
 0x19f   :  { %11508 = vmatprep.subr.bf16.mxu0 %v17742_v20  ;;  %12041 = vmatprep.subr.bf16.mxu1 %v17745_v21  ;;  %v17806_v20 = vld [vmem:[#allocation5 + $0x1b00] ss:$36 sps:$4 sm:$0xff]   ;;  %v17809_v21 = vld [vmem:[#allocation5 + $0x1b08] ss:$36 sps:$4 sm:$0xff]  }
 0x1a2   :  { %11509 = vmatpush1.bf16.msra.mxu0 %v17740_v52  ;;  %12042 = vmatpush1.bf16.msra.mxu1 %v17743_v22  ;;  %v17814_v52 = vld [vmem:[#allocation5 + $0x1b4c] ss:$36 sps:$4 sm:$0xff]   ;;  %v17817_v22 = vld [vmem:[#allocation5 + $0x1b54] ss:$36 sps:$4 sm:$0xff]  }
 0x1a3   :  { %11510 = vmatprep.subr.bf16.mxu0 %v17748_v24  ;;  %12043 = vmatprep.subr.bf16.mxu1 %v17751_v25  ;;  %v20159_v24 = vrot.slane %v2153_v18, %v20070_v49  ;;  %v17812_v25 = vld [vmem:[#allocation5 + $0x1b48] ss:$36 sps:$4 sm:$0xff]  }
 0x1a4   :  { %v17883_v18 = vld [vmem:[#allocation5 + $0x1e6c] ss:$36 sps:$4 sm:$0xff]  }
 0x1a6   :  { %11511 = vmatpush1.bf16.msra.mxu0 %v17746_v26  ;;  %12044 = vmatpush1.bf16.msra.mxu1 %v17749_v28  ;;  %v17815_v26 = vld [vmem:[#allocation5 + $0x1b50] ss:$36 sps:$4 sm:$0xff]  }
 0x1a7   :  { %11512 = vmatprep.subr.bf16.mxu0 %v17754_v29  ;;  %12045 = vmatprep.subr.bf16.mxu1 %v17757_v30  ;;  %v17820_v28 = vld [vmem:[#allocation5 + $0x1b94] ss:$36 sps:$4 sm:$0xff]   ;;  %v17823_v29 = vld [vmem:[#allocation5 + $0x1b9c] ss:$36 sps:$4 sm:$0xff]  }
 0x1a8   :  { %v17818_v30 = vld [vmem:[#allocation5 + $0x1b90] ss:$36 sps:$4 sm:$0xff]  }
 0x1aa   :  { %11513 = vmatpush1.bf16.msra.mxu0 %v17752_v31  ;;  %12046 = vmatpush1.bf16.msra.mxu1 %v17755_v32  ;;  %v17821_v31 = vld [vmem:[#allocation5 + $0x1b98] ss:$36 sps:$4 sm:$0xff]  }
 0x1ab   :  { %11514 = vmatprep.subr.bf16.mxu0 %v17760_v35  ;;  %12047 = vmatprep.subr.bf16.mxu1 %v17763_v36  ;;  %v17826_v32 = vld [vmem:[#allocation5 + $0x1bdc] ss:$36 sps:$4 sm:$0xff]   ;;  %v17829_v35 = vld [vmem:[#allocation5 + $0x1be4] ss:$36 sps:$4 sm:$0xff]  }
 0x1ac   :  { %v17824_v36 = vld [vmem:[#allocation5 + $0x1bd8] ss:$36 sps:$4 sm:$0xff]  }
 0x1ae   :  { %11515 = vmatpush1.bf16.msra.mxu0 %v17758_v38  ;;  %12048 = vmatpush1.bf16.msra.mxu1 %v17761_v16  ;;  %v17827_v38 = vld [vmem:[#allocation5 + $0x1be0] ss:$36 sps:$4 sm:$0xff]  }
 0x1af   :  { %11516 = vmatprep.subr.bf16.mxu0 %v17766_v39  ;;  %12049 = vmatprep.subr.bf16.mxu1 %v17769_v40  ;;  %v17832_v16 = vld [vmem:[#allocation5 + $0x1c24] ss:$36 sps:$4 sm:$0xff]   ;;  %v17835_v39 = vld [vmem:[#allocation5 + $0x1c2c] ss:$36 sps:$4 sm:$0xff]  }
 0x1b0   :  { %v17830_v40 = vld [vmem:[#allocation5 + $0x1c20] ss:$36 sps:$4 sm:$0xff]  }
 0x1b2   :  { %11517 = vmatpush1.bf16.msra.mxu0 %v17764_v41  ;;  %12050 = vmatpush1.bf16.msra.mxu1 %v17767_v43  ;;  %v17833_v41 = vld [vmem:[#allocation5 + $0x1c28] ss:$36 sps:$4 sm:$0xff]  }
 0x1b3   :  { %11518 = vmatprep.subr.bf16.mxu0 %v17772_v44  ;;  %12051 = vmatprep.subr.bf16.mxu1 %v17775_v46  ;;  %v17838_v43 = vld [vmem:[#allocation5 + $0x1c6c] ss:$36 sps:$4 sm:$0xff]   ;;  %v17841_v44 = vld [vmem:[#allocation5 + $0x1c74] ss:$36 sps:$4 sm:$0xff]  }
 0x1b4   :  { %v17836_v46 = vld [vmem:[#allocation5 + $0x1c68] ss:$36 sps:$4 sm:$0xff]  }
 0x1b6   :  { %11519 = vmatpush1.bf16.msra.mxu0 %v17770_v47  ;;  %12052 = vmatpush1.bf16.msra.mxu1 %v17773_v48  ;;  %v17839_v47 = vld [vmem:[#allocation5 + $0x1c70] ss:$36 sps:$4 sm:$0xff]  }
 0x1b7   :  { %11520 = vmatprep.subr.bf16.mxu0 %v17778_v50  ;;  %12053 = vmatprep.subr.bf16.mxu1 %v17781_v53  ;;  %v17844_v48 = vld [vmem:[#allocation5 + $0x1cb4] ss:$36 sps:$4 sm:$0xff]   ;;  %v17847_v50 = vld [vmem:[#allocation5 + $0x1cbc] ss:$36 sps:$4 sm:$0xff]  }
 0x1b8   :  { %v17842_v53 = vld [vmem:[#allocation5 + $0x1cb0] ss:$36 sps:$4 sm:$0xff]  }
 0x1ba   :  { %11521 = vmatpush1.bf16.msra.mxu0 %v17776_v54  ;;  %12054 = vmatpush1.bf16.msra.mxu1 %v17779_v55  ;;  %v17845_v54 = vld [vmem:[#allocation5 + $0x1cb8] ss:$36 sps:$4 sm:$0xff]  }
 0x1bb   :  { %11522 = vmatprep.subr.bf16.mxu0 %v17784_v56  ;;  %12055 = vmatprep.subr.bf16.mxu1 %v17787_v57  ;;  %v17850_v55 = vld [vmem:[#allocation5 + $0x1cfc] ss:$36 sps:$4 sm:$0xff]   ;;  %v17853_v56 = vld [vmem:[#allocation5 + $0x1d04] ss:$36 sps:$4 sm:$0xff]  }
 0x1bc   :  { %v17848_v57 = vld [vmem:[#allocation5 + $0x1cf8] ss:$36 sps:$4 sm:$0xff]  }
 0x1be   :  { %11523 = vmatpush1.bf16.msra.mxu0 %v17782_v58  ;;  %12056 = vmatpush1.bf16.msra.mxu1 %v17785_v59  ;;  %v17851_v58 = vld [vmem:[#allocation5 + $0x1d00] ss:$36 sps:$4 sm:$0xff]  }
 0x1bf   :  { %11524 = vmatprep.subr.bf16.mxu0 %v17790_v61  ;;  %12057 = vmatprep.subr.bf16.mxu1 %v17793_v63  ;;  %v17856_v59 = vld [vmem:[#allocation5 + $0x1d44] ss:$36 sps:$4 sm:$0xff]   ;;  %v17859_v61 = vld [vmem:[#allocation5 + $0x1d4c] ss:$36 sps:$4 sm:$0xff]  }
 0x1c0   :  { %v17854_v63 = vld [vmem:[#allocation5 + $0x1d40] ss:$36 sps:$4 sm:$0xff]  }
 0x1c2   :  { %11525 = vmatpush1.bf16.msra.mxu0 %v17788_v0  ;;  %12058 = vmatpush1.bf16.msra.mxu1 %v17791_v1  ;;  %v17857_v0 = vld [vmem:[#allocation5 + $0x1d48] ss:$36 sps:$4 sm:$0xff]  }
 0x1c3   :  { %11526 = vmatprep.subr.bf16.mxu0 %v17796_v2  ;;  %12059 = vmatprep.subr.bf16.mxu1 %v17799_v34  ;;  %v17862_v1 = vld [vmem:[#allocation5 + $0x1d8c] ss:$36 sps:$4 sm:$0xff]   ;;  %v17865_v2 = vld [vmem:[#allocation5 + $0x1d94] ss:$36 sps:$4 sm:$0xff]  }
 0x1c4   :  { %v17860_v34 = vld [vmem:[#allocation5 + $0x1d88] ss:$36 sps:$4 sm:$0xff]  }
 0x1c6   :  { %11527 = vmatpush1.bf16.msra.mxu0 %v17794_v6  ;;  %12060 = vmatpush1.bf16.msra.mxu1 %v17797_v7  ;;  %v17871_v6 = vld [vmem:[#allocation5 + $0x1ddc] ss:$36 sps:$4 sm:$0xff]   ;;  %v17866_v7 = vld [vmem:[#allocation5 + $0x1dd0] ss:$36 sps:$4 sm:$0xff]  }
 0x1c7   :  { %11528 = vmatprep.subr.bf16.mxu0 %v17802_v8  ;;  %12061 = vmatprep.subr.bf16.mxu1 %v17805_v9  ;;  %v17869_v8 = vld [vmem:[#allocation5 + $0x1dd8] ss:$36 sps:$4 sm:$0xff]  }
 0x1c8   :  { %v17874_v9 = vld [vmem:[#allocation5 + $0x1e1c] ss:$36 sps:$4 sm:$0xff]  }
 0x1ca   :  { %11529 = vmatpush1.bf16.msra.mxu0 %v17800_v11  ;;  %12062 = vmatpush1.bf16.msra.mxu1 %v17803_v12  ;;  %v17877_v11 = vld [vmem:[#allocation5 + $0x1e24] ss:$36 sps:$4 sm:$0xff]   ;;  %v17872_v12 = vld [vmem:[#allocation5 + $0x1e18] ss:$36 sps:$4 sm:$0xff]  }
 0x1cb   :  { %11539 = vmatprep.subr.bf16.mxu0 %v17808_v14  ;;  %12072 = vmatprep.subr.bf16.mxu1 %v17811_v15  ;;  %v17875_v14 = vld [vmem:[#allocation5 + $0x1e20] ss:$36 sps:$4 sm:$0xff]  }
 0x1cc   :  { %v17880_v15 = vld [vmem:[#allocation5 + $0x1e64] ss:$36 sps:$4 sm:$0xff]  }
 0x1cd   :  { %11531 = vmatmul.mubr.bf16.vlgmr.msra.gmra.mrb[0].mxu0 %v20156_v19  ;;  %12064 = vmatmul.mubr.bf16.vlgmr.msra.gmra.mrb[0].mxu1 %v20156_v19 }
 0x1ce   :  { %11540 = vmatpush1.bf16.msra.mxu0 %v17806_v20  ;;  %12073 = vmatpush1.bf16.msra.mxu1 %v17809_v21  ;;  %v17878_v20 = vld [vmem:[#allocation5 + $0x1e60] ss:$36 sps:$4 sm:$0xff]   ;;  %v17881_v21 = vld [vmem:[#allocation5 + $0x1e68] ss:$36 sps:$4 sm:$0xff]  }
 0x1cf   :  { %11541 = vmatprep.subr.bf16.mxu0 %v17814_v52  ;;  %12074 = vmatprep.subr.bf16.mxu1 %v17817_v22  ;;  %v17886_v52 = vld [vmem:[#allocation5 + $0x1eac] ss:$36 sps:$4 sm:$0xff]   ;;  %v17889_v22 = vld [vmem:[#allocation5 + $0x1eb4] ss:$36 sps:$4 sm:$0xff]  }
 0x1d0   :  { %11571 = vmatprep.mubr.bf16.mxu0 %v20159_v24  ;;  %12104 = vmatprep.mubr.bf16.mxu1 %v20159_v24 }
 0x1d2   :  { %11542 = vmatpush1.bf16.msra.mxu0 %v17812_v25  ;;  %12075 = vmatpush1.bf16.msra.mxu1 %v17815_v26  ;;  %v17884_v25 = vld [vmem:[#allocation5 + $0x1ea8] ss:$36 sps:$4 sm:$0xff]   ;;  %v17887_v26 = vld [vmem:[#allocation5 + $0x1eb0] ss:$36 sps:$4 sm:$0xff]  }
 0x1d3   :  { %11543 = vmatprep.subr.bf16.mxu0 %v17820_v28  ;;  %12076 = vmatprep.subr.bf16.mxu1 %v17823_v29  ;;  %v17892_v28 = vld [vmem:[#allocation5 + $0x1ef4] ss:$36 sps:$4 sm:$0xff]   ;;  %v17895_v29 = vld [vmem:[#allocation5 + $0x1efc] ss:$36 sps:$4 sm:$0xff]  }
 0x1d6   :  { %11544 = vmatpush1.bf16.msra.mxu0 %v17818_v30  ;;  %12077 = vmatpush1.bf16.msra.mxu1 %v17821_v31  ;;  %v17890_v30 = vld [vmem:[#allocation5 + $0x1ef0] ss:$36 sps:$4 sm:$0xff]   ;;  %v17893_v31 = vld [vmem:[#allocation5 + $0x1ef8] ss:$36 sps:$4 sm:$0xff]  }
 0x1d7   :  { %11545 = vmatprep.subr.bf16.mxu0 %v17826_v32  ;;  %12078 = vmatprep.subr.bf16.mxu1 %v17829_v35  ;;  %v17898_v32 = vld [vmem:[#allocation5 + $0x1f3c] ss:$36 sps:$4 sm:$0xff]   ;;  %v17901_v35 = vld [vmem:[#allocation5 + $0x1f44] ss:$36 sps:$4 sm:$0xff]  }
 0x1da   :  { %11546 = vmatpush1.bf16.msra.mxu0 %v17824_v36  ;;  %12079 = vmatpush1.bf16.msra.mxu1 %v17827_v38  ;;  %v17896_v36 = vld [vmem:[#allocation5 + $0x1f38] ss:$36 sps:$4 sm:$0xff]   ;;  %v17899_v38 = vld [vmem:[#allocation5 + $0x1f40] ss:$36 sps:$4 sm:$0xff]  }
 0x1db   :  { %11547 = vmatprep.subr.bf16.mxu0 %v17832_v16  ;;  %12080 = vmatprep.subr.bf16.mxu1 %v17835_v39  ;;  %v17905_v16 = vld [vmem:[#allocation5 + $0x1f84] ss:$36 sps:$4 sm:$0xff]   ;;  %v17908_v39 = vld [vmem:[#allocation5 + $0x1f8c] ss:$36 sps:$4 sm:$0xff]  }
 0x1de   :  { %11548 = vmatpush1.bf16.msra.mxu0 %v17830_v40  ;;  %12081 = vmatpush1.bf16.msra.mxu1 %v17833_v41  ;;  %v20167_v40 = vrot.slane %v20150_v10, %v20070_v49  ;;  %v17903_v41 = vld [vmem:[#allocation5 + $0x1f80] ss:$36 sps:$4 sm:$0xff]   ;;  %v17909_v10 = vld [vmem:[#allocation5 + $0x1fc8] ss:$36 sps:$4 sm:$0xff]  }
 0x1df   :  { %11549 = vmatprep.subr.bf16.mxu0 %v17838_v43  ;;  %12082 = vmatprep.subr.bf16.mxu1 %v17841_v44  ;;  %v17906_v43 = vld [vmem:[#allocation5 + $0x1f88] ss:$36 sps:$4 sm:$0xff]  }
 0x1e0   :  { %v17911_v44 = vld [vmem:[#allocation5 + $0x1fcc] ss:$36 sps:$4 sm:$0xff]  }
 0x1e2   :  { %11550 = vmatpush1.bf16.msra.mxu0 %v17836_v46  ;;  %12083 = vmatpush1.bf16.msra.mxu1 %v17839_v47  ;;  %v17914_v46 = vld [vmem:[#allocation5 + $0x1fd4] ss:$36 sps:$4 sm:$0xff]   ;;  %v20171_v47 = vcombine.high %v20159_v24, %v20159_v24 }
 0x1e3   :  { %11551 = vmatprep.subr.bf16.mxu0 %v17844_v48  ;;  %12084 = vmatprep.subr.bf16.mxu1 %v17847_v50  ;;  %v17912_v48 = vld [vmem:[#allocation5 + $0x1fd0] ss:$36 sps:$4 sm:$0xff]  }
 0x1e4   :  { %v17917_v50 = vld [vmem:[#allocation5 + $0x2014] ss:$36 sps:$4 sm:$0xff]  }
 0x1e6   :  { %11552 = vmatpush1.bf16.msra.mxu0 %v17842_v53  ;;  %12085 = vmatpush1.bf16.msra.mxu1 %v17845_v54  ;;  %v17920_v53 = vld [vmem:[#allocation5 + $0x201c] ss:$36 sps:$4 sm:$0xff]   ;;  %v17915_v54 = vld [vmem:[#allocation5 + $0x2010] ss:$36 sps:$4 sm:$0xff]  }
 0x1e7   :  { %11553 = vmatprep.subr.bf16.mxu0 %v17850_v55  ;;  %12086 = vmatprep.subr.bf16.mxu1 %v17853_v56  ;;  %v17918_v55 = vld [vmem:[#allocation5 + $0x2018] ss:$36 sps:$4 sm:$0xff]  }
 0x1e8   :  { %v17923_v56 = vld [vmem:[#allocation5 + $0x205c] ss:$36 sps:$4 sm:$0xff]  }
 0x1ea   :  { %11554 = vmatpush1.bf16.msra.mxu0 %v17848_v57  ;;  %12087 = vmatpush1.bf16.msra.mxu1 %v17851_v58  ;;  %v17926_v57 = vld [vmem:[#allocation5 + $0x2064] ss:$36 sps:$4 sm:$0xff]   ;;  %v17921_v58 = vld [vmem:[#allocation5 + $0x2058] ss:$36 sps:$4 sm:$0xff]  }
 0x1eb   :  { %11555 = vmatprep.subr.bf16.mxu0 %v17856_v59  ;;  %12088 = vmatprep.subr.bf16.mxu1 %v17859_v61  ;;  %v17924_v59 = vld [vmem:[#allocation5 + $0x2060] ss:$36 sps:$4 sm:$0xff]  }
 0x1ec   :  { %v17929_v61 = vld [vmem:[#allocation5 + $0x20a4] ss:$36 sps:$4 sm:$0xff]  }
 0x1ee   :  { %11556 = vmatpush1.bf16.msra.mxu0 %v17854_v63  ;;  %12089 = vmatpush1.bf16.msra.mxu1 %v17857_v0  ;;  %v17932_v63 = vld [vmem:[#allocation5 + $0x20ac] ss:$36 sps:$4 sm:$0xff]   ;;  %v17927_v0 = vld [vmem:[#allocation5 + $0x20a0] ss:$36 sps:$4 sm:$0xff]  }
 0x1ef   :  { %11557 = vmatprep.subr.bf16.mxu0 %v17862_v1  ;;  %12090 = vmatprep.subr.bf16.mxu1 %v17865_v2  ;;  %v17930_v1 = vld [vmem:[#allocation5 + $0x20a8] ss:$36 sps:$4 sm:$0xff]  }
 0x1f0   :  { %v17935_v2 = vld [vmem:[#allocation5 + $0x20ec] ss:$36 sps:$4 sm:$0xff]  }
 0x1f2   :  { %11558 = vmatpush1.bf16.msra.mxu0 %v17860_v34  ;;  %12091 = vmatpush1.bf16.msra.mxu1 %v17863_v4  ;;  %v17938_v34 = vld [vmem:[#allocation5 + $0x20f4] ss:$36 sps:$4 sm:$0xff]   ;;  %v17933_v4 = vld [vmem:[#allocation5 + $0x20e8] ss:$36 sps:$4 sm:$0xff]  }
 0x1f3   :  { %11559 = vmatprep.subr.bf16.mxu0 %v17868_v5  ;;  %12092 = vmatprep.subr.bf16.mxu1 %v17871_v6  ;;  %v17936_v5 = vld [vmem:[#allocation5 + $0x20f0] ss:$36 sps:$4 sm:$0xff]  }
 0x1f4   :  { %v17941_v6 = vld [vmem:[#allocation5 + $0x2134] ss:$36 sps:$4 sm:$0xff]  }
 0x1f6   :  { %11560 = vmatpush1.bf16.msra.mxu0 %v17866_v7  ;;  %12093 = vmatpush1.bf16.msra.mxu1 %v17869_v8  ;;  %v17944_v7 = vld [vmem:[#allocation5 + $0x213c] ss:$36 sps:$4 sm:$0xff]   ;;  %v17939_v8 = vld [vmem:[#allocation5 + $0x2130] ss:$36 sps:$4 sm:$0xff]  }
 0x1f7   :  { %11561 = vmatprep.subr.bf16.mxu0 %v17874_v9  ;;  %12094 = vmatprep.subr.bf16.mxu1 %v17877_v11  ;;  %v17942_v9 = vld [vmem:[#allocation5 + $0x2138] ss:$36 sps:$4 sm:$0xff]  }
 0x1f8   :  { %v17947_v11 = vld [vmem:[#allocation5 + $0x217c] ss:$36 sps:$4 sm:$0xff]  }
 0x1fa   :  { %11562 = vmatpush1.bf16.msra.mxu0 %v17872_v12  ;;  %12095 = vmatpush1.bf16.msra.mxu1 %v17875_v14  ;;  %v17950_v12 = vld [vmem:[#allocation5 + $0x2184] ss:$36 sps:$4 sm:$0xff]   ;;  %v17945_v14 = vld [vmem:[#allocation5 + $0x2178] ss:$36 sps:$4 sm:$0xff]  }
 0x1fb   :  { %11563 = vmatprep.subr.bf16.mxu0 %v17880_v15  ;;  %12096 = vmatprep.subr.bf16.mxu1 %v17883_v18  ;;  %v17948_v15 = vld [vmem:[#allocation5 + $0x2180] ss:$36 sps:$4 sm:$0xff]  }
 0x1fc   :  { %v17953_v18 = vld [vmem:[#allocation5 + $0x21c4] ss:$36 sps:$4 sm:$0xff]  }
 0x1fe   :  { %11564 = vmatpush1.bf16.msra.mxu0 %v17878_v20  ;;  %12097 = vmatpush1.bf16.msra.mxu1 %v17881_v21  ;;  %v17956_v20 = vld [vmem:[#allocation5 + $0x21cc] ss:$36 sps:$4 sm:$0xff]   ;;  %v17951_v21 = vld [vmem:[#allocation5 + $0x21c0] ss:$36 sps:$4 sm:$0xff]  }
 0x1ff   :  { %11565 = vmatprep.subr.bf16.mxu0 %v17886_v52  ;;  %12098 = vmatprep.subr.bf16.mxu1 %v17889_v22  ;;  %v17954_v52 = vld [vmem:[#allocation5 + $0x21c8] ss:$36 sps:$4 sm:$0xff]  }
 0x200   :  { %v17959_v22 = vld [vmem:[#allocation5 + $0x220c] ss:$36 sps:$4 sm:$0xff]  }
 0x202   :  { %11566 = vmatpush1.bf16.msra.mxu0 %v17884_v25  ;;  %12099 = vmatpush1.bf16.msra.mxu1 %v17887_v26  ;;  %v17962_v25 = vld [vmem:[#allocation5 + $0x2214] ss:$36 sps:$4 sm:$0xff]   ;;  %v17957_v26 = vld [vmem:[#allocation5 + $0x2208] ss:$36 sps:$4 sm:$0xff]  }
 0x203   :  { %11567 = vmatprep.subr.bf16.mxu0 %v17892_v28  ;;  %12100 = vmatprep.subr.bf16.mxu1 %v17895_v29  ;;  %v17960_v28 = vld [vmem:[#allocation5 + $0x2210] ss:$36 sps:$4 sm:$0xff]  }
 0x204   :  { %v17965_v29 = vld [vmem:[#allocation5 + $0x2254] ss:$36 sps:$4 sm:$0xff]  }
 0x206   :  { %11568 = vmatpush1.bf16.msra.mxu0 %v17890_v30  ;;  %12101 = vmatpush1.bf16.msra.mxu1 %v17893_v31  ;;  %v17968_v30 = vld [vmem:[#allocation5 + $0x225c] ss:$36 sps:$4 sm:$0xff]   ;;  %v17963_v31 = vld [vmem:[#allocation5 + $0x2250] ss:$36 sps:$4 sm:$0xff]  }
 0x207   :  { %11569 = vmatprep.subr.bf16.mxu0 %v17898_v32  ;;  %12102 = vmatprep.subr.bf16.mxu1 %v17901_v35  ;;  %v17966_v32 = vld [vmem:[#allocation5 + $0x2258] ss:$36 sps:$4 sm:$0xff]  }
 0x208   :  { %v17971_v35 = vld [vmem:[#allocation5 + $0x229c] ss:$36 sps:$4 sm:$0xff]  }
 0x20a   :  { %11570 = vmatpush1.bf16.msra.mxu0 %v17896_v36  ;;  %12103 = vmatpush1.bf16.msra.mxu1 %v17899_v38  ;;  %v17974_v36 = vld [vmem:[#allocation5 + $0x22a4] ss:$36 sps:$4 sm:$0xff]   ;;  %v17969_v38 = vld [vmem:[#allocation5 + $0x2298] ss:$36 sps:$4 sm:$0xff]  }
 0x20b   :  { %11580 = vmatprep.subr.bf16.mxu0 %v17905_v16  ;;  %12113 = vmatprep.subr.bf16.mxu1 %v17908_v39  ;;  %v17972_v16 = vld [vmem:[#allocation5 + $0x22a0] ss:$36 sps:$4 sm:$0xff]  }
 0x20c   :  { %v17977_v39 = vld [vmem:[#allocation5 + $0x22e4] ss:$36 sps:$4 sm:$0xff]  }
 0x20d   :  { %11572 = vmatmul.mubr.bf16.vlgmr.msra.gmra.mrb[0].mxu0 %v20167_v40  ;;  %12105 = vmatmul.mubr.bf16.vlgmr.msra.gmra.mrb[0].mxu1 %v20167_v40 }
 0x20e   :  { %11581 = vmatpush1.bf16.msra.mxu0 %v17903_v41  ;;  %12114 = vmatpush1.bf16.msra.mxu1 %v17906_v43  ;;  %v17980_v41 = vld [vmem:[#allocation5 + $0x22ec] ss:$36 sps:$4 sm:$0xff]   ;;  %v17975_v43 = vld [vmem:[#allocation5 + $0x22e0] ss:$36 sps:$4 sm:$0xff]  }
 0x20f   :  { %11582 = vmatprep.subr.bf16.mxu0 %v17911_v44  ;;  %12115 = vmatprep.subr.bf16.mxu1 %v17914_v46  ;;  %v17978_v44 = vld [vmem:[#allocation5 + $0x22e8] ss:$36 sps:$4 sm:$0xff]  }
 0x210   :  { %11612 = vmatprep.mubr.bf16.mxu0 %v20171_v47  ;;  %12145 = vmatprep.mubr.bf16.mxu1 %v20171_v47  ;;  %v17983_v46 = vld [vmem:[#allocation5 + $0x232c] ss:$36 sps:$4 sm:$0xff]  }
 0x212   :  { %11583 = vmatpush1.bf16.msra.mxu0 %v17909_v10  ;;  %12116 = vmatpush1.bf16.msra.mxu1 %v17912_v48  ;;  %v17986_v10 = vld [vmem:[#allocation5 + $0x2334] ss:$36 sps:$4 sm:$0xff]   ;;  %v17981_v48 = vld [vmem:[#allocation5 + $0x2328] ss:$36 sps:$4 sm:$0xff]  }
 0x213   :  { %11584 = vmatprep.subr.bf16.mxu0 %v17917_v50  ;;  %12117 = vmatprep.subr.bf16.mxu1 %v17920_v53  ;;  %v17984_v50 = vld [vmem:[#allocation5 + $0x2330] ss:$36 sps:$4 sm:$0xff]  }
 0x214   :  { %v17989_v53 = vld [vmem:[#allocation5 + $0x2374] ss:$36 sps:$4 sm:$0xff]  }
 0x216   :  { %11585 = vmatpush1.bf16.msra.mxu0 %v17915_v54  ;;  %12118 = vmatpush1.bf16.msra.mxu1 %v17918_v55  ;;  %v17992_v54 = vld [vmem:[#allocation5 + $0x237c] ss:$36 sps:$4 sm:$0xff]  }
 0x217   :  { %11586 = vmatprep.subr.bf16.mxu0 %v17923_v56  ;;  %12119 = vmatprep.subr.bf16.mxu1 %v17926_v57  ;;  %v20177_v55 = vld.sshfl [vmem:[#allocation2 + $0x10] sm:$0xff pattern:$0x75316420] }
 0x218   :  { %v17987_v56 = vld [vmem:[#allocation5 + $0x2370] ss:$36 sps:$4 sm:$0xff]   ;;  %v17990_v57 = vld [vmem:[#allocation5 + $0x2378] ss:$36 sps:$4 sm:$0xff]  }
 0x21a   :  { %11587 = vmatpush1.bf16.msra.mxu0 %v17921_v58  ;;  %12120 = vmatpush1.bf16.msra.mxu1 %v17924_v59  ;;  %v17995_v58 = vld [vmem:[#allocation5 + $0x23bc] ss:$36 sps:$4 sm:$0xff]   ;;  %v17998_v59 = vld [vmem:[#allocation5 + $0x23c4] ss:$36 sps:$4 sm:$0xff]  }
 0x21b   :  { %11588 = vmatprep.subr.bf16.mxu0 %v17929_v61  ;;  %12121 = vmatprep.subr.bf16.mxu1 %v17932_v63  ;;  %v17993_v61 = vld [vmem:[#allocation5 + $0x23b8] ss:$36 sps:$4 sm:$0xff]   ;;  %v17996_v63 = vld [vmem:[#allocation5 + $0x23c0] ss:$36 sps:$4 sm:$0xff]  }
 0x21e   :  { %11589 = vmatpush1.bf16.msra.mxu0 %v17927_v0  ;;  %12122 = vmatpush1.bf16.msra.mxu1 %v17930_v1  ;;  %v18001_v0 = vld [vmem:[#allocation5 + $0x2404] ss:$36 sps:$4 sm:$0xff]   ;;  %v18004_v1 = vld [vmem:[#allocation5 + $0x240c] ss:$36 sps:$4 sm:$0xff]  }
 0x21f   :  { %11590 = vmatprep.subr.bf16.mxu0 %v17935_v2  ;;  %12123 = vmatprep.subr.bf16.mxu1 %v17938_v34  ;;  %v2201_v2 = vcombine.high %v20177_v55, %v20177_v55  ;;  %v20183_v34 = vcombine.high %v20167_v40, %v20167_v40 }
 0x222   :  { %11591 = vmatpush1.bf16.msra.mxu0 %v17933_v4  ;;  %12124 = vmatpush1.bf16.msra.mxu1 %v17936_v5  ;;  %v17999_v4 = vld [vmem:[#allocation5 + $0x2400] ss:$36 sps:$4 sm:$0xff]   ;;  %v18002_v5 = vld [vmem:[#allocation5 + $0x2408] ss:$36 sps:$4 sm:$0xff]  }
 0x223   :  { %11592 = vmatprep.subr.bf16.mxu0 %v17941_v6  ;;  %12125 = vmatprep.subr.bf16.mxu1 %v17944_v7  ;;  %v18007_v6 = vld [vmem:[#allocation5 + $0x244c] ss:$36 sps:$4 sm:$0xff]   ;;  %v18010_v7 = vld [vmem:[#allocation5 + $0x2454] ss:$36 sps:$4 sm:$0xff]  }
 0x226   :  { %11593 = vmatpush1.bf16.msra.mxu0 %v17939_v8  ;;  %12126 = vmatpush1.bf16.msra.mxu1 %v17942_v9  ;;  %v20186_v8 = vrot.slane %v2201_v2, %v20070_v49  ;;  %v18005_v9 = vld [vmem:[#allocation5 + $0x2448] ss:$36 sps:$4 sm:$0xff]  }
 0x227   :  { %11594 = vmatprep.subr.bf16.mxu0 %v17947_v11  ;;  %12127 = vmatprep.subr.bf16.mxu1 %v17950_v12  ;;  %v18008_v11 = vld [vmem:[#allocation5 + $0x2450] ss:$36 sps:$4 sm:$0xff]   ;;  %v18070_v2 = vld [vmem:[#allocation5 + $0x2724] ss:$36 sps:$4 sm:$0xff]  }
 0x228   :  { %v18013_v12 = vld [vmem:[#allocation5 + $0x2494] ss:$36 sps:$4 sm:$0xff]  }
 0x22a   :  { %11595 = vmatpush1.bf16.msra.mxu0 %v17945_v14  ;;  %12128 = vmatpush1.bf16.msra.mxu1 %v17948_v15  ;;  %v18016_v14 = vld [vmem:[#allocation5 + $0x249c] ss:$36 sps:$4 sm:$0xff]   ;;  %v18011_v15 = vld [vmem:[#allocation5 + $0x2490] ss:$36 sps:$4 sm:$0xff]  }
 0x22b   :  { %11596 = vmatprep.subr.bf16.mxu0 %v17953_v18  ;;  %12129 = vmatprep.subr.bf16.mxu1 %v17956_v20  ;;  %v18014_v18 = vld [vmem:[#allocation5 + $0x2498] ss:$36 sps:$4 sm:$0xff]  }
 0x22c   :  { %v18019_v20 = vld [vmem:[#allocation5 + $0x24dc] ss:$36 sps:$4 sm:$0xff]  }
 0x22e   :  { %11597 = vmatpush1.bf16.msra.mxu0 %v17951_v21  ;;  %12130 = vmatpush1.bf16.msra.mxu1 %v17954_v52  ;;  %v18022_v21 = vld [vmem:[#allocation5 + $0x24e4] ss:$36 sps:$4 sm:$0xff]   ;;  %v18017_v52 = vld [vmem:[#allocation5 + $0x24d8] ss:$36 sps:$4 sm:$0xff]  }
 0x22f   :  { %11598 = vmatprep.subr.bf16.mxu0 %v17959_v22  ;;  %12131 = vmatprep.subr.bf16.mxu1 %v17962_v25  ;;  %v18020_v22 = vld [vmem:[#allocation5 + $0x24e0] ss:$36 sps:$4 sm:$0xff]  }
 0x230   :  { %v18025_v25 = vld [vmem:[#allocation5 + $0x2524] ss:$36 sps:$4 sm:$0xff]  }
 0x232   :  { %11599 = vmatpush1.bf16.msra.mxu0 %v17957_v26  ;;  %12132 = vmatpush1.bf16.msra.mxu1 %v17960_v28  ;;  %v18028_v26 = vld [vmem:[#allocation5 + $0x252c] ss:$36 sps:$4 sm:$0xff]   ;;  %v18023_v28 = vld [vmem:[#allocation5 + $0x2520] ss:$36 sps:$4 sm:$0xff]  }
 0x233   :  { %11600 = vmatprep.subr.bf16.mxu0 %v17965_v29  ;;  %12133 = vmatprep.subr.bf16.mxu1 %v17968_v30  ;;  %v18026_v29 = vld [vmem:[#allocation5 + $0x2528] ss:$36 sps:$4 sm:$0xff]  }
 0x234   :  { %v18031_v30 = vld [vmem:[#allocation5 + $0x256c] ss:$36 sps:$4 sm:$0xff]  }
 0x236   :  { %11601 = vmatpush1.bf16.msra.mxu0 %v17963_v31  ;;  %12134 = vmatpush1.bf16.msra.mxu1 %v17966_v32  ;;  %v18034_v31 = vld [vmem:[#allocation5 + $0x2574] ss:$36 sps:$4 sm:$0xff]   ;;  %v18029_v32 = vld [vmem:[#allocation5 + $0x2568] ss:$36 sps:$4 sm:$0xff]  }
 0x237   :  { %11602 = vmatprep.subr.bf16.mxu0 %v17971_v35  ;;  %12135 = vmatprep.subr.bf16.mxu1 %v17974_v36  ;;  %v18032_v35 = vld [vmem:[#allocation5 + $0x2570] ss:$36 sps:$4 sm:$0xff]  }
 0x238   :  { %v18037_v36 = vld [vmem:[#allocation5 + $0x25b4] ss:$36 sps:$4 sm:$0xff]  }
 0x23a   :  { %11603 = vmatpush1.bf16.msra.mxu0 %v17969_v38  ;;  %12136 = vmatpush1.bf16.msra.mxu1 %v17972_v16  ;;  %v18040_v38 = vld [vmem:[#allocation5 + $0x25bc] ss:$36 sps:$4 sm:$0xff]   ;;  %v18035_v16 = vld [vmem:[#allocation5 + $0x25b0] ss:$36 sps:$4 sm:$0xff]  }
 0x23b   :  { %11604 = vmatprep.subr.bf16.mxu0 %v17977_v39  ;;  %12137 = vmatprep.subr.bf16.mxu1 %v17980_v41  ;;  %v18038_v39 = vld [vmem:[#allocation5 + $0x25b8] ss:$36 sps:$4 sm:$0xff]  }
 0x23c   :  { %v18043_v41 = vld [vmem:[#allocation5 + $0x25fc] ss:$36 sps:$4 sm:$0xff]  }
 0x23e   :  { %11605 = vmatpush1.bf16.msra.mxu0 %v17975_v43  ;;  %12138 = vmatpush1.bf16.msra.mxu1 %v17978_v44  ;;  %v18046_v43 = vld [vmem:[#allocation5 + $0x2604] ss:$36 sps:$4 sm:$0xff]   ;;  %v18041_v44 = vld [vmem:[#allocation5 + $0x25f8] ss:$36 sps:$4 sm:$0xff]  }
 0x23f   :  { %11606 = vmatprep.subr.bf16.mxu0 %v17983_v46  ;;  %12139 = vmatprep.subr.bf16.mxu1 %v17986_v10  ;;  %v18044_v46 = vld [vmem:[#allocation5 + $0x2600] ss:$36 sps:$4 sm:$0xff]  }
 0x240   :  { %v18049_v10 = vld [vmem:[#allocation5 + $0x2644] ss:$36 sps:$4 sm:$0xff]  }
 0x242   :  { %11607 = vmatpush1.bf16.msra.mxu0 %v17981_v48  ;;  %12140 = vmatpush1.bf16.msra.mxu1 %v17984_v50  ;;  %v18052_v48 = vld [vmem:[#allocation5 + $0x264c] ss:$36 sps:$4 sm:$0xff]   ;;  %v18047_v50 = vld [vmem:[#allocation5 + $0x2640] ss:$36 sps:$4 sm:$0xff]  }
 0x243   :  { %11608 = vmatprep.subr.bf16.mxu0 %v17989_v53  ;;  %12141 = vmatprep.subr.bf16.mxu1 %v17992_v54  ;;  %v18050_v53 = vld [vmem:[#allocation5 + $0x2648] ss:$36 sps:$4 sm:$0xff]  }
 0x244   :  { %v18055_v54 = vld [vmem:[#allocation5 + $0x268c] ss:$36 sps:$4 sm:$0xff]  }
 0x246   :  { %11609 = vmatpush1.bf16.msra.mxu0 %v17987_v56  ;;  %12142 = vmatpush1.bf16.msra.mxu1 %v17990_v57  ;;  %v18058_v56 = vld [vmem:[#allocation5 + $0x2694] ss:$36 sps:$4 sm:$0xff]   ;;  %v18053_v57 = vld [vmem:[#allocation5 + $0x2688] ss:$36 sps:$4 sm:$0xff]  }
 0x247   :  { %11610 = vmatprep.subr.bf16.mxu0 %v17995_v58  ;;  %12143 = vmatprep.subr.bf16.mxu1 %v17998_v59  ;;  %v18056_v58 = vld [vmem:[#allocation5 + $0x2690] ss:$36 sps:$4 sm:$0xff]  }
 0x248   :  { %v18061_v59 = vld [vmem:[#allocation5 + $0x26d4] ss:$36 sps:$4 sm:$0xff]  }
 0x24a   :  { %11611 = vmatpush1.bf16.msra.mxu0 %v17993_v61  ;;  %12144 = vmatpush1.bf16.msra.mxu1 %v17996_v63  ;;  %v18064_v61 = vld [vmem:[#allocation5 + $0x26dc] ss:$36 sps:$4 sm:$0xff]   ;;  %v18059_v63 = vld [vmem:[#allocation5 + $0x26d0] ss:$36 sps:$4 sm:$0xff]  }
 0x24b   :  { %11621 = vmatprep.subr.bf16.mxu0 %v18001_v0  ;;  %12154 = vmatprep.subr.bf16.mxu1 %v18004_v1  ;;  %v18062_v0 = vld [vmem:[#allocation5 + $0x26d8] ss:$36 sps:$4 sm:$0xff]  }
 0x24c   :  { %v18067_v1 = vld [vmem:[#allocation5 + $0x271c] ss:$36 sps:$4 sm:$0xff]  }
 0x24d   :  { %11613 = vmatmul.mubr.bf16.vlgmr.msra.gmra.mrb[0].mxu0 %v20183_v34  ;;  %12146 = vmatmul.mubr.bf16.vlgmr.msra.gmra.mrb[0].mxu1 %v20183_v34 }
 0x24e   :  { %11622 = vmatpush1.bf16.msra.mxu0 %v17999_v4  ;;  %12155 = vmatpush1.bf16.msra.mxu1 %v18002_v5  ;;  %v18065_v4 = vld [vmem:[#allocation5 + $0x2718] ss:$36 sps:$4 sm:$0xff]   ;;  %v18068_v5 = vld [vmem:[#allocation5 + $0x2720] ss:$36 sps:$4 sm:$0xff]  }
 0x24f   :  { %11623 = vmatprep.subr.bf16.mxu0 %v18007_v6  ;;  %12156 = vmatprep.subr.bf16.mxu1 %v18010_v7  ;;  %v18073_v6 = vld [vmem:[#allocation5 + $0x2764] ss:$36 sps:$4 sm:$0xff]   ;;  %v18076_v7 = vld [vmem:[#allocation5 + $0x276c] ss:$36 sps:$4 sm:$0xff]  }
 0x250   :  { %11653 = vmatprep.mubr.bf16.mxu0 %v20186_v8  ;;  %12186 = vmatprep.mubr.bf16.mxu1 %v20186_v8 }
 0x252   :  { %11624 = vmatpush1.bf16.msra.mxu0 %v18005_v9  ;;  %12157 = vmatpush1.bf16.msra.mxu1 %v18008_v11  ;;  %v18071_v9 = vld [vmem:[#allocation5 + $0x2760] ss:$36 sps:$4 sm:$0xff]   ;;  %v18074_v11 = vld [vmem:[#allocation5 + $0x2768] ss:$36 sps:$4 sm:$0xff]  }
 0x253   :  { %11625 = vmatprep.subr.bf16.mxu0 %v18013_v12  ;;  %12158 = vmatprep.subr.bf16.mxu1 %v18016_v14  ;;  %v18079_v12 = vld [vmem:[#allocation5 + $0x27ac] ss:$36 sps:$4 sm:$0xff]   ;;  %v18082_v14 = vld [vmem:[#allocation5 + $0x27b4] ss:$36 sps:$4 sm:$0xff]  }
 0x256   :  { %11626 = vmatpush1.bf16.msra.mxu0 %v18011_v15  ;;  %12159 = vmatpush1.bf16.msra.mxu1 %v18014_v18  ;;  %v18077_v15 = vld [vmem:[#allocation5 + $0x27a8] ss:$36 sps:$4 sm:$0xff]   ;;  %v18080_v18 = vld [vmem:[#allocation5 + $0x27b0] ss:$36 sps:$4 sm:$0xff]  }
 0x257   :  { %11627 = vmatprep.subr.bf16.mxu0 %v18019_v20  ;;  %12160 = vmatprep.subr.bf16.mxu1 %v18022_v21  ;;  %v18085_v20 = vld [vmem:[#allocation5 + $0x27f4] ss:$36 sps:$4 sm:$0xff]   ;;  %v18088_v21 = vld [vmem:[#allocation5 + $0x27fc] ss:$36 sps:$4 sm:$0xff]  }
 0x25a   :  { %11628 = vmatpush1.bf16.msra.mxu0 %v18017_v52  ;;  %12161 = vmatpush1.bf16.msra.mxu1 %v18020_v22  ;;  %v18083_v52 = vld [vmem:[#allocation5 + $0x27f0] ss:$36 sps:$4 sm:$0xff]   ;;  %v18086_v22 = vld [vmem:[#allocation5 + $0x27f8] ss:$36 sps:$4 sm:$0xff]  }
 0x25b   :  { %11629 = vmatprep.subr.bf16.mxu0 %v18025_v25  ;;  %12162 = vmatprep.subr.bf16.mxu1 %v18028_v26  ;;  %v18091_v25 = vld [vmem:[#allocation5 + $0x283c] ss:$36 sps:$4 sm:$0xff]   ;;  %v18094_v26 = vld [vmem:[#allocation5 + $0x2844] ss:$36 sps:$4 sm:$0xff]  }
 0x25e   :  { %11630 = vmatpush1.bf16.msra.mxu0 %v18023_v28  ;;  %12163 = vmatpush1.bf16.msra.mxu1 %v18026_v29  ;;  %v18089_v28 = vld [vmem:[#allocation5 + $0x2838] ss:$36 sps:$4 sm:$0xff]   ;;  %v18092_v29 = vld [vmem:[#allocation5 + $0x2840] ss:$36 sps:$4 sm:$0xff]  }
 0x25f   :  { %11631 = vmatprep.subr.bf16.mxu0 %v18031_v30  ;;  %12164 = vmatprep.subr.bf16.mxu1 %v18034_v31  ;;  %v18097_v30 = vld [vmem:[#allocation5 + $0x2884] ss:$36 sps:$4 sm:$0xff]   ;;  %v18100_v31 = vld [vmem:[#allocation5 + $0x288c] ss:$36 sps:$4 sm:$0xff]  }
 0x262   :  { %11632 = vmatpush1.bf16.msra.mxu0 %v18029_v32  ;;  %12165 = vmatpush1.bf16.msra.mxu1 %v18032_v35  ;;  %v20194_v32 = vrot.slane %v20177_v55, %v20070_v49  ;;  %v18095_v35 = vld [vmem:[#allocation5 + $0x2880] ss:$36 sps:$4 sm:$0xff]   ;;  %v18101_v55 = vld [vmem:[#allocation5 + $0x28c8] ss:$36 sps:$4 sm:$0xff]  }
 0x263   :  { %11633 = vmatprep.subr.bf16.mxu0 %v18037_v36  ;;  %12166 = vmatprep.subr.bf16.mxu1 %v18040_v38  ;;  %v18098_v36 = vld [vmem:[#allocation5 + $0x2888] ss:$36 sps:$4 sm:$0xff]  }
 0x264   :  { %v18103_v38 = vld [vmem:[#allocation5 + $0x28cc] ss:$36 sps:$4 sm:$0xff]  }
 0x266   :  { %11634 = vmatpush1.bf16.msra.mxu0 %v18035_v16  ;;  %12167 = vmatpush1.bf16.msra.mxu1 %v18038_v39  ;;  %v18106_v16 = vld [vmem:[#allocation5 + $0x28d4] ss:$36 sps:$4 sm:$0xff]   ;;  %v20198_v39 = vcombine.high %v20186_v8, %v20186_v8 }
 0x267   :  { %11635 = vmatprep.subr.bf16.mxu0 %v18043_v41  ;;  %12168 = vmatprep.subr.bf16.mxu1 %v18046_v43  ;;  %v18104_v41 = vld [vmem:[#allocation5 + $0x28d0] ss:$36 sps:$4 sm:$0xff]  }
 0x268   :  { %v18109_v43 = vld [vmem:[#allocation5 + $0x2914] ss:$36 sps:$4 sm:$0xff]  }
 0x26a   :  { %11636 = vmatpush1.bf16.msra.mxu0 %v18041_v44  ;;  %12169 = vmatpush1.bf16.msra.mxu1 %v18044_v46  ;;  %v18112_v44 = vld [vmem:[#allocation5 + $0x291c] ss:$36 sps:$4 sm:$0xff]   ;;  %v18107_v46 = vld [vmem:[#allocation5 + $0x2910] ss:$36 sps:$4 sm:$0xff]  }
 0x26b   :  { %11637 = vmatprep.subr.bf16.mxu0 %v18049_v10  ;;  %12170 = vmatprep.subr.bf16.mxu1 %v18052_v48  ;;  %v18110_v10 = vld [vmem:[#allocation5 + $0x2918] ss:$36 sps:$4 sm:$0xff]  }
 0x26c   :  { %v18115_v48 = vld [vmem:[#allocation5 + $0x295c] ss:$36 sps:$4 sm:$0xff]  }
 0x26e   :  { %11638 = vmatpush1.bf16.msra.mxu0 %v18047_v50  ;;  %12171 = vmatpush1.bf16.msra.mxu1 %v18050_v53  ;;  %v18118_v50 = vld [vmem:[#allocation5 + $0x2964] ss:$36 sps:$4 sm:$0xff]   ;;  %v18113_v53 = vld [vmem:[#allocation5 + $0x2958] ss:$36 sps:$4 sm:$0xff]  }
 0x26f   :  { %11639 = vmatprep.subr.bf16.mxu0 %v18055_v54  ;;  %12172 = vmatprep.subr.bf16.mxu1 %v18058_v56  ;;  %v18116_v54 = vld [vmem:[#allocation5 + $0x2960] ss:$36 sps:$4 sm:$0xff]  }
 0x270   :  { %v18121_v56 = vld [vmem:[#allocation5 + $0x29a4] ss:$36 sps:$4 sm:$0xff]  }
 0x272   :  { %11640 = vmatpush1.bf16.msra.mxu0 %v18053_v57  ;;  %12173 = vmatpush1.bf16.msra.mxu1 %v18056_v58  ;;  %v18124_v57 = vld [vmem:[#allocation5 + $0x29ac] ss:$36 sps:$4 sm:$0xff]   ;;  %v18119_v58 = vld [vmem:[#allocation5 + $0x29a0] ss:$36 sps:$4 sm:$0xff]  }
 0x273   :  { %11641 = vmatprep.subr.bf16.mxu0 %v18061_v59  ;;  %12174 = vmatprep.subr.bf16.mxu1 %v18064_v61  ;;  %v18122_v59 = vld [vmem:[#allocation5 + $0x29a8] ss:$36 sps:$4 sm:$0xff]  }
 0x274   :  { %v18127_v61 = vld [vmem:[#allocation5 + $0x29ec] ss:$36 sps:$4 sm:$0xff]  }
 0x276   :  { %11642 = vmatpush1.bf16.msra.mxu0 %v18059_v63  ;;  %12175 = vmatpush1.bf16.msra.mxu1 %v18062_v0  ;;  %v18130_v63 = vld [vmem:[#allocation5 + $0x29f4] ss:$36 sps:$4 sm:$0xff]   ;;  %v18125_v0 = vld [vmem:[#allocation5 + $0x29e8] ss:$36 sps:$4 sm:$0xff]  }
 0x277   :  { %11643 = vmatprep.subr.bf16.mxu0 %v18067_v1  ;;  %12176 = vmatprep.subr.bf16.mxu1 %v18070_v2  ;;  %v18128_v1 = vld [vmem:[#allocation5 + $0x29f0] ss:$36 sps:$4 sm:$0xff]  }
 0x278   :  { %v18133_v2 = vld [vmem:[#allocation5 + $0x2a34] ss:$36 sps:$4 sm:$0xff]  }
 0x27a   :  { %11644 = vmatpush1.bf16.msra.mxu0 %v18065_v4  ;;  %12177 = vmatpush1.bf16.msra.mxu1 %v18068_v5  ;;  %v18136_v4 = vld [vmem:[#allocation5 + $0x2a3c] ss:$36 sps:$4 sm:$0xff]   ;;  %v18131_v5 = vld [vmem:[#allocation5 + $0x2a30] ss:$36 sps:$4 sm:$0xff]  }
 0x27b   :  { %11645 = vmatprep.subr.bf16.mxu0 %v18073_v6  ;;  %12178 = vmatprep.subr.bf16.mxu1 %v18076_v7  ;;  %v18134_v6 = vld [vmem:[#allocation5 + $0x2a38] ss:$36 sps:$4 sm:$0xff]  }
 0x27c   :  { %v18139_v7 = vld [vmem:[#allocation5 + $0x2a7c] ss:$36 sps:$4 sm:$0xff]  }
 0x27e   :  { %11646 = vmatpush1.bf16.msra.mxu0 %v18071_v9  ;;  %12179 = vmatpush1.bf16.msra.mxu1 %v18074_v11  ;;  %v18142_v9 = vld [vmem:[#allocation5 + $0x2a84] ss:$36 sps:$4 sm:$0xff]   ;;  %v18137_v11 = vld [vmem:[#allocation5 + $0x2a78] ss:$36 sps:$4 sm:$0xff]  }
 0x27f   :  { %11647 = vmatprep.subr.bf16.mxu0 %v18079_v12  ;;  %12180 = vmatprep.subr.bf16.mxu1 %v18082_v14  ;;  %v18140_v12 = vld [vmem:[#allocation5 + $0x2a80] ss:$36 sps:$4 sm:$0xff]  }
 0x280   :  { %v18145_v14 = vld [vmem:[#allocation5 + $0x2ac4] ss:$36 sps:$4 sm:$0xff]  }
 0x282   :  { %11648 = vmatpush1.bf16.msra.mxu0 %v18077_v15  ;;  %12181 = vmatpush1.bf16.msra.mxu1 %v18080_v18  ;;  %v18148_v15 = vld [vmem:[#allocation5 + $0x2acc] ss:$36 sps:$4 sm:$0xff]   ;;  %v18143_v18 = vld [vmem:[#allocation5 + $0x2ac0] ss:$36 sps:$4 sm:$0xff]  }
 0x283   :  { %11649 = vmatprep.subr.bf16.mxu0 %v18085_v20  ;;  %12182 = vmatprep.subr.bf16.mxu1 %v18088_v21  ;;  %v18146_v20 = vld [vmem:[#allocation5 + $0x2ac8] ss:$36 sps:$4 sm:$0xff]  }
 0x284   :  { %v18151_v21 = vld [vmem:[#allocation5 + $0x2b0c] ss:$36 sps:$4 sm:$0xff]  }
 0x286   :  { %11650 = vmatpush1.bf16.msra.mxu0 %v18083_v52  ;;  %12183 = vmatpush1.bf16.msra.mxu1 %v18086_v22  ;;  %v18154_v52 = vld [vmem:[#allocation5 + $0x2b14] ss:$36 sps:$4 sm:$0xff]   ;;  %v18149_v22 = vld [vmem:[#allocation5 + $0x2b08] ss:$36 sps:$4 sm:$0xff]  }
 0x287   :  { %11651 = vmatprep.subr.bf16.mxu0 %v18091_v25  ;;  %12184 = vmatprep.subr.bf16.mxu1 %v18094_v26  ;;  %v18152_v25 = vld [vmem:[#allocation5 + $0x2b10] ss:$36 sps:$4 sm:$0xff]  }
 0x288   :  { %v18157_v26 = vld [vmem:[#allocation5 + $0x2b54] ss:$36 sps:$4 sm:$0xff]  }
 0x28a   :  { %11652 = vmatpush1.bf16.msra.mxu0 %v18089_v28  ;;  %12185 = vmatpush1.bf16.msra.mxu1 %v18092_v29  ;;  %v18160_v28 = vld [vmem:[#allocation5 + $0x2b5c] ss:$36 sps:$4 sm:$0xff]   ;;  %v18155_v29 = vld [vmem:[#allocation5 + $0x2b50] ss:$36 sps:$4 sm:$0xff]  }
 0x28b   :  { %11662 = vmatprep.subr.bf16.mxu0 %v18097_v30  ;;  %12195 = vmatprep.subr.bf16.mxu1 %v18100_v31  ;;  %v18158_v30 = vld [vmem:[#allocation5 + $0x2b58] ss:$36 sps:$4 sm:$0xff]  }
 0x28c   :  { %v18163_v31 = vld [vmem:[#allocation5 + $0x2b9c] ss:$36 sps:$4 sm:$0xff]  }
 0x28d   :  { %11654 = vmatmul.mubr.bf16.vlgmr.msra.gmra.mrb[0].mxu0 %v20194_v32  ;;  %12187 = vmatmul.mubr.bf16.vlgmr.msra.gmra.mrb[0].mxu1 %v20194_v32 }
 0x28e   :  { %11663 = vmatpush1.bf16.msra.mxu0 %v18095_v35  ;;  %12196 = vmatpush1.bf16.msra.mxu1 %v18098_v36  ;;  %v18166_v35 = vld [vmem:[#allocation5 + $0x2ba4] ss:$36 sps:$4 sm:$0xff]   ;;  %v18161_v36 = vld [vmem:[#allocation5 + $0x2b98] ss:$36 sps:$4 sm:$0xff]  }
 0x28f   :  { %11664 = vmatprep.subr.bf16.mxu0 %v18103_v38  ;;  %12197 = vmatprep.subr.bf16.mxu1 %v18106_v16  ;;  %v18164_v38 = vld [vmem:[#allocation5 + $0x2ba0] ss:$36 sps:$4 sm:$0xff]  }
 0x290   :  { %11694 = vmatprep.mubr.bf16.mxu0 %v20198_v39  ;;  %12227 = vmatprep.mubr.bf16.mxu1 %v20198_v39  ;;  %v18169_v16 = vld [vmem:[#allocation5 + $0x2be4] ss:$36 sps:$4 sm:$0xff]  }
 0x292   :  { %11665 = vmatpush1.bf16.msra.mxu0 %v18101_v55  ;;  %12198 = vmatpush1.bf16.msra.mxu1 %v18104_v41  ;;  %v18172_v55 = vld [vmem:[#allocation5 + $0x2bec] ss:$36 sps:$4 sm:$0xff]   ;;  %v18167_v41 = vld [vmem:[#allocation5 + $0x2be0] ss:$36 sps:$4 sm:$0xff]  }
 0x293   :  { %11666 = vmatprep.subr.bf16.mxu0 %v18109_v43  ;;  %12199 = vmatprep.subr.bf16.mxu1 %v18112_v44  ;;  %v18170_v43 = vld [vmem:[#allocation5 + $0x2be8] ss:$36 sps:$4 sm:$0xff]  }
 0x294   :  { %v18175_v44 = vld [vmem:[#allocation5 + $0x2c2c] ss:$36 sps:$4 sm:$0xff]  }
 0x296   :  { %11667 = vmatpush1.bf16.msra.mxu0 %v18107_v46  ;;  %12200 = vmatpush1.bf16.msra.mxu1 %v18110_v10  ;;  %v18178_v46 = vld [vmem:[#allocation5 + $0x2c34] ss:$36 sps:$4 sm:$0xff]   ;;  %v18173_v10 = vld [vmem:[#allocation5 + $0x2c28] ss:$36 sps:$4 sm:$0xff]  }
 0x297   :  { %11668 = vmatprep.subr.bf16.mxu0 %v18115_v48  ;;  %12201 = vmatprep.subr.bf16.mxu1 %v18118_v50  ;;  %v18176_v48 = vld [vmem:[#allocation5 + $0x2c30] ss:$36 sps:$4 sm:$0xff]  }
 0x298   :  { %v18181_v50 = vld [vmem:[#allocation5 + $0x2c74] ss:$36 sps:$4 sm:$0xff]  }
 0x29a   :  { %11669 = vmatpush1.bf16.msra.mxu0 %v18113_v53  ;;  %12202 = vmatpush1.bf16.msra.mxu1 %v18116_v54  ;;  %v18184_v53 = vld [vmem:[#allocation5 + $0x2c7c] ss:$36 sps:$4 sm:$0xff]  }
 0x29b   :  { %11670 = vmatprep.subr.bf16.mxu0 %v18121_v56  ;;  %12203 = vmatprep.subr.bf16.mxu1 %v18124_v57  ;;  %v19857_v54 = vld [vmem:[#allocation2 + $0x10] sm:$0xff] }
 0x29c   :  { %v2186_v56 = vcombine.high %v19857_v54, %v19857_v54  ;;  %v18179_v57 = vld [vmem:[#allocation5 + $0x2c70] ss:$36 sps:$4 sm:$0xff]   ;;  %v18236_v54 = vld [vmem:[#allocation5 + $0x2f00] ss:$36 sps:$4 sm:$0xff]  }
 0x29e   :  { %11671 = vmatpush1.bf16.msra.mxu0 %v18119_v58  ;;  %12204 = vmatpush1.bf16.msra.mxu1 %v18122_v59  ;;  %v18182_v58 = vld [vmem:[#allocation5 + $0x2c78] ss:$36 sps:$4 sm:$0xff]  }
 0x29f   :  { %11672 = vmatprep.subr.bf16.mxu0 %v18127_v61  ;;  %12205 = vmatprep.subr.bf16.mxu1 %v18130_v63  ;;  %v18187_v59 = vld [vmem:[#allocation5 + $0x2cbc] ss:$36 sps:$4 sm:$0xff]   ;;  %v18190_v61 = vld [vmem:[#allocation5 + $0x2cc4] ss:$36 sps:$4 sm:$0xff]   ;;  %v20205_v63 = vrot.slane %v2186_v56, %v20070_v49 }
 0x2a0   :  { %v18241_v56 = vld [vmem:[#allocation5 + $0x2f44] ss:$36 sps:$4 sm:$0xff]  }
 0x2a2   :  { %11673 = vmatpush1.bf16.msra.mxu0 %v18125_v0  ;;  %12206 = vmatpush1.bf16.msra.mxu1 %v18128_v1  ;;  %v18185_v0 = vld [vmem:[#allocation5 + $0x2cb8] ss:$36 sps:$4 sm:$0xff]   ;;  %v18188_v1 = vld [vmem:[#allocation5 + $0x2cc0] ss:$36 sps:$4 sm:$0xff]  }
 0x2a3   :  { %11674 = vmatprep.subr.bf16.mxu0 %v18133_v2  ;;  %12207 = vmatprep.subr.bf16.mxu1 %v18136_v4  ;;  %v18193_v2 = vld [vmem:[#allocation5 + $0x2d04] ss:$36 sps:$4 sm:$0xff]   ;;  %v18196_v4 = vld [vmem:[#allocation5 + $0x2d0c] ss:$36 sps:$4 sm:$0xff]  }
 0x2a6   :  { %11675 = vmatpush1.bf16.msra.mxu0 %v18131_v5  ;;  %12208 = vmatpush1.bf16.msra.mxu1 %v18134_v6  ;;  %v2202_v5 = vcombine.high %v20205_v63, %v20205_v63  ;;  %v20211_v6 = vcombine.high %v20194_v32, %v20194_v32 }
 0x2a7   :  { %11676 = vmatprep.subr.bf16.mxu0 %v18139_v7  ;;  %12209 = vmatprep.subr.bf16.mxu1 %v18142_v9  ;;  %v18191_v7 = vld [vmem:[#allocation5 + $0x2d00] ss:$36 sps:$4 sm:$0xff]   ;;  %v18194_v9 = vld [vmem:[#allocation5 + $0x2d08] ss:$36 sps:$4 sm:$0xff]  }
 0x2aa   :  { %11677 = vmatpush1.bf16.msra.mxu0 %v18137_v11  ;;  %12210 = vmatpush1.bf16.msra.mxu1 %v18140_v12  ;;  %v18199_v11 = vld [vmem:[#allocation5 + $0x2d4c] ss:$36 sps:$4 sm:$0xff]   ;;  %v18202_v12 = vld [vmem:[#allocation5 + $0x2d54] ss:$36 sps:$4 sm:$0xff]  }
 0x2ab   :  { %11678 = vmatprep.subr.bf16.mxu0 %v18145_v14  ;;  %12211 = vmatprep.subr.bf16.mxu1 %v18148_v15  ;;  %v20214_v14 = vrot.slane %v2202_v5, %v20070_v49  ;;  %v18197_v15 = vld [vmem:[#allocation5 + $0x2d48] ss:$36 sps:$4 sm:$0xff]   ;;  %v18256_v5 = vld [vmem:[#allocation5 + $0x2fdc] ss:$36 sps:$4 sm:$0xff]  }
 0x2ae   :  { %11679 = vmatpush1.bf16.msra.mxu0 %v18143_v18  ;;  %12212 = vmatpush1.bf16.msra.mxu1 %v18146_v20  ;;  %v18200_v18 = vld [vmem:[#allocation5 + $0x2d50] ss:$36 sps:$4 sm:$0xff]  }
 0x2af   :  { %11680 = vmatprep.subr.bf16.mxu0 %v18151_v21  ;;  %12213 = vmatprep.subr.bf16.mxu1 %v18154_v52  ;;  %v18205_v20 = vld [vmem:[#allocation5 + $0x2d94] ss:$36 sps:$4 sm:$0xff]   ;;  %v18208_v21 = vld [vmem:[#allocation5 + $0x2d9c] ss:$36 sps:$4 sm:$0xff]  }
 0x2b0   :  { %v18203_v52 = vld [vmem:[#allocation5 + $0x2d90] ss:$36 sps:$4 sm:$0xff]  }
 0x2b2   :  { %11681 = vmatpush1.bf16.msra.mxu0 %v18149_v22  ;;  %12214 = vmatpush1.bf16.msra.mxu1 %v18152_v25  ;;  %v18206_v22 = vld [vmem:[#allocation5 + $0x2d98] ss:$36 sps:$4 sm:$0xff]  }
 0x2b3   :  { %11682 = vmatprep.subr.bf16.mxu0 %v18157_v26  ;;  %12215 = vmatprep.subr.bf16.mxu1 %v18160_v28  ;;  %v18211_v25 = vld [vmem:[#allocation5 + $0x2ddc] ss:$36 sps:$4 sm:$0xff]   ;;  %v18214_v26 = vld [vmem:[#allocation5 + $0x2de4] ss:$36 sps:$4 sm:$0xff]  }
 0x2b4   :  { %v18209_v28 = vld [vmem:[#allocation5 + $0x2dd8] ss:$36 sps:$4 sm:$0xff]  }
 0x2b6   :  { %11683 = vmatpush1.bf16.msra.mxu0 %v18155_v29  ;;  %12216 = vmatpush1.bf16.msra.mxu1 %v18158_v30  ;;  %v18212_v29 = vld [vmem:[#allocation5 + $0x2de0] ss:$36 sps:$4 sm:$0xff]  }
 0x2b7   :  { %11684 = vmatprep.subr.bf16.mxu0 %v18163_v31  ;;  %12217 = vmatprep.subr.bf16.mxu1 %v18166_v35  ;;  %v18217_v30 = vld [vmem:[#allocation5 + $0x2e24] ss:$36 sps:$4 sm:$0xff]   ;;  %v18220_v31 = vld [vmem:[#allocation5 + $0x2e2c] ss:$36 sps:$4 sm:$0xff]  }
 0x2b8   :  { %v18215_v35 = vld [vmem:[#allocation5 + $0x2e20] ss:$36 sps:$4 sm:$0xff]  }
 0x2ba   :  { %11685 = vmatpush1.bf16.msra.mxu0 %v18161_v36  ;;  %12218 = vmatpush1.bf16.msra.mxu1 %v18164_v38  ;;  %v18218_v36 = vld [vmem:[#allocation5 + $0x2e28] ss:$36 sps:$4 sm:$0xff]  }
 0x2bb   :  { %11686 = vmatprep.subr.bf16.mxu0 %v18169_v16  ;;  %12219 = vmatprep.subr.bf16.mxu1 %v18172_v55  ;;  %v18223_v38 = vld [vmem:[#allocation5 + $0x2e6c] ss:$36 sps:$4 sm:$0xff]   ;;  %v18226_v16 = vld [vmem:[#allocation5 + $0x2e74] ss:$36 sps:$4 sm:$0xff]  }
 0x2bc   :  { %v18221_v55 = vld [vmem:[#allocation5 + $0x2e68] ss:$36 sps:$4 sm:$0xff]  }
 0x2be   :  { %11687 = vmatpush1.bf16.msra.mxu0 %v18167_v41  ;;  %12220 = vmatpush1.bf16.msra.mxu1 %v18170_v43  ;;  %v18224_v41 = vld [vmem:[#allocation5 + $0x2e70] ss:$36 sps:$4 sm:$0xff]  }
 0x2bf   :  { %11688 = vmatprep.subr.bf16.mxu0 %v18175_v44  ;;  %12221 = vmatprep.subr.bf16.mxu1 %v18178_v46  ;;  %v18229_v43 = vld [vmem:[#allocation5 + $0x2eb4] ss:$36 sps:$4 sm:$0xff]   ;;  %v18232_v44 = vld [vmem:[#allocation5 + $0x2ebc] ss:$36 sps:$4 sm:$0xff]  }
 0x2c0   :  { %v18227_v46 = vld [vmem:[#allocation5 + $0x2eb0] ss:$36 sps:$4 sm:$0xff]  }
 0x2c2   :  { %11689 = vmatpush1.bf16.msra.mxu0 %v18173_v10  ;;  %12222 = vmatpush1.bf16.msra.mxu1 %v18176_v48  ;;  %v18230_v10 = vld [vmem:[#allocation5 + $0x2eb8] ss:$36 sps:$4 sm:$0xff]  }
 0x2c3   :  { %11690 = vmatprep.subr.bf16.mxu0 %v18181_v50  ;;  %12223 = vmatprep.subr.bf16.mxu1 %v18184_v53  ;;  %v18235_v48 = vld [vmem:[#allocation5 + $0x2efc] ss:$36 sps:$4 sm:$0xff]   ;;  %v18238_v50 = vld [vmem:[#allocation5 + $0x2f04] ss:$36 sps:$4 sm:$0xff]  }
 0x2c4   :  { %v18233_v53 = vld [vmem:[#allocation5 + $0x2ef8] ss:$36 sps:$4 sm:$0xff]  }
 0x2c6   :  { %11691 = vmatpush1.bf16.msra.mxu0 %v18179_v57  ;;  %12224 = vmatpush1.bf16.msra.mxu1 %v18182_v58  ;;  %v18244_v57 = vld [vmem:[#allocation5 + $0x2f4c] ss:$36 sps:$4 sm:$0xff]   ;;  %v18239_v58 = vld [vmem:[#allocation5 + $0x2f40] ss:$36 sps:$4 sm:$0xff]  }
 0x2c7   :  { %11692 = vmatprep.subr.bf16.mxu0 %v18187_v59  ;;  %12225 = vmatprep.subr.bf16.mxu1 %v18190_v61  ;;  %v18242_v59 = vld [vmem:[#allocation5 + $0x2f48] ss:$36 sps:$4 sm:$0xff]  }
 0x2c8   :  { %v18247_v61 = vld [vmem:[#allocation5 + $0x2f8c] ss:$36 sps:$4 sm:$0xff]  }
 0x2ca   :  { %11693 = vmatpush1.bf16.msra.mxu0 %v18185_v0  ;;  %12226 = vmatpush1.bf16.msra.mxu1 %v18188_v1  ;;  %v18250_v0 = vld [vmem:[#allocation5 + $0x2f94] ss:$36 sps:$4 sm:$0xff]   ;;  %v18245_v1 = vld [vmem:[#allocation5 + $0x2f88] ss:$36 sps:$4 sm:$0xff]  }
 0x2cb   :  { %11703 = vmatprep.subr.bf16.mxu0 %v18193_v2  ;;  %12236 = vmatprep.subr.bf16.mxu1 %v18196_v4  ;;  %v18248_v2 = vld [vmem:[#allocation5 + $0x2f90] ss:$36 sps:$4 sm:$0xff]  }
 0x2cc   :  { %v18253_v4 = vld [vmem:[#allocation5 + $0x2fd4] ss:$36 sps:$4 sm:$0xff]  }
 0x2cd   :  { %11695 = vmatmul.mubr.bf16.vlgmr.msra.gmra.mrb[0].mxu0 %v20211_v6  ;;  %12228 = vmatmul.mubr.bf16.vlgmr.msra.gmra.mrb[0].mxu1 %v20211_v6 }
 0x2ce   :  { %11704 = vmatpush1.bf16.msra.mxu0 %v18191_v7  ;;  %12237 = vmatpush1.bf16.msra.mxu1 %v18194_v9  ;;  %v18251_v7 = vld [vmem:[#allocation5 + $0x2fd0] ss:$36 sps:$4 sm:$0xff]   ;;  %v18254_v9 = vld [vmem:[#allocation5 + $0x2fd8] ss:$36 sps:$4 sm:$0xff]  }
 0x2cf   :  { %11705 = vmatprep.subr.bf16.mxu0 %v18199_v11  ;;  %12238 = vmatprep.subr.bf16.mxu1 %v18202_v12  ;;  %v18259_v11 = vld [vmem:[#allocation5 + $0x301c] ss:$36 sps:$4 sm:$0xff]   ;;  %v18262_v12 = vld [vmem:[#allocation5 + $0x3024] ss:$36 sps:$4 sm:$0xff]  }
 0x2d0   :  { %11735 = vmatprep.mubr.bf16.mxu0 %v20214_v14  ;;  %12268 = vmatprep.mubr.bf16.mxu1 %v20214_v14 }
 0x2d2   :  { %11706 = vmatpush1.bf16.msra.mxu0 %v18197_v15  ;;  %12239 = vmatpush1.bf16.msra.mxu1 %v18200_v18  ;;  %v18257_v15 = vld [vmem:[#allocation5 + $0x3018] ss:$36 sps:$4 sm:$0xff]   ;;  %v18260_v18 = vld [vmem:[#allocation5 + $0x3020] ss:$36 sps:$4 sm:$0xff]  }
 0x2d3   :  { %11707 = vmatprep.subr.bf16.mxu0 %v18205_v20  ;;  %12240 = vmatprep.subr.bf16.mxu1 %v18208_v21  ;;  %v18265_v20 = vld [vmem:[#allocation5 + $0x3064] ss:$36 sps:$4 sm:$0xff]   ;;  %v18268_v21 = vld [vmem:[#allocation5 + $0x306c] ss:$36 sps:$4 sm:$0xff]  }
 0x2d6   :  { %11708 = vmatpush1.bf16.msra.mxu0 %v18203_v52  ;;  %12241 = vmatpush1.bf16.msra.mxu1 %v18206_v22  ;;  %v18263_v52 = vld [vmem:[#allocation5 + $0x3060] ss:$36 sps:$4 sm:$0xff]   ;;  %v18266_v22 = vld [vmem:[#allocation5 + $0x3068] ss:$36 sps:$4 sm:$0xff]  }
 0x2d7   :  { %11709 = vmatprep.subr.bf16.mxu0 %v18211_v25  ;;  %12242 = vmatprep.subr.bf16.mxu1 %v18214_v26  ;;  %v18271_v25 = vld [vmem:[#allocation5 + $0x30ac] ss:$36 sps:$4 sm:$0xff]   ;;  %v18274_v26 = vld [vmem:[#allocation5 + $0x30b4] ss:$36 sps:$4 sm:$0xff]  }
 0x2da   :  { %11710 = vmatpush1.bf16.msra.mxu0 %v18209_v28  ;;  %12243 = vmatpush1.bf16.msra.mxu1 %v18212_v29  ;;  %v18269_v28 = vld [vmem:[#allocation5 + $0x30a8] ss:$36 sps:$4 sm:$0xff]   ;;  %v18272_v29 = vld [vmem:[#allocation5 + $0x30b0] ss:$36 sps:$4 sm:$0xff]  }
 0x2db   :  { %11711 = vmatprep.subr.bf16.mxu0 %v18217_v30  ;;  %12244 = vmatprep.subr.bf16.mxu1 %v18220_v31  ;;  %v18277_v30 = vld [vmem:[#allocation5 + $0x30f4] ss:$36 sps:$4 sm:$0xff]   ;;  %v18280_v31 = vld [vmem:[#allocation5 + $0x30fc] ss:$36 sps:$4 sm:$0xff]  }
 0x2de   :  { %11712 = vmatpush1.bf16.msra.mxu0 %v18215_v35  ;;  %12245 = vmatpush1.bf16.msra.mxu1 %v18218_v36  ;;  %v18275_v35 = vld [vmem:[#allocation5 + $0x30f0] ss:$36 sps:$4 sm:$0xff]   ;;  %v18278_v36 = vld [vmem:[#allocation5 + $0x30f8] ss:$36 sps:$4 sm:$0xff]  }
 0x2df   :  { %11713 = vmatprep.subr.bf16.mxu0 %v18223_v38  ;;  %12246 = vmatprep.subr.bf16.mxu1 %v18226_v16  ;;  %v18283_v38 = vld [vmem:[#allocation5 + $0x313c] ss:$36 sps:$4 sm:$0xff]   ;;  %v18286_v16 = vld [vmem:[#allocation5 + $0x3144] ss:$36 sps:$4 sm:$0xff]  }
 0x2e2   :  { %11714 = vmatpush1.bf16.msra.mxu0 %v18221_v55  ;;  %12247 = vmatpush1.bf16.msra.mxu1 %v18224_v41  ;;  %v18281_v55 = vld [vmem:[#allocation5 + $0x3138] ss:$36 sps:$4 sm:$0xff]   ;;  %v18284_v41 = vld [vmem:[#allocation5 + $0x3140] ss:$36 sps:$4 sm:$0xff]  }
 0x2e3   :  { %11715 = vmatprep.subr.bf16.mxu0 %v18229_v43  ;;  %12248 = vmatprep.subr.bf16.mxu1 %v18232_v44  ;;  %v18290_v43 = vld [vmem:[#allocation5 + $0x3184] ss:$36 sps:$4 sm:$0xff]   ;;  %v18293_v44 = vld [vmem:[#allocation5 + $0x318c] ss:$36 sps:$4 sm:$0xff]  }
 0x2e6   :  { %11716 = vmatpush1.bf16.msra.mxu0 %v18227_v46  ;;  %12249 = vmatpush1.bf16.msra.mxu1 %v18230_v10  ;;  %v20222_v46 = vrot.slane %v20205_v63, %v20070_v49  ;;  %v18288_v10 = vld [vmem:[#allocation5 + $0x3180] ss:$36 sps:$4 sm:$0xff]   ;;  %v18294_v63 = vld [vmem:[#allocation5 + $0x31c8] ss:$36 sps:$4 sm:$0xff]  }
 0x2e7   :  { %11717 = vmatprep.subr.bf16.mxu0 %v18235_v48  ;;  %12250 = vmatprep.subr.bf16.mxu1 %v18238_v50  ;;  %v18291_v48 = vld [vmem:[#allocation5 + $0x3188] ss:$36 sps:$4 sm:$0xff]  }
 0x2e8   :  { %v18296_v50 = vld [vmem:[#allocation5 + $0x31cc] ss:$36 sps:$4 sm:$0xff]  }
 0x2ea   :  { %11718 = vmatpush1.bf16.msra.mxu0 %v18233_v53  ;;  %12251 = vmatpush1.bf16.msra.mxu1 %v18236_v54  ;;  %v18299_v53 = vld [vmem:[#allocation5 + $0x31d4] ss:$36 sps:$4 sm:$0xff]   ;;  %v20226_v54 = vcombine.high %v20214_v14, %v20214_v14 }
 0x2eb   :  { %11719 = vmatprep.subr.bf16.mxu0 %v18241_v56  ;;  %12252 = vmatprep.subr.bf16.mxu1 %v18244_v57  ;;  %v18297_v56 = vld [vmem:[#allocation5 + $0x31d0] ss:$36 sps:$4 sm:$0xff]  }
 0x2ec   :  { %v18302_v57 = vld [vmem:[#allocation5 + $0x3214] ss:$36 sps:$4 sm:$0xff]  }
 0x2ee   :  { %11720 = vmatpush1.bf16.msra.mxu0 %v18239_v58  ;;  %12253 = vmatpush1.bf16.msra.mxu1 %v18242_v59  ;;  %v18305_v58 = vld [vmem:[#allocation5 + $0x321c] ss:$36 sps:$4 sm:$0xff]   ;;  %v18300_v59 = vld [vmem:[#allocation5 + $0x3210] ss:$36 sps:$4 sm:$0xff]  }
 0x2ef   :  { %11721 = vmatprep.subr.bf16.mxu0 %v18247_v61  ;;  %12254 = vmatprep.subr.bf16.mxu1 %v18250_v0  ;;  %v18303_v61 = vld [vmem:[#allocation5 + $0x3218] ss:$36 sps:$4 sm:$0xff]  }
 0x2f0   :  { %v18308_v0 = vld [vmem:[#allocation5 + $0x325c] ss:$36 sps:$4 sm:$0xff]  }
 0x2f2   :  { %11722 = vmatpush1.bf16.msra.mxu0 %v18245_v1  ;;  %12255 = vmatpush1.bf16.msra.mxu1 %v18248_v2  ;;  %v18311_v1 = vld [vmem:[#allocation5 + $0x3264] ss:$36 sps:$4 sm:$0xff]   ;;  %v18306_v2 = vld [vmem:[#allocation5 + $0x3258] ss:$36 sps:$4 sm:$0xff]  }
 0x2f3   :  { %11723 = vmatprep.subr.bf16.mxu0 %v18253_v4  ;;  %12256 = vmatprep.subr.bf16.mxu1 %v18256_v5  ;;  %v18309_v4 = vld [vmem:[#allocation5 + $0x3260] ss:$36 sps:$4 sm:$0xff]  }
 0x2f4   :  { %v18314_v5 = vld [vmem:[#allocation5 + $0x32a4] ss:$36 sps:$4 sm:$0xff]  }
 0x2f6   :  { %11724 = vmatpush1.bf16.msra.mxu0 %v18251_v7  ;;  %12257 = vmatpush1.bf16.msra.mxu1 %v18254_v9  ;;  %v18317_v7 = vld [vmem:[#allocation5 + $0x32ac] ss:$36 sps:$4 sm:$0xff]   ;;  %v18312_v9 = vld [vmem:[#allocation5 + $0x32a0] ss:$36 sps:$4 sm:$0xff]  }
 0x2f7   :  { %11725 = vmatprep.subr.bf16.mxu0 %v18259_v11  ;;  %12258 = vmatprep.subr.bf16.mxu1 %v18262_v12  ;;  %v18315_v11 = vld [vmem:[#allocation5 + $0x32a8] ss:$36 sps:$4 sm:$0xff]  }
 0x2f8   :  { %v18320_v12 = vld [vmem:[#allocation5 + $0x32ec] ss:$36 sps:$4 sm:$0xff]  }
 0x2fa   :  { %11726 = vmatpush1.bf16.msra.mxu0 %v18257_v15  ;;  %12259 = vmatpush1.bf16.msra.mxu1 %v18260_v18  ;;  %v18323_v15 = vld [vmem:[#allocation5 + $0x32f4] ss:$36 sps:$4 sm:$0xff]   ;;  %v18318_v18 = vld [vmem:[#allocation5 + $0x32e8] ss:$36 sps:$4 sm:$0xff]  }
 0x2fb   :  { %11727 = vmatprep.subr.bf16.mxu0 %v18265_v20  ;;  %12260 = vmatprep.subr.bf16.mxu1 %v18268_v21  ;;  %v18321_v20 = vld [vmem:[#allocation5 + $0x32f0] ss:$36 sps:$4 sm:$0xff]  }
 0x2fc   :  { %v18326_v21 = vld [vmem:[#allocation5 + $0x3334] ss:$36 sps:$4 sm:$0xff]  }
 0x2fe   :  { %11728 = vmatpush1.bf16.msra.mxu0 %v18263_v52  ;;  %12261 = vmatpush1.bf16.msra.mxu1 %v18266_v22  ;;  %v18329_v52 = vld [vmem:[#allocation5 + $0x333c] ss:$36 sps:$4 sm:$0xff]   ;;  %v18324_v22 = vld [vmem:[#allocation5 + $0x3330] ss:$36 sps:$4 sm:$0xff]  }
 0x2ff   :  { %11729 = vmatprep.subr.bf16.mxu0 %v18271_v25  ;;  %12262 = vmatprep.subr.bf16.mxu1 %v18274_v26  ;;  %v18327_v25 = vld [vmem:[#allocation5 + $0x3338] ss:$36 sps:$4 sm:$0xff]  }
 0x300   :  { %v18332_v26 = vld [vmem:[#allocation5 + $0x337c] ss:$36 sps:$4 sm:$0xff]  }
 0x302   :  { %11730 = vmatpush1.bf16.msra.mxu0 %v18269_v28  ;;  %12263 = vmatpush1.bf16.msra.mxu1 %v18272_v29  ;;  %v18335_v28 = vld [vmem:[#allocation5 + $0x3384] ss:$36 sps:$4 sm:$0xff]   ;;  %v18330_v29 = vld [vmem:[#allocation5 + $0x3378] ss:$36 sps:$4 sm:$0xff]  }
 0x303   :  { %11731 = vmatprep.subr.bf16.mxu0 %v18277_v30  ;;  %12264 = vmatprep.subr.bf16.mxu1 %v18280_v31  ;;  %v18333_v30 = vld [vmem:[#allocation5 + $0x3380] ss:$36 sps:$4 sm:$0xff]  }
 0x304   :  { %v18338_v31 = vld [vmem:[#allocation5 + $0x33c4] ss:$36 sps:$4 sm:$0xff]  }
 0x306   :  { %11732 = vmatpush1.bf16.msra.mxu0 %v18275_v35  ;;  %12265 = vmatpush1.bf16.msra.mxu1 %v18278_v36  ;;  %v18341_v35 = vld [vmem:[#allocation5 + $0x33cc] ss:$36 sps:$4 sm:$0xff]   ;;  %v18336_v36 = vld [vmem:[#allocation5 + $0x33c0] ss:$36 sps:$4 sm:$0xff]  }
 0x307   :  { %11733 = vmatprep.subr.bf16.mxu0 %v18283_v38  ;;  %12266 = vmatprep.subr.bf16.mxu1 %v18286_v16  ;;  %v18339_v38 = vld [vmem:[#allocation5 + $0x33c8] ss:$36 sps:$4 sm:$0xff]  }
 0x308   :  { %v18344_v16 = vld [vmem:[#allocation5 + $0x340c] ss:$36 sps:$4 sm:$0xff]  }
 0x30a   :  { %11734 = vmatpush1.bf16.msra.mxu0 %v18281_v55  ;;  %12267 = vmatpush1.bf16.msra.mxu1 %v18284_v41  ;;  %v18347_v55 = vld [vmem:[#allocation5 + $0x3414] ss:$36 sps:$4 sm:$0xff]   ;;  %v18342_v41 = vld [vmem:[#allocation5 + $0x3408] ss:$36 sps:$4 sm:$0xff]  }
 0x30b   :  { %11744 = vmatprep.subr.bf16.mxu0 %v18290_v43  ;;  %12277 = vmatprep.subr.bf16.mxu1 %v18293_v44  ;;  %v18345_v43 = vld [vmem:[#allocation5 + $0x3410] ss:$36 sps:$4 sm:$0xff]  }
 0x30c   :  { %v18350_v44 = vld [vmem:[#allocation5 + $0x3454] ss:$36 sps:$4 sm:$0xff]  }
 0x30d   :  { %11736 = vmatmul.mubr.bf16.vlgmr.msra.gmra.mrb[0].mxu0 %v20222_v46  ;;  %12269 = vmatmul.mubr.bf16.vlgmr.msra.gmra.mrb[0].mxu1 %v20222_v46 }
 0x30e   :  { %11745 = vmatpush1.bf16.msra.mxu0 %v18288_v10  ;;  %12278 = vmatpush1.bf16.msra.mxu1 %v18291_v48  ;;  %v18353_v10 = vld [vmem:[#allocation5 + $0x345c] ss:$36 sps:$4 sm:$0xff]   ;;  %v18348_v48 = vld [vmem:[#allocation5 + $0x3450] ss:$36 sps:$4 sm:$0xff]  }
 0x30f   :  { %11746 = vmatprep.subr.bf16.mxu0 %v18296_v50  ;;  %12279 = vmatprep.subr.bf16.mxu1 %v18299_v53  ;;  %v18351_v50 = vld [vmem:[#allocation5 + $0x3458] ss:$36 sps:$4 sm:$0xff]  }
 0x310   :  { %11776 = vmatprep.mubr.bf16.mxu0 %v20226_v54  ;;  %12309 = vmatprep.mubr.bf16.mxu1 %v20226_v54  ;;  %v18356_v53 = vld [vmem:[#allocation5 + $0x349c] ss:$36 sps:$4 sm:$0xff]  }
 0x312   :  { %11747 = vmatpush1.bf16.msra.mxu0 %v18294_v63  ;;  %12280 = vmatpush1.bf16.msra.mxu1 %v18297_v56  ;;  %v18359_v63 = vld [vmem:[#allocation5 + $0x34a4] ss:$36 sps:$4 sm:$0xff]   ;;  %v18354_v56 = vld [vmem:[#allocation5 + $0x3498] ss:$36 sps:$4 sm:$0xff]  }
 0x313   :  { %11748 = vmatprep.subr.bf16.mxu0 %v18302_v57  ;;  %12281 = vmatprep.subr.bf16.mxu1 %v18305_v58  ;;  %v18357_v57 = vld [vmem:[#allocation5 + $0x34a0] ss:$36 sps:$4 sm:$0xff]  }
 0x314   :  { %v18362_v58 = vld [vmem:[#allocation5 + $0x34e4] ss:$36 sps:$4 sm:$0xff]  }
 0x316   :  { %11749 = vmatpush1.bf16.msra.mxu0 %v18300_v59  ;;  %12282 = vmatpush1.bf16.msra.mxu1 %v18303_v61  ;;  %v18365_v59 = vld [vmem:[#allocation5 + $0x34ec] ss:$36 sps:$4 sm:$0xff]   ;;  %v18360_v61 = vld [vmem:[#allocation5 + $0x34e0] ss:$36 sps:$4 sm:$0xff]  }
 0x317   :  { %11750 = vmatprep.subr.bf16.mxu0 %v18308_v0  ;;  %12283 = vmatprep.subr.bf16.mxu1 %v18311_v1  ;;  %v18363_v0 = vld [vmem:[#allocation5 + $0x34e8] ss:$36 sps:$4 sm:$0xff]  }
 0x318   :  { %v18368_v1 = vld [vmem:[#allocation5 + $0x352c] ss:$36 sps:$4 sm:$0xff]  }
 0x31a   :  { %11751 = vmatpush1.bf16.msra.mxu0 %v18306_v2  ;;  %12284 = vmatpush1.bf16.msra.mxu1 %v18309_v4  ;;  %v18371_v2 = vld [vmem:[#allocation5 + $0x3534] ss:$36 sps:$4 sm:$0xff]   ;;  %v18366_v4 = vld [vmem:[#allocation5 + $0x3528] ss:$36 sps:$4 sm:$0xff]  }
 0x31b   :  { %11752 = vmatprep.subr.bf16.mxu0 %v18314_v5  ;;  %12285 = vmatprep.subr.bf16.mxu1 %v18317_v7  ;;  %v18369_v5 = vld [vmem:[#allocation5 + $0x3530] ss:$36 sps:$4 sm:$0xff]  }
 0x31c   :  { %v18374_v7 = vld [vmem:[#allocation5 + $0x3574] ss:$36 sps:$4 sm:$0xff]  }
 0x31e   :  { %11753 = vmatpush1.bf16.msra.mxu0 %v18312_v9  ;;  %12286 = vmatpush1.bf16.msra.mxu1 %v18315_v11  ;;  %v18377_v9 = vld [vmem:[#allocation5 + $0x357c] ss:$36 sps:$4 sm:$0xff]   ;;  %v18372_v11 = vld [vmem:[#allocation5 + $0x3570] ss:$36 sps:$4 sm:$0xff]  }
 0x31f   :  { %11754 = vmatprep.subr.bf16.mxu0 %v18320_v12  ;;  %12287 = vmatprep.subr.bf16.mxu1 %v18323_v15  ;;  %v18375_v12 = vld [vmem:[#allocation5 + $0x3578] ss:$36 sps:$4 sm:$0xff]  }
 0x320   :  { %v18380_v15 = vld [vmem:[#allocation5 + $0x35bc] ss:$36 sps:$4 sm:$0xff]  }
 0x322   :  { %11755 = vmatpush1.bf16.msra.mxu0 %v18318_v18  ;;  %12288 = vmatpush1.bf16.msra.mxu1 %v18321_v20  ;;  %v18383_v18 = vld [vmem:[#allocation5 + $0x35c4] ss:$36 sps:$4 sm:$0xff]   ;;  %v18378_v20 = vld [vmem:[#allocation5 + $0x35b8] ss:$36 sps:$4 sm:$0xff]  }
 0x323   :  { %11756 = vmatprep.subr.bf16.mxu0 %v18326_v21  ;;  %12289 = vmatprep.subr.bf16.mxu1 %v18329_v52  ;;  %v18381_v21 = vld [vmem:[#allocation5 + $0x35c0] ss:$36 sps:$4 sm:$0xff]  }
 0x324   :  { %v18386_v52 = vld [vmem:[#allocation5 + $0x3604] ss:$36 sps:$4 sm:$0xff]  }
 0x326   :  { %11757 = vmatpush1.bf16.msra.mxu0 %v18324_v22  ;;  %12290 = vmatpush1.bf16.msra.mxu1 %v18327_v25  ;;  %v18389_v22 = vld [vmem:[#allocation5 + $0x360c] ss:$36 sps:$4 sm:$0xff]   ;;  %v20234_v25 = vcombine.high %v20222_v46, %v20222_v46 }
 0x327   :  { %11758 = vmatprep.subr.bf16.mxu0 %v18332_v26  ;;  %12291 = vmatprep.subr.bf16.mxu1 %v18335_v28  ;;  %v18384_v26 = vld [vmem:[#allocation5 + $0x3600] ss:$36 sps:$4 sm:$0xff]   ;;  %v18387_v28 = vld [vmem:[#allocation5 + $0x3608] ss:$36 sps:$4 sm:$0xff]  }
 0x32a   :  { %11759 = vmatpush1.bf16.msra.mxu0 %v18330_v29  ;;  %12292 = vmatpush1.bf16.msra.mxu1 %v18333_v30  ;;  %v18392_v29 = vld [vmem:[#allocation5 + $0x364c] ss:$36 sps:$4 sm:$0xff]   ;;  %v18395_v30 = vld [vmem:[#allocation5 + $0x3654] ss:$36 sps:$4 sm:$0xff]  }
 0x32b   :  { %11760 = vmatprep.subr.bf16.mxu0 %v18338_v31  ;;  %12293 = vmatprep.subr.bf16.mxu1 %v18341_v35  ;;  %v18390_v31 = vld [vmem:[#allocation5 + $0x3648] ss:$36 sps:$4 sm:$0xff]   ;;  %v18393_v35 = vld [vmem:[#allocation5 + $0x3650] ss:$36 sps:$4 sm:$0xff]  }
 0x32e   :  { %11761 = vmatpush1.bf16.msra.mxu0 %v18336_v36  ;;  %12294 = vmatpush1.bf16.msra.mxu1 %v18339_v38  ;;  %v18398_v36 = vld [vmem:[#allocation5 + $0x3694] ss:$36 sps:$4 sm:$0xff]   ;;  %v18401_v38 = vld [vmem:[#allocation5 + $0x369c] ss:$36 sps:$4 sm:$0xff]  }
 0x32f   :  { %11762 = vmatprep.subr.bf16.mxu0 %v18344_v16  ;;  %12295 = vmatprep.subr.bf16.mxu1 %v18347_v55  ;;  %v19985_v16 = vmov 0   ;;  %v18396_v55 = vld [vmem:[#allocation5 + $0x3690] ss:$36 sps:$4 sm:$0xff]  }
 0x332   :  { %11763 = vmatpush1.bf16.msra.mxu0 %v18342_v41  ;;  %12296 = vmatpush1.bf16.msra.mxu1 %v18345_v43  ;;  %v18399_v41 = vld [vmem:[#allocation5 + $0x3698] ss:$36 sps:$4 sm:$0xff]  }
 0x333   :  { %11764 = vmatprep.subr.bf16.mxu0 %v18350_v44  ;;  %12297 = vmatprep.subr.bf16.mxu1 %v18353_v10  ;;  %v18404_v43 = vld [vmem:[#allocation5 + $0x36dc] ss:$36 sps:$4 sm:$0xff]   ;;  %v18407_v44 = vld [vmem:[#allocation5 + $0x36e4] ss:$36 sps:$4 sm:$0xff]  }
 0x334   :  { %v18402_v10 = vld [vmem:[#allocation5 + $0x36d8] ss:$36 sps:$4 sm:$0xff]  }
 0x336   :  { %11765 = vmatpush1.bf16.msra.mxu0 %v18348_v48  ;;  %12298 = vmatpush1.bf16.msra.mxu1 %v18351_v50  ;;  %v18405_v48 = vld [vmem:[#allocation5 + $0x36e0] ss:$36 sps:$4 sm:$0xff]   ;;  %v14777_v50 = vld.sshfl [vmem:[#allocation2 + $0x18] sm:$0x1 pattern:$0x75316420] }
 0x337   :  { %11766 = vmatprep.subr.bf16.mxu0 %v18356_v53  ;;  %12299 = vmatprep.subr.bf16.mxu1 %v18359_v63  ;;  %v18410_v53 = vld [vmem:[#allocation5 + $0x14] ss:$36 sps:$4 sm:$0xff]   ;;  %v18413_v63 = vld [vmem:[#allocation5 + $0x1c] ss:$36 sps:$4 sm:$0xff]  }
 0x33a   :  { %11767 = vmatpush1.bf16.msra.mxu0 %v18354_v56  ;;  %12300 = vmatpush1.bf16.msra.mxu1 %v18357_v57  ;;  %v20241_v56 = vrot.slane %v14777_v50, %v20070_v49  ;;  %v18408_v57 = vld [vmem:[#allocation5 + $0x10] ss:$36 sps:$4 sm:$0xff]   ;;  %v18417_v49 = vld [vmem:[#allocation5 + $0x60] ss:$36 sps:$4 sm:$0xff]  }
 0x33b   :  { %11768 = vmatprep.subr.bf16.mxu0 %v18362_v58  ;;  %12301 = vmatprep.subr.bf16.mxu1 %v18365_v59  ;;  %v18411_v58 = vld [vmem:[#allocation5 + $0x18] ss:$36 sps:$4 sm:$0xff]  }
 0x33c   :  { %v18416_v59 = vld [vmem:[#allocation5 + $0x5c] ss:$36 sps:$4 sm:$0xff]  }
 0x33d   :  { %v18464_v50 = vld [vmem:[#allocation5 + $0x29c] ss:$36 sps:$4 sm:$0xff]  }
 0x33e   :  { %11769 = vmatpush1.bf16.msra.mxu0 %v18360_v61  ;;  %12302 = vmatpush1.bf16.msra.mxu1 %v18363_v0  ;;  %v18419_v61 = vld [vmem:[#allocation5 + $0x64] ss:$36 sps:$4 sm:$0xff]   ;;  %v18414_v0 = vld [vmem:[#allocation5 + $0x58] ss:$36 sps:$4 sm:$0xff]  }
 0x33f   :  { %11770 = vmatprep.subr.bf16.mxu0 %v18368_v1  ;;  %12303 = vmatprep.subr.bf16.mxu1 %v18371_v2  ;;  %v18422_v1 = vld [vmem:[#allocation5 + $0xa4] ss:$36 sps:$4 sm:$0xff]   ;;  %v18425_v2 = vld [vmem:[#allocation5 + $0xac] ss:$36 sps:$4 sm:$0xff]  }
 0x342   :  { %11771 = vmatpush1.bf16.msra.mxu0 %v18366_v4  ;;  %12304 = vmatpush1.bf16.msra.mxu1 %v18369_v5  ;;  %v18420_v4 = vld [vmem:[#allocation5 + $0xa0] ss:$36 sps:$4 sm:$0xff]   ;;  %v18423_v5 = vld [vmem:[#allocation5 + $0xa8] ss:$36 sps:$4 sm:$0xff]  }
 0x343   :  { %11772 = vmatprep.subr.bf16.mxu0 %v18374_v7  ;;  %12305 = vmatprep.subr.bf16.mxu1 %v18377_v9  ;;  %v18428_v7 = vld [vmem:[#allocation5 + $0xec] ss:$36 sps:$4 sm:$0xff]   ;;  %v18431_v9 = vld [vmem:[#allocation5 + $0xf4] ss:$36 sps:$4 sm:$0xff]  }
 0x346   :  { %11773 = vmatpush1.bf16.msra.mxu0 %v18372_v11  ;;  %12306 = vmatpush1.bf16.msra.mxu1 %v18375_v12  ;;  %v18426_v11 = vld [vmem:[#allocation5 + $0xe8] ss:$36 sps:$4 sm:$0xff]   ;;  %v18429_v12 = vld [vmem:[#allocation5 + $0xf0] ss:$36 sps:$4 sm:$0xff]  }
 0x347   :  { %11774 = vmatprep.subr.bf16.mxu0 %v18380_v15  ;;  %12307 = vmatprep.subr.bf16.mxu1 %v18383_v18  ;;  %v18434_v15 = vld [vmem:[#allocation5 + $0x134] ss:$36 sps:$4 sm:$0xff]   ;;  %v18437_v18 = vld [vmem:[#allocation5 + $0x13c] ss:$36 sps:$4 sm:$0xff]  }
 0x34a   :  { %11775 = vmatpush1.bf16.msra.mxu0 %v18378_v20  ;;  %12308 = vmatpush1.bf16.msra.mxu1 %v18381_v21  ;;  %v18432_v20 = vld [vmem:[#allocation5 + $0x130] ss:$36 sps:$4 sm:$0xff]   ;;  %v18435_v21 = vld [vmem:[#allocation5 + $0x138] ss:$36 sps:$4 sm:$0xff]  }
 0x34b   :  { %11785 = vmatprep.subr.bf16.mxu0 %v18386_v52  ;;  %12318 = vmatprep.subr.bf16.mxu1 %v18389_v22  ;;  %v18440_v52 = vld [vmem:[#allocation5 + $0x17c] ss:$36 sps:$4 sm:$0xff]   ;;  %v18443_v22 = vld [vmem:[#allocation5 + $0x184] ss:$36 sps:$4 sm:$0xff]  }
 0x34d   :  { %11777 = vmatmul.mubr.bf16.vlgmr.msra.gmra.mrb[0].mxu0 %v20234_v25  ;;  %12310 = vmatmul.mubr.bf16.vlgmr.msra.gmra.mrb[0].mxu1 %v20234_v25 }
 0x34e   :  { %11786 = vmatpush1.bf16.msra.mxu0 %v18384_v26  ;;  %12319 = vmatpush1.bf16.msra.mxu1 %v18387_v28  ;;  %v18438_v26 = vld [vmem:[#allocation5 + $0x178] ss:$36 sps:$4 sm:$0xff]   ;;  %v18441_v28 = vld [vmem:[#allocation5 + $0x180] ss:$36 sps:$4 sm:$0xff]  }
 0x34f   :  { %11787 = vmatprep.subr.bf16.mxu0 %v18392_v29  ;;  %12320 = vmatprep.subr.bf16.mxu1 %v18395_v30  ;;  %v18446_v29 = vld [vmem:[#allocation5 + $0x1c4] ss:$36 sps:$4 sm:$0xff]   ;;  %v18449_v30 = vld [vmem:[#allocation5 + $0x1cc] ss:$36 sps:$4 sm:$0xff]  }
 0x350   :  { %11817 = vmatprep.mubr.bf16.mxu0 %v19985_v16  ;;  %12350 = vmatprep.mubr.bf16.mxu1 %v19985_v16 }
 0x352   :  { %11788 = vmatpush1.bf16.msra.mxu0 %v18390_v31  ;;  %12321 = vmatpush1.bf16.msra.mxu1 %v18393_v35  ;;  %v18444_v31 = vld [vmem:[#allocation5 + $0x1c0] ss:$36 sps:$4 sm:$0xff]   ;;  %v18447_v35 = vld [vmem:[#allocation5 + $0x1c8] ss:$36 sps:$4 sm:$0xff]  }
 0x353   :  { %11789 = vmatprep.subr.bf16.mxu0 %v18398_v36  ;;  %12322 = vmatprep.subr.bf16.mxu1 %v18401_v38  ;;  %v18452_v36 = vld [vmem:[#allocation5 + $0x20c] ss:$36 sps:$4 sm:$0xff]   ;;  %v18455_v38 = vld [vmem:[#allocation5 + $0x214] ss:$36 sps:$4 sm:$0xff]  }
 0x356   :  { %11790 = vmatpush1.bf16.msra.mxu0 %v18396_v55  ;;  %12323 = vmatpush1.bf16.msra.mxu1 %v18399_v41  ;;  %v18450_v55 = vld [vmem:[#allocation5 + $0x208] ss:$36 sps:$4 sm:$0xff]   ;;  %v18453_v41 = vld [vmem:[#allocation5 + $0x210] ss:$36 sps:$4 sm:$0xff]  }
 0x357   :  { %11791 = vmatprep.subr.bf16.mxu0 %v18404_v43  ;;  %12324 = vmatprep.subr.bf16.mxu1 %v18407_v44  ;;  %v18458_v43 = vld [vmem:[#allocation5 + $0x254] ss:$36 sps:$4 sm:$0xff]   ;;  %v18461_v44 = vld [vmem:[#allocation5 + $0x25c] ss:$36 sps:$4 sm:$0xff]  }
 0x35a   :  { %11792 = vmatpush1.bf16.msra.mxu0 %v18402_v10  ;;  %12325 = vmatpush1.bf16.msra.mxu1 %v18405_v48  ;;  %v18456_v10 = vld [vmem:[#allocation5 + $0x250] ss:$36 sps:$4 sm:$0xff]   ;;  %v18459_v48 = vld [vmem:[#allocation5 + $0x258] ss:$36 sps:$4 sm:$0xff]  }
 0x35b   :  { %12359 = vmatprep.subr.bf16.mxu0 %v18410_v53  ;;  %12892 = vmatprep.subr.bf16.mxu1 %v18413_v63  ;;  %v18467_v53 = vld [vmem:[#allocation5 + $0x2a4] ss:$36 sps:$4 sm:$0xff]   ;;  %v18462_v63 = vld [vmem:[#allocation5 + $0x298] ss:$36 sps:$4 sm:$0xff]  }
 0x35d   :  { %16542 = vmatmul.mubr.msk.bf16.vlgmr.msra.gmra.mrb[0].mxu0 %vm11289_vm0, %v20241_v56  ;;  %16543 = vmatmul.mubr.msk.bf16.vlgmr.msra.gmra.mrb[0].mxu1 %vm11289_vm0, %v20241_v56 }
 0x35e   :  { %12360 = vmatpush1.bf16.msra.mxu0 %v18408_v57  ;;  %12893 = vmatpush1.bf16.msra.mxu1 %v18411_v58  ;;  %v18465_v57 = vld [vmem:[#allocation5 + $0x2a0] ss:$36 sps:$4 sm:$0xff]  }
 0x35f   :  { %12361 = vmatprep.subr.bf16.mxu0 %v18416_v59  ;;  %12894 = vmatprep.subr.bf16.mxu1 %v18419_v61  ;;  %v18470_v58 = vld [vmem:[#allocation5 + $0x2e4] ss:$36 sps:$4 sm:$0xff]   ;;  %v18473_v59 = vld [vmem:[#allocation5 + $0x2ec] ss:$36 sps:$4 sm:$0xff]  }
 0x360   :  { %12391 = vmatprep.mubr.bf16.mxu0 %v20077_v60  ;;  %12924 = vmatprep.mubr.bf16.mxu1 %v20077_v60  ;;  %v18468_v61 = vld [vmem:[#allocation5 + $0x2e0] ss:$36 sps:$4 sm:$0xff]  }
 0x362   :  { %12362 = vmatpush1.bf16.msra.mxu0 %v18414_v0  ;;  %12895 = vmatpush1.bf16.msra.mxu1 %v18417_v49  ;;  %v18471_v0 = vld [vmem:[#allocation5 + $0x2e8] ss:$36 sps:$4 sm:$0xff]  }
 0x363   :  { %12363 = vmatprep.subr.bf16.mxu0 %v18422_v1  ;;  %12896 = vmatprep.subr.bf16.mxu1 %v18425_v2  ;;  %v18476_v49 = vld [vmem:[#allocation5 + $0x32c] ss:$36 sps:$4 sm:$0xff]   ;;  %v18479_v1 = vld [vmem:[#allocation5 + $0x334] ss:$36 sps:$4 sm:$0xff]  }
 0x364   :  { %v18474_v2 = vld [vmem:[#allocation5 + $0x328] ss:$36 sps:$4 sm:$0xff]  }
 0x366   :  { %12364 = vmatpush1.bf16.msra.mxu0 %v18420_v4  ;;  %12897 = vmatpush1.bf16.msra.mxu1 %v18423_v5  ;;  %v18477_v4 = vld [vmem:[#allocation5 + $0x330] ss:$36 sps:$4 sm:$0xff]  }
 0x367   :  { %12365 = vmatprep.subr.bf16.mxu0 %v18428_v7  ;;  %12898 = vmatprep.subr.bf16.mxu1 %v18431_v9  ;;  %v18482_v5 = vld [vmem:[#allocation5 + $0x374] ss:$36 sps:$4 sm:$0xff]   ;;  %v18485_v7 = vld [vmem:[#allocation5 + $0x37c] ss:$36 sps:$4 sm:$0xff]  }
 0x368   :  { %v18480_v9 = vld [vmem:[#allocation5 + $0x370] ss:$36 sps:$4 sm:$0xff]  }
 0x36a   :  { %12366 = vmatpush1.bf16.msra.mxu0 %v18426_v11  ;;  %12899 = vmatpush1.bf16.msra.mxu1 %v18429_v12  ;;  %v18483_v11 = vld [vmem:[#allocation5 + $0x378] ss:$36 sps:$4 sm:$0xff]  }
 0x36b   :  { %12367 = vmatprep.subr.bf16.mxu0 %v18434_v15  ;;  %12900 = vmatprep.subr.bf16.mxu1 %v18437_v18  ;;  %v18488_v12 = vld [vmem:[#allocation5 + $0x3bc] ss:$36 sps:$4 sm:$0xff]   ;;  %v18491_v15 = vld [vmem:[#allocation5 + $0x3c4] ss:$36 sps:$4 sm:$0xff]  }
 0x36c   :  { %v18486_v18 = vld [vmem:[#allocation5 + $0x3b8] ss:$36 sps:$4 sm:$0xff]  }
 0x36e   :  { %12368 = vmatpush1.bf16.msra.mxu0 %v18432_v20  ;;  %12901 = vmatpush1.bf16.msra.mxu1 %v18435_v21  ;;  %v18489_v20 = vld [vmem:[#allocation5 + $0x3c0] ss:$36 sps:$4 sm:$0xff]  }
 0x36f   :  { %12369 = vmatprep.subr.bf16.mxu0 %v18440_v52  ;;  %12902 = vmatprep.subr.bf16.mxu1 %v18443_v22  ;;  %v18494_v21 = vld [vmem:[#allocation5 + $0x404] ss:$36 sps:$4 sm:$0xff]   ;;  %v18497_v52 = vld [vmem:[#allocation5 + $0x40c] ss:$36 sps:$4 sm:$0xff]  }
 0x370   :  { %v18492_v22 = vld [vmem:[#allocation5 + $0x400] ss:$36 sps:$4 sm:$0xff]  }
 0x372   :  { %12370 = vmatpush1.bf16.msra.mxu0 %v18438_v26  ;;  %12903 = vmatpush1.bf16.msra.mxu1 %v18441_v28  ;;  %v18495_v26 = vld [vmem:[#allocation5 + $0x408] ss:$36 sps:$4 sm:$0xff]  }
 0x373   :  { %12371 = vmatprep.subr.bf16.mxu0 %v18446_v29  ;;  %12904 = vmatprep.subr.bf16.mxu1 %v18449_v30  ;;  %v18500_v28 = vld [vmem:[#allocation5 + $0x44c] ss:$36 sps:$4 sm:$0xff]   ;;  %v18503_v29 = vld [vmem:[#allocation5 + $0x454] ss:$36 sps:$4 sm:$0xff]  }
 0x374   :  { %v18498_v30 = vld [vmem:[#allocation5 + $0x448] ss:$36 sps:$4 sm:$0xff]  }
 0x376   :  { %12372 = vmatpush1.bf16.msra.mxu0 %v18444_v31  ;;  %12905 = vmatpush1.bf16.msra.mxu1 %v18447_v35  ;;  %v18501_v31 = vld [vmem:[#allocation5 + $0x450] ss:$36 sps:$4 sm:$0xff]  }
 0x377   :  { %12373 = vmatprep.subr.bf16.mxu0 %v18452_v36  ;;  %12906 = vmatprep.subr.bf16.mxu1 %v18455_v38  ;;  %v18506_v35 = vld [vmem:[#allocation5 + $0x494] ss:$36 sps:$4 sm:$0xff]   ;;  %v18509_v36 = vld [vmem:[#allocation5 + $0x49c] ss:$36 sps:$4 sm:$0xff]  }
 0x378   :  { %v18504_v38 = vld [vmem:[#allocation5 + $0x490] ss:$36 sps:$4 sm:$0xff]  }
 0x37a   :  { %12374 = vmatpush1.bf16.msra.mxu0 %v18450_v55  ;;  %12907 = vmatpush1.bf16.msra.mxu1 %v18453_v41  ;;  %v18507_v55 = vld [vmem:[#allocation5 + $0x498] ss:$36 sps:$4 sm:$0xff]  }
 0x37b   :  { %12375 = vmatprep.subr.bf16.mxu0 %v18458_v43  ;;  %12908 = vmatprep.subr.bf16.mxu1 %v18461_v44  ;;  %v18512_v41 = vld [vmem:[#allocation5 + $0x4dc] ss:$36 sps:$4 sm:$0xff]   ;;  %v18515_v43 = vld [vmem:[#allocation5 + $0x4e4] ss:$36 sps:$4 sm:$0xff]  }
 0x37c   :  { %v18510_v44 = vld [vmem:[#allocation5 + $0x4d8] ss:$36 sps:$4 sm:$0xff]  }
 0x37e   :  { %12376 = vmatpush1.bf16.msra.mxu0 %v18456_v10  ;;  %12909 = vmatpush1.bf16.msra.mxu1 %v18459_v48  ;;  %v18513_v10 = vld [vmem:[#allocation5 + $0x4e0] ss:$36 sps:$4 sm:$0xff]  }
 0x37f   :  { %12377 = vmatprep.subr.bf16.mxu0 %v18464_v50  ;;  %12910 = vmatprep.subr.bf16.mxu1 %v18467_v53  ;;  %v18518_v48 = vld [vmem:[#allocation5 + $0x524] ss:$36 sps:$4 sm:$0xff]   ;;  %v18521_v50 = vld [vmem:[#allocation5 + $0x52c] ss:$36 sps:$4 sm:$0xff]  }
 0x380   :  { %v18516_v53 = vld [vmem:[#allocation5 + $0x520] ss:$36 sps:$4 sm:$0xff]  }
 0x382   :  { %12378 = vmatpush1.bf16.msra.mxu0 %v18462_v63  ;;  %12911 = vmatpush1.bf16.msra.mxu1 %v18465_v57  ;;  %v18519_v63 = vld [vmem:[#allocation5 + $0x528] ss:$36 sps:$4 sm:$0xff]  }
 0x383   :  { %12379 = vmatprep.subr.bf16.mxu0 %v18470_v58  ;;  %12912 = vmatprep.subr.bf16.mxu1 %v18473_v59  ;;  %v18524_v57 = vld [vmem:[#allocation5 + $0x56c] ss:$36 sps:$4 sm:$0xff]   ;;  %v18527_v58 = vld [vmem:[#allocation5 + $0x574] ss:$36 sps:$4 sm:$0xff]  }
 0x384   :  { %v18522_v59 = vld [vmem:[#allocation5 + $0x568] ss:$36 sps:$4 sm:$0xff]  }
 0x386   :  { %12380 = vmatpush1.bf16.msra.mxu0 %v18468_v61  ;;  %12913 = vmatpush1.bf16.msra.mxu1 %v18471_v0  ;;  %v18525_v61 = vld [vmem:[#allocation5 + $0x570] ss:$36 sps:$4 sm:$0xff]  }
 0x387   :  { %12381 = vmatprep.subr.bf16.mxu0 %v18476_v49  ;;  %12914 = vmatprep.subr.bf16.mxu1 %v18479_v1  ;;  %v18530_v0 = vld [vmem:[#allocation5 + $0x5b4] ss:$36 sps:$4 sm:$0xff]   ;;  %v18533_v49 = vld [vmem:[#allocation5 + $0x5bc] ss:$36 sps:$4 sm:$0xff]  }
 0x388   :  { %v18528_v1 = vld [vmem:[#allocation5 + $0x5b0] ss:$36 sps:$4 sm:$0xff]  }
 0x38a   :  { %12382 = vmatpush1.bf16.msra.mxu0 %v18474_v2  ;;  %12915 = vmatpush1.bf16.msra.mxu1 %v18477_v4  ;;  %v18531_v2 = vld [vmem:[#allocation5 + $0x5b8] ss:$36 sps:$4 sm:$0xff]  }
 0x38b   :  { %12383 = vmatprep.subr.bf16.mxu0 %v18482_v5  ;;  %12916 = vmatprep.subr.bf16.mxu1 %v18485_v7  ;;  %v18536_v4 = vld [vmem:[#allocation5 + $0x5fc] ss:$36 sps:$4 sm:$0xff]   ;;  %v18539_v5 = vld [vmem:[#allocation5 + $0x604] ss:$36 sps:$4 sm:$0xff]  }
 0x38c   :  { %v18534_v7 = vld [vmem:[#allocation5 + $0x5f8] ss:$36 sps:$4 sm:$0xff]  }
 0x38e   :  { %12384 = vmatpush1.bf16.msra.mxu0 %v18480_v9  ;;  %12917 = vmatpush1.bf16.msra.mxu1 %v18483_v11  ;;  %v18537_v9 = vld [vmem:[#allocation5 + $0x600] ss:$36 sps:$4 sm:$0xff]  }
 0x38f   :  { %12385 = vmatprep.subr.bf16.mxu0 %v18488_v12  ;;  %12918 = vmatprep.subr.bf16.mxu1 %v18491_v15  ;;  %v18542_v11 = vld [vmem:[#allocation5 + $0x644] ss:$36 sps:$4 sm:$0xff]   ;;  %v18545_v12 = vld [vmem:[#allocation5 + $0x64c] ss:$36 sps:$4 sm:$0xff]  }
 0x390   :  { %v18540_v15 = vld [vmem:[#allocation5 + $0x640] ss:$36 sps:$4 sm:$0xff]  }
 0x392   :  { %12386 = vmatpush1.bf16.msra.mxu0 %v18486_v18  ;;  %12919 = vmatpush1.bf16.msra.mxu1 %v18489_v20  ;;  %v18543_v18 = vld [vmem:[#allocation5 + $0x648] ss:$36 sps:$4 sm:$0xff]  }
 0x393   :  { %12387 = vmatprep.subr.bf16.mxu0 %v18494_v21  ;;  %12920 = vmatprep.subr.bf16.mxu1 %v18497_v52  ;;  %v18548_v20 = vld [vmem:[#allocation5 + $0x68c] ss:$36 sps:$4 sm:$0xff]   ;;  %v18551_v21 = vld [vmem:[#allocation5 + $0x694] ss:$36 sps:$4 sm:$0xff]  }
 0x394   :  { %v18546_v52 = vld [vmem:[#allocation5 + $0x688] ss:$36 sps:$4 sm:$0xff]  }
 0x396   :  { %12388 = vmatpush1.bf16.msra.mxu0 %v18492_v22  ;;  %12921 = vmatpush1.bf16.msra.mxu1 %v18495_v26  ;;  %v18549_v22 = vld [vmem:[#allocation5 + $0x690] ss:$36 sps:$4 sm:$0xff]  }
 0x397   :  { %12389 = vmatprep.subr.bf16.mxu0 %v18500_v28  ;;  %12922 = vmatprep.subr.bf16.mxu1 %v18503_v29  ;;  %v18554_v26 = vld [vmem:[#allocation5 + $0x6d4] ss:$36 sps:$4 sm:$0xff]   ;;  %v18557_v28 = vld [vmem:[#allocation5 + $0x6dc] ss:$36 sps:$4 sm:$0xff]  }
 0x398   :  { %v18552_v29 = vld [vmem:[#allocation5 + $0x6d0] ss:$36 sps:$4 sm:$0xff]  }
 0x39a   :  { %12390 = vmatpush1.bf16.msra.mxu0 %v18498_v30  ;;  %12923 = vmatpush1.bf16.msra.mxu1 %v18501_v31  ;;  %v18555_v30 = vld [vmem:[#allocation5 + $0x6d8] ss:$36 sps:$4 sm:$0xff]  }
 0x39b   :  { %12400 = vmatprep.subr.bf16.mxu0 %v18506_v35  ;;  %12933 = vmatprep.subr.bf16.mxu1 %v18509_v36  ;;  %v18560_v31 = vld [vmem:[#allocation5 + $0x71c] ss:$36 sps:$4 sm:$0xff]   ;;  %v18563_v35 = vld [vmem:[#allocation5 + $0x724] ss:$36 sps:$4 sm:$0xff]  }
 0x39c   :  { %v18558_v36 = vld [vmem:[#allocation5 + $0x718] ss:$36 sps:$4 sm:$0xff]  }
 0x39d   :  { %12392 = vmatmul.mubr.bf16.vlgmr.msra.gmra.mrb[4].mxu0 %v20082_v13  ;;  %12925 = vmatmul.mubr.bf16.vlgmr.msra.gmra.mrb[4].mxu1 %v20082_v13 }
 0x39e   :  { %12401 = vmatpush1.bf16.msra.mxu0 %v18504_v38  ;;  %12934 = vmatpush1.bf16.msra.mxu1 %v18507_v55  ;;  %v18561_v38 = vld [vmem:[#allocation5 + $0x720] ss:$36 sps:$4 sm:$0xff]  }
 0x39f   :  { %12402 = vmatprep.subr.bf16.mxu0 %v18512_v41  ;;  %12935 = vmatprep.subr.bf16.mxu1 %v18515_v43  ;;  %v18566_v55 = vld [vmem:[#allocation5 + $0x764] ss:$36 sps:$4 sm:$0xff]   ;;  %v18569_v41 = vld [vmem:[#allocation5 + $0x76c] ss:$36 sps:$4 sm:$0xff]  }
 0x3a0   :  { %12432 = vmatprep.mubr.bf16.mxu0 %v20086_v17  ;;  %12965 = vmatprep.mubr.bf16.mxu1 %v20086_v17  ;;  %v18564_v43 = vld [vmem:[#allocation5 + $0x760] ss:$36 sps:$4 sm:$0xff]  }
 0x3a2   :  { %12403 = vmatpush1.bf16.msra.mxu0 %v18510_v44  ;;  %12936 = vmatpush1.bf16.msra.mxu1 %v18513_v10  ;;  %v18567_v44 = vld [vmem:[#allocation5 + $0x768] ss:$36 sps:$4 sm:$0xff]  }
 0x3a3   :  { %12404 = vmatprep.subr.bf16.mxu0 %v18518_v48  ;;  %12937 = vmatprep.subr.bf16.mxu1 %v18521_v50  ;;  %v18572_v10 = vld [vmem:[#allocation5 + $0x7ac] ss:$36 sps:$4 sm:$0xff]   ;;  %v18575_v48 = vld [vmem:[#allocation5 + $0x7b4] ss:$36 sps:$4 sm:$0xff]  }
 0x3a4   :  { %v18570_v50 = vld [vmem:[#allocation5 + $0x7a8] ss:$36 sps:$4 sm:$0xff]  }
 0x3a6   :  { %12405 = vmatpush1.bf16.msra.mxu0 %v18516_v53  ;;  %12938 = vmatpush1.bf16.msra.mxu1 %v18519_v63  ;;  %v18573_v53 = vld [vmem:[#allocation5 + $0x7b0] ss:$36 sps:$4 sm:$0xff]  }
 0x3a7   :  { %12406 = vmatprep.subr.bf16.mxu0 %v18524_v57  ;;  %12939 = vmatprep.subr.bf16.mxu1 %v18527_v58  ;;  %v18578_v63 = vld [vmem:[#allocation5 + $0x7f4] ss:$36 sps:$4 sm:$0xff]   ;;  %v18581_v57 = vld [vmem:[#allocation5 + $0x7fc] ss:$36 sps:$4 sm:$0xff]  }
 0x3a8   :  { %v18576_v58 = vld [vmem:[#allocation5 + $0x7f0] ss:$36 sps:$4 sm:$0xff]  }
 0x3aa   :  { %12407 = vmatpush1.bf16.msra.mxu0 %v18522_v59  ;;  %12940 = vmatpush1.bf16.msra.mxu1 %v18525_v61  ;;  %v18579_v59 = vld [vmem:[#allocation5 + $0x7f8] ss:$36 sps:$4 sm:$0xff]  }
 0x3ab   :  { %12408 = vmatprep.subr.bf16.mxu0 %v18530_v0  ;;  %12941 = vmatprep.subr.bf16.mxu1 %v18533_v49  ;;  %v18584_v61 = vld [vmem:[#allocation5 + $0x83c] ss:$36 sps:$4 sm:$0xff]   ;;  %v18587_v0 = vld [vmem:[#allocation5 + $0x844] ss:$36 sps:$4 sm:$0xff]  }
 0x3ac   :  { %v18582_v49 = vld [vmem:[#allocation5 + $0x838] ss:$36 sps:$4 sm:$0xff]  }
 0x3ae   :  { %12409 = vmatpush1.bf16.msra.mxu0 %v18528_v1  ;;  %12942 = vmatpush1.bf16.msra.mxu1 %v18531_v2  ;;  %v18585_v1 = vld [vmem:[#allocation5 + $0x840] ss:$36 sps:$4 sm:$0xff]  }
 0x3af   :  { %12410 = vmatprep.subr.bf16.mxu0 %v18536_v4  ;;  %12943 = vmatprep.subr.bf16.mxu1 %v18539_v5  ;;  %v18590_v2 = vld [vmem:[#allocation5 + $0x884] ss:$36 sps:$4 sm:$0xff]   ;;  %v18593_v4 = vld [vmem:[#allocation5 + $0x88c] ss:$36 sps:$4 sm:$0xff]  }
 0x3b0   :  { %v18588_v5 = vld [vmem:[#allocation5 + $0x880] ss:$36 sps:$4 sm:$0xff]  }
 0x3b2   :  { %12411 = vmatpush1.bf16.msra.mxu0 %v18534_v7  ;;  %12944 = vmatpush1.bf16.msra.mxu1 %v18537_v9  ;;  %v18591_v7 = vld [vmem:[#allocation5 + $0x888] ss:$36 sps:$4 sm:$0xff]  }
 0x3b3   :  { %12412 = vmatprep.subr.bf16.mxu0 %v18542_v11  ;;  %12945 = vmatprep.subr.bf16.mxu1 %v18545_v12  ;;  %v18596_v9 = vld [vmem:[#allocation5 + $0x8cc] ss:$36 sps:$4 sm:$0xff]   ;;  %v18599_v11 = vld [vmem:[#allocation5 + $0x8d4] ss:$36 sps:$4 sm:$0xff]  }
 0x3b4   :  { %v18594_v12 = vld [vmem:[#allocation5 + $0x8c8] ss:$36 sps:$4 sm:$0xff]  }
 0x3b6   :  { %12413 = vmatpush1.bf16.msra.mxu0 %v18540_v15  ;;  %12946 = vmatpush1.bf16.msra.mxu1 %v18543_v18  ;;  %v18597_v15 = vld [vmem:[#allocation5 + $0x8d0] ss:$36 sps:$4 sm:$0xff]  }
 0x3b7   :  { %12414 = vmatprep.subr.bf16.mxu0 %v18548_v20  ;;  %12947 = vmatprep.subr.bf16.mxu1 %v18551_v21  ;;  %v18602_v18 = vld [vmem:[#allocation5 + $0x914] ss:$36 sps:$4 sm:$0xff]   ;;  %v18605_v20 = vld [vmem:[#allocation5 + $0x91c] ss:$36 sps:$4 sm:$0xff]  }
 0x3b8   :  { %v18600_v21 = vld [vmem:[#allocation5 + $0x910] ss:$36 sps:$4 sm:$0xff]  }
 0x3ba   :  { %12415 = vmatpush1.bf16.msra.mxu0 %v18546_v52  ;;  %12948 = vmatpush1.bf16.msra.mxu1 %v18549_v22  ;;  %v18603_v52 = vld [vmem:[#allocation5 + $0x918] ss:$36 sps:$4 sm:$0xff]  }
 0x3bb   :  { %12416 = vmatprep.subr.bf16.mxu0 %v18554_v26  ;;  %12949 = vmatprep.subr.bf16.mxu1 %v18557_v28  ;;  %v18608_v22 = vld [vmem:[#allocation5 + $0x95c] ss:$36 sps:$4 sm:$0xff]   ;;  %v18611_v26 = vld [vmem:[#allocation5 + $0x964] ss:$36 sps:$4 sm:$0xff]  }
 0x3bc   :  { %v18606_v28 = vld [vmem:[#allocation5 + $0x958] ss:$36 sps:$4 sm:$0xff]  }
 0x3be   :  { %12417 = vmatpush1.bf16.msra.mxu0 %v18552_v29  ;;  %12950 = vmatpush1.bf16.msra.mxu1 %v18555_v30  ;;  %v18609_v29 = vld [vmem:[#allocation5 + $0x960] ss:$36 sps:$4 sm:$0xff]  }
 0x3bf   :  { %12418 = vmatprep.subr.bf16.mxu0 %v18560_v31  ;;  %12951 = vmatprep.subr.bf16.mxu1 %v18563_v35  ;;  %v18614_v30 = vld [vmem:[#allocation5 + $0x9a4] ss:$36 sps:$4 sm:$0xff]   ;;  %v18617_v31 = vld [vmem:[#allocation5 + $0x9ac] ss:$36 sps:$4 sm:$0xff]  }
 0x3c0   :  { %v18612_v35 = vld [vmem:[#allocation5 + $0x9a0] ss:$36 sps:$4 sm:$0xff]  }
 0x3c2   :  { %12419 = vmatpush1.bf16.msra.mxu0 %v18558_v36  ;;  %12952 = vmatpush1.bf16.msra.mxu1 %v18561_v38  ;;  %v18615_v36 = vld [vmem:[#allocation5 + $0x9a8] ss:$36 sps:$4 sm:$0xff]  }
 0x3c3   :  { %12420 = vmatprep.subr.bf16.mxu0 %v18566_v55  ;;  %12953 = vmatprep.subr.bf16.mxu1 %v18569_v41  ;;  %v18620_v38 = vld [vmem:[#allocation5 + $0x9ec] ss:$36 sps:$4 sm:$0xff]   ;;  %v18623_v55 = vld [vmem:[#allocation5 + $0x9f4] ss:$36 sps:$4 sm:$0xff]  }
 0x3c4   :  { %v18618_v41 = vld [vmem:[#allocation5 + $0x9e8] ss:$36 sps:$4 sm:$0xff]  }
 0x3c6   :  { %12421 = vmatpush1.bf16.msra.mxu0 %v18564_v43  ;;  %12954 = vmatpush1.bf16.msra.mxu1 %v18567_v44  ;;  %v18621_v43 = vld [vmem:[#allocation5 + $0x9f0] ss:$36 sps:$4 sm:$0xff]  }
 0x3c7   :  { %12422 = vmatprep.subr.bf16.mxu0 %v18572_v10  ;;  %12955 = vmatprep.subr.bf16.mxu1 %v18575_v48  ;;  %v18626_v44 = vld [vmem:[#allocation5 + $0xa34] ss:$36 sps:$4 sm:$0xff]   ;;  %v18629_v10 = vld [vmem:[#allocation5 + $0xa3c] ss:$36 sps:$4 sm:$0xff]  }
 0x3c8   :  { %v18624_v48 = vld [vmem:[#allocation5 + $0xa30] ss:$36 sps:$4 sm:$0xff]  }
 0x3ca   :  { %12423 = vmatpush1.bf16.msra.mxu0 %v18570_v50  ;;  %12956 = vmatpush1.bf16.msra.mxu1 %v18573_v53  ;;  %v18627_v50 = vld [vmem:[#allocation5 + $0xa38] ss:$36 sps:$4 sm:$0xff]  }
 0x3cb   :  { %12424 = vmatprep.subr.bf16.mxu0 %v18578_v63  ;;  %12957 = vmatprep.subr.bf16.mxu1 %v18581_v57  ;;  %v18632_v53 = vld [vmem:[#allocation5 + $0xa7c] ss:$36 sps:$4 sm:$0xff]   ;;  %v18635_v63 = vld [vmem:[#allocation5 + $0xa84] ss:$36 sps:$4 sm:$0xff]  }
 0x3cc   :  { %v18630_v57 = vld [vmem:[#allocation5 + $0xa78] ss:$36 sps:$4 sm:$0xff]  }
 0x3ce   :  { %12425 = vmatpush1.bf16.msra.mxu0 %v18576_v58  ;;  %12958 = vmatpush1.bf16.msra.mxu1 %v18579_v59  ;;  %v18633_v58 = vld [vmem:[#allocation5 + $0xa80] ss:$36 sps:$4 sm:$0xff]  }
 0x3cf   :  { %12426 = vmatprep.subr.bf16.mxu0 %v18584_v61  ;;  %12959 = vmatprep.subr.bf16.mxu1 %v18587_v0  ;;  %v18638_v59 = vld [vmem:[#allocation5 + $0xac4] ss:$36 sps:$4 sm:$0xff]   ;;  %v18641_v61 = vld [vmem:[#allocation5 + $0xacc] ss:$36 sps:$4 sm:$0xff]  }
 0x3d0   :  { %v18636_v0 = vld [vmem:[#allocation5 + $0xac0] ss:$36 sps:$4 sm:$0xff]  }
 0x3d2   :  { %12427 = vmatpush1.bf16.msra.mxu0 %v18582_v49  ;;  %12960 = vmatpush1.bf16.msra.mxu1 %v18585_v1  ;;  %v18639_v49 = vld [vmem:[#allocation5 + $0xac8] ss:$36 sps:$4 sm:$0xff]  }
 0x3d3   :  { %12428 = vmatprep.subr.bf16.mxu0 %v18590_v2  ;;  %12961 = vmatprep.subr.bf16.mxu1 %v18593_v4  ;;  %v18644_v1 = vld [vmem:[#allocation5 + $0xb0c] ss:$36 sps:$4 sm:$0xff]   ;;  %v18647_v2 = vld [vmem:[#allocation5 + $0xb14] ss:$36 sps:$4 sm:$0xff]  }
 0x3d4   :  { %v18642_v4 = vld [vmem:[#allocation5 + $0xb08] ss:$36 sps:$4 sm:$0xff]  }
 0x3d6   :  { %12429 = vmatpush1.bf16.msra.mxu0 %v18588_v5  ;;  %12962 = vmatpush1.bf16.msra.mxu1 %v18591_v7  ;;  %v18645_v5 = vld [vmem:[#allocation5 + $0xb10] ss:$36 sps:$4 sm:$0xff]  }
 0x3d7   :  { %12430 = vmatprep.subr.bf16.mxu0 %v18596_v9  ;;  %12963 = vmatprep.subr.bf16.mxu1 %v18599_v11  ;;  %v18650_v7 = vld [vmem:[#allocation5 + $0xb54] ss:$36 sps:$4 sm:$0xff]   ;;  %v18653_v9 = vld [vmem:[#allocation5 + $0xb5c] ss:$36 sps:$4 sm:$0xff]  }
 0x3d8   :  { %v18648_v11 = vld [vmem:[#allocation5 + $0xb50] ss:$36 sps:$4 sm:$0xff]  }
 0x3da   :  { %12431 = vmatpush1.bf16.msra.mxu0 %v18594_v12  ;;  %12964 = vmatpush1.bf16.msra.mxu1 %v18597_v15  ;;  %v18651_v12 = vld [vmem:[#allocation5 + $0xb58] ss:$36 sps:$4 sm:$0xff]  }
 0x3db   :  { %12441 = vmatprep.subr.bf16.mxu0 %v18602_v18  ;;  %12974 = vmatprep.subr.bf16.mxu1 %v18605_v20  ;;  %v18656_v15 = vld [vmem:[#allocation5 + $0xb9c] ss:$36 sps:$4 sm:$0xff]   ;;  %v18659_v18 = vld [vmem:[#allocation5 + $0xba4] ss:$36 sps:$4 sm:$0xff]  }
 0x3dc   :  { %v18654_v20 = vld [vmem:[#allocation5 + $0xb98] ss:$36 sps:$4 sm:$0xff]  }
 0x3dd   :  { %12433 = vmatmul.mubr.bf16.vlgmr.msra.gmra.mrb[4].mxu0 %v20101_v23  ;;  %12966 = vmatmul.mubr.bf16.vlgmr.msra.gmra.mrb[4].mxu1 %v20101_v23 }
 0x3de   :  { %12442 = vmatpush1.bf16.msra.mxu0 %v18600_v21  ;;  %12975 = vmatpush1.bf16.msra.mxu1 %v18603_v52  ;;  %v18657_v21 = vld [vmem:[#allocation5 + $0xba0] ss:$36 sps:$4 sm:$0xff]  }
 0x3df   :  { %12443 = vmatprep.subr.bf16.mxu0 %v18608_v22  ;;  %12976 = vmatprep.subr.bf16.mxu1 %v18611_v26  ;;  %v18662_v52 = vld [vmem:[#allocation5 + $0xbe4] ss:$36 sps:$4 sm:$0xff]   ;;  %v18665_v22 = vld [vmem:[#allocation5 + $0xbec] ss:$36 sps:$4 sm:$0xff]  }
 0x3e0   :  { %12473 = vmatprep.mubr.bf16.mxu0 %v20104_v27  ;;  %13006 = vmatprep.mubr.bf16.mxu1 %v20104_v27  ;;  %v18660_v26 = vld [vmem:[#allocation5 + $0xbe0] ss:$36 sps:$4 sm:$0xff]  }
 0x3e2   :  { %12444 = vmatpush1.bf16.msra.mxu0 %v18606_v28  ;;  %12977 = vmatpush1.bf16.msra.mxu1 %v18609_v29  ;;  %v18663_v28 = vld [vmem:[#allocation5 + $0xbe8] ss:$36 sps:$4 sm:$0xff]  }
 0x3e3   :  { %12445 = vmatprep.subr.bf16.mxu0 %v18614_v30  ;;  %12978 = vmatprep.subr.bf16.mxu1 %v18617_v31  ;;  %v18668_v29 = vld [vmem:[#allocation5 + $0xc2c] ss:$36 sps:$4 sm:$0xff]   ;;  %v18671_v30 = vld [vmem:[#allocation5 + $0xc34] ss:$36 sps:$4 sm:$0xff]  }
 0x3e4   :  { %v18666_v31 = vld [vmem:[#allocation5 + $0xc28] ss:$36 sps:$4 sm:$0xff]  }
 0x3e6   :  { %12446 = vmatpush1.bf16.msra.mxu0 %v18612_v35  ;;  %12979 = vmatpush1.bf16.msra.mxu1 %v18615_v36  ;;  %v18669_v35 = vld [vmem:[#allocation5 + $0xc30] ss:$36 sps:$4 sm:$0xff]  }
 0x3e7   :  { %12447 = vmatprep.subr.bf16.mxu0 %v18620_v38  ;;  %12980 = vmatprep.subr.bf16.mxu1 %v18623_v55  ;;  %v18674_v36 = vld [vmem:[#allocation5 + $0xc74] ss:$36 sps:$4 sm:$0xff]   ;;  %v18677_v38 = vld [vmem:[#allocation5 + $0xc7c] ss:$36 sps:$4 sm:$0xff]  }
 0x3e8   :  { %v18672_v55 = vld [vmem:[#allocation5 + $0xc70] ss:$36 sps:$4 sm:$0xff]  }
 0x3ea   :  { %12448 = vmatpush1.bf16.msra.mxu0 %v18618_v41  ;;  %12981 = vmatpush1.bf16.msra.mxu1 %v18621_v43  ;;  %v18675_v41 = vld [vmem:[#allocation5 + $0xc78] ss:$36 sps:$4 sm:$0xff]  }
 0x3eb   :  { %12449 = vmatprep.subr.bf16.mxu0 %v18626_v44  ;;  %12982 = vmatprep.subr.bf16.mxu1 %v18629_v10  ;;  %v18680_v43 = vld [vmem:[#allocation5 + $0xcbc] ss:$36 sps:$4 sm:$0xff]   ;;  %v18683_v44 = vld [vmem:[#allocation5 + $0xcc4] ss:$36 sps:$4 sm:$0xff]  }
 0x3ec   :  { %v18678_v10 = vld [vmem:[#allocation5 + $0xcb8] ss:$36 sps:$4 sm:$0xff]  }
 0x3ee   :  { %12450 = vmatpush1.bf16.msra.mxu0 %v18624_v48  ;;  %12983 = vmatpush1.bf16.msra.mxu1 %v18627_v50  ;;  %v18681_v48 = vld [vmem:[#allocation5 + $0xcc0] ss:$36 sps:$4 sm:$0xff]  }
 0x3ef   :  { %12451 = vmatprep.subr.bf16.mxu0 %v18632_v53  ;;  %12984 = vmatprep.subr.bf16.mxu1 %v18635_v63  ;;  %v18686_v50 = vld [vmem:[#allocation5 + $0xd04] ss:$36 sps:$4 sm:$0xff]   ;;  %v18689_v53 = vld [vmem:[#allocation5 + $0xd0c] ss:$36 sps:$4 sm:$0xff]  }
 0x3f0   :  { %v18684_v63 = vld [vmem:[#allocation5 + $0xd00] ss:$36 sps:$4 sm:$0xff]  }
 0x3f2   :  { %12452 = vmatpush1.bf16.msra.mxu0 %v18630_v57  ;;  %12985 = vmatpush1.bf16.msra.mxu1 %v18633_v58  ;;  %v18687_v57 = vld [vmem:[#allocation5 + $0xd08] ss:$36 sps:$4 sm:$0xff]  }
 0x3f3   :  { %12453 = vmatprep.subr.bf16.mxu0 %v18638_v59  ;;  %12986 = vmatprep.subr.bf16.mxu1 %v18641_v61  ;;  %v18692_v58 = vld [vmem:[#allocation5 + $0xd4c] ss:$36 sps:$4 sm:$0xff]   ;;  %v18695_v59 = vld [vmem:[#allocation5 + $0xd54] ss:$36 sps:$4 sm:$0xff]  }
 0x3f4   :  { %v18690_v61 = vld [vmem:[#allocation5 + $0xd48] ss:$36 sps:$4 sm:$0xff]  }
 0x3f6   :  { %12454 = vmatpush1.bf16.msra.mxu0 %v18636_v0  ;;  %12987 = vmatpush1.bf16.msra.mxu1 %v18639_v49  ;;  %v18693_v0 = vld [vmem:[#allocation5 + $0xd50] ss:$36 sps:$4 sm:$0xff]  }
 0x3f7   :  { %12455 = vmatprep.subr.bf16.mxu0 %v18644_v1  ;;  %12988 = vmatprep.subr.bf16.mxu1 %v18647_v2  ;;  %v18698_v49 = vld [vmem:[#allocation5 + $0xd94] ss:$36 sps:$4 sm:$0xff]   ;;  %v18701_v1 = vld [vmem:[#allocation5 + $0xd9c] ss:$36 sps:$4 sm:$0xff]  }
 0x3f8   :  { %v18696_v2 = vld [vmem:[#allocation5 + $0xd90] ss:$36 sps:$4 sm:$0xff]  }
 0x3fa   :  { %12456 = vmatpush1.bf16.msra.mxu0 %v18642_v4  ;;  %12989 = vmatpush1.bf16.msra.mxu1 %v18645_v5  ;;  %v18699_v4 = vld [vmem:[#allocation5 + $0xd98] ss:$36 sps:$4 sm:$0xff]  }
 0x3fb   :  { %12457 = vmatprep.subr.bf16.mxu0 %v18650_v7  ;;  %12990 = vmatprep.subr.bf16.mxu1 %v18653_v9  ;;  %v18704_v5 = vld [vmem:[#allocation5 + $0xddc] ss:$36 sps:$4 sm:$0xff]   ;;  %v18707_v7 = vld [vmem:[#allocation5 + $0xde4] ss:$36 sps:$4 sm:$0xff]  }
 0x3fc   :  { %v18702_v9 = vld [vmem:[#allocation5 + $0xdd8] ss:$36 sps:$4 sm:$0xff]  }
 0x3fe   :  { %12458 = vmatpush1.bf16.msra.mxu0 %v18648_v11  ;;  %12991 = vmatpush1.bf16.msra.mxu1 %v18651_v12  ;;  %v18705_v11 = vld [vmem:[#allocation5 + $0xde0] ss:$36 sps:$4 sm:$0xff]  }
 0x3ff   :  { %12459 = vmatprep.subr.bf16.mxu0 %v18656_v15  ;;  %12992 = vmatprep.subr.bf16.mxu1 %v18659_v18  ;;  %v18710_v12 = vld [vmem:[#allocation5 + $0xe24] ss:$36 sps:$4 sm:$0xff]   ;;  %v18713_v15 = vld [vmem:[#allocation5 + $0xe2c] ss:$36 sps:$4 sm:$0xff]  }
 0x400   :  { %v18708_v18 = vld [vmem:[#allocation5 + $0xe20] ss:$36 sps:$4 sm:$0xff]  }
 0x402   :  { %12460 = vmatpush1.bf16.msra.mxu0 %v18654_v20  ;;  %12993 = vmatpush1.bf16.msra.mxu1 %v18657_v21  ;;  %v18711_v20 = vld [vmem:[#allocation5 + $0xe28] ss:$36 sps:$4 sm:$0xff]  }
 0x403   :  { %12461 = vmatprep.subr.bf16.mxu0 %v18662_v52  ;;  %12994 = vmatprep.subr.bf16.mxu1 %v18665_v22  ;;  %v18716_v21 = vld [vmem:[#allocation5 + $0xe6c] ss:$36 sps:$4 sm:$0xff]   ;;  %v18719_v52 = vld [vmem:[#allocation5 + $0xe74] ss:$36 sps:$4 sm:$0xff]  }
 0x404   :  { %v18714_v22 = vld [vmem:[#allocation5 + $0xe68] ss:$36 sps:$4 sm:$0xff]  }
 0x406   :  { %12462 = vmatpush1.bf16.msra.mxu0 %v18660_v26  ;;  %12995 = vmatpush1.bf16.msra.mxu1 %v18663_v28  ;;  %v18717_v26 = vld [vmem:[#allocation5 + $0xe70] ss:$36 sps:$4 sm:$0xff]  }
 0x407   :  { %12463 = vmatprep.subr.bf16.mxu0 %v18668_v29  ;;  %12996 = vmatprep.subr.bf16.mxu1 %v18671_v30  ;;  %v18722_v28 = vld [vmem:[#allocation5 + $0xeb4] ss:$36 sps:$4 sm:$0xff]   ;;  %v18725_v29 = vld [vmem:[#allocation5 + $0xebc] ss:$36 sps:$4 sm:$0xff]  }
 0x408   :  { %v18720_v30 = vld [vmem:[#allocation5 + $0xeb0] ss:$36 sps:$4 sm:$0xff]  }
 0x40a   :  { %12464 = vmatpush1.bf16.msra.mxu0 %v18666_v31  ;;  %12997 = vmatpush1.bf16.msra.mxu1 %v18669_v35  ;;  %v18723_v31 = vld [vmem:[#allocation5 + $0xeb8] ss:$36 sps:$4 sm:$0xff]  }
 0x40b   :  { %12465 = vmatprep.subr.bf16.mxu0 %v18674_v36  ;;  %12998 = vmatprep.subr.bf16.mxu1 %v18677_v38  ;;  %v18728_v35 = vld [vmem:[#allocation5 + $0xefc] ss:$36 sps:$4 sm:$0xff]   ;;  %v18731_v36 = vld [vmem:[#allocation5 + $0xf04] ss:$36 sps:$4 sm:$0xff]  }
 0x40c   :  { %v18726_v38 = vld [vmem:[#allocation5 + $0xef8] ss:$36 sps:$4 sm:$0xff]  }
 0x40e   :  { %12466 = vmatpush1.bf16.msra.mxu0 %v18672_v55  ;;  %12999 = vmatpush1.bf16.msra.mxu1 %v18675_v41  ;;  %v18729_v55 = vld [vmem:[#allocation5 + $0xf00] ss:$36 sps:$4 sm:$0xff]  }
 0x40f   :  { %12467 = vmatprep.subr.bf16.mxu0 %v18680_v43  ;;  %13000 = vmatprep.subr.bf16.mxu1 %v18683_v44  ;;  %v18734_v41 = vld [vmem:[#allocation5 + $0xf44] ss:$36 sps:$4 sm:$0xff]   ;;  %v18737_v43 = vld [vmem:[#allocation5 + $0xf4c] ss:$36 sps:$4 sm:$0xff]  }
 0x412   :  { %12468 = vmatpush1.bf16.msra.mxu0 %v18678_v10  ;;  %13001 = vmatpush1.bf16.msra.mxu1 %v18681_v48 }
 0x413   :  { %12469 = vmatprep.subr.bf16.mxu0 %v18686_v50  ;;  %13002 = vmatprep.subr.bf16.mxu1 %v18689_v53 }
 0x416   :  { %12470 = vmatpush1.bf16.msra.mxu0 %v18684_v63  ;;  %13003 = vmatpush1.bf16.msra.mxu1 %v18687_v57  ;;  %v18732_v57 = vld [vmem:[#allocation5 + $0xf40] ss:$36 sps:$4 sm:$0xff]  }
 0x417   :  { %12471 = vmatprep.subr.bf16.mxu0 %v18692_v58  ;;  %13004 = vmatprep.subr.bf16.mxu1 %v18695_v59  ;;  %v18735_v58 = vld [vmem:[#allocation5 + $0xf48] ss:$36 sps:$4 sm:$0xff]  }
 0x41a   :  { %12472 = vmatpush1.bf16.msra.mxu0 %v18690_v61  ;;  %13005 = vmatpush1.bf16.msra.mxu1 %v18693_v0  ;;  %v18740_v0 = vld [vmem:[#allocation5 + $0xf8c] ss:$36 sps:$4 sm:$0xff]  }
 0x41b   :  { %12482 = vmatprep.subr.bf16.mxu0 %v18698_v49  ;;  %13015 = vmatprep.subr.bf16.mxu1 %v18701_v1  ;;  %v18743_v49 = vld [vmem:[#allocation5 + $0xf94] ss:$36 sps:$4 sm:$0xff]   ;;  %v18738_v1 = vld [vmem:[#allocation5 + $0xf88] ss:$36 sps:$4 sm:$0xff]  }
 0x41d   :  { %12474 = vmatmul.mubr.bf16.vlgmr.msra.gmra.mrb[4].mxu0 %v20112_v33  ;;  %13007 = vmatmul.mubr.bf16.vlgmr.msra.gmra.mrb[4].mxu1 %v20112_v33 }
 0x41e   :  { %12483 = vmatpush1.bf16.msra.mxu0 %v18696_v2  ;;  %13016 = vmatpush1.bf16.msra.mxu1 %v18699_v4  ;;  %v18741_v2 = vld [vmem:[#allocation5 + $0xf90] ss:$36 sps:$4 sm:$0xff]  }
 0x41f   :  { %12484 = vmatprep.subr.bf16.mxu0 %v18704_v5  ;;  %13017 = vmatprep.subr.bf16.mxu1 %v18707_v7  ;;  %v18746_v4 = vld [vmem:[#allocation5 + $0xfd4] ss:$36 sps:$4 sm:$0xff]   ;;  %v18749_v5 = vld [vmem:[#allocation5 + $0xfdc] ss:$36 sps:$4 sm:$0xff]  }
 0x420   :  { %12514 = vmatprep.mubr.bf16.mxu0 %v20116_v37  ;;  %13047 = vmatprep.mubr.bf16.mxu1 %v20116_v37  ;;  %v18744_v7 = vld [vmem:[#allocation5 + $0xfd0] ss:$36 sps:$4 sm:$0xff]  }
 0x422   :  { %12485 = vmatpush1.bf16.msra.mxu0 %v18702_v9  ;;  %13018 = vmatpush1.bf16.msra.mxu1 %v18705_v11  ;;  %v18747_v9 = vld [vmem:[#allocation5 + $0xfd8] ss:$36 sps:$4 sm:$0xff]  }
 0x423   :  { %12486 = vmatprep.subr.bf16.mxu0 %v18710_v12  ;;  %13019 = vmatprep.subr.bf16.mxu1 %v18713_v15  ;;  %v18752_v11 = vld [vmem:[#allocation5 + $0x101c] ss:$36 sps:$4 sm:$0xff]   ;;  %v18755_v12 = vld [vmem:[#allocation5 + $0x1024] ss:$36 sps:$4 sm:$0xff]  }
 0x424   :  { %v18750_v15 = vld [vmem:[#allocation5 + $0x1018] ss:$36 sps:$4 sm:$0xff]  }
 0x426   :  { %12487 = vmatpush1.bf16.msra.mxu0 %v18708_v18  ;;  %13020 = vmatpush1.bf16.msra.mxu1 %v18711_v20  ;;  %v18753_v18 = vld [vmem:[#allocation5 + $0x1020] ss:$36 sps:$4 sm:$0xff]  }
 0x427   :  { %12488 = vmatprep.subr.bf16.mxu0 %v18716_v21  ;;  %13021 = vmatprep.subr.bf16.mxu1 %v18719_v52  ;;  %v18758_v20 = vld [vmem:[#allocation5 + $0x1064] ss:$36 sps:$4 sm:$0xff]   ;;  %v18761_v21 = vld [vmem:[#allocation5 + $0x106c] ss:$36 sps:$4 sm:$0xff]  }
 0x428   :  { %v18756_v52 = vld [vmem:[#allocation5 + $0x1060] ss:$36 sps:$4 sm:$0xff]  }
 0x42a   :  { %12489 = vmatpush1.bf16.msra.mxu0 %v18714_v22  ;;  %13022 = vmatpush1.bf16.msra.mxu1 %v18717_v26  ;;  %v18759_v22 = vld [vmem:[#allocation5 + $0x1068] ss:$36 sps:$4 sm:$0xff]  }
 0x42b   :  { %12490 = vmatprep.subr.bf16.mxu0 %v18722_v28  ;;  %13023 = vmatprep.subr.bf16.mxu1 %v18725_v29  ;;  %v18764_v26 = vld [vmem:[#allocation5 + $0x10ac] ss:$36 sps:$4 sm:$0xff]   ;;  %v18767_v28 = vld [vmem:[#allocation5 + $0x10b4] ss:$36 sps:$4 sm:$0xff]  }
 0x42c   :  { %v18762_v29 = vld [vmem:[#allocation5 + $0x10a8] ss:$36 sps:$4 sm:$0xff]  }
 0x42e   :  { %12491 = vmatpush1.bf16.msra.mxu0 %v18720_v30  ;;  %13024 = vmatpush1.bf16.msra.mxu1 %v18723_v31  ;;  %v18765_v30 = vld [vmem:[#allocation5 + $0x10b0] ss:$36 sps:$4 sm:$0xff]  }
 0x42f   :  { %12492 = vmatprep.subr.bf16.mxu0 %v18728_v35  ;;  %13025 = vmatprep.subr.bf16.mxu1 %v18731_v36  ;;  %v18770_v31 = vld [vmem:[#allocation5 + $0x10f4] ss:$36 sps:$4 sm:$0xff]   ;;  %v18773_v35 = vld [vmem:[#allocation5 + $0x10fc] ss:$36 sps:$4 sm:$0xff]  }
 0x430   :  { %v20261_v44 = vpop.f32.mrb[0].mxu0  ;;  %v20263_v10 = vpop.f32.mrb[0].mxu1  ;;  %v18768_v36 = vld [vmem:[#allocation5 + $0x10f0] ss:$36 sps:$4 sm:$0xff]  }
 0x431   :  { %v20265_v48 = vpop.f32.mrb[1].mxu0  ;;  %v20267_v50 = vpop.f32.mrb[1].mxu1 }
 0x432   :  { %v11823_v53 = vpop.f32.mrb[2].mxu0  ;;  %v12356_v63 = vpop.f32.mrb[2].mxu1  ;;  %12493 = vmatpush1.bf16.msra.mxu0 %v18726_v38  ;;  %13026 = vmatpush1.bf16.msra.mxu1 %v18729_v55  ;;  %v18771_v38 = vld [vmem:[#allocation5 + $0x10f8] ss:$36 sps:$4 sm:$0xff]  }
 0x433   :  { %v11824_v59 = vpop.f32.mrb[3].mxu0  ;;  %v12357_v61 = vpop.f32.mrb[3].mxu1  ;;  %12494 = vmatprep.subr.bf16.mxu0 %v18734_v41  ;;  %13027 = vmatprep.subr.bf16.mxu1 %v18737_v43  ;;  %v18776_v55 = vld [vmem:[#allocation5 + $0x113c] ss:$36 sps:$4 sm:$0xff]   ;;  %v18779_v41 = vld [vmem:[#allocation5 + $0x1144] ss:$36 sps:$4 sm:$0xff]  }
 0x434   :  { %v18774_v43 = vld [vmem:[#allocation5 + $0x1138] ss:$36 sps:$4 sm:$0xff]   ;;  %v18777_v53 = vld [vmem:[#allocation5 + $0x1140] ss:$36 sps:$4 sm:$0xff]   ;;  %v18783_v59 = vld [vmem:[#allocation5 + $0x1188] ss:$36 sps:$4 sm:$0xff]  }
 0x435   :  { %v18782_v63 = vld [vmem:[#allocation5 + $0x1184] ss:$36 sps:$4 sm:$0xff]   ;;  %v18788_v61 = vld [vmem:[#allocation5 + $0x11cc] ss:$36 sps:$4 sm:$0xff]  }
 0x436   :  { %12495 = vmatpush1.bf16.msra.mxu0 %v18732_v57  ;;  %13028 = vmatpush1.bf16.msra.mxu1 %v18735_v58  ;;  %v18785_v57 = vld [vmem:[#allocation5 + $0x118c] ss:$36 sps:$4 sm:$0xff]   ;;  %v18780_v58 = vld [vmem:[#allocation5 + $0x1180] ss:$36 sps:$4 sm:$0xff]  }
 0x437   :  { %12496 = vmatprep.subr.bf16.mxu0 %v18740_v0  ;;  %13029 = vmatprep.subr.bf16.mxu1 %v18743_v49  ;;  %v18791_v0 = vld [vmem:[#allocation5 + $0x11d4] ss:$36 sps:$4 sm:$0xff]   ;;  %v18786_v49 = vld [vmem:[#allocation5 + $0x11c8] ss:$36 sps:$4 sm:$0xff]  }
 0x43a   :  { %12497 = vmatpush1.bf16.msra.mxu0 %v18738_v1  ;;  %13030 = vmatpush1.bf16.msra.mxu1 %v18741_v2  ;;  %v18789_v1 = vld [vmem:[#allocation5 + $0x11d0] ss:$36 sps:$4 sm:$0xff]  }
 0x43b   :  { %12498 = vmatprep.subr.bf16.mxu0 %v18746_v4  ;;  %13031 = vmatprep.subr.bf16.mxu1 %v18749_v5  ;;  %v18794_v2 = vld [vmem:[#allocation5 + $0x1214] ss:$36 sps:$4 sm:$0xff]   ;;  %v18797_v4 = vld [vmem:[#allocation5 + $0x121c] ss:$36 sps:$4 sm:$0xff]  }
 0x43c   :  { %v18792_v5 = vld [vmem:[#allocation5 + $0x1210] ss:$36 sps:$4 sm:$0xff]  }
 0x43e   :  { %12499 = vmatpush1.bf16.msra.mxu0 %v18744_v7  ;;  %13032 = vmatpush1.bf16.msra.mxu1 %v18747_v9  ;;  %v18795_v7 = vld [vmem:[#allocation5 + $0x1218] ss:$36 sps:$4 sm:$0xff]  }
 0x43f   :  { %12500 = vmatprep.subr.bf16.mxu0 %v18752_v11  ;;  %13033 = vmatprep.subr.bf16.mxu1 %v18755_v12  ;;  %v18800_v9 = vld [vmem:[#allocation5 + $0x125c] ss:$36 sps:$4 sm:$0xff]   ;;  %v18803_v11 = vld [vmem:[#allocation5 + $0x1264] ss:$36 sps:$4 sm:$0xff]  }
 0x440   :  { %v18798_v12 = vld [vmem:[#allocation5 + $0x1258] ss:$36 sps:$4 sm:$0xff]  }
 0x442   :  { %12501 = vmatpush1.bf16.msra.mxu0 %v18750_v15  ;;  %13034 = vmatpush1.bf16.msra.mxu1 %v18753_v18  ;;  %v18801_v15 = vld [vmem:[#allocation5 + $0x1260] ss:$36 sps:$4 sm:$0xff]  }
 0x443   :  { %12502 = vmatprep.subr.bf16.mxu0 %v18758_v20  ;;  %13035 = vmatprep.subr.bf16.mxu1 %v18761_v21  ;;  %v18806_v18 = vld [vmem:[#allocation5 + $0x12a4] ss:$36 sps:$4 sm:$0xff]   ;;  %v18809_v20 = vld [vmem:[#allocation5 + $0x12ac] ss:$36 sps:$4 sm:$0xff]  }
 0x444   :  { %v18804_v21 = vld [vmem:[#allocation5 + $0x12a0] ss:$36 sps:$4 sm:$0xff]  }
 0x446   :  { %12503 = vmatpush1.bf16.msra.mxu0 %v18756_v52  ;;  %13036 = vmatpush1.bf16.msra.mxu1 %v18759_v22  ;;  %v18807_v52 = vld [vmem:[#allocation5 + $0x12a8] ss:$36 sps:$4 sm:$0xff]  }
 0x447   :  { %12504 = vmatprep.subr.bf16.mxu0 %v18764_v26  ;;  %13037 = vmatprep.subr.bf16.mxu1 %v18767_v28  ;;  %v18812_v22 = vld [vmem:[#allocation5 + $0x12ec] ss:$36 sps:$4 sm:$0xff]   ;;  %v18815_v26 = vld [vmem:[#allocation5 + $0x12f4] ss:$36 sps:$4 sm:$0xff]  }
 0x448   :  { %v18810_v28 = vld [vmem:[#allocation5 + $0x12e8] ss:$36 sps:$4 sm:$0xff]  }
 0x44a   :  { %12505 = vmatpush1.bf16.msra.mxu0 %v18762_v29  ;;  %13038 = vmatpush1.bf16.msra.mxu1 %v18765_v30  ;;  %v18813_v29 = vld [vmem:[#allocation5 + $0x12f0] ss:$36 sps:$4 sm:$0xff]  }
 0x44b   :  { %12506 = vmatprep.subr.bf16.mxu0 %v18770_v31  ;;  %13039 = vmatprep.subr.bf16.mxu1 %v18773_v35  ;;  %v18818_v30 = vld [vmem:[#allocation5 + $0x1334] ss:$36 sps:$4 sm:$0xff]   ;;  %v18821_v31 = vld [vmem:[#allocation5 + $0x133c] ss:$36 sps:$4 sm:$0xff]  }
 0x44c   :  { %v18816_v35 = vld [vmem:[#allocation5 + $0x1330] ss:$36 sps:$4 sm:$0xff]  }
 0x44e   :  { %12507 = vmatpush1.bf16.msra.mxu0 %v18768_v36  ;;  %13040 = vmatpush1.bf16.msra.mxu1 %v18771_v38  ;;  %v18819_v36 = vld [vmem:[#allocation5 + $0x1338] ss:$36 sps:$4 sm:$0xff]  }
 0x44f   :  { %12508 = vmatprep.subr.bf16.mxu0 %v18776_v55  ;;  %13041 = vmatprep.subr.bf16.mxu1 %v18779_v41  ;;  %v18824_v38 = vld [vmem:[#allocation5 + $0x137c] ss:$36 sps:$4 sm:$0xff]   ;;  %v18827_v55 = vld [vmem:[#allocation5 + $0x1384] ss:$36 sps:$4 sm:$0xff]  }
 0x450   :  { %v18822_v41 = vld [vmem:[#allocation5 + $0x1378] ss:$36 sps:$4 sm:$0xff]  }
 0x452   :  { %12509 = vmatpush1.bf16.msra.mxu0 %v18774_v43  ;;  %13042 = vmatpush1.bf16.msra.mxu1 %v18777_v53  ;;  %v18825_v43 = vld [vmem:[#allocation5 + $0x1380] ss:$36 sps:$4 sm:$0xff]  }
 0x453   :  { %12510 = vmatprep.subr.bf16.mxu0 %v18782_v63  ;;  %13043 = vmatprep.subr.bf16.mxu1 %v18785_v57  ;;  %v18830_v53 = vld [vmem:[#allocation5 + $0x13c4] ss:$36 sps:$4 sm:$0xff]   ;;  %v18833_v63 = vld [vmem:[#allocation5 + $0x13cc] ss:$36 sps:$4 sm:$0xff]  }
 0x454   :  { %v18828_v57 = vld [vmem:[#allocation5 + $0x13c0] ss:$36 sps:$4 sm:$0xff]  }
 0x456   :  { %12511 = vmatpush1.bf16.msra.mxu0 %v18780_v58  ;;  %13044 = vmatpush1.bf16.msra.mxu1 %v18783_v59  ;;  %v18831_v58 = vld [vmem:[#allocation5 + $0x13c8] ss:$36 sps:$4 sm:$0xff]  }
 0x457   :  { %12512 = vmatprep.subr.bf16.mxu0 %v18788_v61  ;;  %13045 = vmatprep.subr.bf16.mxu1 %v18791_v0  ;;  %v18836_v59 = vld [vmem:[#allocation5 + $0x140c] ss:$36 sps:$4 sm:$0xff]   ;;  %v18839_v61 = vld [vmem:[#allocation5 + $0x1414] ss:$36 sps:$4 sm:$0xff]  }
 0x458   :  { %v18834_v0 = vld [vmem:[#allocation5 + $0x1408] ss:$36 sps:$4 sm:$0xff]  }
 0x45a   :  { %12513 = vmatpush1.bf16.msra.mxu0 %v18786_v49  ;;  %13046 = vmatpush1.bf16.msra.mxu1 %v18789_v1  ;;  %v18837_v49 = vld [vmem:[#allocation5 + $0x1410] ss:$36 sps:$4 sm:$0xff]  }
 0x45b   :  { %12523 = vmatprep.subr.bf16.mxu0 %v18794_v2  ;;  %13056 = vmatprep.subr.bf16.mxu1 %v18797_v4  ;;  %v18842_v1 = vld [vmem:[#allocation5 + $0x1454] ss:$36 sps:$4 sm:$0xff]   ;;  %v18845_v2 = vld [vmem:[#allocation5 + $0x145c] ss:$36 sps:$4 sm:$0xff]  }
 0x45c   :  { %v18840_v4 = vld [vmem:[#allocation5 + $0x1450] ss:$36 sps:$4 sm:$0xff]  }
 0x45d   :  { %12515 = vmatmul.mubr.bf16.vlgmr.msra.gmra.mrb[4].mxu0 %v20128_v45  ;;  %13048 = vmatmul.mubr.bf16.vlgmr.msra.gmra.mrb[4].mxu1 %v20128_v45 }
 0x45e   :  { %12524 = vmatpush1.bf16.msra.mxu0 %v18792_v5  ;;  %13057 = vmatpush1.bf16.msra.mxu1 %v18795_v7  ;;  %v18843_v5 = vld [vmem:[#allocation5 + $0x1458] ss:$36 sps:$4 sm:$0xff]  }
 0x45f   :  { %12525 = vmatprep.subr.bf16.mxu0 %v18800_v9  ;;  %13058 = vmatprep.subr.bf16.mxu1 %v18803_v11  ;;  %v18848_v7 = vld [vmem:[#allocation5 + $0x149c] ss:$36 sps:$4 sm:$0xff]   ;;  %v18851_v9 = vld [vmem:[#allocation5 + $0x14a4] ss:$36 sps:$4 sm:$0xff]  }
 0x460   :  { %12555 = vmatprep.mubr.bf16.mxu0 %v20131_v51  ;;  %13088 = vmatprep.mubr.bf16.mxu1 %v20131_v51  ;;  %v18846_v11 = vld [vmem:[#allocation5 + $0x1498] ss:$36 sps:$4 sm:$0xff]  }
 0x462   :  { %12526 = vmatpush1.bf16.msra.mxu0 %v18798_v12  ;;  %13059 = vmatpush1.bf16.msra.mxu1 %v18801_v15  ;;  %v18849_v12 = vld [vmem:[#allocation5 + $0x14a0] ss:$36 sps:$4 sm:$0xff]  }
 0x463   :  { %12527 = vmatprep.subr.bf16.mxu0 %v18806_v18  ;;  %13060 = vmatprep.subr.bf16.mxu1 %v18809_v20  ;;  %v18854_v15 = vld [vmem:[#allocation5 + $0x14e4] ss:$36 sps:$4 sm:$0xff]   ;;  %v18857_v18 = vld [vmem:[#allocation5 + $0x14ec] ss:$36 sps:$4 sm:$0xff]  }
 0x464   :  { %v18852_v20 = vld [vmem:[#allocation5 + $0x14e0] ss:$36 sps:$4 sm:$0xff]  }
 0x466   :  { %12528 = vmatpush1.bf16.msra.mxu0 %v18804_v21  ;;  %13061 = vmatpush1.bf16.msra.mxu1 %v18807_v52  ;;  %v18855_v21 = vld [vmem:[#allocation5 + $0x14e8] ss:$36 sps:$4 sm:$0xff]  }
 0x467   :  { %12529 = vmatprep.subr.bf16.mxu0 %v18812_v22  ;;  %13062 = vmatprep.subr.bf16.mxu1 %v18815_v26  ;;  %v18860_v52 = vld [vmem:[#allocation5 + $0x152c] ss:$36 sps:$4 sm:$0xff]   ;;  %v18863_v22 = vld [vmem:[#allocation5 + $0x1534] ss:$36 sps:$4 sm:$0xff]  }
 0x468   :  { %v18858_v26 = vld [vmem:[#allocation5 + $0x1528] ss:$36 sps:$4 sm:$0xff]  }
 0x46a   :  { %12530 = vmatpush1.bf16.msra.mxu0 %v18810_v28  ;;  %13063 = vmatpush1.bf16.msra.mxu1 %v18813_v29  ;;  %v18861_v28 = vld [vmem:[#allocation5 + $0x1530] ss:$36 sps:$4 sm:$0xff]  }
 0x46b   :  { %12531 = vmatprep.subr.bf16.mxu0 %v18818_v30  ;;  %13064 = vmatprep.subr.bf16.mxu1 %v18821_v31  ;;  %v18866_v29 = vld [vmem:[#allocation5 + $0x1574] ss:$36 sps:$4 sm:$0xff]   ;;  %v18869_v30 = vld [vmem:[#allocation5 + $0x157c] ss:$36 sps:$4 sm:$0xff]  }
 0x46c   :  { %v18864_v31 = vld [vmem:[#allocation5 + $0x1570] ss:$36 sps:$4 sm:$0xff]  }
 0x46e   :  { %12532 = vmatpush1.bf16.msra.mxu0 %v18816_v35  ;;  %13065 = vmatpush1.bf16.msra.mxu1 %v18819_v36  ;;  %v18867_v35 = vld [vmem:[#allocation5 + $0x1578] ss:$36 sps:$4 sm:$0xff]  }
 0x46f   :  { %12533 = vmatprep.subr.bf16.mxu0 %v18824_v38  ;;  %13066 = vmatprep.subr.bf16.mxu1 %v18827_v55  ;;  %v18872_v36 = vld [vmem:[#allocation5 + $0x15bc] ss:$36 sps:$4 sm:$0xff]   ;;  %v18875_v38 = vld [vmem:[#allocation5 + $0x15c4] ss:$36 sps:$4 sm:$0xff]  }
 0x470   :  { %v18870_v55 = vld [vmem:[#allocation5 + $0x15b8] ss:$36 sps:$4 sm:$0xff]  }
 0x472   :  { %12534 = vmatpush1.bf16.msra.mxu0 %v18822_v41  ;;  %13067 = vmatpush1.bf16.msra.mxu1 %v18825_v43  ;;  %v18873_v41 = vld [vmem:[#allocation5 + $0x15c0] ss:$36 sps:$4 sm:$0xff]  }
 0x473   :  { %12535 = vmatprep.subr.bf16.mxu0 %v18830_v53  ;;  %13068 = vmatprep.subr.bf16.mxu1 %v18833_v63  ;;  %v18878_v43 = vld [vmem:[#allocation5 + $0x1604] ss:$36 sps:$4 sm:$0xff]   ;;  %v18881_v53 = vld [vmem:[#allocation5 + $0x160c] ss:$36 sps:$4 sm:$0xff]  }
 0x474   :  { %v18876_v63 = vld [vmem:[#allocation5 + $0x1600] ss:$36 sps:$4 sm:$0xff]  }
 0x476   :  { %12536 = vmatpush1.bf16.msra.mxu0 %v18828_v57  ;;  %13069 = vmatpush1.bf16.msra.mxu1 %v18831_v58  ;;  %v18879_v57 = vld [vmem:[#allocation5 + $0x1608] ss:$36 sps:$4 sm:$0xff]  }
 0x477   :  { %12537 = vmatprep.subr.bf16.mxu0 %v18836_v59  ;;  %13070 = vmatprep.subr.bf16.mxu1 %v18839_v61  ;;  %v18884_v58 = vld [vmem:[#allocation5 + $0x164c] ss:$36 sps:$4 sm:$0xff]   ;;  %v18887_v59 = vld [vmem:[#allocation5 + $0x1654] ss:$36 sps:$4 sm:$0xff]  }
 0x478   :  { %v18882_v61 = vld [vmem:[#allocation5 + $0x1648] ss:$36 sps:$4 sm:$0xff]  }
 0x47a   :  { %12538 = vmatpush1.bf16.msra.mxu0 %v18834_v0  ;;  %13071 = vmatpush1.bf16.msra.mxu1 %v18837_v49  ;;  %v18885_v0 = vld [vmem:[#allocation5 + $0x1650] ss:$36 sps:$4 sm:$0xff]  }
 0x47b   :  { %12539 = vmatprep.subr.bf16.mxu0 %v18842_v1  ;;  %13072 = vmatprep.subr.bf16.mxu1 %v18845_v2  ;;  %v18890_v49 = vld [vmem:[#allocation5 + $0x1694] ss:$36 sps:$4 sm:$0xff]   ;;  %v18893_v1 = vld [vmem:[#allocation5 + $0x169c] ss:$36 sps:$4 sm:$0xff]  }
 0x47c   :  { %v18888_v2 = vld [vmem:[#allocation5 + $0x1690] ss:$36 sps:$4 sm:$0xff]  }
 0x47e   :  { %12540 = vmatpush1.bf16.msra.mxu0 %v18840_v4  ;;  %13073 = vmatpush1.bf16.msra.mxu1 %v18843_v5  ;;  %v18891_v4 = vld [vmem:[#allocation5 + $0x1698] ss:$36 sps:$4 sm:$0xff]  }
 0x47f   :  { %12541 = vmatprep.subr.bf16.mxu0 %v18848_v7  ;;  %13074 = vmatprep.subr.bf16.mxu1 %v18851_v9  ;;  %v18896_v5 = vld [vmem:[#allocation5 + $0x16dc] ss:$36 sps:$4 sm:$0xff]   ;;  %v18899_v7 = vld [vmem:[#allocation5 + $0x16e4] ss:$36 sps:$4 sm:$0xff]  }
 0x480   :  { %v18894_v9 = vld [vmem:[#allocation5 + $0x16d8] ss:$36 sps:$4 sm:$0xff]  }
 0x482   :  { %12542 = vmatpush1.bf16.msra.mxu0 %v18846_v11  ;;  %13075 = vmatpush1.bf16.msra.mxu1 %v18849_v12  ;;  %v18897_v11 = vld [vmem:[#allocation5 + $0x16e0] ss:$36 sps:$4 sm:$0xff]  }
 0x483   :  { %12543 = vmatprep.subr.bf16.mxu0 %v18854_v15  ;;  %13076 = vmatprep.subr.bf16.mxu1 %v18857_v18  ;;  %v18902_v12 = vld [vmem:[#allocation5 + $0x1724] ss:$36 sps:$4 sm:$0xff]   ;;  %v18905_v15 = vld [vmem:[#allocation5 + $0x172c] ss:$36 sps:$4 sm:$0xff]  }
 0x484   :  { %v18900_v18 = vld [vmem:[#allocation5 + $0x1720] ss:$36 sps:$4 sm:$0xff]  }
 0x486   :  { %12544 = vmatpush1.bf16.msra.mxu0 %v18852_v20  ;;  %13077 = vmatpush1.bf16.msra.mxu1 %v18855_v21  ;;  %v18903_v20 = vld [vmem:[#allocation5 + $0x1728] ss:$36 sps:$4 sm:$0xff]  }
 0x487   :  { %12545 = vmatprep.subr.bf16.mxu0 %v18860_v52  ;;  %13078 = vmatprep.subr.bf16.mxu1 %v18863_v22  ;;  %v18908_v21 = vld [vmem:[#allocation5 + $0x176c] ss:$36 sps:$4 sm:$0xff]   ;;  %v18911_v52 = vld [vmem:[#allocation5 + $0x1774] ss:$36 sps:$4 sm:$0xff]  }
 0x488   :  { %v18906_v22 = vld [vmem:[#allocation5 + $0x1768] ss:$36 sps:$4 sm:$0xff]  }
 0x48a   :  { %12546 = vmatpush1.bf16.msra.mxu0 %v18858_v26  ;;  %13079 = vmatpush1.bf16.msra.mxu1 %v18861_v28  ;;  %v18909_v26 = vld [vmem:[#allocation5 + $0x1770] ss:$36 sps:$4 sm:$0xff]  }
 0x48b   :  { %12547 = vmatprep.subr.bf16.mxu0 %v18866_v29  ;;  %13080 = vmatprep.subr.bf16.mxu1 %v18869_v30  ;;  %v18914_v28 = vld [vmem:[#allocation5 + $0x17b4] ss:$36 sps:$4 sm:$0xff]   ;;  %v18917_v29 = vld [vmem:[#allocation5 + $0x17bc] ss:$36 sps:$4 sm:$0xff]  }
 0x48c   :  { %v18912_v30 = vld [vmem:[#allocation5 + $0x17b0] ss:$36 sps:$4 sm:$0xff]  }
 0x48e   :  { %12548 = vmatpush1.bf16.msra.mxu0 %v18864_v31  ;;  %13081 = vmatpush1.bf16.msra.mxu1 %v18867_v35  ;;  %v18915_v31 = vld [vmem:[#allocation5 + $0x17b8] ss:$36 sps:$4 sm:$0xff]  }
 0x48f   :  { %12549 = vmatprep.subr.bf16.mxu0 %v18872_v36  ;;  %13082 = vmatprep.subr.bf16.mxu1 %v18875_v38  ;;  %v18920_v35 = vld [vmem:[#allocation5 + $0x17fc] ss:$36 sps:$4 sm:$0xff]   ;;  %v18923_v36 = vld [vmem:[#allocation5 + $0x1804] ss:$36 sps:$4 sm:$0xff]  }
 0x490   :  { %v18918_v38 = vld [vmem:[#allocation5 + $0x17f8] ss:$36 sps:$4 sm:$0xff]  }
 0x492   :  { %12550 = vmatpush1.bf16.msra.mxu0 %v18870_v55  ;;  %13083 = vmatpush1.bf16.msra.mxu1 %v18873_v41  ;;  %v18921_v55 = vld [vmem:[#allocation5 + $0x1800] ss:$36 sps:$4 sm:$0xff]  }
 0x493   :  { %12551 = vmatprep.subr.bf16.mxu0 %v18878_v43  ;;  %13084 = vmatprep.subr.bf16.mxu1 %v18881_v53  ;;  %v18926_v41 = vld [vmem:[#allocation5 + $0x1844] ss:$36 sps:$4 sm:$0xff]   ;;  %v18929_v43 = vld [vmem:[#allocation5 + $0x184c] ss:$36 sps:$4 sm:$0xff]  }
 0x494   :  { %v18924_v53 = vld [vmem:[#allocation5 + $0x1840] ss:$36 sps:$4 sm:$0xff]  }
 0x496   :  { %12552 = vmatpush1.bf16.msra.mxu0 %v18876_v63  ;;  %13085 = vmatpush1.bf16.msra.mxu1 %v18879_v57  ;;  %v18927_v63 = vld [vmem:[#allocation5 + $0x1848] ss:$36 sps:$4 sm:$0xff]  }
 0x497   :  { %12553 = vmatprep.subr.bf16.mxu0 %v18884_v58  ;;  %13086 = vmatprep.subr.bf16.mxu1 %v18887_v59  ;;  %v18932_v57 = vld [vmem:[#allocation5 + $0x188c] ss:$36 sps:$4 sm:$0xff]   ;;  %v18935_v58 = vld [vmem:[#allocation5 + $0x1894] ss:$36 sps:$4 sm:$0xff]  }
 0x498   :  { %v18930_v59 = vld [vmem:[#allocation5 + $0x1888] ss:$36 sps:$4 sm:$0xff]  }
 0x49a   :  { %12554 = vmatpush1.bf16.msra.mxu0 %v18882_v61  ;;  %13087 = vmatpush1.bf16.msra.mxu1 %v18885_v0  ;;  %v18933_v61 = vld [vmem:[#allocation5 + $0x1890] ss:$36 sps:$4 sm:$0xff]  }
 0x49b   :  { %12564 = vmatprep.subr.bf16.mxu0 %v18890_v49  ;;  %13097 = vmatprep.subr.bf16.mxu1 %v18893_v1  ;;  %v18938_v0 = vld [vmem:[#allocation5 + $0x18d4] ss:$36 sps:$4 sm:$0xff]   ;;  %v18941_v49 = vld [vmem:[#allocation5 + $0x18dc] ss:$36 sps:$4 sm:$0xff]  }
 0x49c   :  { %v18936_v1 = vld [vmem:[#allocation5 + $0x18d0] ss:$36 sps:$4 sm:$0xff]  }
 0x49d   :  { %12556 = vmatmul.mubr.bf16.vlgmr.msra.gmra.mrb[4].mxu0 %v20139_v62  ;;  %13089 = vmatmul.mubr.bf16.vlgmr.msra.gmra.mrb[4].mxu1 %v20139_v62 }
 0x49e   :  { %12565 = vmatpush1.bf16.msra.mxu0 %v18888_v2  ;;  %13098 = vmatpush1.bf16.msra.mxu1 %v18891_v4  ;;  %v18939_v2 = vld [vmem:[#allocation5 + $0x18d8] ss:$36 sps:$4 sm:$0xff]  }
 0x49f   :  { %12566 = vmatprep.subr.bf16.mxu0 %v18896_v5  ;;  %13099 = vmatprep.subr.bf16.mxu1 %v18899_v7  ;;  %v18944_v4 = vld [vmem:[#allocation5 + $0x191c] ss:$36 sps:$4 sm:$0xff]   ;;  %v18947_v5 = vld [vmem:[#allocation5 + $0x1924] ss:$36 sps:$4 sm:$0xff]  }
 0x4a0   :  { %12596 = vmatprep.mubr.bf16.mxu0 %v20143_v3  ;;  %13129 = vmatprep.mubr.bf16.mxu1 %v20143_v3  ;;  %v18942_v7 = vld [vmem:[#allocation5 + $0x1918] ss:$36 sps:$4 sm:$0xff]  }
 0x4a2   :  { %12567 = vmatpush1.bf16.msra.mxu0 %v18894_v9  ;;  %13100 = vmatpush1.bf16.msra.mxu1 %v18897_v11  ;;  %v18945_v9 = vld [vmem:[#allocation5 + $0x1920] ss:$36 sps:$4 sm:$0xff]  }
 0x4a3   :  { %12568 = vmatprep.subr.bf16.mxu0 %v18902_v12  ;;  %13101 = vmatprep.subr.bf16.mxu1 %v18905_v15  ;;  %v18950_v11 = vld [vmem:[#allocation5 + $0x1964] ss:$36 sps:$4 sm:$0xff]   ;;  %v18953_v12 = vld [vmem:[#allocation5 + $0x196c] ss:$36 sps:$4 sm:$0xff]  }
 0x4a4   :  { %v18948_v15 = vld [vmem:[#allocation5 + $0x1960] ss:$36 sps:$4 sm:$0xff]  }
 0x4a6   :  { %12569 = vmatpush1.bf16.msra.mxu0 %v18900_v18  ;;  %13102 = vmatpush1.bf16.msra.mxu1 %v18903_v20  ;;  %v18951_v18 = vld [vmem:[#allocation5 + $0x1968] ss:$36 sps:$4 sm:$0xff]  }
 0x4a7   :  { %12570 = vmatprep.subr.bf16.mxu0 %v18908_v21  ;;  %13103 = vmatprep.subr.bf16.mxu1 %v18911_v52  ;;  %v18956_v20 = vld [vmem:[#allocation5 + $0x19ac] ss:$36 sps:$4 sm:$0xff]   ;;  %v18959_v21 = vld [vmem:[#allocation5 + $0x19b4] ss:$36 sps:$4 sm:$0xff]  }
 0x4a8   :  { %v18954_v52 = vld [vmem:[#allocation5 + $0x19a8] ss:$36 sps:$4 sm:$0xff]  }
 0x4aa   :  { %12571 = vmatpush1.bf16.msra.mxu0 %v18906_v22  ;;  %13104 = vmatpush1.bf16.msra.mxu1 %v18909_v26  ;;  %v18957_v22 = vld [vmem:[#allocation5 + $0x19b0] ss:$36 sps:$4 sm:$0xff]  }
 0x4ab   :  { %12572 = vmatprep.subr.bf16.mxu0 %v18914_v28  ;;  %13105 = vmatprep.subr.bf16.mxu1 %v18917_v29  ;;  %v18962_v26 = vld [vmem:[#allocation5 + $0x19f4] ss:$36 sps:$4 sm:$0xff]   ;;  %v18965_v28 = vld [vmem:[#allocation5 + $0x19fc] ss:$36 sps:$4 sm:$0xff]  }
 0x4ac   :  { %v18960_v29 = vld [vmem:[#allocation5 + $0x19f0] ss:$36 sps:$4 sm:$0xff]  }
 0x4ae   :  { %12573 = vmatpush1.bf16.msra.mxu0 %v18912_v30  ;;  %13106 = vmatpush1.bf16.msra.mxu1 %v18915_v31  ;;  %v18963_v30 = vld [vmem:[#allocation5 + $0x19f8] ss:$36 sps:$4 sm:$0xff]  }
 0x4af   :  { %12574 = vmatprep.subr.bf16.mxu0 %v18920_v35  ;;  %13107 = vmatprep.subr.bf16.mxu1 %v18923_v36  ;;  %v18968_v31 = vld [vmem:[#allocation5 + $0x1a3c] ss:$36 sps:$4 sm:$0xff]   ;;  %v18971_v35 = vld [vmem:[#allocation5 + $0x1a44] ss:$36 sps:$4 sm:$0xff]  }
 0x4b0   :  { %v18966_v36 = vld [vmem:[#allocation5 + $0x1a38] ss:$36 sps:$4 sm:$0xff]  }
 0x4b2   :  { %12575 = vmatpush1.bf16.msra.mxu0 %v18918_v38  ;;  %13108 = vmatpush1.bf16.msra.mxu1 %v18921_v55  ;;  %v18969_v38 = vld [vmem:[#allocation5 + $0x1a40] ss:$36 sps:$4 sm:$0xff]  }
 0x4b3   :  { %12576 = vmatprep.subr.bf16.mxu0 %v18926_v41  ;;  %13109 = vmatprep.subr.bf16.mxu1 %v18929_v43  ;;  %v18974_v55 = vld [vmem:[#allocation5 + $0x1a84] ss:$36 sps:$4 sm:$0xff]   ;;  %v18977_v41 = vld [vmem:[#allocation5 + $0x1a8c] ss:$36 sps:$4 sm:$0xff]  }
 0x4b4   :  { %v18972_v43 = vld [vmem:[#allocation5 + $0x1a80] ss:$36 sps:$4 sm:$0xff]  }
 0x4b6   :  { %12577 = vmatpush1.bf16.msra.mxu0 %v18924_v53  ;;  %13110 = vmatpush1.bf16.msra.mxu1 %v18927_v63  ;;  %v18975_v53 = vld [vmem:[#allocation5 + $0x1a88] ss:$36 sps:$4 sm:$0xff]  }
 0x4b7   :  { %12578 = vmatprep.subr.bf16.mxu0 %v18932_v57  ;;  %13111 = vmatprep.subr.bf16.mxu1 %v18935_v58  ;;  %v18980_v63 = vld [vmem:[#allocation5 + $0x1acc] ss:$36 sps:$4 sm:$0xff]   ;;  %v18983_v57 = vld [vmem:[#allocation5 + $0x1ad4] ss:$36 sps:$4 sm:$0xff]  }
 0x4b8   :  { %v18978_v58 = vld [vmem:[#allocation5 + $0x1ac8] ss:$36 sps:$4 sm:$0xff]  }
 0x4ba   :  { %12579 = vmatpush1.bf16.msra.mxu0 %v18930_v59  ;;  %13112 = vmatpush1.bf16.msra.mxu1 %v18933_v61  ;;  %v18981_v59 = vld [vmem:[#allocation5 + $0x1ad0] ss:$36 sps:$4 sm:$0xff]  }
 0x4bb   :  { %12580 = vmatprep.subr.bf16.mxu0 %v18938_v0  ;;  %13113 = vmatprep.subr.bf16.mxu1 %v18941_v49  ;;  %v18986_v61 = vld [vmem:[#allocation5 + $0x1b14] ss:$36 sps:$4 sm:$0xff]   ;;  %v18989_v0 = vld [vmem:[#allocation5 + $0x1b1c] ss:$36 sps:$4 sm:$0xff]  }
 0x4bc   :  { %v18984_v49 = vld [vmem:[#allocation5 + $0x1b10] ss:$36 sps:$4 sm:$0xff]  }
 0x4be   :  { %12581 = vmatpush1.bf16.msra.mxu0 %v18936_v1  ;;  %13114 = vmatpush1.bf16.msra.mxu1 %v18939_v2  ;;  %v18987_v1 = vld [vmem:[#allocation5 + $0x1b18] ss:$36 sps:$4 sm:$0xff]  }
 0x4bf   :  { %12582 = vmatprep.subr.bf16.mxu0 %v18944_v4  ;;  %13115 = vmatprep.subr.bf16.mxu1 %v18947_v5  ;;  %v18992_v2 = vld [vmem:[#allocation5 + $0x1b5c] ss:$36 sps:$4 sm:$0xff]   ;;  %v18995_v4 = vld [vmem:[#allocation5 + $0x1b64] ss:$36 sps:$4 sm:$0xff]  }
 0x4c0   :  { %v18990_v5 = vld [vmem:[#allocation5 + $0x1b58] ss:$36 sps:$4 sm:$0xff]  }
 0x4c2   :  { %12583 = vmatpush1.bf16.msra.mxu0 %v18942_v7  ;;  %13116 = vmatpush1.bf16.msra.mxu1 %v18945_v9  ;;  %v18993_v7 = vld [vmem:[#allocation5 + $0x1b60] ss:$36 sps:$4 sm:$0xff]  }
 0x4c3   :  { %12584 = vmatprep.subr.bf16.mxu0 %v18950_v11  ;;  %13117 = vmatprep.subr.bf16.mxu1 %v18953_v12  ;;  %v18998_v9 = vld [vmem:[#allocation5 + $0x1ba4] ss:$36 sps:$4 sm:$0xff]   ;;  %v19001_v11 = vld [vmem:[#allocation5 + $0x1bac] ss:$36 sps:$4 sm:$0xff]  }
 0x4c4   :  { %v18996_v12 = vld [vmem:[#allocation5 + $0x1ba0] ss:$36 sps:$4 sm:$0xff]  }
 0x4c6   :  { %12585 = vmatpush1.bf16.msra.mxu0 %v18948_v15  ;;  %13118 = vmatpush1.bf16.msra.mxu1 %v18951_v18  ;;  %v18999_v15 = vld [vmem:[#allocation5 + $0x1ba8] ss:$36 sps:$4 sm:$0xff]  }
 0x4c7   :  { %12586 = vmatprep.subr.bf16.mxu0 %v18956_v20  ;;  %13119 = vmatprep.subr.bf16.mxu1 %v18959_v21  ;;  %v19004_v18 = vld [vmem:[#allocation5 + $0x1bec] ss:$36 sps:$4 sm:$0xff]   ;;  %v19007_v20 = vld [vmem:[#allocation5 + $0x1bf4] ss:$36 sps:$4 sm:$0xff]  }
 0x4c8   :  { %v19002_v21 = vld [vmem:[#allocation5 + $0x1be8] ss:$36 sps:$4 sm:$0xff]  }
 0x4ca   :  { %12587 = vmatpush1.bf16.msra.mxu0 %v18954_v52  ;;  %13120 = vmatpush1.bf16.msra.mxu1 %v18957_v22  ;;  %v19005_v52 = vld [vmem:[#allocation5 + $0x1bf0] ss:$36 sps:$4 sm:$0xff]  }
 0x4cb   :  { %12588 = vmatprep.subr.bf16.mxu0 %v18962_v26  ;;  %13121 = vmatprep.subr.bf16.mxu1 %v18965_v28  ;;  %v19010_v22 = vld [vmem:[#allocation5 + $0x1c34] ss:$36 sps:$4 sm:$0xff]   ;;  %v19013_v26 = vld [vmem:[#allocation5 + $0x1c3c] ss:$36 sps:$4 sm:$0xff]  }
 0x4cc   :  { %v19008_v28 = vld [vmem:[#allocation5 + $0x1c30] ss:$36 sps:$4 sm:$0xff]  }
 0x4ce   :  { %12589 = vmatpush1.bf16.msra.mxu0 %v18960_v29  ;;  %13122 = vmatpush1.bf16.msra.mxu1 %v18963_v30  ;;  %v19011_v29 = vld [vmem:[#allocation5 + $0x1c38] ss:$36 sps:$4 sm:$0xff]  }
 0x4cf   :  { %12590 = vmatprep.subr.bf16.mxu0 %v18968_v31  ;;  %13123 = vmatprep.subr.bf16.mxu1 %v18971_v35  ;;  %v19016_v30 = vld [vmem:[#allocation5 + $0x1c7c] ss:$36 sps:$4 sm:$0xff]   ;;  %v19019_v31 = vld [vmem:[#allocation5 + $0x1c84] ss:$36 sps:$4 sm:$0xff]  }
 0x4d0   :  { %v19014_v35 = vld [vmem:[#allocation5 + $0x1c78] ss:$36 sps:$4 sm:$0xff]  }
 0x4d2   :  { %12591 = vmatpush1.bf16.msra.mxu0 %v18966_v36  ;;  %13124 = vmatpush1.bf16.msra.mxu1 %v18969_v38  ;;  %v19017_v36 = vld [vmem:[#allocation5 + $0x1c80] ss:$36 sps:$4 sm:$0xff]  }
 0x4d3   :  { %12592 = vmatprep.subr.bf16.mxu0 %v18974_v55  ;;  %13125 = vmatprep.subr.bf16.mxu1 %v18977_v41  ;;  %v19022_v38 = vld [vmem:[#allocation5 + $0x1cc4] ss:$36 sps:$4 sm:$0xff]   ;;  %v19025_v55 = vld [vmem:[#allocation5 + $0x1ccc] ss:$36 sps:$4 sm:$0xff]  }
 0x4d4   :  { %v19020_v41 = vld [vmem:[#allocation5 + $0x1cc0] ss:$36 sps:$4 sm:$0xff]  }
 0x4d6   :  { %12593 = vmatpush1.bf16.msra.mxu0 %v18972_v43  ;;  %13126 = vmatpush1.bf16.msra.mxu1 %v18975_v53  ;;  %v19023_v43 = vld [vmem:[#allocation5 + $0x1cc8] ss:$36 sps:$4 sm:$0xff]  }
 0x4d7   :  { %12594 = vmatprep.subr.bf16.mxu0 %v18980_v63  ;;  %13127 = vmatprep.subr.bf16.mxu1 %v18983_v57  ;;  %v19028_v53 = vld [vmem:[#allocation5 + $0x1d0c] ss:$36 sps:$4 sm:$0xff]   ;;  %v19031_v63 = vld [vmem:[#allocation5 + $0x1d14] ss:$36 sps:$4 sm:$0xff]  }
 0x4d8   :  { %v19026_v57 = vld [vmem:[#allocation5 + $0x1d08] ss:$36 sps:$4 sm:$0xff]  }
 0x4da   :  { %12595 = vmatpush1.bf16.msra.mxu0 %v18978_v58  ;;  %13128 = vmatpush1.bf16.msra.mxu1 %v18981_v59  ;;  %v19029_v58 = vld [vmem:[#allocation5 + $0x1d10] ss:$36 sps:$4 sm:$0xff]  }
 0x4db   :  { %12605 = vmatprep.subr.bf16.mxu0 %v18986_v61  ;;  %13138 = vmatprep.subr.bf16.mxu1 %v18989_v0  ;;  %v19034_v59 = vld [vmem:[#allocation5 + $0x1d54] ss:$36 sps:$4 sm:$0xff]   ;;  %v19037_v61 = vld [vmem:[#allocation5 + $0x1d5c] ss:$36 sps:$4 sm:$0xff]  }
 0x4dc   :  { %v19032_v0 = vld [vmem:[#allocation5 + $0x1d50] ss:$36 sps:$4 sm:$0xff]  }
 0x4dd   :  { %12597 = vmatmul.mubr.bf16.vlgmr.msra.gmra.mrb[4].mxu0 %v20156_v19  ;;  %13130 = vmatmul.mubr.bf16.vlgmr.msra.gmra.mrb[4].mxu1 %v20156_v19 }
 0x4de   :  { %12606 = vmatpush1.bf16.msra.mxu0 %v18984_v49  ;;  %13139 = vmatpush1.bf16.msra.mxu1 %v18987_v1  ;;  %v19035_v49 = vld [vmem:[#allocation5 + $0x1d58] ss:$36 sps:$4 sm:$0xff]  }
 0x4df   :  { %12607 = vmatprep.subr.bf16.mxu0 %v18992_v2  ;;  %13140 = vmatprep.subr.bf16.mxu1 %v18995_v4  ;;  %v19040_v1 = vld [vmem:[#allocation5 + $0x1d9c] ss:$36 sps:$4 sm:$0xff]   ;;  %v19043_v2 = vld [vmem:[#allocation5 + $0x1da4] ss:$36 sps:$4 sm:$0xff]  }
 0x4e0   :  { %12637 = vmatprep.mubr.bf16.mxu0 %v20159_v24  ;;  %13170 = vmatprep.mubr.bf16.mxu1 %v20159_v24  ;;  %v19038_v4 = vld [vmem:[#allocation5 + $0x1d98] ss:$36 sps:$4 sm:$0xff]  }
 0x4e2   :  { %12608 = vmatpush1.bf16.msra.mxu0 %v18990_v5  ;;  %13141 = vmatpush1.bf16.msra.mxu1 %v18993_v7  ;;  %v19041_v5 = vld [vmem:[#allocation5 + $0x1da0] ss:$36 sps:$4 sm:$0xff]  }
 0x4e3   :  { %12609 = vmatprep.subr.bf16.mxu0 %v18998_v9  ;;  %13142 = vmatprep.subr.bf16.mxu1 %v19001_v11  ;;  %v19046_v7 = vld [vmem:[#allocation5 + $0x1de4] ss:$36 sps:$4 sm:$0xff]   ;;  %v19049_v9 = vld [vmem:[#allocation5 + $0x1dec] ss:$36 sps:$4 sm:$0xff]  }
 0x4e4   :  { %v19044_v11 = vld [vmem:[#allocation5 + $0x1de0] ss:$36 sps:$4 sm:$0xff]  }
 0x4e6   :  { %12610 = vmatpush1.bf16.msra.mxu0 %v18996_v12  ;;  %13143 = vmatpush1.bf16.msra.mxu1 %v18999_v15  ;;  %v19047_v12 = vld [vmem:[#allocation5 + $0x1de8] ss:$36 sps:$4 sm:$0xff]  }
 0x4e7   :  { %12611 = vmatprep.subr.bf16.mxu0 %v19004_v18  ;;  %13144 = vmatprep.subr.bf16.mxu1 %v19007_v20  ;;  %v19052_v15 = vld [vmem:[#allocation5 + $0x1e2c] ss:$36 sps:$4 sm:$0xff]   ;;  %v19055_v18 = vld [vmem:[#allocation5 + $0x1e34] ss:$36 sps:$4 sm:$0xff]  }
 0x4e8   :  { %v19050_v20 = vld [vmem:[#allocation5 + $0x1e28] ss:$36 sps:$4 sm:$0xff]  }
 0x4ea   :  { %12612 = vmatpush1.bf16.msra.mxu0 %v19002_v21  ;;  %13145 = vmatpush1.bf16.msra.mxu1 %v19005_v52  ;;  %v19053_v21 = vld [vmem:[#allocation5 + $0x1e30] ss:$36 sps:$4 sm:$0xff]  }
 0x4eb   :  { %12613 = vmatprep.subr.bf16.mxu0 %v19010_v22  ;;  %13146 = vmatprep.subr.bf16.mxu1 %v19013_v26  ;;  %v19058_v52 = vld [vmem:[#allocation5 + $0x1e74] ss:$36 sps:$4 sm:$0xff]   ;;  %v19061_v22 = vld [vmem:[#allocation5 + $0x1e7c] ss:$36 sps:$4 sm:$0xff]  }
 0x4ec   :  { %v19056_v26 = vld [vmem:[#allocation5 + $0x1e70] ss:$36 sps:$4 sm:$0xff]  }
 0x4ee   :  { %12614 = vmatpush1.bf16.msra.mxu0 %v19008_v28  ;;  %13147 = vmatpush1.bf16.msra.mxu1 %v19011_v29  ;;  %v19059_v28 = vld [vmem:[#allocation5 + $0x1e78] ss:$36 sps:$4 sm:$0xff]  }
 0x4ef   :  { %12615 = vmatprep.subr.bf16.mxu0 %v19016_v30  ;;  %13148 = vmatprep.subr.bf16.mxu1 %v19019_v31  ;;  %v19064_v29 = vld [vmem:[#allocation5 + $0x1ebc] ss:$36 sps:$4 sm:$0xff]   ;;  %v19067_v30 = vld [vmem:[#allocation5 + $0x1ec4] ss:$36 sps:$4 sm:$0xff]  }
 0x4f0   :  { %v19062_v31 = vld [vmem:[#allocation5 + $0x1eb8] ss:$36 sps:$4 sm:$0xff]  }
 0x4f2   :  { %12616 = vmatpush1.bf16.msra.mxu0 %v19014_v35  ;;  %13149 = vmatpush1.bf16.msra.mxu1 %v19017_v36  ;;  %v19065_v35 = vld [vmem:[#allocation5 + $0x1ec0] ss:$36 sps:$4 sm:$0xff]  }
 0x4f3   :  { %12617 = vmatprep.subr.bf16.mxu0 %v19022_v38  ;;  %13150 = vmatprep.subr.bf16.mxu1 %v19025_v55  ;;  %v19070_v36 = vld [vmem:[#allocation5 + $0x1f04] ss:$36 sps:$4 sm:$0xff]   ;;  %v19073_v38 = vld [vmem:[#allocation5 + $0x1f0c] ss:$36 sps:$4 sm:$0xff]  }
 0x4f4   :  { %v19068_v55 = vld [vmem:[#allocation5 + $0x1f00] ss:$36 sps:$4 sm:$0xff]  }
 0x4f6   :  { %12618 = vmatpush1.bf16.msra.mxu0 %v19020_v41  ;;  %13151 = vmatpush1.bf16.msra.mxu1 %v19023_v43  ;;  %v19071_v41 = vld [vmem:[#allocation5 + $0x1f08] ss:$36 sps:$4 sm:$0xff]  }
 0x4f7   :  { %12619 = vmatprep.subr.bf16.mxu0 %v19028_v53  ;;  %13152 = vmatprep.subr.bf16.mxu1 %v19031_v63  ;;  %v19076_v43 = vld [vmem:[#allocation5 + $0x1f4c] ss:$36 sps:$4 sm:$0xff]   ;;  %v19079_v53 = vld [vmem:[#allocation5 + $0x1f54] ss:$36 sps:$4 sm:$0xff]  }
 0x4f8   :  { %v19074_v63 = vld [vmem:[#allocation5 + $0x1f48] ss:$36 sps:$4 sm:$0xff]  }
 0x4fa   :  { %12620 = vmatpush1.bf16.msra.mxu0 %v19026_v57  ;;  %13153 = vmatpush1.bf16.msra.mxu1 %v19029_v58  ;;  %v19077_v57 = vld [vmem:[#allocation5 + $0x1f50] ss:$36 sps:$4 sm:$0xff]  }
 0x4fb   :  { %12621 = vmatprep.subr.bf16.mxu0 %v19034_v59  ;;  %13154 = vmatprep.subr.bf16.mxu1 %v19037_v61  ;;  %v19082_v58 = vld [vmem:[#allocation5 + $0x1f94] ss:$36 sps:$4 sm:$0xff]   ;;  %v19085_v59 = vld [vmem:[#allocation5 + $0x1f9c] ss:$36 sps:$4 sm:$0xff]  }
 0x4fc   :  { %v19080_v61 = vld [vmem:[#allocation5 + $0x1f90] ss:$36 sps:$4 sm:$0xff]  }
 0x4fe   :  { %12622 = vmatpush1.bf16.msra.mxu0 %v19032_v0  ;;  %13155 = vmatpush1.bf16.msra.mxu1 %v19035_v49  ;;  %v19083_v0 = vld [vmem:[#allocation5 + $0x1f98] ss:$36 sps:$4 sm:$0xff]  }
 0x4ff   :  { %12623 = vmatprep.subr.bf16.mxu0 %v19040_v1  ;;  %13156 = vmatprep.subr.bf16.mxu1 %v19043_v2  ;;  %v19088_v49 = vld [vmem:[#allocation5 + $0x1fdc] ss:$36 sps:$4 sm:$0xff]   ;;  %v19091_v1 = vld [vmem:[#allocation5 + $0x1fe4] ss:$36 sps:$4 sm:$0xff]  }
 0x500   :  { %v19086_v2 = vld [vmem:[#allocation5 + $0x1fd8] ss:$36 sps:$4 sm:$0xff]  }
 0x502   :  { %12624 = vmatpush1.bf16.msra.mxu0 %v19038_v4  ;;  %13157 = vmatpush1.bf16.msra.mxu1 %v19041_v5  ;;  %v19089_v4 = vld [vmem:[#allocation5 + $0x1fe0] ss:$36 sps:$4 sm:$0xff]  }
 0x503   :  { %12625 = vmatprep.subr.bf16.mxu0 %v19046_v7  ;;  %13158 = vmatprep.subr.bf16.mxu1 %v19049_v9  ;;  %v19094_v5 = vld [vmem:[#allocation5 + $0x2024] ss:$36 sps:$4 sm:$0xff]   ;;  %v19097_v7 = vld [vmem:[#allocation5 + $0x202c] ss:$36 sps:$4 sm:$0xff]  }
 0x504   :  { %v19092_v9 = vld [vmem:[#allocation5 + $0x2020] ss:$36 sps:$4 sm:$0xff]  }
 0x506   :  { %12626 = vmatpush1.bf16.msra.mxu0 %v19044_v11  ;;  %13159 = vmatpush1.bf16.msra.mxu1 %v19047_v12  ;;  %v19095_v11 = vld [vmem:[#allocation5 + $0x2028] ss:$36 sps:$4 sm:$0xff]  }
 0x507   :  { %12627 = vmatprep.subr.bf16.mxu0 %v19052_v15  ;;  %13160 = vmatprep.subr.bf16.mxu1 %v19055_v18  ;;  %v19100_v12 = vld [vmem:[#allocation5 + $0x206c] ss:$36 sps:$4 sm:$0xff]   ;;  %v19103_v15 = vld [vmem:[#allocation5 + $0x2074] ss:$36 sps:$4 sm:$0xff]  }
 0x508   :  { %v19098_v18 = vld [vmem:[#allocation5 + $0x2068] ss:$36 sps:$4 sm:$0xff]  }
 0x50a   :  { %12628 = vmatpush1.bf16.msra.mxu0 %v19050_v20  ;;  %13161 = vmatpush1.bf16.msra.mxu1 %v19053_v21  ;;  %v19101_v20 = vld [vmem:[#allocation5 + $0x2070] ss:$36 sps:$4 sm:$0xff]  }
 0x50b   :  { %12629 = vmatprep.subr.bf16.mxu0 %v19058_v52  ;;  %13162 = vmatprep.subr.bf16.mxu1 %v19061_v22  ;;  %v19106_v21 = vld [vmem:[#allocation5 + $0x20b4] ss:$36 sps:$4 sm:$0xff]   ;;  %v19109_v52 = vld [vmem:[#allocation5 + $0x20bc] ss:$36 sps:$4 sm:$0xff]  }
 0x50c   :  { %v19104_v22 = vld [vmem:[#allocation5 + $0x20b0] ss:$36 sps:$4 sm:$0xff]  }
 0x50e   :  { %12630 = vmatpush1.bf16.msra.mxu0 %v19056_v26  ;;  %13163 = vmatpush1.bf16.msra.mxu1 %v19059_v28  ;;  %v19107_v26 = vld [vmem:[#allocation5 + $0x20b8] ss:$36 sps:$4 sm:$0xff]  }
 0x50f   :  { %12631 = vmatprep.subr.bf16.mxu0 %v19064_v29  ;;  %13164 = vmatprep.subr.bf16.mxu1 %v19067_v30  ;;  %v19112_v28 = vld [vmem:[#allocation5 + $0x20fc] ss:$36 sps:$4 sm:$0xff]   ;;  %v19115_v29 = vld [vmem:[#allocation5 + $0x2104] ss:$36 sps:$4 sm:$0xff]  }
 0x510   :  { %v19110_v30 = vld [vmem:[#allocation5 + $0x20f8] ss:$36 sps:$4 sm:$0xff]  }
 0x512   :  { %12632 = vmatpush1.bf16.msra.mxu0 %v19062_v31  ;;  %13165 = vmatpush1.bf16.msra.mxu1 %v19065_v35  ;;  %v19113_v31 = vld [vmem:[#allocation5 + $0x2100] ss:$36 sps:$4 sm:$0xff]  }
 0x513   :  { %12633 = vmatprep.subr.bf16.mxu0 %v19070_v36  ;;  %13166 = vmatprep.subr.bf16.mxu1 %v19073_v38  ;;  %v19118_v35 = vld [vmem:[#allocation5 + $0x2144] ss:$36 sps:$4 sm:$0xff]   ;;  %v19121_v36 = vld [vmem:[#allocation5 + $0x214c] ss:$36 sps:$4 sm:$0xff]  }
 0x514   :  { %v19116_v38 = vld [vmem:[#allocation5 + $0x2140] ss:$36 sps:$4 sm:$0xff]  }
 0x516   :  { %12634 = vmatpush1.bf16.msra.mxu0 %v19068_v55  ;;  %13167 = vmatpush1.bf16.msra.mxu1 %v19071_v41  ;;  %v19119_v55 = vld [vmem:[#allocation5 + $0x2148] ss:$36 sps:$4 sm:$0xff]  }
 0x517   :  { %12635 = vmatprep.subr.bf16.mxu0 %v19076_v43  ;;  %13168 = vmatprep.subr.bf16.mxu1 %v19079_v53  ;;  %v19124_v41 = vld [vmem:[#allocation5 + $0x218c] ss:$36 sps:$4 sm:$0xff]   ;;  %v19127_v43 = vld [vmem:[#allocation5 + $0x2194] ss:$36 sps:$4 sm:$0xff]  }
 0x518   :  { %v19122_v53 = vld [vmem:[#allocation5 + $0x2188] ss:$36 sps:$4 sm:$0xff]  }
 0x51a   :  { %12636 = vmatpush1.bf16.msra.mxu0 %v19074_v63  ;;  %13169 = vmatpush1.bf16.msra.mxu1 %v19077_v57  ;;  %v19125_v63 = vld [vmem:[#allocation5 + $0x2190] ss:$36 sps:$4 sm:$0xff]  }
 0x51b   :  { %12646 = vmatprep.subr.bf16.mxu0 %v19082_v58  ;;  %13179 = vmatprep.subr.bf16.mxu1 %v19085_v59  ;;  %v19130_v57 = vld [vmem:[#allocation5 + $0x21d4] ss:$36 sps:$4 sm:$0xff]   ;;  %v19133_v58 = vld [vmem:[#allocation5 + $0x21dc] ss:$36 sps:$4 sm:$0xff]  }
 0x51c   :  { %v19128_v59 = vld [vmem:[#allocation5 + $0x21d0] ss:$36 sps:$4 sm:$0xff]  }
 0x51d   :  { %12638 = vmatmul.mubr.bf16.vlgmr.msra.gmra.mrb[4].mxu0 %v20167_v40  ;;  %13171 = vmatmul.mubr.bf16.vlgmr.msra.gmra.mrb[4].mxu1 %v20167_v40 }
 0x51e   :  { %12647 = vmatpush1.bf16.msra.mxu0 %v19080_v61  ;;  %13180 = vmatpush1.bf16.msra.mxu1 %v19083_v0  ;;  %v19131_v61 = vld [vmem:[#allocation5 + $0x21d8] ss:$36 sps:$4 sm:$0xff]  }
 0x51f   :  { %12648 = vmatprep.subr.bf16.mxu0 %v19088_v49  ;;  %13181 = vmatprep.subr.bf16.mxu1 %v19091_v1  ;;  %v19136_v0 = vld [vmem:[#allocation5 + $0x221c] ss:$36 sps:$4 sm:$0xff]   ;;  %v19139_v49 = vld [vmem:[#allocation5 + $0x2224] ss:$36 sps:$4 sm:$0xff]  }
 0x520   :  { %12678 = vmatprep.mubr.bf16.mxu0 %v20171_v47  ;;  %13211 = vmatprep.mubr.bf16.mxu1 %v20171_v47  ;;  %v19134_v1 = vld [vmem:[#allocation5 + $0x2218] ss:$36 sps:$4 sm:$0xff]  }
 0x522   :  { %12649 = vmatpush1.bf16.msra.mxu0 %v19086_v2  ;;  %13182 = vmatpush1.bf16.msra.mxu1 %v19089_v4  ;;  %v19137_v2 = vld [vmem:[#allocation5 + $0x2220] ss:$36 sps:$4 sm:$0xff]  }
 0x523   :  { %12650 = vmatprep.subr.bf16.mxu0 %v19094_v5  ;;  %13183 = vmatprep.subr.bf16.mxu1 %v19097_v7  ;;  %v19142_v4 = vld [vmem:[#allocation5 + $0x2264] ss:$36 sps:$4 sm:$0xff]   ;;  %v19145_v5 = vld [vmem:[#allocation5 + $0x226c] ss:$36 sps:$4 sm:$0xff]  }
 0x524   :  { %v19140_v7 = vld [vmem:[#allocation5 + $0x2260] ss:$36 sps:$4 sm:$0xff]  }
 0x526   :  { %12651 = vmatpush1.bf16.msra.mxu0 %v19092_v9  ;;  %13184 = vmatpush1.bf16.msra.mxu1 %v19095_v11  ;;  %v19143_v9 = vld [vmem:[#allocation5 + $0x2268] ss:$36 sps:$4 sm:$0xff]  }
 0x527   :  { %12652 = vmatprep.subr.bf16.mxu0 %v19100_v12  ;;  %13185 = vmatprep.subr.bf16.mxu1 %v19103_v15  ;;  %v19148_v11 = vld [vmem:[#allocation5 + $0x22ac] ss:$36 sps:$4 sm:$0xff]   ;;  %v19151_v12 = vld [vmem:[#allocation5 + $0x22b4] ss:$36 sps:$4 sm:$0xff]  }
 0x528   :  { %v19146_v15 = vld [vmem:[#allocation5 + $0x22a8] ss:$36 sps:$4 sm:$0xff]  }
 0x52a   :  { %12653 = vmatpush1.bf16.msra.mxu0 %v19098_v18  ;;  %13186 = vmatpush1.bf16.msra.mxu1 %v19101_v20  ;;  %v19149_v18 = vld [vmem:[#allocation5 + $0x22b0] ss:$36 sps:$4 sm:$0xff]  }
 0x52b   :  { %12654 = vmatprep.subr.bf16.mxu0 %v19106_v21  ;;  %13187 = vmatprep.subr.bf16.mxu1 %v19109_v52  ;;  %v19154_v20 = vld [vmem:[#allocation5 + $0x22f4] ss:$36 sps:$4 sm:$0xff]   ;;  %v19157_v21 = vld [vmem:[#allocation5 + $0x22fc] ss:$36 sps:$4 sm:$0xff]  }
 0x52c   :  { %v19152_v52 = vld [vmem:[#allocation5 + $0x22f0] ss:$36 sps:$4 sm:$0xff]  }
 0x52e   :  { %12655 = vmatpush1.bf16.msra.mxu0 %v19104_v22  ;;  %13188 = vmatpush1.bf16.msra.mxu1 %v19107_v26  ;;  %v19155_v22 = vld [vmem:[#allocation5 + $0x22f8] ss:$36 sps:$4 sm:$0xff]  }
 0x52f   :  { %12656 = vmatprep.subr.bf16.mxu0 %v19112_v28  ;;  %13189 = vmatprep.subr.bf16.mxu1 %v19115_v29  ;;  %v19160_v26 = vld [vmem:[#allocation5 + $0x233c] ss:$36 sps:$4 sm:$0xff]   ;;  %v19163_v28 = vld [vmem:[#allocation5 + $0x2344] ss:$36 sps:$4 sm:$0xff]  }
 0x530   :  { %v19158_v29 = vld [vmem:[#allocation5 + $0x2338] ss:$36 sps:$4 sm:$0xff]  }
 0x532   :  { %12657 = vmatpush1.bf16.msra.mxu0 %v19110_v30  ;;  %13190 = vmatpush1.bf16.msra.mxu1 %v19113_v31  ;;  %v19161_v30 = vld [vmem:[#allocation5 + $0x2340] ss:$36 sps:$4 sm:$0xff]  }
 0x533   :  { %12658 = vmatprep.subr.bf16.mxu0 %v19118_v35  ;;  %13191 = vmatprep.subr.bf16.mxu1 %v19121_v36  ;;  %v19166_v31 = vld [vmem:[#allocation5 + $0x2384] ss:$36 sps:$4 sm:$0xff]   ;;  %v19169_v35 = vld [vmem:[#allocation5 + $0x238c] ss:$36 sps:$4 sm:$0xff]  }
 0x534   :  { %v19164_v36 = vld [vmem:[#allocation5 + $0x2380] ss:$36 sps:$4 sm:$0xff]  }
 0x536   :  { %12659 = vmatpush1.bf16.msra.mxu0 %v19116_v38  ;;  %13192 = vmatpush1.bf16.msra.mxu1 %v19119_v55  ;;  %v19167_v38 = vld [vmem:[#allocation5 + $0x2388] ss:$36 sps:$4 sm:$0xff]  }
 0x537   :  { %12660 = vmatprep.subr.bf16.mxu0 %v19124_v41  ;;  %13193 = vmatprep.subr.bf16.mxu1 %v19127_v43  ;;  %v19172_v55 = vld [vmem:[#allocation5 + $0x23cc] ss:$36 sps:$4 sm:$0xff]   ;;  %v19175_v41 = vld [vmem:[#allocation5 + $0x23d4] ss:$36 sps:$4 sm:$0xff]  }
 0x538   :  { %v19170_v43 = vld [vmem:[#allocation5 + $0x23c8] ss:$36 sps:$4 sm:$0xff]  }
 0x53a   :  { %12661 = vmatpush1.bf16.msra.mxu0 %v19122_v53  ;;  %13194 = vmatpush1.bf16.msra.mxu1 %v19125_v63  ;;  %v19173_v53 = vld [vmem:[#allocation5 + $0x23d0] ss:$36 sps:$4 sm:$0xff]  }
 0x53b   :  { %12662 = vmatprep.subr.bf16.mxu0 %v19130_v57  ;;  %13195 = vmatprep.subr.bf16.mxu1 %v19133_v58  ;;  %v19178_v63 = vld [vmem:[#allocation5 + $0x2414] ss:$36 sps:$4 sm:$0xff]   ;;  %v19181_v57 = vld [vmem:[#allocation5 + $0x241c] ss:$36 sps:$4 sm:$0xff]  }
 0x53c   :  { %v19176_v58 = vld [vmem:[#allocation5 + $0x2410] ss:$36 sps:$4 sm:$0xff]  }
 0x53e   :  { %12663 = vmatpush1.bf16.msra.mxu0 %v19128_v59  ;;  %13196 = vmatpush1.bf16.msra.mxu1 %v19131_v61  ;;  %v19179_v59 = vld [vmem:[#allocation5 + $0x2418] ss:$36 sps:$4 sm:$0xff]  }
 0x53f   :  { %12664 = vmatprep.subr.bf16.mxu0 %v19136_v0  ;;  %13197 = vmatprep.subr.bf16.mxu1 %v19139_v49  ;;  %v19184_v61 = vld [vmem:[#allocation5 + $0x245c] ss:$36 sps:$4 sm:$0xff]   ;;  %v19187_v0 = vld [vmem:[#allocation5 + $0x2464] ss:$36 sps:$4 sm:$0xff]  }
 0x540   :  { %v19182_v49 = vld [vmem:[#allocation5 + $0x2458] ss:$36 sps:$4 sm:$0xff]  }
 0x542   :  { %12665 = vmatpush1.bf16.msra.mxu0 %v19134_v1  ;;  %13198 = vmatpush1.bf16.msra.mxu1 %v19137_v2  ;;  %v19185_v1 = vld [vmem:[#allocation5 + $0x2460] ss:$36 sps:$4 sm:$0xff]  }
 0x543   :  { %12666 = vmatprep.subr.bf16.mxu0 %v19142_v4  ;;  %13199 = vmatprep.subr.bf16.mxu1 %v19145_v5  ;;  %v19190_v2 = vld [vmem:[#allocation5 + $0x24a4] ss:$36 sps:$4 sm:$0xff]   ;;  %v19193_v4 = vld [vmem:[#allocation5 + $0x24ac] ss:$36 sps:$4 sm:$0xff]  }
 0x544   :  { %v19188_v5 = vld [vmem:[#allocation5 + $0x24a0] ss:$36 sps:$4 sm:$0xff]  }
 0x546   :  { %12667 = vmatpush1.bf16.msra.mxu0 %v19140_v7  ;;  %13200 = vmatpush1.bf16.msra.mxu1 %v19143_v9  ;;  %v19191_v7 = vld [vmem:[#allocation5 + $0x24a8] ss:$36 sps:$4 sm:$0xff]  }
 0x547   :  { %12668 = vmatprep.subr.bf16.mxu0 %v19148_v11  ;;  %13201 = vmatprep.subr.bf16.mxu1 %v19151_v12  ;;  %v19196_v9 = vld [vmem:[#allocation5 + $0x24ec] ss:$36 sps:$4 sm:$0xff]   ;;  %v19199_v11 = vld [vmem:[#allocation5 + $0x24f4] ss:$36 sps:$4 sm:$0xff]  }
 0x548   :  { %v19194_v12 = vld [vmem:[#allocation5 + $0x24e8] ss:$36 sps:$4 sm:$0xff]  }
 0x54a   :  { %12669 = vmatpush1.bf16.msra.mxu0 %v19146_v15  ;;  %13202 = vmatpush1.bf16.msra.mxu1 %v19149_v18  ;;  %v19197_v15 = vld [vmem:[#allocation5 + $0x24f0] ss:$36 sps:$4 sm:$0xff]  }
 0x54b   :  { %12670 = vmatprep.subr.bf16.mxu0 %v19154_v20  ;;  %13203 = vmatprep.subr.bf16.mxu1 %v19157_v21  ;;  %v19202_v18 = vld [vmem:[#allocation5 + $0x2534] ss:$36 sps:$4 sm:$0xff]   ;;  %v19205_v20 = vld [vmem:[#allocation5 + $0x253c] ss:$36 sps:$4 sm:$0xff]  }
 0x54c   :  { %v19200_v21 = vld [vmem:[#allocation5 + $0x2530] ss:$36 sps:$4 sm:$0xff]  }
 0x54e   :  { %12671 = vmatpush1.bf16.msra.mxu0 %v19152_v52  ;;  %13204 = vmatpush1.bf16.msra.mxu1 %v19155_v22  ;;  %v19203_v52 = vld [vmem:[#allocation5 + $0x2538] ss:$36 sps:$4 sm:$0xff]  }
 0x54f   :  { %12672 = vmatprep.subr.bf16.mxu0 %v19160_v26  ;;  %13205 = vmatprep.subr.bf16.mxu1 %v19163_v28  ;;  %v19208_v22 = vld [vmem:[#allocation5 + $0x257c] ss:$36 sps:$4 sm:$0xff]   ;;  %v19211_v26 = vld [vmem:[#allocation5 + $0x2584] ss:$36 sps:$4 sm:$0xff]  }
 0x550   :  { %v19206_v28 = vld [vmem:[#allocation5 + $0x2578] ss:$36 sps:$4 sm:$0xff]  }
 0x552   :  { %12673 = vmatpush1.bf16.msra.mxu0 %v19158_v29  ;;  %13206 = vmatpush1.bf16.msra.mxu1 %v19161_v30  ;;  %v19209_v29 = vld [vmem:[#allocation5 + $0x2580] ss:$36 sps:$4 sm:$0xff]  }
 0x553   :  { %12674 = vmatprep.subr.bf16.mxu0 %v19166_v31  ;;  %13207 = vmatprep.subr.bf16.mxu1 %v19169_v35  ;;  %v19214_v30 = vld [vmem:[#allocation5 + $0x25c4] ss:$36 sps:$4 sm:$0xff]   ;;  %v19217_v31 = vld [vmem:[#allocation5 + $0x25cc] ss:$36 sps:$4 sm:$0xff]  }
 0x554   :  { %v19212_v35 = vld [vmem:[#allocation5 + $0x25c0] ss:$36 sps:$4 sm:$0xff]  }
 0x556   :  { %12675 = vmatpush1.bf16.msra.mxu0 %v19164_v36  ;;  %13208 = vmatpush1.bf16.msra.mxu1 %v19167_v38  ;;  %v19215_v36 = vld [vmem:[#allocation5 + $0x25c8] ss:$36 sps:$4 sm:$0xff]  }
 0x557   :  { %12676 = vmatprep.subr.bf16.mxu0 %v19172_v55  ;;  %13209 = vmatprep.subr.bf16.mxu1 %v19175_v41  ;;  %v19220_v38 = vld [vmem:[#allocation5 + $0x260c] ss:$36 sps:$4 sm:$0xff]   ;;  %v19223_v55 = vld [vmem:[#allocation5 + $0x2614] ss:$36 sps:$4 sm:$0xff]  }
 0x558   :  { %v19218_v41 = vld [vmem:[#allocation5 + $0x2608] ss:$36 sps:$4 sm:$0xff]  }
 0x55a   :  { %12677 = vmatpush1.bf16.msra.mxu0 %v19170_v43  ;;  %13210 = vmatpush1.bf16.msra.mxu1 %v19173_v53  ;;  %v19221_v43 = vld [vmem:[#allocation5 + $0x2610] ss:$36 sps:$4 sm:$0xff]  }
 0x55b   :  { %12687 = vmatprep.subr.bf16.mxu0 %v19178_v63  ;;  %13220 = vmatprep.subr.bf16.mxu1 %v19181_v57  ;;  %v19226_v53 = vld [vmem:[#allocation5 + $0x2654] ss:$36 sps:$4 sm:$0xff]   ;;  %v19229_v63 = vld [vmem:[#allocation5 + $0x265c] ss:$36 sps:$4 sm:$0xff]  }
 0x55c   :  { %v19224_v57 = vld [vmem:[#allocation5 + $0x2650] ss:$36 sps:$4 sm:$0xff]  }
 0x55d   :  { %12679 = vmatmul.mubr.bf16.vlgmr.msra.gmra.mrb[4].mxu0 %v20183_v34  ;;  %13212 = vmatmul.mubr.bf16.vlgmr.msra.gmra.mrb[4].mxu1 %v20183_v34 }
 0x55e   :  { %12688 = vmatpush1.bf16.msra.mxu0 %v19176_v58  ;;  %13221 = vmatpush1.bf16.msra.mxu1 %v19179_v59  ;;  %v19227_v58 = vld [vmem:[#allocation5 + $0x2658] ss:$36 sps:$4 sm:$0xff]  }
 0x55f   :  { %12689 = vmatprep.subr.bf16.mxu0 %v19184_v61  ;;  %13222 = vmatprep.subr.bf16.mxu1 %v19187_v0  ;;  %v19232_v59 = vld [vmem:[#allocation5 + $0x269c] ss:$36 sps:$4 sm:$0xff]   ;;  %v19235_v61 = vld [vmem:[#allocation5 + $0x26a4] ss:$36 sps:$4 sm:$0xff]  }
 0x560   :  { %12719 = vmatprep.mubr.bf16.mxu0 %v20186_v8  ;;  %13252 = vmatprep.mubr.bf16.mxu1 %v20186_v8  ;;  %v19230_v0 = vld [vmem:[#allocation5 + $0x2698] ss:$36 sps:$4 sm:$0xff]  }
 0x562   :  { %12690 = vmatpush1.bf16.msra.mxu0 %v19182_v49  ;;  %13223 = vmatpush1.bf16.msra.mxu1 %v19185_v1  ;;  %v19233_v49 = vld [vmem:[#allocation5 + $0x26a0] ss:$36 sps:$4 sm:$0xff]  }
 0x563   :  { %12691 = vmatprep.subr.bf16.mxu0 %v19190_v2  ;;  %13224 = vmatprep.subr.bf16.mxu1 %v19193_v4  ;;  %v19238_v1 = vld [vmem:[#allocation5 + $0x26e4] ss:$36 sps:$4 sm:$0xff]   ;;  %v19241_v2 = vld [vmem:[#allocation5 + $0x26ec] ss:$36 sps:$4 sm:$0xff]  }
 0x564   :  { %v19236_v4 = vld [vmem:[#allocation5 + $0x26e0] ss:$36 sps:$4 sm:$0xff]  }
 0x566   :  { %12692 = vmatpush1.bf16.msra.mxu0 %v19188_v5  ;;  %13225 = vmatpush1.bf16.msra.mxu1 %v19191_v7  ;;  %v19239_v5 = vld [vmem:[#allocation5 + $0x26e8] ss:$36 sps:$4 sm:$0xff]  }
 0x567   :  { %12693 = vmatprep.subr.bf16.mxu0 %v19196_v9  ;;  %13226 = vmatprep.subr.bf16.mxu1 %v19199_v11  ;;  %v19244_v7 = vld [vmem:[#allocation5 + $0x272c] ss:$36 sps:$4 sm:$0xff]   ;;  %v19247_v9 = vld [vmem:[#allocation5 + $0x2734] ss:$36 sps:$4 sm:$0xff]  }
 0x568   :  { %v19242_v11 = vld [vmem:[#allocation5 + $0x2728] ss:$36 sps:$4 sm:$0xff]  }
 0x56a   :  { %12694 = vmatpush1.bf16.msra.mxu0 %v19194_v12  ;;  %13227 = vmatpush1.bf16.msra.mxu1 %v19197_v15  ;;  %v19245_v12 = vld [vmem:[#allocation5 + $0x2730] ss:$36 sps:$4 sm:$0xff]  }
 0x56b   :  { %12695 = vmatprep.subr.bf16.mxu0 %v19202_v18  ;;  %13228 = vmatprep.subr.bf16.mxu1 %v19205_v20  ;;  %v19250_v15 = vld [vmem:[#allocation5 + $0x2774] ss:$36 sps:$4 sm:$0xff]   ;;  %v19253_v18 = vld [vmem:[#allocation5 + $0x277c] ss:$36 sps:$4 sm:$0xff]  }
 0x56c   :  { %v19248_v20 = vld [vmem:[#allocation5 + $0x2770] ss:$36 sps:$4 sm:$0xff]  }
 0x56e   :  { %12696 = vmatpush1.bf16.msra.mxu0 %v19200_v21  ;;  %13229 = vmatpush1.bf16.msra.mxu1 %v19203_v52  ;;  %v19251_v21 = vld [vmem:[#allocation5 + $0x2778] ss:$36 sps:$4 sm:$0xff]  }
 0x56f   :  { %12697 = vmatprep.subr.bf16.mxu0 %v19208_v22  ;;  %13230 = vmatprep.subr.bf16.mxu1 %v19211_v26  ;;  %v19256_v52 = vld [vmem:[#allocation5 + $0x27bc] ss:$36 sps:$4 sm:$0xff]   ;;  %v19259_v22 = vld [vmem:[#allocation5 + $0x27c4] ss:$36 sps:$4 sm:$0xff]  }
 0x570   :  { %v19254_v26 = vld [vmem:[#allocation5 + $0x27b8] ss:$36 sps:$4 sm:$0xff]  }
 0x572   :  { %12698 = vmatpush1.bf16.msra.mxu0 %v19206_v28  ;;  %13231 = vmatpush1.bf16.msra.mxu1 %v19209_v29  ;;  %v19257_v28 = vld [vmem:[#allocation5 + $0x27c0] ss:$36 sps:$4 sm:$0xff]  }
 0x573   :  { %12699 = vmatprep.subr.bf16.mxu0 %v19214_v30  ;;  %13232 = vmatprep.subr.bf16.mxu1 %v19217_v31  ;;  %v19262_v29 = vld [vmem:[#allocation5 + $0x2804] ss:$36 sps:$4 sm:$0xff]   ;;  %v19265_v30 = vld [vmem:[#allocation5 + $0x280c] ss:$36 sps:$4 sm:$0xff]  }
 0x574   :  { %v19260_v31 = vld [vmem:[#allocation5 + $0x2800] ss:$36 sps:$4 sm:$0xff]  }
 0x576   :  { %12700 = vmatpush1.bf16.msra.mxu0 %v19212_v35  ;;  %13233 = vmatpush1.bf16.msra.mxu1 %v19215_v36  ;;  %v19263_v35 = vld [vmem:[#allocation5 + $0x2808] ss:$36 sps:$4 sm:$0xff]  }
 0x577   :  { %12701 = vmatprep.subr.bf16.mxu0 %v19220_v38  ;;  %13234 = vmatprep.subr.bf16.mxu1 %v19223_v55  ;;  %v19268_v36 = vld [vmem:[#allocation5 + $0x284c] ss:$36 sps:$4 sm:$0xff]   ;;  %v19271_v38 = vld [vmem:[#allocation5 + $0x2854] ss:$36 sps:$4 sm:$0xff]  }
 0x578   :  { %v19266_v55 = vld [vmem:[#allocation5 + $0x2848] ss:$36 sps:$4 sm:$0xff]  }
 0x57a   :  { %12702 = vmatpush1.bf16.msra.mxu0 %v19218_v41  ;;  %13235 = vmatpush1.bf16.msra.mxu1 %v19221_v43  ;;  %v19269_v41 = vld [vmem:[#allocation5 + $0x2850] ss:$36 sps:$4 sm:$0xff]  }
 0x57b   :  { %12703 = vmatprep.subr.bf16.mxu0 %v19226_v53  ;;  %13236 = vmatprep.subr.bf16.mxu1 %v19229_v63  ;;  %v19274_v43 = vld [vmem:[#allocation5 + $0x2894] ss:$36 sps:$4 sm:$0xff]   ;;  %v19277_v53 = vld [vmem:[#allocation5 + $0x289c] ss:$36 sps:$4 sm:$0xff]  }
 0x57c   :  { %v19272_v63 = vld [vmem:[#allocation5 + $0x2890] ss:$36 sps:$4 sm:$0xff]  }
 0x57e   :  { %12704 = vmatpush1.bf16.msra.mxu0 %v19224_v57  ;;  %13237 = vmatpush1.bf16.msra.mxu1 %v19227_v58  ;;  %v19275_v57 = vld [vmem:[#allocation5 + $0x2898] ss:$36 sps:$4 sm:$0xff]  }
 0x57f   :  { %12705 = vmatprep.subr.bf16.mxu0 %v19232_v59  ;;  %13238 = vmatprep.subr.bf16.mxu1 %v19235_v61  ;;  %v19280_v58 = vld [vmem:[#allocation5 + $0x28dc] ss:$36 sps:$4 sm:$0xff]   ;;  %v19283_v59 = vld [vmem:[#allocation5 + $0x28e4] ss:$36 sps:$4 sm:$0xff]  }
 0x580   :  { %v19278_v61 = vld [vmem:[#allocation5 + $0x28d8] ss:$36 sps:$4 sm:$0xff]  }
 0x582   :  { %12706 = vmatpush1.bf16.msra.mxu0 %v19230_v0  ;;  %13239 = vmatpush1.bf16.msra.mxu1 %v19233_v49  ;;  %v19281_v0 = vld [vmem:[#allocation5 + $0x28e0] ss:$36 sps:$4 sm:$0xff]  }
 0x583   :  { %12707 = vmatprep.subr.bf16.mxu0 %v19238_v1  ;;  %13240 = vmatprep.subr.bf16.mxu1 %v19241_v2  ;;  %v19286_v49 = vld [vmem:[#allocation5 + $0x2924] ss:$36 sps:$4 sm:$0xff]   ;;  %v19289_v1 = vld [vmem:[#allocation5 + $0x292c] ss:$36 sps:$4 sm:$0xff]  }
 0x584   :  { %v19284_v2 = vld [vmem:[#allocation5 + $0x2920] ss:$36 sps:$4 sm:$0xff]  }
 0x586   :  { %12708 = vmatpush1.bf16.msra.mxu0 %v19236_v4  ;;  %13241 = vmatpush1.bf16.msra.mxu1 %v19239_v5  ;;  %v19287_v4 = vld [vmem:[#allocation5 + $0x2928] ss:$36 sps:$4 sm:$0xff]  }
 0x587   :  { %12709 = vmatprep.subr.bf16.mxu0 %v19244_v7  ;;  %13242 = vmatprep.subr.bf16.mxu1 %v19247_v9  ;;  %v19292_v5 = vld [vmem:[#allocation5 + $0x296c] ss:$36 sps:$4 sm:$0xff]   ;;  %v19295_v7 = vld [vmem:[#allocation5 + $0x2974] ss:$36 sps:$4 sm:$0xff]  }
 0x588   :  { %v19290_v9 = vld [vmem:[#allocation5 + $0x2968] ss:$36 sps:$4 sm:$0xff]  }
 0x58a   :  { %12710 = vmatpush1.bf16.msra.mxu0 %v19242_v11  ;;  %13243 = vmatpush1.bf16.msra.mxu1 %v19245_v12  ;;  %v19293_v11 = vld [vmem:[#allocation5 + $0x2970] ss:$36 sps:$4 sm:$0xff]  }
 0x58b   :  { %12711 = vmatprep.subr.bf16.mxu0 %v19250_v15  ;;  %13244 = vmatprep.subr.bf16.mxu1 %v19253_v18  ;;  %v19298_v12 = vld [vmem:[#allocation5 + $0x29b4] ss:$36 sps:$4 sm:$0xff]   ;;  %v19301_v15 = vld [vmem:[#allocation5 + $0x29bc] ss:$36 sps:$4 sm:$0xff]  }
 0x58c   :  { %v19296_v18 = vld [vmem:[#allocation5 + $0x29b0] ss:$36 sps:$4 sm:$0xff]  }
 0x58e   :  { %12712 = vmatpush1.bf16.msra.mxu0 %v19248_v20  ;;  %13245 = vmatpush1.bf16.msra.mxu1 %v19251_v21  ;;  %v19299_v20 = vld [vmem:[#allocation5 + $0x29b8] ss:$36 sps:$4 sm:$0xff]  }
 0x58f   :  { %12713 = vmatprep.subr.bf16.mxu0 %v19256_v52  ;;  %13246 = vmatprep.subr.bf16.mxu1 %v19259_v22  ;;  %v19304_v21 = vld [vmem:[#allocation5 + $0x29fc] ss:$36 sps:$4 sm:$0xff]   ;;  %v19307_v52 = vld [vmem:[#allocation5 + $0x2a04] ss:$36 sps:$4 sm:$0xff]  }
 0x590   :  { %v19302_v22 = vld [vmem:[#allocation5 + $0x29f8] ss:$36 sps:$4 sm:$0xff]  }
 0x592   :  { %12714 = vmatpush1.bf16.msra.mxu0 %v19254_v26  ;;  %13247 = vmatpush1.bf16.msra.mxu1 %v19257_v28  ;;  %v19305_v26 = vld [vmem:[#allocation5 + $0x2a00] ss:$36 sps:$4 sm:$0xff]  }
 0x593   :  { %12715 = vmatprep.subr.bf16.mxu0 %v19262_v29  ;;  %13248 = vmatprep.subr.bf16.mxu1 %v19265_v30  ;;  %v19310_v28 = vld [vmem:[#allocation5 + $0x2a44] ss:$36 sps:$4 sm:$0xff]   ;;  %v19313_v29 = vld [vmem:[#allocation5 + $0x2a4c] ss:$36 sps:$4 sm:$0xff]  }
 0x594   :  { %v19308_v30 = vld [vmem:[#allocation5 + $0x2a40] ss:$36 sps:$4 sm:$0xff]  }
 0x596   :  { %12716 = vmatpush1.bf16.msra.mxu0 %v19260_v31  ;;  %13249 = vmatpush1.bf16.msra.mxu1 %v19263_v35  ;;  %v19311_v31 = vld [vmem:[#allocation5 + $0x2a48] ss:$36 sps:$4 sm:$0xff]  }
 0x597   :  { %12717 = vmatprep.subr.bf16.mxu0 %v19268_v36  ;;  %13250 = vmatprep.subr.bf16.mxu1 %v19271_v38  ;;  %v19316_v35 = vld [vmem:[#allocation5 + $0x2a8c] ss:$36 sps:$4 sm:$0xff]   ;;  %v19319_v36 = vld [vmem:[#allocation5 + $0x2a94] ss:$36 sps:$4 sm:$0xff]  }
 0x598   :  { %v19314_v38 = vld [vmem:[#allocation5 + $0x2a88] ss:$36 sps:$4 sm:$0xff]  }
 0x59a   :  { %12718 = vmatpush1.bf16.msra.mxu0 %v19266_v55  ;;  %13251 = vmatpush1.bf16.msra.mxu1 %v19269_v41  ;;  %v19317_v55 = vld [vmem:[#allocation5 + $0x2a90] ss:$36 sps:$4 sm:$0xff]  }
 0x59b   :  { %12728 = vmatprep.subr.bf16.mxu0 %v19274_v43  ;;  %13261 = vmatprep.subr.bf16.mxu1 %v19277_v53  ;;  %v19322_v41 = vld [vmem:[#allocation5 + $0x2ad4] ss:$36 sps:$4 sm:$0xff]   ;;  %v19325_v43 = vld [vmem:[#allocation5 + $0x2adc] ss:$36 sps:$4 sm:$0xff]  }
 0x59c   :  { %v19320_v53 = vld [vmem:[#allocation5 + $0x2ad0] ss:$36 sps:$4 sm:$0xff]  }
 0x59d   :  { %12720 = vmatmul.mubr.bf16.vlgmr.msra.gmra.mrb[4].mxu0 %v20194_v32  ;;  %13253 = vmatmul.mubr.bf16.vlgmr.msra.gmra.mrb[4].mxu1 %v20194_v32 }
 0x59e   :  { %12729 = vmatpush1.bf16.msra.mxu0 %v19272_v63  ;;  %13262 = vmatpush1.bf16.msra.mxu1 %v19275_v57  ;;  %v19323_v63 = vld [vmem:[#allocation5 + $0x2ad8] ss:$36 sps:$4 sm:$0xff]  }
 0x59f   :  { %12730 = vmatprep.subr.bf16.mxu0 %v19280_v58  ;;  %13263 = vmatprep.subr.bf16.mxu1 %v19283_v59  ;;  %v19328_v57 = vld [vmem:[#allocation5 + $0x2b1c] ss:$36 sps:$4 sm:$0xff]   ;;  %v19331_v58 = vld [vmem:[#allocation5 + $0x2b24] ss:$36 sps:$4 sm:$0xff]  }
 0x5a0   :  { %12760 = vmatprep.mubr.bf16.mxu0 %v20198_v39  ;;  %13293 = vmatprep.mubr.bf16.mxu1 %v20198_v39  ;;  %v19326_v59 = vld [vmem:[#allocation5 + $0x2b18] ss:$36 sps:$4 sm:$0xff]  }
 0x5a2   :  { %12731 = vmatpush1.bf16.msra.mxu0 %v19278_v61  ;;  %13264 = vmatpush1.bf16.msra.mxu1 %v19281_v0  ;;  %v19329_v61 = vld [vmem:[#allocation5 + $0x2b20] ss:$36 sps:$4 sm:$0xff]  }
 0x5a3   :  { %12732 = vmatprep.subr.bf16.mxu0 %v19286_v49  ;;  %13265 = vmatprep.subr.bf16.mxu1 %v19289_v1  ;;  %v19334_v0 = vld [vmem:[#allocation5 + $0x2b64] ss:$36 sps:$4 sm:$0xff]   ;;  %v19337_v49 = vld [vmem:[#allocation5 + $0x2b6c] ss:$36 sps:$4 sm:$0xff]  }
 0x5a4   :  { %v19332_v1 = vld [vmem:[#allocation5 + $0x2b60] ss:$36 sps:$4 sm:$0xff]  }
 0x5a6   :  { %12733 = vmatpush1.bf16.msra.mxu0 %v19284_v2  ;;  %13266 = vmatpush1.bf16.msra.mxu1 %v19287_v4  ;;  %v19335_v2 = vld [vmem:[#allocation5 + $0x2b68] ss:$36 sps:$4 sm:$0xff]  }
 0x5a7   :  { %12734 = vmatprep.subr.bf16.mxu0 %v19292_v5  ;;  %13267 = vmatprep.subr.bf16.mxu1 %v19295_v7  ;;  %v19340_v4 = vld [vmem:[#allocation5 + $0x2bac] ss:$36 sps:$4 sm:$0xff]   ;;  %v19343_v5 = vld [vmem:[#allocation5 + $0x2bb4] ss:$36 sps:$4 sm:$0xff]  }
 0x5a8   :  { %v19338_v7 = vld [vmem:[#allocation5 + $0x2ba8] ss:$36 sps:$4 sm:$0xff]  }
 0x5aa   :  { %12735 = vmatpush1.bf16.msra.mxu0 %v19290_v9  ;;  %13268 = vmatpush1.bf16.msra.mxu1 %v19293_v11  ;;  %v19341_v9 = vld [vmem:[#allocation5 + $0x2bb0] ss:$36 sps:$4 sm:$0xff]  }
 0x5ab   :  { %12736 = vmatprep.subr.bf16.mxu0 %v19298_v12  ;;  %13269 = vmatprep.subr.bf16.mxu1 %v19301_v15  ;;  %v19346_v11 = vld [vmem:[#allocation5 + $0x2bf4] ss:$36 sps:$4 sm:$0xff]   ;;  %v19349_v12 = vld [vmem:[#allocation5 + $0x2bfc] ss:$36 sps:$4 sm:$0xff]  }
 0x5ac   :  { %v19344_v15 = vld [vmem:[#allocation5 + $0x2bf0] ss:$36 sps:$4 sm:$0xff]  }
 0x5ae   :  { %12737 = vmatpush1.bf16.msra.mxu0 %v19296_v18  ;;  %13270 = vmatpush1.bf16.msra.mxu1 %v19299_v20  ;;  %v19347_v18 = vld [vmem:[#allocation5 + $0x2bf8] ss:$36 sps:$4 sm:$0xff]  }
 0x5af   :  { %12738 = vmatprep.subr.bf16.mxu0 %v19304_v21  ;;  %13271 = vmatprep.subr.bf16.mxu1 %v19307_v52  ;;  %v19352_v20 = vld [vmem:[#allocation5 + $0x2c3c] ss:$36 sps:$4 sm:$0xff]   ;;  %v19355_v21 = vld [vmem:[#allocation5 + $0x2c44] ss:$36 sps:$4 sm:$0xff]  }
 0x5b0   :  { %v19350_v52 = vld [vmem:[#allocation5 + $0x2c38] ss:$36 sps:$4 sm:$0xff]  }
 0x5b2   :  { %12739 = vmatpush1.bf16.msra.mxu0 %v19302_v22  ;;  %13272 = vmatpush1.bf16.msra.mxu1 %v19305_v26  ;;  %v19353_v22 = vld [vmem:[#allocation5 + $0x2c40] ss:$36 sps:$4 sm:$0xff]  }
 0x5b3   :  { %12740 = vmatprep.subr.bf16.mxu0 %v19310_v28  ;;  %13273 = vmatprep.subr.bf16.mxu1 %v19313_v29  ;;  %v19358_v26 = vld [vmem:[#allocation5 + $0x2c84] ss:$36 sps:$4 sm:$0xff]   ;;  %v19361_v28 = vld [vmem:[#allocation5 + $0x2c8c] ss:$36 sps:$4 sm:$0xff]  }
 0x5b4   :  { %v19356_v29 = vld [vmem:[#allocation5 + $0x2c80] ss:$36 sps:$4 sm:$0xff]  }
 0x5b6   :  { %12741 = vmatpush1.bf16.msra.mxu0 %v19308_v30  ;;  %13274 = vmatpush1.bf16.msra.mxu1 %v19311_v31  ;;  %v19359_v30 = vld [vmem:[#allocation5 + $0x2c88] ss:$36 sps:$4 sm:$0xff]  }
 0x5b7   :  { %12742 = vmatprep.subr.bf16.mxu0 %v19316_v35  ;;  %13275 = vmatprep.subr.bf16.mxu1 %v19319_v36  ;;  %v19364_v31 = vld [vmem:[#allocation5 + $0x2ccc] ss:$36 sps:$4 sm:$0xff]   ;;  %v19367_v35 = vld [vmem:[#allocation5 + $0x2cd4] ss:$36 sps:$4 sm:$0xff]  }
 0x5b8   :  { %v19362_v36 = vld [vmem:[#allocation5 + $0x2cc8] ss:$36 sps:$4 sm:$0xff]  }
 0x5ba   :  { %12743 = vmatpush1.bf16.msra.mxu0 %v19314_v38  ;;  %13276 = vmatpush1.bf16.msra.mxu1 %v19317_v55  ;;  %v19365_v38 = vld [vmem:[#allocation5 + $0x2cd0] ss:$36 sps:$4 sm:$0xff]  }
 0x5bb   :  { %12744 = vmatprep.subr.bf16.mxu0 %v19322_v41  ;;  %13277 = vmatprep.subr.bf16.mxu1 %v19325_v43  ;;  %v19370_v55 = vld [vmem:[#allocation5 + $0x2d14] ss:$36 sps:$4 sm:$0xff]   ;;  %v19373_v41 = vld [vmem:[#allocation5 + $0x2d1c] ss:$36 sps:$4 sm:$0xff]  }
 0x5bc   :  { %v19368_v43 = vld [vmem:[#allocation5 + $0x2d10] ss:$36 sps:$4 sm:$0xff]  }
 0x5be   :  { %12745 = vmatpush1.bf16.msra.mxu0 %v19320_v53  ;;  %13278 = vmatpush1.bf16.msra.mxu1 %v19323_v63  ;;  %v19371_v53 = vld [vmem:[#allocation5 + $0x2d18] ss:$36 sps:$4 sm:$0xff]  }
 0x5bf   :  { %12746 = vmatprep.subr.bf16.mxu0 %v19328_v57  ;;  %13279 = vmatprep.subr.bf16.mxu1 %v19331_v58  ;;  %v19376_v63 = vld [vmem:[#allocation5 + $0x2d5c] ss:$36 sps:$4 sm:$0xff]   ;;  %v19379_v57 = vld [vmem:[#allocation5 + $0x2d64] ss:$36 sps:$4 sm:$0xff]  }
 0x5c0   :  { %v19374_v58 = vld [vmem:[#allocation5 + $0x2d58] ss:$36 sps:$4 sm:$0xff]  }
 0x5c2   :  { %12747 = vmatpush1.bf16.msra.mxu0 %v19326_v59  ;;  %13280 = vmatpush1.bf16.msra.mxu1 %v19329_v61  ;;  %v19377_v59 = vld [vmem:[#allocation5 + $0x2d60] ss:$36 sps:$4 sm:$0xff]  }
 0x5c3   :  { %12748 = vmatprep.subr.bf16.mxu0 %v19334_v0  ;;  %13281 = vmatprep.subr.bf16.mxu1 %v19337_v49  ;;  %v19382_v61 = vld [vmem:[#allocation5 + $0x2da4] ss:$36 sps:$4 sm:$0xff]   ;;  %v19385_v0 = vld [vmem:[#allocation5 + $0x2dac] ss:$36 sps:$4 sm:$0xff]  }
 0x5c4   :  { %v19380_v49 = vld [vmem:[#allocation5 + $0x2da0] ss:$36 sps:$4 sm:$0xff]  }
 0x5c6   :  { %12749 = vmatpush1.bf16.msra.mxu0 %v19332_v1  ;;  %13282 = vmatpush1.bf16.msra.mxu1 %v19335_v2  ;;  %v19383_v1 = vld [vmem:[#allocation5 + $0x2da8] ss:$36 sps:$4 sm:$0xff]  }
 0x5c7   :  { %12750 = vmatprep.subr.bf16.mxu0 %v19340_v4  ;;  %13283 = vmatprep.subr.bf16.mxu1 %v19343_v5  ;;  %v19388_v2 = vld [vmem:[#allocation5 + $0x2dec] ss:$36 sps:$4 sm:$0xff]   ;;  %v19391_v4 = vld [vmem:[#allocation5 + $0x2df4] ss:$36 sps:$4 sm:$0xff]  }
 0x5c8   :  { %v19386_v5 = vld [vmem:[#allocation5 + $0x2de8] ss:$36 sps:$4 sm:$0xff]  }
 0x5ca   :  { %12751 = vmatpush1.bf16.msra.mxu0 %v19338_v7  ;;  %13284 = vmatpush1.bf16.msra.mxu1 %v19341_v9  ;;  %v19389_v7 = vld [vmem:[#allocation5 + $0x2df0] ss:$36 sps:$4 sm:$0xff]  }
 0x5cb   :  { %12752 = vmatprep.subr.bf16.mxu0 %v19346_v11  ;;  %13285 = vmatprep.subr.bf16.mxu1 %v19349_v12  ;;  %v19394_v9 = vld [vmem:[#allocation5 + $0x2e34] ss:$36 sps:$4 sm:$0xff]   ;;  %v19397_v11 = vld [vmem:[#allocation5 + $0x2e3c] ss:$36 sps:$4 sm:$0xff]  }
 0x5cc   :  { %v19392_v12 = vld [vmem:[#allocation5 + $0x2e30] ss:$36 sps:$4 sm:$0xff]  }
 0x5ce   :  { %12753 = vmatpush1.bf16.msra.mxu0 %v19344_v15  ;;  %13286 = vmatpush1.bf16.msra.mxu1 %v19347_v18  ;;  %v19395_v15 = vld [vmem:[#allocation5 + $0x2e38] ss:$36 sps:$4 sm:$0xff]  }
 0x5cf   :  { %12754 = vmatprep.subr.bf16.mxu0 %v19352_v20  ;;  %13287 = vmatprep.subr.bf16.mxu1 %v19355_v21  ;;  %v19400_v18 = vld [vmem:[#allocation5 + $0x2e7c] ss:$36 sps:$4 sm:$0xff]   ;;  %v19403_v20 = vld [vmem:[#allocation5 + $0x2e84] ss:$36 sps:$4 sm:$0xff]  }
 0x5d0   :  { %v19398_v21 = vld [vmem:[#allocation5 + $0x2e78] ss:$36 sps:$4 sm:$0xff]  }
 0x5d2   :  { %12755 = vmatpush1.bf16.msra.mxu0 %v19350_v52  ;;  %13288 = vmatpush1.bf16.msra.mxu1 %v19353_v22  ;;  %v19401_v52 = vld [vmem:[#allocation5 + $0x2e80] ss:$36 sps:$4 sm:$0xff]  }
 0x5d3   :  { %12756 = vmatprep.subr.bf16.mxu0 %v19358_v26  ;;  %13289 = vmatprep.subr.bf16.mxu1 %v19361_v28  ;;  %v19406_v22 = vld [vmem:[#allocation5 + $0x2ec4] ss:$36 sps:$4 sm:$0xff]   ;;  %v19409_v26 = vld [vmem:[#allocation5 + $0x2ecc] ss:$36 sps:$4 sm:$0xff]  }
 0x5d4   :  { %v19404_v28 = vld [vmem:[#allocation5 + $0x2ec0] ss:$36 sps:$4 sm:$0xff]  }
 0x5d6   :  { %12757 = vmatpush1.bf16.msra.mxu0 %v19356_v29  ;;  %13290 = vmatpush1.bf16.msra.mxu1 %v19359_v30  ;;  %v19407_v29 = vld [vmem:[#allocation5 + $0x2ec8] ss:$36 sps:$4 sm:$0xff]  }
 0x5d7   :  { %12758 = vmatprep.subr.bf16.mxu0 %v19364_v31  ;;  %13291 = vmatprep.subr.bf16.mxu1 %v19367_v35  ;;  %v19412_v30 = vld [vmem:[#allocation5 + $0x2f0c] ss:$36 sps:$4 sm:$0xff]   ;;  %v19415_v31 = vld [vmem:[#allocation5 + $0x2f14] ss:$36 sps:$4 sm:$0xff]  }
 0x5d8   :  { %v19410_v35 = vld [vmem:[#allocation5 + $0x2f08] ss:$36 sps:$4 sm:$0xff]  }
 0x5da   :  { %12759 = vmatpush1.bf16.msra.mxu0 %v19362_v36  ;;  %13292 = vmatpush1.bf16.msra.mxu1 %v19365_v38  ;;  %v19413_v36 = vld [vmem:[#allocation5 + $0x2f10] ss:$36 sps:$4 sm:$0xff]  }
 0x5db   :  { %12769 = vmatprep.subr.bf16.mxu0 %v19370_v55  ;;  %13302 = vmatprep.subr.bf16.mxu1 %v19373_v41  ;;  %v19418_v38 = vld [vmem:[#allocation5 + $0x2f54] ss:$36 sps:$4 sm:$0xff]   ;;  %v19421_v55 = vld [vmem:[#allocation5 + $0x2f5c] ss:$36 sps:$4 sm:$0xff]  }
 0x5dc   :  { %v19416_v41 = vld [vmem:[#allocation5 + $0x2f50] ss:$36 sps:$4 sm:$0xff]  }
 0x5dd   :  { %12761 = vmatmul.mubr.bf16.vlgmr.msra.gmra.mrb[4].mxu0 %v20211_v6  ;;  %13294 = vmatmul.mubr.bf16.vlgmr.msra.gmra.mrb[4].mxu1 %v20211_v6 }
 0x5de   :  { %12770 = vmatpush1.bf16.msra.mxu0 %v19368_v43  ;;  %13303 = vmatpush1.bf16.msra.mxu1 %v19371_v53  ;;  %v19419_v43 = vld [vmem:[#allocation5 + $0x2f58] ss:$36 sps:$4 sm:$0xff]  }
 0x5df   :  { %12771 = vmatprep.subr.bf16.mxu0 %v19376_v63  ;;  %13304 = vmatprep.subr.bf16.mxu1 %v19379_v57  ;;  %v19424_v53 = vld [vmem:[#allocation5 + $0x2f9c] ss:$36 sps:$4 sm:$0xff]   ;;  %v19427_v63 = vld [vmem:[#allocation5 + $0x2fa4] ss:$36 sps:$4 sm:$0xff]  }
 0x5e0   :  { %12801 = vmatprep.mubr.bf16.mxu0 %v20214_v14  ;;  %13334 = vmatprep.mubr.bf16.mxu1 %v20214_v14  ;;  %v19422_v57 = vld [vmem:[#allocation5 + $0x2f98] ss:$36 sps:$4 sm:$0xff]  }
 0x5e2   :  { %12772 = vmatpush1.bf16.msra.mxu0 %v19374_v58  ;;  %13305 = vmatpush1.bf16.msra.mxu1 %v19377_v59  ;;  %v19425_v58 = vld [vmem:[#allocation5 + $0x2fa0] ss:$36 sps:$4 sm:$0xff]  }
 0x5e3   :  { %12773 = vmatprep.subr.bf16.mxu0 %v19382_v61  ;;  %13306 = vmatprep.subr.bf16.mxu1 %v19385_v0  ;;  %v19430_v59 = vld [vmem:[#allocation5 + $0x2fe4] ss:$36 sps:$4 sm:$0xff]   ;;  %v19433_v61 = vld [vmem:[#allocation5 + $0x2fec] ss:$36 sps:$4 sm:$0xff]  }
 0x5e4   :  { %v19428_v0 = vld [vmem:[#allocation5 + $0x2fe0] ss:$36 sps:$4 sm:$0xff]  }
 0x5e6   :  { %12774 = vmatpush1.bf16.msra.mxu0 %v19380_v49  ;;  %13307 = vmatpush1.bf16.msra.mxu1 %v19383_v1  ;;  %v19431_v49 = vld [vmem:[#allocation5 + $0x2fe8] ss:$36 sps:$4 sm:$0xff]  }
 0x5e7   :  { %12775 = vmatprep.subr.bf16.mxu0 %v19388_v2  ;;  %13308 = vmatprep.subr.bf16.mxu1 %v19391_v4  ;;  %v19436_v1 = vld [vmem:[#allocation5 + $0x302c] ss:$36 sps:$4 sm:$0xff]   ;;  %v19439_v2 = vld [vmem:[#allocation5 + $0x3034] ss:$36 sps:$4 sm:$0xff]  }
 0x5e8   :  { %v19434_v4 = vld [vmem:[#allocation5 + $0x3028] ss:$36 sps:$4 sm:$0xff]  }
 0x5ea   :  { %12776 = vmatpush1.bf16.msra.mxu0 %v19386_v5  ;;  %13309 = vmatpush1.bf16.msra.mxu1 %v19389_v7  ;;  %v19437_v5 = vld [vmem:[#allocation5 + $0x3030] ss:$36 sps:$4 sm:$0xff]  }
 0x5eb   :  { %12777 = vmatprep.subr.bf16.mxu0 %v19394_v9  ;;  %13310 = vmatprep.subr.bf16.mxu1 %v19397_v11  ;;  %v19442_v7 = vld [vmem:[#allocation5 + $0x3074] ss:$36 sps:$4 sm:$0xff]   ;;  %v19445_v9 = vld [vmem:[#allocation5 + $0x307c] ss:$36 sps:$4 sm:$0xff]  }
 0x5ec   :  { %v19440_v11 = vld [vmem:[#allocation5 + $0x3070] ss:$36 sps:$4 sm:$0xff]  }
 0x5ee   :  { %12778 = vmatpush1.bf16.msra.mxu0 %v19392_v12  ;;  %13311 = vmatpush1.bf16.msra.mxu1 %v19395_v15  ;;  %v19443_v12 = vld [vmem:[#allocation5 + $0x3078] ss:$36 sps:$4 sm:$0xff]  }
 0x5ef   :  { %12779 = vmatprep.subr.bf16.mxu0 %v19400_v18  ;;  %13312 = vmatprep.subr.bf16.mxu1 %v19403_v20  ;;  %v19448_v15 = vld [vmem:[#allocation5 + $0x30bc] ss:$36 sps:$4 sm:$0xff]   ;;  %v19451_v18 = vld [vmem:[#allocation5 + $0x30c4] ss:$36 sps:$4 sm:$0xff]  }
 0x5f0   :  { %v19446_v20 = vld [vmem:[#allocation5 + $0x30b8] ss:$36 sps:$4 sm:$0xff]  }
 0x5f2   :  { %12780 = vmatpush1.bf16.msra.mxu0 %v19398_v21  ;;  %13313 = vmatpush1.bf16.msra.mxu1 %v19401_v52  ;;  %v19449_v21 = vld [vmem:[#allocation5 + $0x30c0] ss:$36 sps:$4 sm:$0xff]  }
 0x5f3   :  { %12781 = vmatprep.subr.bf16.mxu0 %v19406_v22  ;;  %13314 = vmatprep.subr.bf16.mxu1 %v19409_v26  ;;  %v19454_v52 = vld [vmem:[#allocation5 + $0x3104] ss:$36 sps:$4 sm:$0xff]   ;;  %v19457_v22 = vld [vmem:[#allocation5 + $0x310c] ss:$36 sps:$4 sm:$0xff]  }
 0x5f4   :  { %v19452_v26 = vld [vmem:[#allocation5 + $0x3100] ss:$36 sps:$4 sm:$0xff]  }
 0x5f6   :  { %12782 = vmatpush1.bf16.msra.mxu0 %v19404_v28  ;;  %13315 = vmatpush1.bf16.msra.mxu1 %v19407_v29  ;;  %v19455_v28 = vld [vmem:[#allocation5 + $0x3108] ss:$36 sps:$4 sm:$0xff]  }
 0x5f7   :  { %12783 = vmatprep.subr.bf16.mxu0 %v19412_v30  ;;  %13316 = vmatprep.subr.bf16.mxu1 %v19415_v31  ;;  %v19460_v29 = vld [vmem:[#allocation5 + $0x314c] ss:$36 sps:$4 sm:$0xff]   ;;  %v19463_v30 = vld [vmem:[#allocation5 + $0x3154] ss:$36 sps:$4 sm:$0xff]  }
 0x5f8   :  { %v19458_v31 = vld [vmem:[#allocation5 + $0x3148] ss:$36 sps:$4 sm:$0xff]  }
 0x5fa   :  { %12784 = vmatpush1.bf16.msra.mxu0 %v19410_v35  ;;  %13317 = vmatpush1.bf16.msra.mxu1 %v19413_v36  ;;  %v19461_v35 = vld [vmem:[#allocation5 + $0x3150] ss:$36 sps:$4 sm:$0xff]  }
 0x5fb   :  { %12785 = vmatprep.subr.bf16.mxu0 %v19418_v38  ;;  %13318 = vmatprep.subr.bf16.mxu1 %v19421_v55  ;;  %v19466_v36 = vld [vmem:[#allocation5 + $0x3194] ss:$36 sps:$4 sm:$0xff]   ;;  %v19469_v38 = vld [vmem:[#allocation5 + $0x319c] ss:$36 sps:$4 sm:$0xff]  }
 0x5fc   :  { %v19464_v55 = vld [vmem:[#allocation5 + $0x3190] ss:$36 sps:$4 sm:$0xff]  }
 0x5fe   :  { %12786 = vmatpush1.bf16.msra.mxu0 %v19416_v41  ;;  %13319 = vmatpush1.bf16.msra.mxu1 %v19419_v43  ;;  %v19467_v41 = vld [vmem:[#allocation5 + $0x3198] ss:$36 sps:$4 sm:$0xff]  }
 0x5ff   :  { %12787 = vmatprep.subr.bf16.mxu0 %v19424_v53  ;;  %13320 = vmatprep.subr.bf16.mxu1 %v19427_v63  ;;  %v19472_v43 = vld [vmem:[#allocation5 + $0x31dc] ss:$36 sps:$4 sm:$0xff]   ;;  %v19475_v53 = vld [vmem:[#allocation5 + $0x31e4] ss:$36 sps:$4 sm:$0xff]  }
 0x600   :  { %v19470_v63 = vld [vmem:[#allocation5 + $0x31d8] ss:$36 sps:$4 sm:$0xff]  }
 0x602   :  { %12788 = vmatpush1.bf16.msra.mxu0 %v19422_v57  ;;  %13321 = vmatpush1.bf16.msra.mxu1 %v19425_v58  ;;  %v19473_v57 = vld [vmem:[#allocation5 + $0x31e0] ss:$36 sps:$4 sm:$0xff]  }
 0x603   :  { %12789 = vmatprep.subr.bf16.mxu0 %v19430_v59  ;;  %13322 = vmatprep.subr.bf16.mxu1 %v19433_v61  ;;  %v19478_v58 = vld [vmem:[#allocation5 + $0x3224] ss:$36 sps:$4 sm:$0xff]   ;;  %v19481_v59 = vld [vmem:[#allocation5 + $0x322c] ss:$36 sps:$4 sm:$0xff]  }
 0x604   :  { %v19476_v61 = vld [vmem:[#allocation5 + $0x3220] ss:$36 sps:$4 sm:$0xff]  }
 0x606   :  { %12790 = vmatpush1.bf16.msra.mxu0 %v19428_v0  ;;  %13323 = vmatpush1.bf16.msra.mxu1 %v19431_v49  ;;  %v19479_v0 = vld [vmem:[#allocation5 + $0x3228] ss:$36 sps:$4 sm:$0xff]  }
 0x607   :  { %12791 = vmatprep.subr.bf16.mxu0 %v19436_v1  ;;  %13324 = vmatprep.subr.bf16.mxu1 %v19439_v2  ;;  %v19484_v49 = vld [vmem:[#allocation5 + $0x326c] ss:$36 sps:$4 sm:$0xff]   ;;  %v19487_v1 = vld [vmem:[#allocation5 + $0x3274] ss:$36 sps:$4 sm:$0xff]  }
 0x608   :  { %v19482_v2 = vld [vmem:[#allocation5 + $0x3268] ss:$36 sps:$4 sm:$0xff]  }
 0x60a   :  { %12792 = vmatpush1.bf16.msra.mxu0 %v19434_v4  ;;  %13325 = vmatpush1.bf16.msra.mxu1 %v19437_v5  ;;  %v19485_v4 = vld [vmem:[#allocation5 + $0x3270] ss:$36 sps:$4 sm:$0xff]  }
 0x60b   :  { %12793 = vmatprep.subr.bf16.mxu0 %v19442_v7  ;;  %13326 = vmatprep.subr.bf16.mxu1 %v19445_v9  ;;  %v19490_v5 = vld [vmem:[#allocation5 + $0x32b4] ss:$36 sps:$4 sm:$0xff]   ;;  %v19493_v7 = vld [vmem:[#allocation5 + $0x32bc] ss:$36 sps:$4 sm:$0xff]  }
 0x60c   :  { %v19488_v9 = vld [vmem:[#allocation5 + $0x32b0] ss:$36 sps:$4 sm:$0xff]  }
 0x60e   :  { %12794 = vmatpush1.bf16.msra.mxu0 %v19440_v11  ;;  %13327 = vmatpush1.bf16.msra.mxu1 %v19443_v12  ;;  %v19491_v11 = vld [vmem:[#allocation5 + $0x32b8] ss:$36 sps:$4 sm:$0xff]  }
 0x60f   :  { %12795 = vmatprep.subr.bf16.mxu0 %v19448_v15  ;;  %13328 = vmatprep.subr.bf16.mxu1 %v19451_v18  ;;  %v19496_v12 = vld [vmem:[#allocation5 + $0x32fc] ss:$36 sps:$4 sm:$0xff]   ;;  %v19499_v15 = vld [vmem:[#allocation5 + $0x3304] ss:$36 sps:$4 sm:$0xff]  }
 0x610   :  { %v19494_v18 = vld [vmem:[#allocation5 + $0x32f8] ss:$36 sps:$4 sm:$0xff]  }
 0x612   :  { %12796 = vmatpush1.bf16.msra.mxu0 %v19446_v20  ;;  %13329 = vmatpush1.bf16.msra.mxu1 %v19449_v21  ;;  %v19497_v20 = vld [vmem:[#allocation5 + $0x3300] ss:$36 sps:$4 sm:$0xff]  }
 0x613   :  { %12797 = vmatprep.subr.bf16.mxu0 %v19454_v52  ;;  %13330 = vmatprep.subr.bf16.mxu1 %v19457_v22  ;;  %v19502_v21 = vld [vmem:[#allocation5 + $0x3344] ss:$36 sps:$4 sm:$0xff]   ;;  %v19505_v52 = vld [vmem:[#allocation5 + $0x334c] ss:$36 sps:$4 sm:$0xff]  }
 0x614   :  { %v19500_v22 = vld [vmem:[#allocation5 + $0x3340] ss:$36 sps:$4 sm:$0xff]  }
 0x616   :  { %12798 = vmatpush1.bf16.msra.mxu0 %v19452_v26  ;;  %13331 = vmatpush1.bf16.msra.mxu1 %v19455_v28  ;;  %v19503_v26 = vld [vmem:[#allocation5 + $0x3348] ss:$36 sps:$4 sm:$0xff]  }
 0x617   :  { %12799 = vmatprep.subr.bf16.mxu0 %v19460_v29  ;;  %13332 = vmatprep.subr.bf16.mxu1 %v19463_v30  ;;  %v19508_v28 = vld [vmem:[#allocation5 + $0x338c] ss:$36 sps:$4 sm:$0xff]   ;;  %v19511_v29 = vld [vmem:[#allocation5 + $0x3394] ss:$36 sps:$4 sm:$0xff]  }
 0x618   :  { %v19506_v30 = vld [vmem:[#allocation5 + $0x3388] ss:$36 sps:$4 sm:$0xff]  }
 0x61a   :  { %12800 = vmatpush1.bf16.msra.mxu0 %v19458_v31  ;;  %13333 = vmatpush1.bf16.msra.mxu1 %v19461_v35  ;;  %v19509_v31 = vld [vmem:[#allocation5 + $0x3390] ss:$36 sps:$4 sm:$0xff]  }
 0x61b   :  { %12810 = vmatprep.subr.bf16.mxu0 %v19466_v36  ;;  %13343 = vmatprep.subr.bf16.mxu1 %v19469_v38  ;;  %v19514_v35 = vld [vmem:[#allocation5 + $0x33d4] ss:$36 sps:$4 sm:$0xff]   ;;  %v19517_v36 = vld [vmem:[#allocation5 + $0x33dc] ss:$36 sps:$4 sm:$0xff]  }
 0x61c   :  { %v19512_v38 = vld [vmem:[#allocation5 + $0x33d0] ss:$36 sps:$4 sm:$0xff]  }
 0x61d   :  { %12802 = vmatmul.mubr.bf16.vlgmr.msra.gmra.mrb[4].mxu0 %v20222_v46  ;;  %13335 = vmatmul.mubr.bf16.vlgmr.msra.gmra.mrb[4].mxu1 %v20222_v46 }
 0x61e   :  { %12811 = vmatpush1.bf16.msra.mxu0 %v19464_v55  ;;  %13344 = vmatpush1.bf16.msra.mxu1 %v19467_v41  ;;  %v19515_v55 = vld [vmem:[#allocation5 + $0x33d8] ss:$36 sps:$4 sm:$0xff]  }
 0x61f   :  { %12812 = vmatprep.subr.bf16.mxu0 %v19472_v43  ;;  %13345 = vmatprep.subr.bf16.mxu1 %v19475_v53  ;;  %v19520_v41 = vld [vmem:[#allocation5 + $0x341c] ss:$36 sps:$4 sm:$0xff]   ;;  %v19523_v43 = vld [vmem:[#allocation5 + $0x3424] ss:$36 sps:$4 sm:$0xff]  }
 0x620   :  { %12842 = vmatprep.mubr.bf16.mxu0 %v20226_v54  ;;  %13375 = vmatprep.mubr.bf16.mxu1 %v20226_v54  ;;  %v19518_v53 = vld [vmem:[#allocation5 + $0x3418] ss:$36 sps:$4 sm:$0xff]  }
 0x622   :  { %12813 = vmatpush1.bf16.msra.mxu0 %v19470_v63  ;;  %13346 = vmatpush1.bf16.msra.mxu1 %v19473_v57  ;;  %v19521_v63 = vld [vmem:[#allocation5 + $0x3420] ss:$36 sps:$4 sm:$0xff]  }
 0x623   :  { %12814 = vmatprep.subr.bf16.mxu0 %v19478_v58  ;;  %13347 = vmatprep.subr.bf16.mxu1 %v19481_v59  ;;  %v19526_v57 = vld [vmem:[#allocation5 + $0x3464] ss:$36 sps:$4 sm:$0xff]   ;;  %v19529_v58 = vld [vmem:[#allocation5 + $0x346c] ss:$36 sps:$4 sm:$0xff]  }
 0x624   :  { %v19524_v59 = vld [vmem:[#allocation5 + $0x3460] ss:$36 sps:$4 sm:$0xff]  }
 0x626   :  { %12815 = vmatpush1.bf16.msra.mxu0 %v19476_v61  ;;  %13348 = vmatpush1.bf16.msra.mxu1 %v19479_v0  ;;  %v19527_v61 = vld [vmem:[#allocation5 + $0x3468] ss:$36 sps:$4 sm:$0xff]  }
 0x627   :  { %12816 = vmatprep.subr.bf16.mxu0 %v19484_v49  ;;  %13349 = vmatprep.subr.bf16.mxu1 %v19487_v1  ;;  %v19532_v0 = vld [vmem:[#allocation5 + $0x34ac] ss:$36 sps:$4 sm:$0xff]   ;;  %v19535_v49 = vld [vmem:[#allocation5 + $0x34b4] ss:$36 sps:$4 sm:$0xff]  }
 0x628   :  { %v19530_v1 = vld [vmem:[#allocation5 + $0x34a8] ss:$36 sps:$4 sm:$0xff]  }
 0x62a   :  { %12817 = vmatpush1.bf16.msra.mxu0 %v19482_v2  ;;  %13350 = vmatpush1.bf16.msra.mxu1 %v19485_v4  ;;  %v19533_v2 = vld [vmem:[#allocation5 + $0x34b0] ss:$36 sps:$4 sm:$0xff]  }
 0x62b   :  { %12818 = vmatprep.subr.bf16.mxu0 %v19490_v5  ;;  %13351 = vmatprep.subr.bf16.mxu1 %v19493_v7  ;;  %v19538_v4 = vld [vmem:[#allocation5 + $0x34f4] ss:$36 sps:$4 sm:$0xff]   ;;  %v19541_v5 = vld [vmem:[#allocation5 + $0x34fc] ss:$36 sps:$4 sm:$0xff]  }
 0x62c   :  { %v19536_v7 = vld [vmem:[#allocation5 + $0x34f0] ss:$36 sps:$4 sm:$0xff]  }
 0x62e   :  { %12819 = vmatpush1.bf16.msra.mxu0 %v19488_v9  ;;  %13352 = vmatpush1.bf16.msra.mxu1 %v19491_v11  ;;  %v19539_v9 = vld [vmem:[#allocation5 + $0x34f8] ss:$36 sps:$4 sm:$0xff]  }
 0x62f   :  { %12820 = vmatprep.subr.bf16.mxu0 %v19496_v12  ;;  %13353 = vmatprep.subr.bf16.mxu1 %v19499_v15  ;;  %v19544_v11 = vld [vmem:[#allocation5 + $0x353c] ss:$36 sps:$4 sm:$0xff]   ;;  %v19547_v12 = vld [vmem:[#allocation5 + $0x3544] ss:$36 sps:$4 sm:$0xff]  }
 0x630   :  { %v19542_v15 = vld [vmem:[#allocation5 + $0x3538] ss:$36 sps:$4 sm:$0xff]  }
 0x632   :  { %12821 = vmatpush1.bf16.msra.mxu0 %v19494_v18  ;;  %13354 = vmatpush1.bf16.msra.mxu1 %v19497_v20  ;;  %v19545_v18 = vld [vmem:[#allocation5 + $0x3540] ss:$36 sps:$4 sm:$0xff]  }
 0x633   :  { %12822 = vmatprep.subr.bf16.mxu0 %v19502_v21  ;;  %13355 = vmatprep.subr.bf16.mxu1 %v19505_v52  ;;  %v19550_v20 = vld [vmem:[#allocation5 + $0x3584] ss:$36 sps:$4 sm:$0xff]   ;;  %v19553_v21 = vld [vmem:[#allocation5 + $0x358c] ss:$36 sps:$4 sm:$0xff]  }
 0x634   :  { %v19548_v52 = vld [vmem:[#allocation5 + $0x3580] ss:$36 sps:$4 sm:$0xff]  }
 0x636   :  { %12823 = vmatpush1.bf16.msra.mxu0 %v19500_v22  ;;  %13356 = vmatpush1.bf16.msra.mxu1 %v19503_v26  ;;  %v19551_v22 = vld [vmem:[#allocation5 + $0x3588] ss:$36 sps:$4 sm:$0xff]  }
 0x637   :  { %12824 = vmatprep.subr.bf16.mxu0 %v19508_v28  ;;  %13357 = vmatprep.subr.bf16.mxu1 %v19511_v29  ;;  %v19556_v26 = vld [vmem:[#allocation5 + $0x35cc] ss:$36 sps:$4 sm:$0xff]   ;;  %v19559_v28 = vld [vmem:[#allocation5 + $0x35d4] ss:$36 sps:$4 sm:$0xff]  }
 0x638   :  { %v19554_v29 = vld [vmem:[#allocation5 + $0x35c8] ss:$36 sps:$4 sm:$0xff]  }
 0x63a   :  { %12825 = vmatpush1.bf16.msra.mxu0 %v19506_v30  ;;  %13358 = vmatpush1.bf16.msra.mxu1 %v19509_v31  ;;  %v19557_v30 = vld [vmem:[#allocation5 + $0x35d0] ss:$36 sps:$4 sm:$0xff]  }
 0x63b   :  { %12826 = vmatprep.subr.bf16.mxu0 %v19514_v35  ;;  %13359 = vmatprep.subr.bf16.mxu1 %v19517_v36  ;;  %v19562_v31 = vld [vmem:[#allocation5 + $0x3614] ss:$36 sps:$4 sm:$0xff]   ;;  %v19565_v35 = vld [vmem:[#allocation5 + $0x361c] ss:$36 sps:$4 sm:$0xff]  }
 0x63c   :  { %v19560_v36 = vld [vmem:[#allocation5 + $0x3610] ss:$36 sps:$4 sm:$0xff]  }
 0x63e   :  { %12827 = vmatpush1.bf16.msra.mxu0 %v19512_v38  ;;  %13360 = vmatpush1.bf16.msra.mxu1 %v19515_v55  ;;  %v19563_v38 = vld [vmem:[#allocation5 + $0x3618] ss:$36 sps:$4 sm:$0xff]  }
 0x63f   :  { %12828 = vmatprep.subr.bf16.mxu0 %v19520_v41  ;;  %13361 = vmatprep.subr.bf16.mxu1 %v19523_v43  ;;  %v19568_v55 = vld [vmem:[#allocation5 + $0x365c] ss:$36 sps:$4 sm:$0xff]   ;;  %v19571_v41 = vld [vmem:[#allocation5 + $0x3664] ss:$36 sps:$4 sm:$0xff]  }
 0x640   :  { %v19566_v43 = vld [vmem:[#allocation5 + $0x3658] ss:$36 sps:$4 sm:$0xff]  }
 0x642   :  { %12829 = vmatpush1.bf16.msra.mxu0 %v19518_v53  ;;  %13362 = vmatpush1.bf16.msra.mxu1 %v19521_v63  ;;  %v19569_v53 = vld [vmem:[#allocation5 + $0x3660] ss:$36 sps:$4 sm:$0xff]  }
 0x643   :  { %12830 = vmatprep.subr.bf16.mxu0 %v19526_v57  ;;  %13363 = vmatprep.subr.bf16.mxu1 %v19529_v58  ;;  %v19574_v63 = vld [vmem:[#allocation5 + $0x36a4] ss:$36 sps:$4 sm:$0xff]   ;;  %v19577_v57 = vld [vmem:[#allocation5 + $0x36ac] ss:$36 sps:$4 sm:$0xff]  }
 0x644   :  { %v19572_v58 = vld [vmem:[#allocation5 + $0x36a0] ss:$36 sps:$4 sm:$0xff]  }
 0x646   :  { %12831 = vmatpush1.bf16.msra.mxu0 %v19524_v59  ;;  %13364 = vmatpush1.bf16.msra.mxu1 %v19527_v61  ;;  %v19575_v59 = vld [vmem:[#allocation5 + $0x36a8] ss:$36 sps:$4 sm:$0xff]  }
 0x647   :  { %12832 = vmatprep.subr.bf16.mxu0 %v19532_v0  ;;  %13365 = vmatprep.subr.bf16.mxu1 %v19535_v49  ;;  %v19580_v61 = vld [vmem:[#allocation5 + $0x36ec] ss:$36 sps:$4 sm:$0xff]   ;;  %v19583_v0 = vld [vmem:[#allocation5 + $0x36f4] ss:$36 sps:$4 sm:$0xff]  }
 0x648   :  { %v19578_v49 = vld [vmem:[#allocation5 + $0x36e8] ss:$36 sps:$4 sm:$0xff]  }
 0x64a   :  { %12833 = vmatpush1.bf16.msra.mxu0 %v19530_v1  ;;  %13366 = vmatpush1.bf16.msra.mxu1 %v19533_v2  ;;  %v19581_v1 = vld [vmem:[#allocation5 + $0x36f0] ss:$36 sps:$4 sm:$0xff]   ;;  %v19584_v2 = vld [vmem:[#allocation5 + $0x260] ss:$36 sps:$4 sm:$0xff]  }
 0x64b   :  { %12834 = vmatprep.subr.bf16.mxu0 %v19538_v4  ;;  %13367 = vmatprep.subr.bf16.mxu1 %v19541_v5  ;;  %v19585_v4 = vld [vmem:[#allocation5 + $0x6e0] ss:$36 sps:$4 sm:$0xff]  }
 0x64c   :  { %v19586_v5 = vld [vmem:[#allocation5 + $0x20] ss:$36 sps:$4 sm:$0xff]  }
 0x64e   :  { %12835 = vmatpush1.bf16.msra.mxu0 %v19536_v7  ;;  %13368 = vmatpush1.bf16.msra.mxu1 %v19539_v9  ;;  %v19588_v7 = vld [vmem:[#allocation5 + $0x2a8] ss:$36 sps:$4 sm:$0xff]  }
 0x64f   :  { %12836 = vmatprep.subr.bf16.mxu0 %v19544_v11  ;;  %13369 = vmatprep.subr.bf16.mxu1 %v19547_v12  ;;  %v19589_v9 = vld [vmem:[#allocation5 + $0x728] ss:$36 sps:$4 sm:$0xff]  }
 0x650   :  { %v19590_v11 = vld [vmem:[#allocation5 + $0x68] ss:$36 sps:$4 sm:$0xff]  }
 0x651   :  { %v19591_v12 = vld [vmem:[#allocation5 + $0x4e8] ss:$36 sps:$4 sm:$0xff]  }
 0x652   :  { %12837 = vmatpush1.bf16.msra.mxu0 %v19542_v15  ;;  %13370 = vmatpush1.bf16.msra.mxu1 %v19545_v18  ;;  %v19592_v15 = vld [vmem:[#allocation5 + $0x2f0] ss:$36 sps:$4 sm:$0xff]  }
 0x653   :  { %12838 = vmatprep.subr.bf16.mxu0 %v19550_v20  ;;  %13371 = vmatprep.subr.bf16.mxu1 %v19553_v21  ;;  %v19593_v18 = vld [vmem:[#allocation5 + $0x770] ss:$36 sps:$4 sm:$0xff]  }
 0x654   :  { %v19594_v20 = vld [vmem:[#allocation5 + $0xb0] ss:$36 sps:$4 sm:$0xff]  }
 0x655   :  { %v19595_v21 = vld [vmem:[#allocation5 + $0x530] ss:$36 sps:$4 sm:$0xff]  }
 0x656   :  { %12839 = vmatpush1.bf16.msra.mxu0 %v19548_v52  ;;  %13372 = vmatpush1.bf16.msra.mxu1 %v19551_v22  ;;  %v19596_v52 = vld [vmem:[#allocation5 + $0x338] ss:$36 sps:$4 sm:$0xff]  }
 0x657   :  { %12840 = vmatprep.subr.bf16.mxu0 %v19556_v26  ;;  %13373 = vmatprep.subr.bf16.mxu1 %v19559_v28  ;;  %v19597_v22 = vld [vmem:[#allocation5 + $0x7b8] ss:$36 sps:$4 sm:$0xff]  }
 0x658   :  { %v19598_v26 = vld [vmem:[#allocation5 + $0xf8] ss:$36 sps:$4 sm:$0xff]  }
 0x659   :  { %v19599_v28 = vld [vmem:[#allocation5 + $0x578] ss:$36 sps:$4 sm:$0xff]  }
 0x65a   :  { %12841 = vmatpush1.bf16.msra.mxu0 %v19554_v29  ;;  %13374 = vmatpush1.bf16.msra.mxu1 %v19557_v30  ;;  %v19600_v29 = vld [vmem:[#allocation5 + $0x380] ss:$36 sps:$4 sm:$0xff]  }
 0x65b   :  { %12851 = vmatprep.subr.bf16.mxu0 %v19562_v31  ;;  %13384 = vmatprep.subr.bf16.mxu1 %v19565_v35  ;;  %v19601_v30 = vld [vmem:[#allocation5 + $0x800] ss:$36 sps:$4 sm:$0xff]   ;;  %v19604_v31 = vld [vmem:[#allocation5 + $0x3c8] ss:$36 sps:$4 sm:$0xff]  }
 0x65c   :  { %v19605_v35 = vld [vmem:[#allocation5 + $0x848] ss:$36 sps:$4 sm:$0xff]  }
 0x65d   :  { %12843 = vmatmul.mubr.bf16.vlgmr.msra.gmra.mrb[4].mxu0 %v20234_v25  ;;  %13376 = vmatmul.mubr.bf16.vlgmr.msra.gmra.mrb[4].mxu1 %v20234_v25 }
 0x65e   :  { %12852 = vmatpush1.bf16.msra.mxu0 %v19560_v36  ;;  %13385 = vmatpush1.bf16.msra.mxu1 %v19563_v38  ;;  %v19606_v36 = vld [vmem:[#allocation5 + $0x188] ss:$36 sps:$4 sm:$0xff]  }
 0x65f   :  { %12853 = vmatprep.subr.bf16.mxu0 %v19568_v55  ;;  %13386 = vmatprep.subr.bf16.mxu1 %v19571_v41  ;;  %v19607_v38 = vld [vmem:[#allocation5 + $0x608] ss:$36 sps:$4 sm:$0xff]   ;;  %v19608_v55 = vld [vmem:[#allocation5 + $0x410] ss:$36 sps:$4 sm:$0xff]  }
 0x660   :  { %12883 = vmatprep.mubr.bf16.mxu0 %v19985_v16  ;;  %13416 = vmatprep.mubr.bf16.mxu1 %v19985_v16  ;;  %v19587_v16 = vld [vmem:[#allocation5 + $0x4a0] ss:$36 sps:$4 sm:$0xff]   ;;  %v19609_v41 = vld [vmem:[#allocation5 + $0x890] ss:$36 sps:$4 sm:$0xff]  }
 0x662   :  { %12854 = vmatpush1.bf16.msra.mxu0 %v19566_v43  ;;  %13387 = vmatpush1.bf16.msra.mxu1 %v19569_v53  ;;  %v19610_v43 = vld [vmem:[#allocation5 + $0x1d0] ss:$36 sps:$4 sm:$0xff]  }
 0x663   :  { %12855 = vmatprep.subr.bf16.mxu0 %v19574_v63  ;;  %13388 = vmatprep.subr.bf16.mxu1 %v19577_v57  ;;  %v19611_v53 = vld [vmem:[#allocation5 + $0x650] ss:$36 sps:$4 sm:$0xff]   ;;  %v19612_v63 = vld [vmem:[#allocation5 + $0x458] ss:$36 sps:$4 sm:$0xff]  }
 0x664   :  { %v19613_v57 = vld [vmem:[#allocation5 + $0x8d8] ss:$36 sps:$4 sm:$0xff]  }
 0x666   :  { %12856 = vmatpush1.bf16.msra.mxu0 %v19572_v58  ;;  %13389 = vmatpush1.bf16.msra.mxu1 %v19575_v59  ;;  %v19614_v58 = vld [vmem:[#allocation5 + $0x218] ss:$36 sps:$4 sm:$0xff]  }
 0x667   :  { %12857 = vmatprep.subr.bf16.mxu0 %v19580_v61  ;;  %13390 = vmatprep.subr.bf16.mxu1 %v19583_v0  ;;  %v19615_v59 = vld [vmem:[#allocation5 + $0x698] ss:$36 sps:$4 sm:$0xff]   ;;  %v19616_v61 = vld [vmem:[#allocation5 + $0xb60] ss:$36 sps:$4 sm:$0xff]  }
 0x668   :  { %v19617_v0 = vld [vmem:[#allocation5 + $0xfe0] ss:$36 sps:$4 sm:$0xff]  }
 0x66a   :  { %12858 = vmatpush1.bf16.msra.mxu0 %v19578_v49  ;;  %13391 = vmatpush1.bf16.msra.mxu1 %v19581_v1  ;;  %v19618_v49 = vld [vmem:[#allocation5 + $0x920] ss:$36 sps:$4 sm:$0xff]  }
 0x66b   :  { %16620 = vmatprep.subr.bf16.mxu0 %v19584_v2  ;;  %16642 = vmatprep.subr.bf16.mxu1 %v19585_v4  ;;  %v19619_v1 = vld [vmem:[#allocation5 + $0xda0] ss:$36 sps:$4 sm:$0xff]   ;;  %v19620_v2 = vld [vmem:[#allocation5 + $0xba8] ss:$36 sps:$4 sm:$0xff]  }
 0x66c   :  { %v19621_v4 = vld [vmem:[#allocation5 + $0x1028] ss:$36 sps:$4 sm:$0xff]  }
 0x66d   :  { %16544 = vmatmul.mubr.msk.bf16.vlgmr.msra.gmra.mrb[4].mxu0 %vm11289_vm0, %v20241_v56  ;;  %16545 = vmatmul.mubr.msk.bf16.vlgmr.msra.gmra.mrb[4].mxu1 %vm11289_vm0, %v20241_v56 }
 0x66e   :  { %16621 = vmatpush3.bf16.msra.mxu0 %v19586_v5  ;;  %16643 = vmatpush3.bf16.msra.mxu1 %v19587_v16  ;;  %v19622_v5 = vld [vmem:[#allocation5 + $0x968] ss:$36 sps:$4 sm:$0xff]  }
 0x66f   :  { %16622 = vmatprep.subr.bf16.mxu0 %v19588_v7  ;;  %16644 = vmatprep.subr.bf16.mxu1 %v19589_v9  ;;  %v19623_v16 = vld [vmem:[#allocation5 + $0xde8] ss:$36 sps:$4 sm:$0xff]   ;;  %v19624_v7 = vld [vmem:[#allocation5 + $0xbf0] ss:$36 sps:$4 sm:$0xff]  }
 0x670   :  { %13457 = vmatprep.mubr.bf16.mxu0 %v20077_v60  ;;  %13497 = vmatprep.mubr.bf16.mxu1 %v20086_v17  ;;  %v19602_v60 = vld [vmem:[#allocation5 + $0x140] ss:$36 sps:$4 sm:$0xff]   ;;  %v19625_v9 = vld [vmem:[#allocation5 + $0x1070] ss:$36 sps:$4 sm:$0xff]  }
 0x671   :  { %v19603_v17 = vld [vmem:[#allocation5 + $0x5c0] ss:$36 sps:$4 sm:$0xff]  }
 0x672   :  { %16623 = vmatpush3.bf16.msra.mxu0 %v19590_v11  ;;  %16645 = vmatpush3.bf16.msra.mxu1 %v19591_v12  ;;  %v19626_v11 = vld [vmem:[#allocation5 + $0x9b0] ss:$36 sps:$4 sm:$0xff]  }
 0x673   :  { %16624 = vmatprep.subr.bf16.mxu0 %v19592_v15  ;;  %16646 = vmatprep.subr.bf16.mxu1 %v19593_v18  ;;  %v19627_v12 = vld [vmem:[#allocation5 + $0xe30] ss:$36 sps:$4 sm:$0xff]   ;;  %v19630_v15 = vld [vmem:[#allocation5 + $0x9f8] ss:$36 sps:$4 sm:$0xff]  }
 0x674   :  { %v19631_v18 = vld [vmem:[#allocation5 + $0xe78] ss:$36 sps:$4 sm:$0xff]  }
 0x676   :  { %16625 = vmatpush3.bf16.msra.mxu0 %v19594_v20  ;;  %16647 = vmatpush3.bf16.msra.mxu1 %v19595_v21  ;;  %v19632_v20 = vld [vmem:[#allocation5 + $0xc80] ss:$36 sps:$4 sm:$0xff]  }
 0x677   :  { %16626 = vmatprep.subr.bf16.mxu0 %v19596_v52  ;;  %16648 = vmatprep.subr.bf16.mxu1 %v19597_v22  ;;  %v19633_v21 = vld [vmem:[#allocation5 + $0x1100] ss:$36 sps:$4 sm:$0xff]   ;;  %v19636_v52 = vld [vmem:[#allocation5 + $0xcc8] ss:$36 sps:$4 sm:$0xff]  }
 0x678   :  { %v19637_v22 = vld [vmem:[#allocation5 + $0x1148] ss:$36 sps:$4 sm:$0xff]  }
 0x67a   :  { %16627 = vmatpush3.bf16.msra.mxu0 %v19598_v26  ;;  %16649 = vmatpush3.bf16.msra.mxu1 %v19599_v28  ;;  %v19638_v26 = vld [vmem:[#allocation5 + $0xa88] ss:$36 sps:$4 sm:$0xff]  }
 0x67b   :  { %16628 = vmatprep.subr.bf16.mxu0 %v19600_v29  ;;  %16650 = vmatprep.subr.bf16.mxu1 %v19601_v30  ;;  %v19639_v28 = vld [vmem:[#allocation5 + $0xf08] ss:$36 sps:$4 sm:$0xff]   ;;  %v19640_v29 = vld [vmem:[#allocation5 + $0xd10] ss:$36 sps:$4 sm:$0xff]  }
 0x67c   :  { %v19641_v30 = vld [vmem:[#allocation5 + $0x1190] ss:$36 sps:$4 sm:$0xff]  }
 0x67e   :  { %16629 = vmatpush3.bf16.msra.mxu0 %v19602_v60  ;;  %16651 = vmatpush3.bf16.msra.mxu1 %v19603_v17  ;;  %v19642_v60 = vld [vmem:[#allocation5 + $0xad0] ss:$36 sps:$4 sm:$0xff]  }
 0x67f   :  { %16630 = vmatprep.subr.bf16.mxu0 %v19604_v31  ;;  %16652 = vmatprep.subr.bf16.mxu1 %v19605_v35  ;;  %v19643_v17 = vld [vmem:[#allocation5 + $0xf50] ss:$36 sps:$4 sm:$0xff]   ;;  %v19644_v31 = vld [vmem:[#allocation5 + $0xd58] ss:$36 sps:$4 sm:$0xff]  }
 0x680   :  { %v19645_v35 = vld [vmem:[#allocation5 + $0x11d8] ss:$36 sps:$4 sm:$0xff]  }
 0x682   :  { %16631 = vmatpush3.bf16.msra.mxu0 %v19606_v36  ;;  %16653 = vmatpush3.bf16.msra.mxu1 %v19607_v38  ;;  %v19646_v36 = vld [vmem:[#allocation5 + $0xb18] ss:$36 sps:$4 sm:$0xff]  }
 0x683   :  { %16632 = vmatprep.subr.bf16.mxu0 %v19608_v55  ;;  %16654 = vmatprep.subr.bf16.mxu1 %v19609_v41  ;;  %v19647_v38 = vld [vmem:[#allocation5 + $0xf98] ss:$36 sps:$4 sm:$0xff]   ;;  %v19648_v55 = vld [vmem:[#allocation5 + $0x1460] ss:$36 sps:$4 sm:$0xff]  }
 0x684   :  { %v19649_v41 = vld [vmem:[#allocation5 + $0x18e0] ss:$36 sps:$4 sm:$0xff]  }
 0x686   :  { %16633 = vmatpush3.bf16.msra.mxu0 %v19610_v43  ;;  %16655 = vmatpush3.bf16.msra.mxu1 %v19611_v53  ;;  %v19650_v43 = vld [vmem:[#allocation5 + $0x1220] ss:$36 sps:$4 sm:$0xff]  }
 0x687   :  { %16634 = vmatprep.subr.bf16.mxu0 %v19612_v63  ;;  %16656 = vmatprep.subr.bf16.mxu1 %v19613_v57  ;;  %v19651_v53 = vld [vmem:[#allocation5 + $0x16a0] ss:$36 sps:$4 sm:$0xff]   ;;  %v19652_v63 = vld [vmem:[#allocation5 + $0x14a8] ss:$36 sps:$4 sm:$0xff]  }
 0x688   :  { %v19653_v57 = vld [vmem:[#allocation5 + $0x1928] ss:$36 sps:$4 sm:$0xff]  }
 0x68a   :  { %16635 = vmatpush3.bf16.msra.mxu0 %v19614_v58  ;;  %16657 = vmatpush3.bf16.msra.mxu1 %v19615_v59  ;;  %v19654_v58 = vld [vmem:[#allocation5 + $0x1268] ss:$36 sps:$4 sm:$0xff]  }
 0x68b   :  { %16664 = vmatprep.subr.bf16.mxu0 %v19616_v61  ;;  %16686 = vmatprep.subr.bf16.mxu1 %v19617_v0  ;;  %v19655_v59 = vld [vmem:[#allocation5 + $0x16e8] ss:$36 sps:$4 sm:$0xff]   ;;  %v19656_v61 = vld [vmem:[#allocation5 + $0x14f0] ss:$36 sps:$4 sm:$0xff]  }
 0x68c   :  { %v19657_v0 = vld [vmem:[#allocation5 + $0x1970] ss:$36 sps:$4 sm:$0xff]  }
 0x68d   :  { %13458 = vmatmul.mubr.bf16.vlgmr.msra.gmra.mrb[8].mxu0 %v20082_v13  ;;  %13498 = vmatmul.mubr.bf16.vlgmr.msra.gmra.mrb[8].mxu1 %v20101_v23  ;;  %v19628_v13 = vld [vmem:[#allocation5 + $0xc38] ss:$36 sps:$4 sm:$0xff]  }
 0x68e   :  { %16665 = vmatpush3.bf16.msra.mxu0 %v19618_v49  ;;  %16687 = vmatpush3.bf16.msra.mxu1 %v19619_v1  ;;  %v19629_v23 = vld [vmem:[#allocation5 + $0x10b8] ss:$36 sps:$4 sm:$0xff]   ;;  %v19658_v49 = vld [vmem:[#allocation5 + $0x12b0] ss:$36 sps:$4 sm:$0xff]  }
 0x68f   :  { %16666 = vmatprep.subr.bf16.mxu0 %v19620_v2  ;;  %16688 = vmatprep.subr.bf16.mxu1 %v19621_v4  ;;  %v19659_v1 = vld [vmem:[#allocation5 + $0x1730] ss:$36 sps:$4 sm:$0xff]   ;;  %v19662_v2 = vld [vmem:[#allocation5 + $0x12f8] ss:$36 sps:$4 sm:$0xff]  }
 0x690   :  { %13537 = vmatprep.mubr.bf16.mxu0 %v20104_v27  ;;  %13577 = vmatprep.mubr.bf16.mxu1 %v20116_v37  ;;  %v19634_v27 = vld [vmem:[#allocation5 + $0xa40] ss:$36 sps:$4 sm:$0xff]   ;;  %v19663_v4 = vld [vmem:[#allocation5 + $0x1778] ss:$36 sps:$4 sm:$0xff]  }
 0x691   :  { %v19635_v37 = vld [vmem:[#allocation5 + $0xec0] ss:$36 sps:$4 sm:$0xff]  }
 0x692   :  { %16667 = vmatpush3.bf16.msra.mxu0 %v19622_v5  ;;  %16689 = vmatpush3.bf16.msra.mxu1 %v19623_v16  ;;  %v19664_v5 = vld [vmem:[#allocation5 + $0x1580] ss:$36 sps:$4 sm:$0xff]  }
 0x693   :  { %16668 = vmatprep.subr.bf16.mxu0 %v19624_v7  ;;  %16690 = vmatprep.subr.bf16.mxu1 %v19625_v9  ;;  %v19665_v16 = vld [vmem:[#allocation5 + $0x1a00] ss:$36 sps:$4 sm:$0xff]   ;;  %v19668_v7 = vld [vmem:[#allocation5 + $0x15c8] ss:$36 sps:$4 sm:$0xff]  }
 0x694   :  { %v19669_v9 = vld [vmem:[#allocation5 + $0x1a48] ss:$36 sps:$4 sm:$0xff]  }
 0x696   :  { %16669 = vmatpush3.bf16.msra.mxu0 %v19626_v11  ;;  %16691 = vmatpush3.bf16.msra.mxu1 %v19627_v12  ;;  %v19670_v11 = vld [vmem:[#allocation5 + $0x1388] ss:$36 sps:$4 sm:$0xff]  }
 0x697   :  { %16670 = vmatprep.subr.bf16.mxu0 %v19628_v13  ;;  %16692 = vmatprep.subr.bf16.mxu1 %v19629_v23  ;;  %v19671_v12 = vld [vmem:[#allocation5 + $0x1808] ss:$36 sps:$4 sm:$0xff]   ;;  %v19672_v13 = vld [vmem:[#allocation5 + $0x1610] ss:$36 sps:$4 sm:$0xff]  }
 0x698   :  { %v19673_v23 = vld [vmem:[#allocation5 + $0x1a90] ss:$36 sps:$4 sm:$0xff]  }
 0x69a   :  { %16671 = vmatpush3.bf16.msra.mxu0 %v19630_v15  ;;  %16693 = vmatpush3.bf16.msra.mxu1 %v19631_v18  ;;  %v19674_v15 = vld [vmem:[#allocation5 + $0x13d0] ss:$36 sps:$4 sm:$0xff]  }
 0x69b   :  { %16672 = vmatprep.subr.bf16.mxu0 %v19632_v20  ;;  %16694 = vmatprep.subr.bf16.mxu1 %v19633_v21  ;;  %v19675_v18 = vld [vmem:[#allocation5 + $0x1850] ss:$36 sps:$4 sm:$0xff]   ;;  %v19676_v20 = vld [vmem:[#allocation5 + $0x1658] ss:$36 sps:$4 sm:$0xff]  }
 0x69c   :  { %v19677_v21 = vld [vmem:[#allocation5 + $0x1ad8] ss:$36 sps:$4 sm:$0xff]  }
 0x69e   :  { %16673 = vmatpush3.bf16.msra.mxu0 %v19634_v27  ;;  %16695 = vmatpush3.bf16.msra.mxu1 %v19635_v37  ;;  %v19678_v27 = vld [vmem:[#allocation5 + $0x1418] ss:$36 sps:$4 sm:$0xff]  }
 0x69f   :  { %16674 = vmatprep.subr.bf16.mxu0 %v19636_v52  ;;  %16696 = vmatprep.subr.bf16.mxu1 %v19637_v22  ;;  %v19679_v37 = vld [vmem:[#allocation5 + $0x1898] ss:$36 sps:$4 sm:$0xff]   ;;  %v19680_v52 = vld [vmem:[#allocation5 + $0x1d60] ss:$36 sps:$4 sm:$0xff]  }
 0x6a0   :  { %v19681_v22 = vld [vmem:[#allocation5 + $0x21e0] ss:$36 sps:$4 sm:$0xff]  }
 0x6a2   :  { %16675 = vmatpush3.bf16.msra.mxu0 %v19638_v26  ;;  %16697 = vmatpush3.bf16.msra.mxu1 %v19639_v28  ;;  %v19682_v26 = vld [vmem:[#allocation5 + $0x1b20] ss:$36 sps:$4 sm:$0xff]  }
 0x6a3   :  { %16676 = vmatprep.subr.bf16.mxu0 %v19640_v29  ;;  %16698 = vmatprep.subr.bf16.mxu1 %v19641_v30  ;;  %v19683_v28 = vld [vmem:[#allocation5 + $0x1fa0] ss:$36 sps:$4 sm:$0xff]   ;;  %v19684_v29 = vld [vmem:[#allocation5 + $0x1da8] ss:$36 sps:$4 sm:$0xff]  }
 0x6a4   :  { %v19685_v30 = vld [vmem:[#allocation5 + $0x2228] ss:$36 sps:$4 sm:$0xff]  }
 0x6a6   :  { %16677 = vmatpush3.bf16.msra.mxu0 %v19642_v60  ;;  %16699 = vmatpush3.bf16.msra.mxu1 %v19643_v17  ;;  %v19686_v60 = vld [vmem:[#allocation5 + $0x1b68] ss:$36 sps:$4 sm:$0xff]  }
 0x6a7   :  { %16678 = vmatprep.subr.bf16.mxu0 %v19644_v31  ;;  %16700 = vmatprep.subr.bf16.mxu1 %v19645_v35  ;;  %v19687_v17 = vld [vmem:[#allocation5 + $0x1fe8] ss:$36 sps:$4 sm:$0xff]   ;;  %v19688_v31 = vld [vmem:[#allocation5 + $0x1df0] ss:$36 sps:$4 sm:$0xff]  }
 0x6a8   :  { %v19689_v35 = vld [vmem:[#allocation5 + $0x2270] ss:$36 sps:$4 sm:$0xff]  }
 0x6aa   :  { %16679 = vmatpush3.bf16.msra.mxu0 %v19646_v36  ;;  %16701 = vmatpush3.bf16.msra.mxu1 %v19647_v38  ;;  %v19690_v36 = vld [vmem:[#allocation5 + $0x1bb0] ss:$36 sps:$4 sm:$0xff]  }
 0x6ab   :  { %16708 = vmatprep.subr.bf16.mxu0 %v19648_v55  ;;  %16730 = vmatprep.subr.bf16.mxu1 %v19649_v41  ;;  %v19691_v38 = vld [vmem:[#allocation5 + $0x2030] ss:$36 sps:$4 sm:$0xff]   ;;  %v19694_v55 = vld [vmem:[#allocation5 + $0x1bf8] ss:$36 sps:$4 sm:$0xff]  }
 0x6ac   :  { %v19695_v41 = vld [vmem:[#allocation5 + $0x2078] ss:$36 sps:$4 sm:$0xff]  }
 0x6ad   :  { %13538 = vmatmul.mubr.bf16.vlgmr.msra.gmra.mrb[12].mxu0 %v20112_v33  ;;  %13578 = vmatmul.mubr.bf16.vlgmr.msra.gmra.mrb[12].mxu1 %v20128_v45  ;;  %v19660_v33 = vld [vmem:[#allocation5 + $0x1538] ss:$36 sps:$4 sm:$0xff]  }
 0x6ae   :  { %16709 = vmatpush3.bf16.msra.mxu0 %v19650_v43  ;;  %16731 = vmatpush3.bf16.msra.mxu1 %v19651_v53  ;;  %v19661_v45 = vld [vmem:[#allocation5 + $0x19b8] ss:$36 sps:$4 sm:$0xff]   ;;  %v19696_v43 = vld [vmem:[#allocation5 + $0x1e80] ss:$36 sps:$4 sm:$0xff]  }
 0x6af   :  { %16710 = vmatprep.subr.bf16.mxu0 %v19652_v63  ;;  %16732 = vmatprep.subr.bf16.mxu1 %v19653_v57  ;;  %v19697_v53 = vld [vmem:[#allocation5 + $0x2300] ss:$36 sps:$4 sm:$0xff]   ;;  %v19700_v63 = vld [vmem:[#allocation5 + $0x1ec8] ss:$36 sps:$4 sm:$0xff]  }
 0x6b0   :  { %13617 = vmatprep.mubr.bf16.mxu0 %v20131_v51  ;;  %13657 = vmatprep.mubr.bf16.mxu1 %v20143_v3  ;;  %v19666_v51 = vld [vmem:[#allocation5 + $0x1340] ss:$36 sps:$4 sm:$0xff]   ;;  %v19701_v57 = vld [vmem:[#allocation5 + $0x2348] ss:$36 sps:$4 sm:$0xff]  }
 0x6b1   :  { %v19667_v3 = vld [vmem:[#allocation5 + $0x17c0] ss:$36 sps:$4 sm:$0xff]  }
 0x6b2   :  { %16711 = vmatpush3.bf16.msra.mxu0 %v19654_v58  ;;  %16733 = vmatpush3.bf16.msra.mxu1 %v19655_v59  ;;  %v19702_v58 = vld [vmem:[#allocation5 + $0x1c88] ss:$36 sps:$4 sm:$0xff]  }
 0x6b3   :  { %16712 = vmatprep.subr.bf16.mxu0 %v19656_v61  ;;  %16734 = vmatprep.subr.bf16.mxu1 %v19657_v0  ;;  %v19703_v59 = vld [vmem:[#allocation5 + $0x2108] ss:$36 sps:$4 sm:$0xff]   ;;  %v19704_v61 = vld [vmem:[#allocation5 + $0x1f10] ss:$36 sps:$4 sm:$0xff]  }
 0x6b4   :  { %v19705_v0 = vld [vmem:[#allocation5 + $0x2390] ss:$36 sps:$4 sm:$0xff]  }
 0x6b6   :  { %16713 = vmatpush3.bf16.msra.mxu0 %v19658_v49  ;;  %16735 = vmatpush3.bf16.msra.mxu1 %v19659_v1  ;;  %v19706_v49 = vld [vmem:[#allocation5 + $0x1cd0] ss:$36 sps:$4 sm:$0xff]  }
 0x6b7   :  { %16714 = vmatprep.subr.bf16.mxu0 %v19660_v33  ;;  %16736 = vmatprep.subr.bf16.mxu1 %v19661_v45  ;;  %v19707_v1 = vld [vmem:[#allocation5 + $0x2150] ss:$36 sps:$4 sm:$0xff]   ;;  %v19708_v33 = vld [vmem:[#allocation5 + $0x1f58] ss:$36 sps:$4 sm:$0xff]  }
 0x6b8   :  { %v19709_v45 = vld [vmem:[#allocation5 + $0x23d8] ss:$36 sps:$4 sm:$0xff]  }
 0x6ba   :  { %16715 = vmatpush3.bf16.msra.mxu0 %v19662_v2  ;;  %16737 = vmatpush3.bf16.msra.mxu1 %v19663_v4  ;;  %v19710_v2 = vld [vmem:[#allocation5 + $0x1d18] ss:$36 sps:$4 sm:$0xff]  }
 0x6bb   :  { %16716 = vmatprep.subr.bf16.mxu0 %v19664_v5  ;;  %16738 = vmatprep.subr.bf16.mxu1 %v19665_v16  ;;  %v19711_v4 = vld [vmem:[#allocation5 + $0x2198] ss:$36 sps:$4 sm:$0xff]   ;;  %v19712_v5 = vld [vmem:[#allocation5 + $0x2660] ss:$36 sps:$4 sm:$0xff]  }
 0x6bc   :  { %v19713_v16 = vld [vmem:[#allocation5 + $0x2ae0] ss:$36 sps:$4 sm:$0xff]  }
 0x6be   :  { %16717 = vmatpush3.bf16.msra.mxu0 %v19666_v51  ;;  %16739 = vmatpush3.bf16.msra.mxu1 %v19667_v3  ;;  %v19714_v51 = vld [vmem:[#allocation5 + $0x2420] ss:$36 sps:$4 sm:$0xff]  }
 0x6bf   :  { %16718 = vmatprep.subr.bf16.mxu0 %v19668_v7  ;;  %16740 = vmatprep.subr.bf16.mxu1 %v19669_v9  ;;  %v19715_v3 = vld [vmem:[#allocation5 + $0x28a0] ss:$36 sps:$4 sm:$0xff]   ;;  %v19716_v7 = vld [vmem:[#allocation5 + $0x26a8] ss:$36 sps:$4 sm:$0xff]  }
 0x6c0   :  { %v19717_v9 = vld [vmem:[#allocation5 + $0x2b28] ss:$36 sps:$4 sm:$0xff]  }
 0x6c2   :  { %16719 = vmatpush3.bf16.msra.mxu0 %v19670_v11  ;;  %16741 = vmatpush3.bf16.msra.mxu1 %v19671_v12  ;;  %v19718_v11 = vld [vmem:[#allocation5 + $0x2468] ss:$36 sps:$4 sm:$0xff]  }
 0x6c3   :  { %16720 = vmatprep.subr.bf16.mxu0 %v19672_v13  ;;  %16742 = vmatprep.subr.bf16.mxu1 %v19673_v23  ;;  %v19719_v12 = vld [vmem:[#allocation5 + $0x28e8] ss:$36 sps:$4 sm:$0xff]   ;;  %v19720_v13 = vld [vmem:[#allocation5 + $0x26f0] ss:$36 sps:$4 sm:$0xff]  }
 0x6c4   :  { %v19721_v23 = vld [vmem:[#allocation5 + $0x2b70] ss:$36 sps:$4 sm:$0xff]  }
 0x6c6   :  { %16721 = vmatpush3.bf16.msra.mxu0 %v19674_v15  ;;  %16743 = vmatpush3.bf16.msra.mxu1 %v19675_v18  ;;  %v19722_v15 = vld [vmem:[#allocation5 + $0x24b0] ss:$36 sps:$4 sm:$0xff]  }
 0x6c7   :  { %16722 = vmatprep.subr.bf16.mxu0 %v19676_v20  ;;  %16744 = vmatprep.subr.bf16.mxu1 %v19677_v21  ;;  %v19723_v18 = vld [vmem:[#allocation5 + $0x2930] ss:$36 sps:$4 sm:$0xff]   ;;  %v19726_v20 = vld [vmem:[#allocation5 + $0x24f8] ss:$36 sps:$4 sm:$0xff]  }
 0x6c8   :  { %v19727_v21 = vld [vmem:[#allocation5 + $0x2978] ss:$36 sps:$4 sm:$0xff]  }
 0x6ca   :  { %16723 = vmatpush3.bf16.msra.mxu0 %v19678_v27  ;;  %16745 = vmatpush3.bf16.msra.mxu1 %v19679_v37  ;;  %v19728_v27 = vld [vmem:[#allocation5 + $0x2780] ss:$36 sps:$4 sm:$0xff]  }
 0x6cb   :  { %16752 = vmatprep.subr.bf16.mxu0 %v19680_v52  ;;  %16774 = vmatprep.subr.bf16.mxu1 %v19681_v22  ;;  %v19729_v37 = vld [vmem:[#allocation5 + $0x2c00] ss:$36 sps:$4 sm:$0xff]   ;;  %v19732_v52 = vld [vmem:[#allocation5 + $0x27c8] ss:$36 sps:$4 sm:$0xff]  }
 0x6cc   :  { %v19733_v22 = vld [vmem:[#allocation5 + $0x2c48] ss:$36 sps:$4 sm:$0xff]  }
 0x6cd   :  { %13618 = vmatmul.mubr.bf16.vlgmr.msra.gmra.mrb[16].mxu0 %v20139_v62  ;;  %13658 = vmatmul.mubr.bf16.vlgmr.msra.gmra.mrb[16].mxu1 %v20156_v19  ;;  %v19692_v62 = vld [vmem:[#allocation5 + $0x1e38] ss:$36 sps:$4 sm:$0xff]  }
 0x6ce   :  { %16753 = vmatpush3.bf16.msra.mxu0 %v19682_v26  ;;  %16775 = vmatpush3.bf16.msra.mxu1 %v19683_v28  ;;  %v19693_v19 = vld [vmem:[#allocation5 + $0x22b8] ss:$36 sps:$4 sm:$0xff]   ;;  %v19734_v26 = vld [vmem:[#allocation5 + $0x2588] ss:$36 sps:$4 sm:$0xff]  }
 0x6cf   :  { %16754 = vmatprep.subr.bf16.mxu0 %v19684_v29  ;;  %16776 = vmatprep.subr.bf16.mxu1 %v19685_v30  ;;  %v19735_v28 = vld [vmem:[#allocation5 + $0x2a08] ss:$36 sps:$4 sm:$0xff]   ;;  %v19736_v29 = vld [vmem:[#allocation5 + $0x2810] ss:$36 sps:$4 sm:$0xff]  }
 0x6d0   :  { %13697 = vmatprep.mubr.bf16.mxu0 %v20159_v24  ;;  %13737 = vmatprep.mubr.bf16.mxu1 %v20171_v47  ;;  %v19698_v24 = vld [vmem:[#allocation5 + $0x1c40] ss:$36 sps:$4 sm:$0xff]   ;;  %v19737_v30 = vld [vmem:[#allocation5 + $0x2c90] ss:$36 sps:$4 sm:$0xff]  }
 0x6d1   :  { %v19699_v47 = vld [vmem:[#allocation5 + $0x20c0] ss:$36 sps:$4 sm:$0xff]  }
 0x6d2   :  { %16755 = vmatpush3.bf16.msra.mxu0 %v19686_v60  ;;  %16777 = vmatpush3.bf16.msra.mxu1 %v19687_v17  ;;  %v19738_v60 = vld [vmem:[#allocation5 + $0x25d0] ss:$36 sps:$4 sm:$0xff]  }
 0x6d3   :  { %16756 = vmatprep.subr.bf16.mxu0 %v19688_v31  ;;  %16778 = vmatprep.subr.bf16.mxu1 %v19689_v35  ;;  %v19739_v17 = vld [vmem:[#allocation5 + $0x2a50] ss:$36 sps:$4 sm:$0xff]   ;;  %v19740_v31 = vld [vmem:[#allocation5 + $0x2858] ss:$36 sps:$4 sm:$0xff]  }
 0x6d4   :  { %v19741_v35 = vld [vmem:[#allocation5 + $0x2cd8] ss:$36 sps:$4 sm:$0xff]  }
 0x6d6   :  { %16757 = vmatpush3.bf16.msra.mxu0 %v19690_v36  ;;  %16779 = vmatpush3.bf16.msra.mxu1 %v19691_v38  ;;  %v19742_v36 = vld [vmem:[#allocation5 + $0x2618] ss:$36 sps:$4 sm:$0xff]  }
 0x6d7   :  { %16758 = vmatprep.subr.bf16.mxu0 %v19692_v62  ;;  %16780 = vmatprep.subr.bf16.mxu1 %v19693_v19  ;;  %v19743_v38 = vld [vmem:[#allocation5 + $0x2a98] ss:$36 sps:$4 sm:$0xff]   ;;  %v19744_v62 = vld [vmem:[#allocation5 + $0x2f60] ss:$36 sps:$4 sm:$0xff]  }
 0x6d8   :  { %v19745_v19 = vld [vmem:[#allocation5 + $0x33e0] ss:$36 sps:$4 sm:$0xff]  }
 0x6da   :  { %16759 = vmatpush3.bf16.msra.mxu0 %v19694_v55  ;;  %16781 = vmatpush3.bf16.msra.mxu1 %v19695_v41  ;;  %v19746_v55 = vld [vmem:[#allocation5 + $0x2d20] ss:$36 sps:$4 sm:$0xff]  }
 0x6db   :  { %16760 = vmatprep.subr.bf16.mxu0 %v19696_v43  ;;  %16782 = vmatprep.subr.bf16.mxu1 %v19697_v53  ;;  %v19747_v41 = vld [vmem:[#allocation5 + $0x31a0] ss:$36 sps:$4 sm:$0xff]   ;;  %v19748_v43 = vld [vmem:[#allocation5 + $0x2fa8] ss:$36 sps:$4 sm:$0xff]  }
 0x6dc   :  { %v19749_v53 = vld [vmem:[#allocation5 + $0x3428] ss:$36 sps:$4 sm:$0xff]  }
 0x6de   :  { %16761 = vmatpush3.bf16.msra.mxu0 %v19698_v24  ;;  %16783 = vmatpush3.bf16.msra.mxu1 %v19699_v47  ;;  %v19750_v24 = vld [vmem:[#allocation5 + $0x2d68] ss:$36 sps:$4 sm:$0xff]  }
 0x6df   :  { %16762 = vmatprep.subr.bf16.mxu0 %v19700_v63  ;;  %16784 = vmatprep.subr.bf16.mxu1 %v19701_v57  ;;  %v19751_v47 = vld [vmem:[#allocation5 + $0x31e8] ss:$36 sps:$4 sm:$0xff]   ;;  %v19752_v63 = vld [vmem:[#allocation5 + $0x2ff0] ss:$36 sps:$4 sm:$0xff]  }
 0x6e0   :  { %v19753_v57 = vld [vmem:[#allocation5 + $0x3470] ss:$36 sps:$4 sm:$0xff]  }
 0x6e2   :  { %16763 = vmatpush3.bf16.msra.mxu0 %v19702_v58  ;;  %16785 = vmatpush3.bf16.msra.mxu1 %v19703_v59  ;;  %v19754_v58 = vld [vmem:[#allocation5 + $0x2db0] ss:$36 sps:$4 sm:$0xff]  }
 0x6e3   :  { %16764 = vmatprep.subr.bf16.mxu0 %v19704_v61  ;;  %16786 = vmatprep.subr.bf16.mxu1 %v19705_v0  ;;  %v19755_v59 = vld [vmem:[#allocation5 + $0x3230] ss:$36 sps:$4 sm:$0xff]   ;;  %v19758_v61 = vld [vmem:[#allocation5 + $0x2df8] ss:$36 sps:$4 sm:$0xff]  }
 0x6e4   :  { %v19759_v0 = vld [vmem:[#allocation5 + $0x3278] ss:$36 sps:$4 sm:$0xff]  }
 0x6e6   :  { %16765 = vmatpush3.bf16.msra.mxu0 %v19706_v49  ;;  %16787 = vmatpush3.bf16.msra.mxu1 %v19707_v1  ;;  %v19760_v49 = vld [vmem:[#allocation5 + $0x3080] ss:$36 sps:$4 sm:$0xff]  }
 0x6e7   :  { %16766 = vmatprep.subr.bf16.mxu0 %v19708_v33  ;;  %16788 = vmatprep.subr.bf16.mxu1 %v19709_v45  ;;  %v19761_v1 = vld [vmem:[#allocation5 + $0x3500] ss:$36 sps:$4 sm:$0xff]   ;;  %v19764_v33 = vld [vmem:[#allocation5 + $0x30c8] ss:$36 sps:$4 sm:$0xff]  }
 0x6e8   :  { %v19765_v45 = vld [vmem:[#allocation5 + $0x3548] ss:$36 sps:$4 sm:$0xff]  }
 0x6ea   :  { %16767 = vmatpush3.bf16.msra.mxu0 %v19710_v2  ;;  %16789 = vmatpush3.bf16.msra.mxu1 %v19711_v4  ;;  %v2045_v2 = vsub.s32 1, %v20067_v42  ;;  %v20332_v4 = vld [vmem:[#allocation7] sm:$0xff] }
 0x6eb   :  { %16796 = vmatprep.subr.bf16.mxu0 %v19712_v5  ;;  %16818 = vmatprep.subr.bf16.mxu1 %v19713_v16  ;;  %v19766_v5 = vld [vmem:[#allocation5 + $0x2e88] ss:$36 sps:$4 sm:$0xff]  }
 0x6ec   :  { %v19767_v16 = vld [vmem:[#allocation5 + $0x3308] ss:$36 sps:$4 sm:$0xff]  }
 0x6ed   :  { %13698 = vmatmul.mubr.bf16.vlgmr.msra.gmra.mrb[20].mxu0 %v20167_v40  ;;  %13738 = vmatmul.mubr.bf16.vlgmr.msra.gmra.mrb[20].mxu1 %v20183_v34  ;;  %v19724_v40 = vld [vmem:[#allocation5 + $0x2738] ss:$36 sps:$4 sm:$0xff]  }
 0x6ee   :  { %16797 = vmatpush3.bf16.msra.mxu0 %v19714_v51  ;;  %16819 = vmatpush3.bf16.msra.mxu1 %v19715_v3  ;;  %v19725_v34 = vld [vmem:[#allocation5 + $0x2bb8] ss:$36 sps:$4 sm:$0xff]   ;;  %v19768_v51 = vld [vmem:[#allocation5 + $0x3110] ss:$36 sps:$4 sm:$0xff]  }
 0x6ef   :  { %16798 = vmatprep.subr.bf16.mxu0 %v19716_v7  ;;  %16820 = vmatprep.subr.bf16.mxu1 %v19717_v9  ;;  %v19769_v3 = vld [vmem:[#allocation5 + $0x3590] ss:$36 sps:$4 sm:$0xff]   ;;  %v2046_v7 = vrot.slane %v20332_v4, %v2045_v2 }
 0x6f0   :  { %13777 = vmatprep.mubr.bf16.mxu0 %v20186_v8  ;;  %13817 = vmatprep.mubr.bf16.mxu1 %v20198_v39  ;;  %v19730_v8 = vld [vmem:[#allocation5 + $0x2540] ss:$36 sps:$4 sm:$0xff]   ;;  %v19770_v9 = vld [vmem:[#allocation5 + $0x2ed0] ss:$36 sps:$4 sm:$0xff]  }
 0x6f1   :  { %v19731_v39 = vld [vmem:[#allocation5 + $0x29c0] ss:$36 sps:$4 sm:$0xff]  }
 0x6f2   :  { %16799 = vmatpush3.bf16.msra.mxu0 %v19718_v11  ;;  %16821 = vmatpush3.bf16.msra.mxu1 %v19719_v12  ;;  %v19771_v11 = vld [vmem:[#allocation5 + $0x3350] ss:$36 sps:$4 sm:$0xff]   ;;  %v19772_v12 = vld [vmem:[#allocation5 + $0x3158] ss:$36 sps:$4 sm:$0xff]  }
 0x6f3   :  { %16800 = vmatprep.subr.bf16.mxu0 %v19720_v13  ;;  %16822 = vmatprep.subr.bf16.mxu1 %v19721_v23  ;;  %v19773_v13 = vld [vmem:[#allocation5 + $0x35d8] ss:$36 sps:$4 sm:$0xff]   ;;  %v17019_v23 = vadd.f32 %v20265_v48, %v2046_v7  ;;  %v19779_v48 = vld [vmem:[%s20613_s3 + $0x48] sm:$0xff]  }
 0x6f6   :  { %16801 = vmatpush3.bf16.msra.mxu0 %v19722_v15  ;;  %16823 = vmatpush3.bf16.msra.mxu1 %v19723_v18  ;;  %v19774_v15 = vld [vmem:[#allocation5 + $0x2f18] ss:$36 sps:$4 sm:$0xff]  }
 0x6f7   :  { %16802 = vmatprep.subr.bf16.mxu0 %v19724_v40  ;;  %16824 = vmatprep.subr.bf16.mxu1 %v19725_v34  ;;  %v19775_v18 = vld [vmem:[#allocation5 + $0x3398] ss:$36 sps:$4 sm:$0xff]   ;;  %v19776_v40 = vld [vmem:[%s20613_s3 + $0x40] sm:$0xff]   ;;  %v13946_v34 = vmax.f32 %v17019_v23, 0.0  ;;  %v19808_v23 = vld [vmem:[%s20613_s3 + $0xe8] sm:$0xff]  }
 0x6fa   :  { %16803 = vmatpush3.bf16.msra.mxu0 %v19726_v20  ;;  %16825 = vmatpush3.bf16.msra.mxu1 %v19727_v21  ;;  %v19777_v20 = vld [vmem:[#allocation5 + $0x3620] ss:$36 sps:$4 sm:$0xff]  }
 0x6fb   :  { %16804 = vmatprep.subr.bf16.mxu0 %v19728_v27  ;;  %16826 = vmatprep.subr.bf16.mxu1 %v19729_v37  ;;  %v19778_v21 = vld [vmem:[%s20613_s3] sm:$0xff]   ;;  %v19986_v27 = vmov 0.0   ;;  %v13955_v37 = vpack.c.bf16 %v13946_v34, %v13946_v34  ;;  %v19810_v34 = vld [vmem:[%s20613_s3 + $0xa8] sm:$0xff]  }
 0x6fe   :  { %16805 = vmatpush3.bf16.msra.mxu0 %v19730_v8  ;;  %16827 = vmatpush3.bf16.msra.mxu1 %v19731_v39  ;;  %v2053_v8 = vsub.s32 3, %v20067_v42  ;;  %v19780_v39 = vld [vmem:[#allocation5 + $0x3668] ss:$36 sps:$4 sm:$0xff]  }
 0x6ff   :  { %16806 = vmatprep.subr.bf16.mxu0 %v19732_v52  ;;  %16828 = vmatprep.subr.bf16.mxu1 %v19733_v22  ;;  %v19781_v52 = vld [vmem:[%s20613_s3 + $0x8] sm:$0xff]   ;;  %v19782_v22 = vld [vmem:[%s20613_s3 + $0x50] sm:$0xff]  }
 0x702   :  { %16807 = vmatpush3.bf16.msra.mxu0 %v19734_v26  ;;  %16829 = vmatpush3.bf16.msra.mxu1 %v19735_v28  ;;  %v19784_v26 = vld [vmem:[%s20613_s3 + $0x10] sm:$0xff]   ;;  %v19785_v28 = vld [vmem:[%s20613_s3 + $0x58] sm:$0xff]  }
 0x703   :  { %16808 = vmatprep.subr.bf16.mxu0 %v19736_v29  ;;  %16830 = vmatprep.subr.bf16.mxu1 %v19737_v30  ;;  %v19786_v30 = vld [vmem:[#allocation5 + $0x36f8] ss:$36 sps:$4 sm:$0xff]  }
 0x706   :  { %16809 = vmatpush3.bf16.msra.mxu0 %v19738_v60  ;;  %16831 = vmatpush3.bf16.msra.mxu1 %v19739_v17  ;;  %v19787_v60 = vld [vmem:[%s20613_s3 + $0x18] sm:$0xff]   ;;  %v19788_v17 = vld [vmem:[%s20613_s3 + $0x60] sm:$0xff]  }
 0x707   :  { %16810 = vmatprep.subr.bf16.mxu0 %v19740_v31  ;;  %16832 = vmatprep.subr.bf16.mxu1 %v19741_v35  ;;  %v19789_v31 = vld [vmem:[%s20613_s3 + $0xc0] sm:$0xff]  }
 0x70a   :  { %16811 = vmatpush3.bf16.msra.mxu0 %v19742_v36  ;;  %16833 = vmatpush3.bf16.msra.mxu1 %v19743_v38  ;;  %v19791_v36 = vld [vmem:[%s20613_s3 + $0x80] sm:$0xff]   ;;  %v2041_v38 = vsub.s32 0, %v20067_v42 }
 0x70b   :  { %16840 = vmatprep.subr.bf16.mxu0 %v19744_v62  ;;  %16862 = vmatprep.subr.bf16.mxu1 %v19745_v19  ;;  %v19792_v62 = vld [vmem:[%s20613_s3 + $0x68] sm:$0xff]  }
 0x70c   :  { %v19793_v19 = vld [vmem:[%s20613_s3 + $0xc8] sm:$0xff]  }
 0x70d   :  { %13778 = vmatmul.mubr.bf16.vlgmr.msra.gmra.mrb[24].mxu0 %v20194_v32  ;;  %13818 = vmatmul.mubr.bf16.vlgmr.msra.gmra.mrb[24].mxu1 %v20211_v6  ;;  %v19756_v32 = vld [vmem:[#allocation5 + $0x3038] ss:$36 sps:$4 sm:$0xff]  }
 0x70e   :  { %16841 = vmatpush3.bf16.msra.mxu0 %v19746_v55  ;;  %16863 = vmatpush3.bf16.msra.mxu1 %v19747_v41  ;;  %v19757_v6 = vld [vmem:[#allocation5 + $0x34b8] ss:$36 sps:$4 sm:$0xff]   ;;  %v2061_v41 = vsub.s32 5, %v20067_v42 }
 0x70f   :  { %16842 = vmatprep.subr.bf16.mxu0 %v19748_v43  ;;  %16864 = vmatprep.subr.bf16.mxu1 %v19749_v53  ;;  %v19794_v43 = vld [vmem:[%s20613_s3 + $0x28] sm:$0xff]  }
 0x710   :  { %13857 = vmatprep.mubr.bf16.mxu0 %v20214_v14  ;;  %13897 = vmatprep.mubr.bf16.mxu1 %v20226_v54  ;;  %v19762_v14 = vld [vmem:[#allocation5 + $0x2e40] ss:$36 sps:$4 sm:$0xff]   ;;  %v19795_v53 = vld [vmem:[%s20613_s3 + $0x88] sm:$0xff]  }
 0x711   :  { %v19763_v54 = vld [vmem:[#allocation5 + $0x32c0] ss:$36 sps:$4 sm:$0xff]  }
 0x712   :  { %16843 = vmatpush3.bf16.msra.mxu0 %v19750_v24  ;;  %16865 = vmatpush3.bf16.msra.mxu1 %v19751_v47  ;;  %v2042_v24 = vrot.slane %v20332_v4, %v2041_v38  ;;  %v19797_v47 = vld [vmem:[%s20613_s3 + $0xd0] sm:$0xff]   ;;  %v19824_v38 = vld [vmem:[%s20613_s3 + $0x168] sm:$0xff]  }
 0x713   :  { %16844 = vmatprep.subr.bf16.mxu0 %v19752_v63  ;;  %16866 = vmatprep.subr.bf16.mxu1 %v19753_v57 }
 0x716   :  { %16845 = vmatpush3.bf16.msra.mxu0 %v19754_v58  ;;  %16867 = vmatpush3.bf16.msra.mxu1 %v19755_v59  ;;  %v2062_v58 = vrot.slane %v20332_v4, %v2061_v41  ;;  %v19827_v41 = vld [vmem:[%s20613_s3 + $0x188] sm:$0xff]  }
 0x717   :  { %16846 = vmatprep.subr.bf16.mxu0 %v19756_v32  ;;  %16868 = vmatprep.subr.bf16.mxu1 %v19757_v6 }
 0x71a   :  { %16847 = vmatpush3.bf16.msra.mxu0 %v19758_v61  ;;  %16869 = vmatpush3.bf16.msra.mxu1 %v19759_v0  ;;  %v19798_v0 = vld [vmem:[%s20613_s3 + $0x30] sm:$0xff]  }
 0x71b   :  { %16848 = vmatprep.subr.bf16.mxu0 %v19760_v49  ;;  %16870 = vmatprep.subr.bf16.mxu1 %v19761_v1  ;;  %v19799_v49 = vld [vmem:[%s20613_s3 + $0x90] sm:$0xff]   ;;  %v17018_v1 = vadd.f32 %v20261_v44, %v2042_v24  ;;  %v19803_v44 = vld [vmem:[%s20613_s3 + $0x98] sm:$0xff]  }
 0x71c   :  { %v19829_v24 = vld [vmem:[%s20613_s3 + $0x1d0] sm:$0xff]  }
 0x71e   :  { %16849 = vmatpush3.bf16.msra.mxu0 %v19762_v14  ;;  %16871 = vmatpush3.bf16.msra.mxu1 %v19763_v54 }
 0x71f   :  { %16850 = vmatprep.subr.bf16.mxu0 %v19764_v33  ;;  %16872 = vmatprep.subr.bf16.mxu1 %v19765_v45  ;;  %v19800_v33 = vld [vmem:[%s20613_s3 + $0x78] sm:$0xff]  }
 0x720   :  { %v19801_v45 = vld [vmem:[%s20613_s3 + $0xd8] sm:$0xff]  }
 0x722   :  { %16851 = vmatpush3.bf16.msra.mxu0 %v19766_v5  ;;  %16873 = vmatpush3.bf16.msra.mxu1 %v19767_v16  ;;  %v19802_v5 = vld [vmem:[%s20613_s3 + $0x38] sm:$0xff]   ;;  %v13945_v16 = vmax.f32 %v17018_v1, 0.0  ;;  %v19831_v1 = vld [vmem:[%s20613_s3 + $0x190] sm:$0xff]  }
 0x723   :  { %16852 = vmatprep.subr.bf16.mxu0 %v19768_v51  ;;  %16874 = vmatprep.subr.bf16.mxu1 %v19769_v3  ;;  %v19804_v51 = vld [vmem:[%s20613_s3 + $0xe0] sm:$0xff]  }
 0x724   :  { %v19805_v3 = vld [vmem:[%s20613_s3 + $0x140] sm:$0xff]  }
 0x726   :  { %16853 = vmatpush3.bf16.msra.mxu0 %v19770_v9  ;;  %16875 = vmatpush3.bf16.msra.mxu1 %v19771_v11  ;;  %v19806_v9 = vld [vmem:[%s20613_s3 + $0xa0] sm:$0xff]  }
 0x727   :  { %16854 = vmatprep.subr.bf16.mxu0 %v19772_v12  ;;  %16876 = vmatprep.subr.bf16.mxu1 %v19773_v13  ;;  %v19807_v11 = vld [vmem:[%s20613_s3 + $0x100] sm:$0xff]   ;;  %v13954_v12 = vpack.c.bf16 %v13945_v16, %v13945_v16  ;;  %v2049_v13 = vsub.s32 2, %v20067_v42 }
 0x72a   :  { %16855 = vmatpush3.bf16.msra.mxu0 %v19774_v15  ;;  %16877 = vmatpush3.bf16.msra.mxu1 %v19775_v18  ;;  %v19809_v15 = vld [vmem:[%s20613_s3 + $0x148] sm:$0xff]  }
 0x72b   :  { %16986 = vmatprep.subr.bf16.mxu0 %v19986_v27  ;;  %16889 = vmatprep.subr.bf16.mxu1 %v19776_v40  ;;  %v2069_v40 = vsub.s32 7, %v20067_v42 }
 0x72d   :  { %13858 = vmatmul.mubr.bf16.vlgmr.msra.gmra.mrb[28].mxu0 %v20222_v46  ;;  %13898 = vmatmul.mubr.bf16.vlgmr.msra.gmra.mrb[28].mxu1 %v20234_v25  ;;  %v2054_v46 = vrot.slane %v20332_v4, %v2053_v8  ;;  %v19783_v25 = vld [vmem:[#allocation5 + $0x36b0] ss:$36 sps:$4 sm:$0xff]   ;;  %v2070_v8 = vrot.slane %v20332_v4, %v2069_v40 }
 0x72e   :  { %16987 = vmatpush3.bf16.msra.mxu0 %v19777_v20  ;;  %16890 = vmatpush3.bf16.msra.mxu1 %v19778_v21  ;;  %v19811_v20 = vld [vmem:[%s20613_s3 + $0x108] sm:$0xff]   ;;  %v2050_v21 = vrot.slane %v20332_v4, %v2049_v13  ;;  %v2065_v13 = vsub.s32 6, %v20067_v42  ;;  %v19840_v40 = vld [vmem:[%s20613_s3 + $0x1f0] sm:$0xff]  }
 0x72f   :  { %14578 = vmatprep.mubr.bf16.mxu1 %v13955_v37  ;;  %16988 = vmatprep.subr.bf16.mxu0 %v19986_v27  ;;  %v17021_v29 = vadd.f32 %v20267_v50, %v2054_v46  ;;  %v19790_v50 = vld [vmem:[%s20613_s3 + $0x20] sm:$0xff]   ;;  %v19813_v37 = vld [vmem:[%s20613_s3 + $0x150] sm:$0xff]   ;;  %v19816_v46 = vld [vmem:[%s20613_s3 + $0xf8] sm:$0xff]  }
 0x730   :  { %16891 = vmatprep.subr.bf16.mxu1 %v19779_v48  ;;  %16994 = vmatprep.mubr.msk.bf16.mxu0 %vm19987_vm1, %v19986_v27  ;;  %v19812_v48 = vld [vmem:[%s20613_s3 + $0xf0] sm:$0xff]  }
 0x731   :  { %v13948_v35 = vmax.f32 %v17021_v29, 0.0 }
 0x732   :  { %16989 = vmatpush3.bf16.msra.mxu0 %v19780_v39  ;;  %16892 = vmatpush3.bf16.msra.mxu1 %v19781_v52  ;;  %v19814_v39 = vld [vmem:[%s20613_s3 + $0xb0] sm:$0xff]  }
 0x733   :  { %16990 = vmatprep.subr.bf16.mxu0 %v19986_v27  ;;  %16893 = vmatprep.subr.bf16.mxu1 %v19782_v22  ;;  %v13957_v55 = vpack.c.bf16 %v13948_v35, %v13948_v35  ;;  %v19815_v52 = vld [vmem:[%s20613_s3 + $0x110] sm:$0xff]   ;;  %v17020_v22 = vadd.f32 %v20263_v10, %v2050_v21  ;;  %v19819_v10 = vld [vmem:[%s20613_s3 + $0x118] sm:$0xff]   ;;  %v19823_v35 = vld [vmem:[%s20613_s3 + $0x180] sm:$0xff]  }
 0x734   :  { %v19843_v21 = vld [vmem:[%s20613_s3 + $0x1b8] sm:$0xff]  }
 0x735   :  { %v13947_v29 = vmax.f32 %v17020_v22, 0.0 }
 0x736   :  { %16991 = vmatpush3.bf16.msra.mxu0 %v19783_v25  ;;  %16894 = vmatpush3.bf16.msra.mxu1 %v19784_v26  ;;  %v19817_v25 = vld [vmem:[%s20613_s3 + $0x158] sm:$0xff]  }
 0x737   :  { %16992 = vmatprep.subr.bf16.mxu0 %v19986_v27  ;;  %16895 = vmatprep.subr.bf16.mxu1 %v19785_v28  ;;  %v19818_v28 = vld [vmem:[%s20613_s3 + $0xb8] sm:$0xff]  }
 0x73a   :  { %16993 = vmatpush3.bf16.msra.mxu0 %v19786_v30  ;;  %16896 = vmatpush3.bf16.msra.mxu1 %v19787_v60  ;;  %v19820_v30 = vld [vmem:[%s20613_s3 + $0x160] sm:$0xff]  }
 0x73b   :  { %16897 = vmatprep.subr.bf16.mxu1 %v19788_v17  ;;  %16911 = vmatprep.subr.bf16.mxu0 %v19789_v31  ;;  %v19821_v60 = vld [vmem:[%s20613_s3 + $0x1c0] sm:$0xff]  }
 0x73c   :  { %v19822_v31 = vld [vmem:[%s20613_s3 + $0x120] sm:$0xff]  }
 0x73d   :  { %16995 = vmatmul.mubr.msk.bf16.vlgmr.msra.gmra.mrb[32].mxu0 %vm11289_vm0, %v20241_v56  ;;  %v19796_v56 = vld [vmem:[%s20613_s3 + $0x70] sm:$0xff]  }
 0x73e   :  { %16898 = vmatpush3.bf16.msra.mxu1 %v19790_v50  ;;  %16912 = vmatpush3.bf16.msra.mxu0 %v19791_v36  ;;  %v13956_v50 = vpack.c.bf16 %v13947_v29, %v13947_v29  ;;  %v2057_v36 = vsub.s32 4, %v20067_v42  ;;  %v2066_v42 = vrot.slane %v20332_v4, %v2065_v13 }
 0x73f   :  { %14618 = vmatprep.mubr.bf16.mxu0 %v13957_v55  ;;  %16899 = vmatprep.subr.bf16.mxu1 %v19792_v62  ;;  %v19825_v62 = vld [vmem:[%s20613_s3 + $0x1c8] sm:$0xff]  }
 0x740   :  { %v20406_v63 = vpop.f32.mrb[4].mxu0  ;;  %v20408_v57 = vpop.f32.mrb[4].mxu1  ;;  %16913 = vmatprep.subr.bf16.mxu0 %v19793_v19  ;;  %v19826_v55 = vld [vmem:[%s20613_s3 + $0x128] sm:$0xff]  }
 0x741   :  { %v12887_v59 = vpop.f32.mrb[5].mxu0  ;;  %v13420_v32 = vpop.f32.mrb[5].mxu1 }
 0x742   :  { %v12889_v6 = vpop.f32.mrb[6].mxu0  ;;  %v13422_v61 = vpop.f32.mrb[6].mxu1  ;;  %16900 = vmatpush3.bf16.msra.mxu1 %v19794_v43  ;;  %16914 = vmatpush3.bf16.msra.mxu0 %v19795_v53  ;;  %v17023_v2 = vadd.f32 %v12887_v59, %v2062_v58  ;;  %v17025_v26 = vadd.f32 %v13420_v32, %v2070_v8  ;;  %v2058_v43 = vrot.slane %v20332_v4, %v2057_v36  ;;  %v19828_v53 = vld [vmem:[%s20613_s3 + $0x170] sm:$0xff]   ;;  %v14776_v58 = vld [vmem:[#allocation7 + $0x8] ss:$0 sm:$0xff]  ;;  %v19842_v4 = vld [vmem:[%s20613_s3 + $0x1f8] sm:$0xff]  }
 0x743   :  { %v12890_v14 = vpop.f32.mrb[7].mxu0  ;;  %v13423_v54 = vpop.f32.mrb[7].mxu1  ;;  %16901 = vmatprep.subr.bf16.mxu1 %v19796_v56  ;;  %16915 = vmatprep.subr.bf16.mxu0 %v19797_v47  ;;  %v19851_v36 = vld [vmem:[%s20613_s3 + $0x238] sm:$0xff]  }
 0x744   :  { %v13950_v7 = vmax.f32 %v17023_v2, 0.0  ;;  %v13952_v17 = vmax.f32 %v17025_v26, 0.0  ;;  %v17022_v54 = vadd.f32 %v20406_v63, %v2058_v43  ;;  %v19833_v2 = vld [vmem:[%s20613_s3 + $0x1d8] sm:$0xff]  }
 0x745   :  { %v19834_v63 = vld [vmem:[%s20613_s3 + $0x138] sm:$0xff]  }
 0x746   :  { %16902 = vmatpush3.bf16.msra.mxu1 %v19798_v0  ;;  %16916 = vmatpush3.bf16.msra.mxu0 %v19799_v49  ;;  %v13959_v18 = vpack.c.bf16 %v13950_v7, %v13950_v7  ;;  %v13961_v19 = vpack.c.bf16 %v13952_v17, %v13952_v17  ;;  %v19830_v49 = vld [vmem:[%s20613_s3 + $0x130] sm:$0xff]   ;;  %v19836_v7 = vld [vmem:[%s20613_s3 + $0x1e0] sm:$0xff]  }
 0x747   :  { %16903 = vmatprep.subr.bf16.mxu1 %v19800_v33  ;;  %16917 = vmatprep.subr.bf16.mxu0 %v19801_v45  ;;  %v19832_v45 = vld [vmem:[%s20613_s3 + $0x178] sm:$0xff]   ;;  %v19848_v17 = vld [vmem:[%s20613_s3 + $0x220] sm:$0xff]  }
 0x74a   :  { %16904 = vmatpush3.bf16.msra.mxu1 %v19802_v5  ;;  %16918 = vmatpush3.bf16.msra.mxu0 %v19803_v44 }
 0x74b   :  { %16919 = vmatprep.subr.bf16.mxu0 %v19804_v51  ;;  %16933 = vmatprep.subr.bf16.mxu1 %v19805_v3  ;;  %v19835_v51 = vld [vmem:[%s20613_s3 + $0x198] sm:$0xff]   ;;  %v13949_v3 = vmax.f32 %v17022_v54, 0.0 }
 0x74d   :  { %14579 = vmatmul.mubr.bf16.vlgmr.msra.gmra.mrb[32].mxu1 %v13954_v12  ;;  %v13958_v12 = vpack.c.bf16 %v13949_v3, %v13949_v3 }
 0x74e   :  { %16920 = vmatpush3.bf16.msra.mxu0 %v19806_v9  ;;  %16934 = vmatpush3.bf16.msra.mxu1 %v19807_v11  ;;  %v19837_v9 = vld [vmem:[%s20613_s3 + $0x1a0] sm:$0xff]  }
 0x74f   :  { %14658 = vmatprep.mubr.bf16.mxu1 %v13959_v18  ;;  %16921 = vmatprep.subr.bf16.mxu0 %v19808_v23  ;;  %v19844_v11 = vld [vmem:[%s20613_s3 + $0x200] sm:$0xff]   ;;  %v19838_v23 = vld [vmem:[%s20613_s3 + $0x1e8] sm:$0xff]  }
 0x750   :  { %16935 = vmatprep.subr.bf16.mxu1 %v19809_v15  ;;  %v19839_v15 = vld [vmem:[%s20613_s3 + $0x1a8] sm:$0xff]  }
 0x751   :  { %v19845_v18 = vld [vmem:[%s20613_s3 + $0x208] sm:$0xff]  }
 0x752   :  { %16922 = vmatpush3.bf16.msra.mxu0 %v19810_v34  ;;  %16936 = vmatpush3.bf16.msra.mxu1 %v19811_v20  ;;  %v19841_v34 = vld [vmem:[%s20613_s3 + $0x1b0] sm:$0xff]   ;;  %v17024_v20 = vadd.f32 %v20408_v57, %v2066_v42 }
 0x753   :  { %16923 = vmatprep.subr.bf16.mxu0 %v19812_v48  ;;  %16937 = vmatprep.subr.bf16.mxu1 %v19813_v37  ;;  %v19846_v57 = vld [vmem:[%s20613_s3 + $0x210] sm:$0xff]  }
 0x754   :  { %v13951_v48 = vmax.f32 %v17024_v20, 0.0 }
 0x756   :  { %16924 = vmatpush3.bf16.msra.mxu0 %v19814_v39  ;;  %16938 = vmatpush3.bf16.msra.mxu1 %v19815_v52  ;;  %v13960_v37 = vpack.c.bf16 %v13951_v48, %v13951_v48 }
 0x757   :  { %16925 = vmatprep.subr.bf16.mxu0 %v19816_v46  ;;  %16939 = vmatprep.subr.bf16.mxu1 %v19817_v25 }
 0x75a   :  { %16926 = vmatpush3.bf16.msra.mxu0 %v19818_v28  ;;  %16940 = vmatpush3.bf16.msra.mxu1 %v19819_v10 }
 0x75b   :  { %16941 = vmatprep.subr.bf16.mxu1 %v19820_v30  ;;  %16955 = vmatprep.subr.bf16.mxu0 %v19821_v60  ;;  %v19847_v30 = vld [vmem:[%s20613_s3 + $0x218] sm:$0xff]  }
 0x75d   :  { %14619 = vmatmul.mubr.bf16.vlgmr.msra.gmra.mrb[36].mxu0 %v13956_v50  ;;  %v19850_v50 = vld [vmem:[%s20613_s3 + $0x230] sm:$0xff]  }
 0x75e   :  { %16942 = vmatpush3.bf16.msra.mxu1 %v19822_v31  ;;  %16956 = vmatpush3.bf16.msra.mxu0 %v19823_v35  ;;  %v19849_v35 = vld [vmem:[%s20613_s3 + $0x228] sm:$0xff]   ;;  %s19988_s3 = smov [#allocation10]  }
 0x75f   :  { %14698 = vmatprep.mubr.bf16.mxu0 %v13961_v19  ;;  %16943 = vmatprep.subr.bf16.mxu1 %v19824_v38  ;;  %s14765_s17 = sshll.u32 %s19988_s3, 4  ;;  %s14766_s17 = int_to_ptr.vmem [resolvable:$true] %s14765_s17 }
 0x760   :  { %v16636_v56 = vpop.f32.mrb[8].mxu0  ;;  %16957 = vmatprep.subr.bf16.mxu0 %v19825_v62  ;;  %v16658_v47 = vpop.f32.mrb[8].mxu1  ;;  %s19948_s4 = scalar_lea.vmem %s14766_s17, 32  ;;  %p19953_p5 = scmp.lt.s32.totalorder %s14766_s17, %s14766_s17 }
 0x761   :  { %v16637_v59 = vpop.f32.mrb[9].mxu0  ;;  %v16659_v32 = vpop.f32.mrb[9].mxu1  ;;  %p19949_p4 = scmp.ne.s32.totalorder %s14766_s17, %s19948_s4  ;;  %p19954_p6 = scmp.lt.s32.totalorder %s19948_s4, %s19948_s4 }
 0x762   :  { %v16638_v6 = vadd.f32 %v16637_v59, %v16636_v56  ;;  %v16639_v61 = vpop.f32.mrb[10].mxu0  ;;  %16944 = vmatpush3.bf16.msra.mxu1 %v19826_v55  ;;  %16958 = vmatpush3.bf16.msra.mxu0 %v19827_v41  ;;  %v16660_v0 = vadd.f32 %v16659_v32, %v16658_v47  ;;  %v16661_v14 = vpop.f32.mrb[10].mxu1 }
 0x763   :  { %v16640_v33 = vpop.f32.mrb[11].mxu0  ;;  %16945 = vmatprep.subr.bf16.mxu1 %v19828_v53  ;;  %16959 = vmatprep.subr.bf16.mxu0 %v19829_v24  ;;  %v16662_v5 = vpop.f32.mrb[11].mxu1  ;;  %p19955_p7 = por %p19954_p6, %p19953_p5 }
 0x764   :  { %v13460_v44 = vadd.f32 %v16638_v6, %v14776_v58 }
 0x765   :  { %p19956_p8 = pnand %p19955_p7, %p19949_p4 }
 0x766   :  { %v13500_v16 = vadd.f32 %v16660_v0, %v13460_v44  ;;  %16946 = vmatpush3.bf16.msra.mxu1 %v19830_v49  ;;  %16960 = vmatpush3.bf16.msra.mxu0 %v19831_v1 }
 0x767   :  { %16947 = vmatprep.subr.bf16.mxu1 %v19832_v45  ;;  %16961 = vmatprep.subr.bf16.mxu0 %v19833_v2 }
 0x76a   :  { %16948 = vmatpush3.bf16.msra.mxu1 %v19834_v63  ;;  %16962 = vmatpush3.bf16.msra.mxu0 %v19835_v51 }
 0x76b   :  { %16963 = vmatprep.subr.bf16.mxu0 %v19836_v7  ;;  %16998 = vmatprep.subr.bf16.mxu1 %v19986_v27 }
 0x76d   :  { %14659 = vmatmul.mubr.bf16.vlgmr.msra.gmra.mrb[36].mxu1 %v13958_v12 }
 0x76e   :  { %16964 = vmatpush3.bf16.msra.mxu0 %v19837_v9  ;;  %16999 = vmatpush3.bf16.msra.mxu1 %v19844_v11 }
 0x76f   :  { %16965 = vmatprep.subr.bf16.mxu0 %v19838_v23  ;;  %17000 = vmatprep.subr.bf16.mxu1 %v19986_v27 }
 0x770   :  { %17014 = vmatprep.mubr.msk.bf16.mxu1 %vm19987_vm1, %v19986_v27 }
 0x772   :  { %16966 = vmatpush3.bf16.msra.mxu0 %v19839_v15  ;;  %17001 = vmatpush3.bf16.msra.mxu1 %v19845_v18 }
 0x773   :  { %16967 = vmatprep.subr.bf16.mxu0 %v19840_v40  ;;  %17002 = vmatprep.subr.bf16.mxu1 %v19986_v27 }
 0x776   :  { %16968 = vmatpush3.bf16.msra.mxu0 %v19841_v34  ;;  %17003 = vmatpush3.bf16.msra.mxu1 %v19846_v57 }
 0x777   :  { %16969 = vmatprep.subr.bf16.mxu0 %v19842_v4  ;;  %17004 = vmatprep.subr.bf16.mxu1 %v19986_v27 }
 0x77a   :  { %16970 = vmatpush3.bf16.msra.mxu0 %v19843_v21  ;;  %17005 = vmatpush3.bf16.msra.mxu1 %v19847_v30 }
 0x77b   :  { %17006 = vmatprep.subr.bf16.mxu1 %v19986_v27 }
 0x77d   :  { %14699 = vmatmul.mubr.bf16.vlgmr.msra.gmra.mrb[40].mxu0 %v13960_v37 }
 0x77e   :  { %17007 = vmatpush3.bf16.msra.mxu1 %v19848_v17 }
 0x77f   :  { %17008 = vmatprep.subr.bf16.mxu1 %v19986_v27 }
 0x780   :  { %v16680_v8 = vpop.f32.mrb[12].mxu0  ;;  %v16702_v39 = vpop.f32.mrb[12].mxu1 }
 0x781   :  { %v16681_v52 = vpop.f32.mrb[13].mxu0  ;;  %v16703_v22 = vpop.f32.mrb[13].mxu1 }
 0x782   :  { %v16682_v46 = vadd.f32 %v16681_v52, %v16680_v8  ;;  %v16683_v25 = vpop.f32.mrb[14].mxu0  ;;  %v16704_v26 = vadd.f32 %v16703_v22, %v16702_v39  ;;  %v16705_v28 = vpop.f32.mrb[14].mxu1  ;;  %17009 = vmatpush3.bf16.msra.mxu1 %v19849_v35 }
 0x783   :  { %v16684_v10 = vpop.f32.mrb[15].mxu0  ;;  %v16706_v29 = vpop.f32.mrb[15].mxu1  ;;  %17010 = vmatprep.subr.bf16.mxu1 %v19986_v27 }
 0x784   :  { %v13540_v60 = vadd.f32 %v16682_v46, %v13500_v16 }
 0x786   :  { %v13580_v31 = vadd.f32 %v16704_v26, %v13540_v60  ;;  %17011 = vmatpush3.bf16.msra.mxu1 %v19850_v50 }
 0x787   :  { %17012 = vmatprep.subr.bf16.mxu1 %v19986_v27 }
 0x78a   :  { %17013 = vmatpush3.bf16.msra.mxu1 %v19851_v36 }
 0x7a0   :  { %v16724_v38 = vpop.f32.mrb[16].mxu0  ;;  %v16746_v62 = vpop.f32.mrb[16].mxu1 }
 0x7a1   :  { %v16725_v19 = vpop.f32.mrb[17].mxu0  ;;  %v16747_v55 = vpop.f32.mrb[17].mxu1 }
 0x7a2   :  { %v16726_v41 = vadd.f32 %v16725_v19, %v16724_v38  ;;  %v16727_v43 = vpop.f32.mrb[18].mxu0  ;;  %v16748_v53 = vadd.f32 %v16747_v55, %v16746_v62  ;;  %v16749_v24 = vpop.f32.mrb[18].mxu1 }
 0x7a3   :  { %v16728_v56 = vpop.f32.mrb[19].mxu0  ;;  %v16750_v47 = vpop.f32.mrb[19].mxu1 }
 0x7a4   :  { %v13620_v58 = vadd.f32 %v16726_v41, %v13580_v31  ;;  %v16547_v31 = vld [vmem:[#allocation8] ss:$0 sm:$0xff] }
 0x7a6   :  { %v13660_v59 = vadd.f32 %v16748_v53, %v13620_v58 }
 0x7c0   :  { %v16768_v32 = vpop.f32.mrb[20].mxu0  ;;  %v16790_v6 = vpop.f32.mrb[20].mxu1 }
 0x7c1   :  { %v16769_v27 = vpop.f32.mrb[21].mxu0  ;;  %v16791_v61 = vpop.f32.mrb[21].mxu1 }
 0x7c2   :  { %v16770_v0 = vadd.f32 %v16769_v27, %v16768_v32  ;;  %v16771_v49 = vpop.f32.mrb[22].mxu0  ;;  %v16792_v1 = vadd.f32 %v16791_v61, %v16790_v6  ;;  %v16793_v14 = vpop.f32.mrb[22].mxu1 }
 0x7c3   :  { %v16772_v54 = vpop.f32.mrb[23].mxu0  ;;  %v16794_v33 = vpop.f32.mrb[23].mxu1 }
 0x7c4   :  { %v13700_v45 = vadd.f32 %v16770_v0, %v13660_v59 }
 0x7c6   :  { %v13740_v2 = vadd.f32 %v16792_v1, %v13700_v45 }
 0x7e0   :  { %v16812_v5 = vpop.f32.mrb[24].mxu0  ;;  %v16834_v44 = vpop.f32.mrb[24].mxu1 }
 0x7e1   :  { %v16813_v16 = vpop.f32.mrb[25].mxu0  ;;  %v16835_v63 = vpop.f32.mrb[25].mxu1 }
 0x7e2   :  { %v16814_v51 = vadd.f32 %v16813_v16, %v16812_v5  ;;  %v16815_v3 = vpop.f32.mrb[26].mxu0  ;;  %v16836_v7 = vadd.f32 %v16835_v63, %v16834_v44  ;;  %v16837_v9 = vpop.f32.mrb[26].mxu1 }
 0x7e3   :  { %v16816_v11 = vpop.f32.mrb[27].mxu0  ;;  %v16838_v12 = vpop.f32.mrb[27].mxu1 }
 0x7e4   :  { %v13780_v13 = vadd.f32 %v16814_v51, %v13740_v2 }
 0x7e6   :  { %v13820_v23 = vadd.f32 %v16836_v7, %v13780_v13 }
 0x800   :  { %v16856_v15 = vpop.f32.mrb[28].mxu0  ;;  %v16878_v18 = vpop.f32.mrb[28].mxu1 }
 0x801   :  { %v16857_v42 = vpop.f32.mrb[29].mxu0  ;;  %v16879_v40 = vpop.f32.mrb[29].mxu1 }
 0x802   :  { %v16858_v34 = vadd.f32 %v16857_v42, %v16856_v15  ;;  %v16859_v20 = vpop.f32.mrb[30].mxu0  ;;  %v16880_v4 = vadd.f32 %v16879_v40, %v16878_v18  ;;  %v16881_v21 = vpop.f32.mrb[30].mxu1 }
 0x803   :  { %v16860_v48 = vpop.f32.mrb[31].mxu0  ;;  %v16882_v37 = vpop.f32.mrb[31].mxu1 }
 0x804   :  { %v13860_v57 = vadd.f32 %v16858_v34, %v13820_v23 }
 0x806   :  { %v13900_v8 = vadd.f32 %v16880_v4, %v13860_v57 }
 0x810   :  { %v13939_v39 = vpop.f32.mrb[32].mxu0 }
 0x811   :  { %v13940_v52 = vadd.f32 %v13939_v39, %v13900_v8  ;;  %v16996_v22 = vpop.f32.mrb[33].mxu0 }
 0x812   :  { %v13942_v46 = vpop.f32.mrb[34].mxu0 }
 0x813   :  { %v13953_v25 = vmax.f32 %v13940_v52, 0.0  ;;  %v16997_v26 = vpop.f32.mrb[35].mxu0 }
 0x815   :  { %v13962_v28 = vpack.c.bf16 %v13953_v25, %v13953_v25 }
 0x817   :  { %17015 = vmatmul.mubr.bf16.vlgmr.msra.gmra.mrb[40].mxu1 %v13962_v28 }
 0x820   :  { %v16905_v10 = vpop.f32.mrb[32].mxu1 }
 0x821   :  { %v16906_v29 = vpop.f32.mrb[33].mxu1 }
 0x822   :  { %v16907_v30 = vadd.f32 %v16906_v29, %v16905_v10  ;;  %v16908_v60 = vpop.f32.mrb[34].mxu1 }
 0x823   :  { %v16909_v17 = vpop.f32.mrb[35].mxu1 }
 0x824   :  { %v14581_v36 = vadd.f32 %v16907_v30, %v16547_v31 }
 0x830   :  { %v16927_v35 = vpop.f32.mrb[36].mxu0 }
 0x831   :  { %v16928_v50 = vpop.f32.mrb[37].mxu0 }
 0x832   :  { %v16929_v38 = vadd.f32 %v16928_v50, %v16927_v35  ;;  %v16930_v62 = vpop.f32.mrb[38].mxu0 }
 0x833   :  { %v16931_v19 = vpop.f32.mrb[39].mxu0 }
 0x834   :  { %v14621_v55 = vadd.f32 %v16929_v38, %v14581_v36 }
 0x840   :  { %v16949_v41 = vpop.f32.mrb[36].mxu1 }
 0x841   :  { %v16950_v43 = vpop.f32.mrb[37].mxu1 }
 0x842   :  { %v16951_v53 = vadd.f32 %v16950_v43, %v16949_v41  ;;  %v16952_v24 = vpop.f32.mrb[38].mxu1 }
 0x843   :  { %v16953_v56 = vpop.f32.mrb[39].mxu1 }
 0x844   :  { %v14661_v47 = vadd.f32 %v16951_v53, %v14621_v55 }
 0x850   :  { %v16971_v58 = vpop.f32.mrb[40].mxu0 }
 0x851   :  { %v16972_v59 = vpop.f32.mrb[41].mxu0 }
 0x852   :  { %v16973_v32 = vadd.f32 %v16972_v59, %v16971_v58  ;;  %v16974_v6 = vpop.f32.mrb[42].mxu0 }
 0x853   :  { %v16975_v27 = vpop.f32.mrb[43].mxu0 }
 0x854   :  { %v14701_v61 = vadd.f32 %v16973_v32, %v14661_v47 }
 0x8ea   :  { %v14740_v0 = vpop.f32.mrb[40].mxu1 }
 0x8eb   :  { %v14741_v49 = vadd.f32 %v14740_v0, %v14701_v61  ;;  %v17016_v1 = vpop.f32.mrb[41].mxu1 }
 0x8ec   :  { %v14743_v14 = vpop.f32.mrb[42].mxu1 }
 0x8ed   :  { %v17017_v54 = vpop.f32.mrb[43].mxu1  ;;  %v14747_v33 = vsel %vm14746_vm2, %v14741_v49, -inf }
 0x8ee   :  { %14748 = vmax.xlane.f32.xlu0 %v14747_v33 }
 0x97b   :  { %v14749_v45 = vpop.xlane.xlu0 %14748 }
 0x97c   :  { %v14750_v2 = vsub.f32 %v14741_v49, %v14749_v45 }
 0x97e   :  { %v14751_v5 = vmul.f32 1.442695, %v14750_v2 }
 0x980   :  { %19852 = vpow2.f32 %v14751_v5 }
 0x98a   :  { %v19853_v44 = vpop.eup %19852 }
 0x98b   :  { %v14753_v16 = vsel %vm14746_vm2, %v19853_v44, 0.0 }
 0x98c   :  { %14754 = vadd.xlane.f32.xlu0 %v14753_v16 }
 0xa19   :  { %v14755_v63 = vpop.xlane.xlu0 %14754 }
 0xa1a   :  { %19854 = vrcp.f32 %v14755_v63 }
 0xa24   :  { %v19855_v51 = vpop.eup %19854 }
 0xa25   :  { %v14757_v3 = vmul.f32 %v19855_v51, %v19853_v44 }
 0xa27   :  { %14758 = vst.msk [vmem:[#allocation10] sm:$0x3] %vm14746_vm2, %v14757_v3 }
 0xa28   :  { %19959 = shalt.err (!%p19956_p8)
}
 0xa29   :  { %s19960_s19 = scalar_lea.hbm %s20615_s5, 32 }
 0xa2a   :  { %p19961_p9 = scmp.ne.s32.totalorder %s20615_s5, %s19960_s19  ;;  %p19964_p10 = scmp.lt.u32.totalorder %s19960_s19, %s20615_s5 }
 0xa2c   :  { %p19966_p11 = pnand %p19964_p10, %p19961_p9 }
 0xa2e   :  { %19969 = shalt.err (!%p19966_p11)
}
 0xa2f   :  { %14768 = dma.vmem_to_hbm [thread:$0]  %s14766_s17, 32, %s20615_s5, [#allocation4]  }
 0xa30   :  { %19976 = dma.done.wait [#allocation4], 32  }
 0xa31   :  { %19977 = vsyncadd [#allocation4], 4294967264 }
 0xa32   :  { %14772 = vsyncpa [#allocation3], 1 }
 0xa33   :  { %14773 = vsyncpa [#allocation6], 1 }
 0xa34   :  { %14774 = vsyncpa [#allocation9], 1 }
 0xa35   :  { %14775 = vsyncpa [#allocation4], 1 }

</bundles_post_ra>
